<compile_context>
chip_gen: v5e
topology: v5e:2x2
jax: 0.10.0
libtpu: 0.0.40
codegen_flags: <defaults>
</compile_context>

<pallas_src>
import math

import jax
import jax.numpy as jnp
from jax import lax
from jax.experimental import pallas as pl
from jax.experimental.pallas import tpu as pltpu


# ----------------------------- Pallas kernels -----------------------------

def _make_gmm_kernel(G, K_g, relu, has_residual):
    """Fused grouped matmul: per group g, out[:, g*Co:(g+1)*Co] = a[:, g*K:(g+1)*K] @ w[g];
    epilogue adds shift (+ residual) and applies ReLU, all in f32."""
    def kernel(a_ref, w_ref, sh_ref, *refs):
        if has_residual:
            r_ref, o_ref = refs
        else:
            (o_ref,) = refs
        parts = []
        for g in range(G):                                    # G is small -> unrolled
            a_g = a_ref[:, g * K_g:(g + 1) * K_g]
            parts.append(jnp.dot(a_g, w_ref[g], preferred_element_type=jnp.float32))
        acc = parts[0] if G == 1 else jnp.concatenate(parts, axis=-1)
        acc = acc + sh_ref[...]
        if has_residual:
            acc = acc + r_ref[...].astype(jnp.float32)
        if relu:
            acc = jnp.maximum(acc, 0.0)
        o_ref[...] = acc.astype(o_ref.dtype)
    return kernel


def _pick_m_tiling(M, CK, Cout):
    """Pick the largest M tile whose double-buffered A / out / residual blocks stay well
    inside the v7x 32 MiB scoped-VMEM default (binding constraint across generations)."""
    budget = 12 * 1024 * 1024
    # 2x buffering of bf16 A, bf16 out, bf16 residual + f32 epilogue slack (conservative).
    per_row = 2 * (2 * CK + 2 * Cout + 2 * Cout) + 4 * Cout
    tm = 1024
    while tm > 128 and tm * per_row > budget:
        tm //= 2
    if M <= tm:
        return M, M                                           # single full-M tile
    m_pad = ((M + tm - 1) // tm) * tm
    return tm, m_pad


def grouped_matmul_fused(a, w_g, shift, *, relu, residual=None, out_dtype=jnp.bfloat16):
    """out[:, g*Co:(g+1)*Co] = act(a[:, g*K:(g+1)*K] @ w_g[g] + shift (+ residual))."""
    M, CK = a.shape
    G, K_g, Cout_g = w_g.shape
    assert CK == G * K_g
    Cout = G * Cout_g
    TM, M_pad = _pick_m_tiling(M, CK, Cout)

    a = a.astype(jnp.bfloat16)                                # MXU bf16 path
    w_g = w_g.astype(jnp.bfloat16)
    sh = shift.reshape(1, Cout).astype(jnp.float32)
    if M_pad != M:                                            # not hit at demo shapes
        a = jnp.pad(a, ((0, M_pad - M), (0, 0)))
        if residual is not None:
            residual = jnp.pad(residual, ((0, M_pad - M), (0, 0)))

    in_specs = [
        pl.BlockSpec((TM, CK), lambda m: (m, 0)),             # A streamed over M tiles
        pl.BlockSpec((G, K_g, Cout_g), lambda m: (0, 0, 0)),  # weights: VMEM-resident
        pl.BlockSpec((1, Cout), lambda m: (0, 0)),            # shift: VMEM-resident
    ]
    args = [a, w_g, sh]
    res_bytes = 0
    if residual is not None:
        in_specs.append(pl.BlockSpec((TM, Cout), lambda m: (m, 0)))
        args.append(residual)
        res_bytes = M_pad * Cout * residual.dtype.itemsize

    cost = pl.CostEstimate(
        flops=2 * M_pad * CK * Cout_g,
        transcendentals=0,
        bytes_accessed=(M_pad * CK * 2 + G * K_g * Cout_g * 2 + Cout * 4
                        + M_pad * Cout * jnp.dtype(out_dtype).itemsize + res_bytes))

    out = pl.pallas_call(
        _make_gmm_kernel(G, K_g, relu, residual is not None),
        out_shape=jax.ShapeDtypeStruct((M_pad, Cout), out_dtype),
        grid=(M_pad // TM,),
        in_specs=in_specs,
        out_specs=pl.BlockSpec((TM, Cout), lambda m: (m, 0)),  # lane-dense full-Cout block
        compiler_params=pltpu.CompilerParams(
            dimension_semantics=("parallel",),                 # megacore sharding of M tiles
            vmem_limit_bytes=64 * 1024 * 1024),
        cost_estimate=cost,
    )(*args)
    return out if M_pad == M else out[:M]


def _make_pool_linear_kernel(G, K_g):
    """Fused AdaptiveAvgPool2d(1) + Flatten + grouped PackedLinear: the pooled (N, C)
    activation never leaves VMEM before the classifier matmul."""
    def kernel(x_ref, w_ref, b_ref, o_ref):
        pooled = jnp.mean(x_ref[...].astype(jnp.float32), axis=1)     # (N, C), XLU reduce
        a = pooled.astype(jnp.bfloat16)
        parts = []
        for g in range(G):
            a_g = a[:, g * K_g:(g + 1) * K_g]
            parts.append(jnp.dot(a_g, w_ref[g], preferred_element_type=jnp.float32))
        acc = parts[0] if G == 1 else jnp.concatenate(parts, axis=-1)
        o_ref[...] = acc + b_ref[...]
    return kernel


def pool_and_packed_linear(x_nhwc, w, b, groups):
    """(N,H,W,C) -> mean over H,W -> grouped linear -> (N, Cout), one Pallas call."""
    N, H, W, C = x_nhwc.shape
    Cout = w.shape[0]
    G = groups
    Cin_g, Cout_g = C // G, Cout // G
    w_g = jnp.transpose(w.reshape(G, Cout_g, Cin_g), (0, 2, 1)).astype(jnp.bfloat16)
    b2 = b.reshape(1, Cout).astype(jnp.float32)
    x = x_nhwc.reshape(N, H * W, C).astype(jnp.bfloat16)
    # Classifier-head sizes are tiny (N, H*W, C all small post-downsampling): one grid step,
    # all operands fully VMEM-resident.
    return pl.pallas_call(
        _make_pool_linear_kernel(G, Cin_g),
        out_shape=jax.ShapeDtypeStruct((N, Cout), jnp.float32),
        grid=(1,),
        in_specs=[pl.BlockSpec((N, H * W, C), lambda i: (0, 0, 0)),
                  pl.BlockSpec((G, Cin_g, Cout_g), lambda i: (0, 0, 0)),
                  pl.BlockSpec((1, Cout), lambda i: (0, 0))],
        out_specs=pl.BlockSpec((N, Cout), lambda i: (0, 0)),
        compiler_params=pltpu.CompilerParams(dimension_semantics=("arbitrary",)),
    )(x, w_g, b2)


# ------------------------- conv glue (NHWC, patches) -----------------------

def packed_conv2d_bn(x, weight, scale, shift, *, stride, padding, groups,
                     relu, residual=None):
    """Grouped PackedConv2d + folded BatchNorm (+ residual, ReLU). NHWC bf16 in/out."""
    N, H, W, Cin = x.shape
    Cout, Cin_g, kh, kw = weight.shape
    G = groups
    assert Cin == Cin_g * G and Cout % G == 0
    Cout_g = Cout // G
    Ho = (H + 2 * padding - kh) // stride + 1
    Wo = (W + 2 * padding - kw) // stride + 1
    if kh == 1 and kw == 1 and padding == 0:
        patches = x[:, ::stride, ::stride, :]
    else:
        # TODO(synk): the kh*kw patch gather is still an XLA im2col op; an in-kernel
        # halo-block gather would remove this expanded HBM round trip entirely.
        patches = lax.conv_general_dilated_patches(
            x, (kh, kw), (stride, stride),
            padding=((padding, padding), (padding, padding)),
            dimension_numbers=("NHWC", "HWIO", "NHWC"))
    # patches channel ordering is (c, kh, kw) with c slowest -> per-group K slices are
    # contiguous and match PyTorch's weight.reshape(Cout, Cin_g*kh*kw) ordering.
    a = patches.reshape(N * Ho * Wo, Cin * kh * kw)            # free reshape
    # Fold BN per-out-channel scale into the weights; kernel epilogue does shift/res/relu.
    w_folded = (weight * scale[:, None, None, None]).reshape(G, Cout_g, Cin_g * kh * kw)
    w_folded = jnp.transpose(w_folded, (0, 2, 1))              # (G, K_g, Cout_g)
    res = residual.reshape(N * Ho * Wo, Cout) if residual is not None else None
    out = grouped_matmul_fused(a, w_folded, shift, relu=relu, residual=res)
    return out.reshape(N, Ho, Wo, Cout)


def max_pool_3x3_s2(x):  # imagenet-style optional_pool (XLA glue; unused in cifar demo)
    return lax.reduce_window(x, jnp.array(-jnp.inf, x.dtype), lax.max,
                             (1, 3, 3, 1), (1, 2, 2, 1),
                             padding=((0, 0), (1, 1), (1, 1), (0, 0)))


# ----------------------------- parameter setup -----------------------------

def _conv_weight(key, cout, cin_g, k):
    fan_in = cin_g * k * k
    return jax.random.normal(key, (cout, cin_g, k, k), jnp.float32) / math.sqrt(fan_in)


def _bn_params(key, c):
    k1, k2, k3, k4 = jax.random.split(key, 4)
    return dict(gamma=1.0 + 0.1 * jax.random.normal(k1, (c,), jnp.float32),
                beta=0.1 * jax.random.normal(k2, (c,), jnp.float32),
                mean=0.1 * jax.random.normal(k3, (c,), jnp.float32),
                var=jax.random.uniform(k4, (c,), jnp.float32, 0.5, 1.5))


def _fold_bn(bn, conv_bias=None, eps=1e-5):
    scale = bn["gamma"] / jnp.sqrt(bn["var"] + eps)
    shift = bn["beta"] - bn["mean"] * scale
    if conv_bias is not None:
        shift = shift + scale * conv_bias
    return scale, shift


def _packed_conv_dims(in_c, out_c, alpha, ne, gamma, groups, first=False, last=False):
    # TODO(synk): PackedConv2d's minimum_channels_per_group gamma-reduction heuristic not replicated.
    actual_groups = 1 if first else gamma * groups * ne
    ext_in = in_c * (1 if first else alpha)
    ext_out = out_c * (ne if last else alpha)
    assert ext_in % actual_groups == 0 and ext_out % actual_groups == 0
    return ext_in, ext_out, actual_groups


def _build_packed_conv(key, in_c, out_c, k, alpha, ne, gamma, groups, conv_bias,
                       first=False, last=False):
    ext_in, ext_out, g = _packed_conv_dims(in_c, out_c, alpha, ne, gamma, groups, first, last)
    kw, kb = jax.random.split(key)
    w = _conv_weight(kw, ext_out, ext_in // g, k)
    b = 0.01 * jax.random.normal(kb, (ext_out,), jnp.float32) if conv_bias else None
    return dict(w=w, b=b, groups=g)


def build_basic_block(key, in_planes, planes, stride, alpha, ne, gamma, groups, conv_bias):
    ks = jax.random.split(key, 6)
    p = dict(kind="basic", stride=stride)
    p["conv1"] = _build_packed_conv(ks[0], in_planes, planes, 3, alpha, ne, 1, groups, conv_bias)
    p["bn1"] = _bn_params(ks[1], planes * alpha)
    p["conv2"] = _build_packed_conv(ks[2], planes, planes, 3, alpha, ne, gamma, groups, conv_bias)
    p["bn2"] = _bn_params(ks[3], planes * alpha)
    if stride != 1 or in_planes != planes:          # expansion == 1
        p["sc_conv"] = _build_packed_conv(ks[4], in_planes, planes, 1, alpha, ne, gamma, groups, conv_bias)
        p["sc_bn"] = _bn_params(ks[5], planes * alpha)
    return p, planes * 1


def build_bottleneck(key, in_planes, planes, stride, alpha, ne, gamma, groups, conv_bias):
    ks = jax.random.split(key, 8)
    p = dict(kind="bottleneck", stride=stride)
    p["conv1"] = _build_packed_conv(ks[0], in_planes, planes, 1, alpha, ne, 1, groups, conv_bias)
    p["bn1"] = _bn_params(ks[1], planes * alpha)
    p["conv2"] = _build_packed_conv(ks[2], planes, planes, 3, alpha, ne, gamma, groups, conv_bias)
    p["bn2"] = _bn_params(ks[3], planes * alpha)
    p["conv3"] = _build_packed_conv(ks[4], planes, 4 * planes, 1, alpha, ne, gamma, groups, conv_bias)
    p["bn3"] = _bn_params(ks[5], 4 * planes * alpha)
    if stride != 1 or in_planes != 4 * planes:      # expansion == 4
        p["sc_conv"] = _build_packed_conv(ks[6], in_planes, 4 * planes, 1, alpha, ne, gamma, groups, conv_bias)
        p["sc_bn"] = _bn_params(ks[7], 4 * planes * alpha)
    return p, 4 * planes


def build_packed_resnet(key, *, block="basic", num_blocks=(1, 1, 1, 1), in_channels=3,
                        num_classes=10, conv_bias=False, num_estimators=2, alpha=2,
                        gamma=1, groups=1, style="cifar", in_planes=16):
    expansion = 1 if block == "basic" else 4
    builder = build_basic_block if block == "basic" else build_bottleneck
    keys = iter(jax.random.split(key, 64))
    params = dict(style=style, block=block)
    block_planes = in_planes
    k_stem = 7 if style == "imagenet" else 3
    params["conv1"] = _build_packed_conv(next(keys), in_channels, block_planes, k_stem,
                                         alpha, num_estimators, 1, groups, conv_bias, first=True)
    params["bn1"] = _bn_params(next(keys), block_planes * alpha)
    cur = in_planes
    layers = []
    layer_strides = [1, 2, 2, 2]
    for li, nb in enumerate(num_blocks):
        planes = block_planes * (2 ** li)
        blocks = []
        for s in [layer_strides[li]] + [1] * (nb - 1):
            bp, cur = builder(next(keys), cur, planes, s, alpha, num_estimators,
                              gamma, groups, conv_bias)
            blocks.append(bp)
        layers.append(blocks)
    params["layers"] = layers
    linear_multiplier = 8 if len(num_blocks) == 4 else 4
    feat = block_planes * linear_multiplier * expansion
    ext_in, ext_out, lg = feat * alpha, num_classes * num_estimators, num_estimators * 1
    kw, kb = jax.random.split(next(keys))
    params["linear"] = dict(
        w=jax.random.normal(kw, (ext_out, ext_in // lg), jnp.float32) / math.sqrt(ext_in // lg),
        b=0.01 * jax.random.normal(kb, (ext_out,), jnp.float32),
        groups=lg)
    return params


# -------------------------------- forward ---------------------------------

def basic_block_forward(p, x):
    c1, c2 = p["conv1"], p["conv2"]
    s1, b1 = _fold_bn(p["bn1"], c1["b"])
    out = packed_conv2d_bn(x, c1["w"], s1, b1, stride=p["stride"], padding=1,
                           groups=c1["groups"], relu=True)      # dropout2d = identity (eval)
    if "sc_conv" in p:
        cs = p["sc_conv"]
        ss, bs = _fold_bn(p["sc_bn"], cs["b"])
        sc = packed_conv2d_bn(x, cs["w"], ss, bs, stride=p["stride"], padding=0,
                              groups=cs["groups"], relu=False)
    else:
        sc = x
    s2, b2 = _fold_bn(p["bn2"], c2["b"])
    return packed_conv2d_bn(out, c2["w"], s2, b2, stride=1, padding=1,
                            groups=c2["groups"], relu=True, residual=sc)


def bottleneck_forward(p, x):
    c1, c2, c3 = p["conv1"], p["conv2"], p["conv3"]
    s1, b1 = _fold_bn(p["bn1"], c1["b"])
    out = packed_conv2d_bn(x, c1["w"], s1, b1, stride=1, padding=0,
                           groups=c1["groups"], relu=True)
    s2, b2 = _fold_bn(p["bn2"], c2["b"])
    out = packed_conv2d_bn(out, c2["w"], s2, b2, stride=p["stride"], padding=1,
                           groups=c2["groups"], relu=True)      # dropout2d = identity (eval)
    if "sc_conv" in p:
        cs = p["sc_conv"]
        ss, bs = _fold_bn(p["sc_bn"], cs["b"])
        sc = packed_conv2d_bn(x, cs["w"], ss, bs, stride=p["stride"], padding=0,
                              groups=cs["groups"], relu=False)
    else:
        sc = x
    s3, b3 = _fold_bn(p["bn3"], c3["b"])
    return packed_conv2d_bn(out, c3["w"], s3, b3, stride=1, padding=0,
                            groups=c3["groups"], relu=True, residual=sc)


def packed_resnet_forward(params, x_nchw):
    # One-time NCHW -> NHWC + bf16 conversion; everything downstream stays NHWC/bf16.
    x = jnp.transpose(x_nchw, (0, 2, 3, 1)).astype(jnp.bfloat16)
    c1 = params["conv1"]
    s1, b1 = _fold_bn(params["bn1"], c1["b"])
    if params["style"] == "imagenet":
        out = packed_conv2d_bn(x, c1["w"], s1, b1, stride=2, padding=3,
                               groups=c1["groups"], relu=True)
        out = max_pool_3x3_s2(out)
    else:
        out = packed_conv2d_bn(x, c1["w"], s1, b1, stride=1, padding=1,
                               groups=c1["groups"], relu=True)
    block_fwd = basic_block_forward if params["block"] == "basic" else bottleneck_forward
    for blocks in params["layers"]:
        for bp in blocks:
            out = block_fwd(bp, out)
    # AdaptiveAvgPool2d(1) + Flatten(1) + final_dropout(identity, eval) + PackedLinear,
    # fused in a single Pallas kernel.
    lin = params["linear"]
    return pool_and_packed_linear(out, lin["w"], lin["b"], lin["groups"])


# ---------------------------------- main -----------------------------------

if __name__ == "__main__":
    key = jax.random.PRNGKey(0)
    kp, kx = jax.random.split(key)
    params = build_packed_resnet(
        kp, block="basic", num_blocks=(1, 1, 1, 1), in_channels=3, num_classes=10,
        conv_bias=False, num_estimators=2, alpha=2, gamma=1, groups=1,
        style="cifar", in_planes=16)
    x = jax.random.normal(kx, (2, 3, 16, 16), jnp.float32)   # NCHW, like PyTorch
    fwd = jax.jit(lambda inp: packed_resnet_forward(params, inp))
    logits = fwd(x)
    jax.block_until_ready(logits)
    assert logits.shape == (2, 20)   # (batch, num_classes * num_estimators)
    print("KERNEL_OK")
</pallas_src>

<mosaic_0001>
module attributes {stable_mosaic.version = 11 : i64} {
  func.func @kernel(%arg0: i32, %arg1: memref<512x27xbf16, #tpu.memory_space<vmem>>, %arg2: memref<1x27x32xbf16, #tpu.memory_space<vmem>>, %arg3: memref<1x32xf32, #tpu.memory_space<vmem>>, %arg4: memref<512x32xbf16, #tpu.memory_space<vmem>>) attributes {dimension_semantics = [#tpu.dimension_semantics<parallel>], iteration_bounds = array<i64: 1>, scalar_prefetch = 0 : i64, scratch_operands = 0 : i64, tpu.core_type = #tpu.core_type<tc>, window_params = [{transform_indices = @transform_0, window_bounds = array<i64: 512, 27>}, {pipeline_mode = #tpu.pipeline_mode<synchronous>, transform_indices = @transform_1, window_bounds = array<i64: 1, 27, 32>}, {pipeline_mode = #tpu.pipeline_mode<synchronous>, transform_indices = @transform_2, window_bounds = array<i64: 1, 32>}, {transform_indices = @transform_3, window_bounds = array<i64: 512, 32>}]} {
    %c0 = arith.constant 0 : index
    %c0_0 = arith.constant 0 : index
    %0 = vector.load %arg1[%c0, %c0_0] : memref<512x27xbf16, #tpu.memory_space<vmem>>, vector<512x27xbf16>
    %c0_1 = arith.constant 0 : index
    %c0_2 = arith.constant 0 : index
    %c0_3 = arith.constant 0 : index
    %1 = vector.load %arg2[%c0_1, %c0_2, %c0_3] : memref<1x27x32xbf16, #tpu.memory_space<vmem>>, vector<1x27x32xbf16>
    %2 = vector.shape_cast %1 : vector<1x27x32xbf16> to vector<27x32xbf16>
    %cst = arith.constant dense<0.000000e+00> : vector<512x32xf32>
    %3 = tpu.matmul %0, %2, %cst {dimension_numbers = #tpu.dot_dimension_numbers<[1], [0], [0], [1], [0, 0, 1, 1], [], []>} : vector<512x27xbf16>, vector<27x32xbf16>, vector<512x32xf32> -> vector<512x32xf32>
    %c0_4 = arith.constant 0 : index
    %c0_5 = arith.constant 0 : index
    %4 = vector.load %arg3[%c0_4, %c0_5] : memref<1x32xf32, #tpu.memory_space<vmem>>, vector<1x32xf32>
    %5 = vector.broadcast %4 : vector<1x32xf32> to vector<512x32xf32>
    %6 = arith.addf %3, %5 : vector<512x32xf32>
    %cst_6 = arith.constant 0.000000e+00 : f32
    %7 = vector.broadcast %cst_6 : f32 to vector<512x32xf32>
    %8 = arith.maximumf %6, %7 : vector<512x32xf32>
    %9 = arith.truncf %8 : vector<512x32xf32> to vector<512x32xbf16>
    %c0_7 = arith.constant 0 : index
    %c0_8 = arith.constant 0 : index
    %10 = vector.load %arg4[%c0_7, %c0_8] : memref<512x32xbf16, #tpu.memory_space<vmem>>, vector<512x32xbf16>
    tpu.vector_store %arg4[%c0_7, %c0_8], %9 {strides = array<i32>} : memref<512x32xbf16, #tpu.memory_space<vmem>>, vector<512x32xbf16>,
    return
  }
  func.func @transform_0(%arg0: i32) -> (i32, i32) {
    %c0_i32 = arith.constant 0 : i32
    %c0_i32_0 = arith.constant 0 : i32
    return %arg0, %c0_i32 : i32, i32
  }
  func.func @transform_1(%arg0: i32) -> (i32, i32, i32) {
    %c0_i32 = arith.constant 0 : i32
    %c0_i32_0 = arith.constant 0 : i32
    %c0_i32_1 = arith.constant 0 : i32
    %c0_i32_2 = arith.constant 0 : i32
    return %c0_i32, %c0_i32_0, %c0_i32_1 : i32, i32, i32
  }
  func.func @transform_2(%arg0: i32) -> (i32, i32) {
    %c0_i32 = arith.constant 0 : i32
    %c0_i32_0 = arith.constant 0 : i32
    %c0_i32_1 = arith.constant 0 : i32
    return %c0_i32, %c0_i32_0 : i32, i32
  }
  func.func @transform_3(%arg0: i32) -> (i32, i32) {
    %c0_i32 = arith.constant 0 : i32
    %c0_i32_0 = arith.constant 0 : i32
    return %arg0, %c0_i32 : i32, i32
  }
}

module attributes {stable_mosaic.version = 11 : i64} {
  func.func @kernel(%arg0: i32, %arg1: memref<512x288xbf16, #tpu.memory_space<vmem>>, %arg2: memref<2x144x16xbf16, #tpu.memory_space<vmem>>, %arg3: memref<1x32xf32, #tpu.memory_space<vmem>>, %arg4: memref<512x32xbf16, #tpu.memory_space<vmem>>) attributes {dimension_semantics = [#tpu.dimension_semantics<parallel>], iteration_bounds = array<i64: 1>, scalar_prefetch = 0 : i64, scratch_operands = 0 : i64, tpu.core_type = #tpu.core_type<tc>, window_params = [{transform_indices = @transform_0, window_bounds = array<i64: 512, 288>}, {pipeline_mode = #tpu.pipeline_mode<synchronous>, transform_indices = @transform_1, window_bounds = array<i64: 2, 144, 16>}, {pipeline_mode = #tpu.pipeline_mode<synchronous>, transform_indices = @transform_2, window_bounds = array<i64: 1, 32>}, {transform_indices = @transform_3, window_bounds = array<i64: 512, 32>}]} {
    %c0 = arith.constant 0 : index
    %c0_0 = arith.constant 0 : index
    %0 = vector.load %arg1[%c0, %c0_0] : memref<512x288xbf16, #tpu.memory_space<vmem>>, vector<512x144xbf16>
    %c0_1 = arith.constant 0 : index
    %c0_2 = arith.constant 0 : index
    %c0_3 = arith.constant 0 : index
    %1 = vector.load %arg2[%c0_1, %c0_2, %c0_3] : memref<2x144x16xbf16, #tpu.memory_space<vmem>>, vector<1x144x16xbf16>
    %2 = vector.shape_cast %1 : vector<1x144x16xbf16> to vector<144x16xbf16>
    %cst = arith.constant dense<0.000000e+00> : vector<512x16xf32>
    %3 = tpu.matmul %0, %2, %cst {dimension_numbers = #tpu.dot_dimension_numbers<[1], [0], [0], [1], [0, 0, 1, 1], [], []>} : vector<512x144xbf16>, vector<144x16xbf16>, vector<512x16xf32> -> vector<512x16xf32>
    %c0_4 = arith.constant 0 : index
    %c144 = arith.constant 144 : index
    %4 = vector.load %arg1[%c0_4, %c144] : memref<512x288xbf16, #tpu.memory_space<vmem>>, vector<512x144xbf16>
    %c1 = arith.constant 1 : index
    %c0_5 = arith.constant 0 : index
    %c0_6 = arith.constant 0 : index
    %5 = vector.load %arg2[%c1, %c0_5, %c0_6] : memref<2x144x16xbf16, #tpu.memory_space<vmem>>, vector<1x144x16xbf16>
    %6 = vector.shape_cast %5 : vector<1x144x16xbf16> to vector<144x16xbf16>
    %cst_7 = arith.constant dense<0.000000e+00> : vector<512x16xf32>
    %7 = tpu.matmul %4, %6, %cst_7 {dimension_numbers = #tpu.dot_dimension_numbers<[1], [0], [0], [1], [0, 0, 1, 1], [], []>} : vector<512x144xbf16>, vector<144x16xbf16>, vector<512x16xf32> -> vector<512x16xf32>
    %8 = tpu.concatenate %3, %7 in 1 : vector<512x16xf32>, vector<512x16xf32> -> vector<512x32xf32>
    %c0_8 = arith.constant 0 : index
    %c0_9 = arith.constant 0 : index
    %9 = vector.load %arg3[%c0_8, %c0_9] : memref<1x32xf32, #tpu.memory_space<vmem>>, vector<1x32xf32>
    %10 = vector.broadcast %9 : vector<1x32xf32> to vector<512x32xf32>
    %11 = arith.addf %8, %10 : vector<512x32xf32>
    %cst_10 = arith.constant 0.000000e+00 : f32
    %12 = vector.broadcast %cst_10 : f32 to vector<512x32xf32>
    %13 = arith.maximumf %11, %12 : vector<512x32xf32>
    %14 = arith.truncf %13 : vector<512x32xf32> to vector<512x32xbf16>
    %c0_11 = arith.constant 0 : index
    %c0_12 = arith.constant 0 : index
    %15 = vector.load %arg4[%c0_11, %c0_12] : memref<512x32xbf16, #tpu.memory_space<vmem>>, vector<512x32xbf16>
    tpu.vector_store %arg4[%c0_11, %c0_12], %14 {strides = array<i32>} : memref<512x32xbf16, #tpu.memory_space<vmem>>, vector<512x32xbf16>,
    return
  }
  func.func @transform_0(%arg0: i32) -> (i32, i32) {
    %c0_i32 = arith.constant 0 : i32
    %c0_i32_0 = arith.constant 0 : i32
    return %arg0, %c0_i32 : i32, i32
  }
  func.func @transform_1(%arg0: i32) -> (i32, i32, i32) {
    %c0_i32 = arith.constant 0 : i32
    %c0_i32_0 = arith.constant 0 : i32
    %c0_i32_1 = arith.constant 0 : i32
    %c0_i32_2 = arith.constant 0 : i32
    return %c0_i32, %c0_i32_0, %c0_i32_1 : i32, i32, i32
  }
  func.func @transform_2(%arg0: i32) -> (i32, i32) {
    %c0_i32 = arith.constant 0 : i32
    %c0_i32_0 = arith.constant 0 : i32
    %c0_i32_1 = arith.constant 0 : i32
    return %c0_i32, %c0_i32_0 : i32, i32
  }
  func.func @transform_3(%arg0: i32) -> (i32, i32) {
    %c0_i32 = arith.constant 0 : i32
    %c0_i32_0 = arith.constant 0 : i32
    return %arg0, %c0_i32 : i32, i32
  }
}

module attributes {stable_mosaic.version = 11 : i64} {
  func.func @kernel(%arg0: i32, %arg1: memref<512x288xbf16, #tpu.memory_space<vmem>>, %arg2: memref<2x144x16xbf16, #tpu.memory_space<vmem>>, %arg3: memref<1x32xf32, #tpu.memory_space<vmem>>, %arg4: memref<512x32xbf16, #tpu.memory_space<vmem>>, %arg5: memref<512x32xbf16, #tpu.memory_space<vmem>>) attributes {dimension_semantics = [#tpu.dimension_semantics<parallel>], iteration_bounds = array<i64: 1>, scalar_prefetch = 0 : i64, scratch_operands = 0 : i64, tpu.core_type = #tpu.core_type<tc>, window_params = [{transform_indices = @transform_0, window_bounds = array<i64: 512, 288>}, {pipeline_mode = #tpu.pipeline_mode<synchronous>, transform_indices = @transform_1, window_bounds = array<i64: 2, 144, 16>}, {pipeline_mode = #tpu.pipeline_mode<synchronous>, transform_indices = @transform_2, window_bounds = array<i64: 1, 32>}, {transform_indices = @transform_3, window_bounds = array<i64: 512, 32>}, {transform_indices = @transform_4, window_bounds = array<i64: 512, 32>}]} {
    %c0 = arith.constant 0 : index
    %c0_0 = arith.constant 0 : index
    %0 = vector.load %arg1[%c0, %c0_0] : memref<512x288xbf16, #tpu.memory_space<vmem>>, vector<512x144xbf16>
    %c0_1 = arith.constant 0 : index
    %c0_2 = arith.constant 0 : index
    %c0_3 = arith.constant 0 : index
    %1 = vector.load %arg2[%c0_1, %c0_2, %c0_3] : memref<2x144x16xbf16, #tpu.memory_space<vmem>>, vector<1x144x16xbf16>
    %2 = vector.shape_cast %1 : vector<1x144x16xbf16> to vector<144x16xbf16>
    %cst = arith.constant dense<0.000000e+00> : vector<512x16xf32>
    %3 = tpu.matmul %0, %2, %cst {dimension_numbers = #tpu.dot_dimension_numbers<[1], [0], [0], [1], [0, 0, 1, 1], [], []>} : vector<512x144xbf16>, vector<144x16xbf16>, vector<512x16xf32> -> vector<512x16xf32>
    %c0_4 = arith.constant 0 : index
    %c144 = arith.constant 144 : index
    %4 = vector.load %arg1[%c0_4, %c144] : memref<512x288xbf16, #tpu.memory_space<vmem>>, vector<512x144xbf16>
    %c1 = arith.constant 1 : index
    %c0_5 = arith.constant 0 : index
    %c0_6 = arith.constant 0 : index
    %5 = vector.load %arg2[%c1, %c0_5, %c0_6] : memref<2x144x16xbf16, #tpu.memory_space<vmem>>, vector<1x144x16xbf16>
    %6 = vector.shape_cast %5 : vector<1x144x16xbf16> to vector<144x16xbf16>
    %cst_7 = arith.constant dense<0.000000e+00> : vector<512x16xf32>
    %7 = tpu.matmul %4, %6, %cst_7 {dimension_numbers = #tpu.dot_dimension_numbers<[1], [0], [0], [1], [0, 0, 1, 1], [], []>} : vector<512x144xbf16>, vector<144x16xbf16>, vector<512x16xf32> -> vector<512x16xf32>
    %8 = tpu.concatenate %3, %7 in 1 : vector<512x16xf32>, vector<512x16xf32> -> vector<512x32xf32>
    %c0_8 = arith.constant 0 : index
    %c0_9 = arith.constant 0 : index
    %9 = vector.load %arg3[%c0_8, %c0_9] : memref<1x32xf32, #tpu.memory_space<vmem>>, vector<1x32xf32>
    %10 = vector.broadcast %9 : vector<1x32xf32> to vector<512x32xf32>
    %11 = arith.addf %8, %10 : vector<512x32xf32>
    %c0_10 = arith.constant 0 : index
    %c0_11 = arith.constant 0 : index
    %12 = vector.load %arg4[%c0_10, %c0_11] : memref<512x32xbf16, #tpu.memory_space<vmem>>, vector<512x32xbf16>
    %13 = arith.extf %12 : vector<512x32xbf16> to vector<512x32xf32>
    %14 = arith.addf %11, %13 : vector<512x32xf32>
    %cst_12 = arith.constant 0.000000e+00 : f32
    %15 = vector.broadcast %cst_12 : f32 to vector<512x32xf32>
    %16 = arith.maximumf %14, %15 : vector<512x32xf32>
    %17 = arith.truncf %16 : vector<512x32xf32> to vector<512x32xbf16>
    %c0_13 = arith.constant 0 : index
    %c0_14 = arith.constant 0 : index
    %18 = vector.load %arg5[%c0_13, %c0_14] : memref<512x32xbf16, #tpu.memory_space<vmem>>, vector<512x32xbf16>
    tpu.vector_store %arg5[%c0_13, %c0_14], %17 {strides = array<i32>} : memref<512x32xbf16, #tpu.memory_space<vmem>>, vector<512x32xbf16>,
    return
  }
  func.func @transform_0(%arg0: i32) -> (i32, i32) {
    %c0_i32 = arith.constant 0 : i32
    %c0_i32_0 = arith.constant 0 : i32
    return %arg0, %c0_i32 : i32, i32
  }
  func.func @transform_1(%arg0: i32) -> (i32, i32, i32) {
    %c0_i32 = arith.constant 0 : i32
    %c0_i32_0 = arith.constant 0 : i32
    %c0_i32_1 = arith.constant 0 : i32
    %c0_i32_2 = arith.constant 0 : i32
    return %c0_i32, %c0_i32_0, %c0_i32_1 : i32, i32, i32
  }
  func.func @transform_2(%arg0: i32) -> (i32, i32) {
    %c0_i32 = arith.constant 0 : i32
    %c0_i32_0 = arith.constant 0 : i32
    %c0_i32_1 = arith.constant 0 : i32
    return %c0_i32, %c0_i32_0 : i32, i32
  }
  func.func @transform_3(%arg0: i32) -> (i32, i32) {
    %c0_i32 = arith.constant 0 : i32
    %c0_i32_0 = arith.constant 0 : i32
    return %arg0, %c0_i32 : i32, i32
  }
  func.func @transform_4(%arg0: i32) -> (i32, i32) {
    %c0_i32 = arith.constant 0 : i32
    %c0_i32_0 = arith.constant 0 : i32
    return %arg0, %c0_i32 : i32, i32
  }
}

module attributes {stable_mosaic.version = 11 : i64} {
  func.func @kernel(%arg0: i32, %arg1: memref<128x288xbf16, #tpu.memory_space<vmem>>, %arg2: memref<2x144x32xbf16, #tpu.memory_space<vmem>>, %arg3: memref<1x64xf32, #tpu.memory_space<vmem>>, %arg4: memref<128x64xbf16, #tpu.memory_space<vmem>>) attributes {dimension_semantics = [#tpu.dimension_semantics<parallel>], iteration_bounds = array<i64: 1>, scalar_prefetch = 0 : i64, scratch_operands = 0 : i64, tpu.core_type = #tpu.core_type<tc>, window_params = [{transform_indices = @transform_0, window_bounds = array<i64: 128, 288>}, {pipeline_mode = #tpu.pipeline_mode<synchronous>, transform_indices = @transform_1, window_bounds = array<i64: 2, 144, 32>}, {pipeline_mode = #tpu.pipeline_mode<synchronous>, transform_indices = @transform_2, window_bounds = array<i64: 1, 64>}, {transform_indices = @transform_3, window_bounds = array<i64: 128, 64>}]} {
    %c0 = arith.constant 0 : index
    %c0_0 = arith.constant 0 : index
    %0 = vector.load %arg1[%c0, %c0_0] : memref<128x288xbf16, #tpu.memory_space<vmem>>, vector<128x144xbf16>
    %c0_1 = arith.constant 0 : index
    %c0_2 = arith.constant 0 : index
    %c0_3 = arith.constant 0 : index
    %1 = vector.load %arg2[%c0_1, %c0_2, %c0_3] : memref<2x144x32xbf16, #tpu.memory_space<vmem>>, vector<1x144x32xbf16>
    %2 = vector.shape_cast %1 : vector<1x144x32xbf16> to vector<144x32xbf16>
    %cst = arith.constant dense<0.000000e+00> : vector<128x32xf32>
    %3 = tpu.matmul %0, %2, %cst {dimension_numbers = #tpu.dot_dimension_numbers<[1], [0], [0], [1], [0, 0, 1, 1], [], []>} : vector<128x144xbf16>, vector<144x32xbf16>, vector<128x32xf32> -> vector<128x32xf32>
    %c0_4 = arith.constant 0 : index
    %c144 = arith.constant 144 : index
    %4 = vector.load %arg1[%c0_4, %c144] : memref<128x288xbf16, #tpu.memory_space<vmem>>, vector<128x144xbf16>
    %c1 = arith.constant 1 : index
    %c0_5 = arith.constant 0 : index
    %c0_6 = arith.constant 0 : index
    %5 = vector.load %arg2[%c1, %c0_5, %c0_6] : memref<2x144x32xbf16, #tpu.memory_space<vmem>>, vector<1x144x32xbf16>
    %6 = vector.shape_cast %5 : vector<1x144x32xbf16> to vector<144x32xbf16>
    %cst_7 = arith.constant dense<0.000000e+00> : vector<128x32xf32>
    %7 = tpu.matmul %4, %6, %cst_7 {dimension_numbers = #tpu.dot_dimension_numbers<[1], [0], [0], [1], [0, 0, 1, 1], [], []>} : vector<128x144xbf16>, vector<144x32xbf16>, vector<128x32xf32> -> vector<128x32xf32>
    %8 = tpu.concatenate %3, %7 in 1 : vector<128x32xf32>, vector<128x32xf32> -> vector<128x64xf32>
    %c0_8 = arith.constant 0 : index
    %c0_9 = arith.constant 0 : index
    %9 = vector.load %arg3[%c0_8, %c0_9] : memref<1x64xf32, #tpu.memory_space<vmem>>, vector<1x64xf32>
    %10 = vector.broadcast %9 : vector<1x64xf32> to vector<128x64xf32>
    %11 = arith.addf %8, %10 : vector<128x64xf32>
    %cst_10 = arith.constant 0.000000e+00 : f32
    %12 = vector.broadcast %cst_10 : f32 to vector<128x64xf32>
    %13 = arith.maximumf %11, %12 : vector<128x64xf32>
    %14 = arith.truncf %13 : vector<128x64xf32> to vector<128x64xbf16>
    %c0_11 = arith.constant 0 : index
    %c0_12 = arith.constant 0 : index
    %15 = vector.load %arg4[%c0_11, %c0_12] : memref<128x64xbf16, #tpu.memory_space<vmem>>, vector<128x64xbf16>
    tpu.vector_store %arg4[%c0_11, %c0_12], %14 {strides = array<i32>} : memref<128x64xbf16, #tpu.memory_space<vmem>>, vector<128x64xbf16>,
    return
  }
  func.func @transform_0(%arg0: i32) -> (i32, i32) {
    %c0_i32 = arith.constant 0 : i32
    %c0_i32_0 = arith.constant 0 : i32
    return %arg0, %c0_i32 : i32, i32
  }
  func.func @transform_1(%arg0: i32) -> (i32, i32, i32) {
    %c0_i32 = arith.constant 0 : i32
    %c0_i32_0 = arith.constant 0 : i32
    %c0_i32_1 = arith.constant 0 : i32
    %c0_i32_2 = arith.constant 0 : i32
    return %c0_i32, %c0_i32_0, %c0_i32_1 : i32, i32, i32
  }
  func.func @transform_2(%arg0: i32) -> (i32, i32) {
    %c0_i32 = arith.constant 0 : i32
    %c0_i32_0 = arith.constant 0 : i32
    %c0_i32_1 = arith.constant 0 : i32
    return %c0_i32, %c0_i32_0 : i32, i32
  }
  func.func @transform_3(%arg0: i32) -> (i32, i32) {
    %c0_i32 = arith.constant 0 : i32
    %c0_i32_0 = arith.constant 0 : i32
    return %arg0, %c0_i32 : i32, i32
  }
}

module attributes {stable_mosaic.version = 11 : i64} {
  func.func @kernel(%arg0: i32, %arg1: memref<128x32xbf16, #tpu.memory_space<vmem>>, %arg2: memref<2x16x32xbf16, #tpu.memory_space<vmem>>, %arg3: memref<1x64xf32, #tpu.memory_space<vmem>>, %arg4: memref<128x64xbf16, #tpu.memory_space<vmem>>) attributes {dimension_semantics = [#tpu.dimension_semantics<parallel>], iteration_bounds = array<i64: 1>, scalar_prefetch = 0 : i64, scratch_operands = 0 : i64, tpu.core_type = #tpu.core_type<tc>, window_params = [{transform_indices = @transform_0, window_bounds = array<i64: 128, 32>}, {pipeline_mode = #tpu.pipeline_mode<synchronous>, transform_indices = @transform_1, window_bounds = array<i64: 2, 16, 32>}, {pipeline_mode = #tpu.pipeline_mode<synchronous>, transform_indices = @transform_2, window_bounds = array<i64: 1, 64>}, {transform_indices = @transform_3, window_bounds = array<i64: 128, 64>}]} {
    %c0 = arith.constant 0 : index
    %c0_0 = arith.constant 0 : index
    %0 = vector.load %arg1[%c0, %c0_0] : memref<128x32xbf16, #tpu.memory_space<vmem>>, vector<128x16xbf16>
    %c0_1 = arith.constant 0 : index
    %c0_2 = arith.constant 0 : index
    %c0_3 = arith.constant 0 : index
    %1 = vector.load %arg2[%c0_1, %c0_2, %c0_3] : memref<2x16x32xbf16, #tpu.memory_space<vmem>>, vector<1x16x32xbf16>
    %2 = vector.shape_cast %1 : vector<1x16x32xbf16> to vector<16x32xbf16>
    %cst = arith.constant dense<0.000000e+00> : vector<128x32xf32>
    %3 = tpu.matmul %0, %2, %cst {dimension_numbers = #tpu.dot_dimension_numbers<[1], [0], [0], [1], [0, 0, 1, 1], [], []>} : vector<128x16xbf16>, vector<16x32xbf16>, vector<128x32xf32> -> vector<128x32xf32>
    %c0_4 = arith.constant 0 : index
    %c16 = arith.constant 16 : index
    %4 = vector.load %arg1[%c0_4, %c16] : memref<128x32xbf16, #tpu.memory_space<vmem>>, vector<128x16xbf16>
    %c1 = arith.constant 1 : index
    %c0_5 = arith.constant 0 : index
    %c0_6 = arith.constant 0 : index
    %5 = vector.load %arg2[%c1, %c0_5, %c0_6] : memref<2x16x32xbf16, #tpu.memory_space<vmem>>, vector<1x16x32xbf16>
    %6 = vector.shape_cast %5 : vector<1x16x32xbf16> to vector<16x32xbf16>
    %cst_7 = arith.constant dense<0.000000e+00> : vector<128x32xf32>
    %7 = tpu.matmul %4, %6, %cst_7 {dimension_numbers = #tpu.dot_dimension_numbers<[1], [0], [0], [1], [0, 0, 1, 1], [], []>} : vector<128x16xbf16>, vector<16x32xbf16>, vector<128x32xf32> -> vector<128x32xf32>
    %8 = tpu.concatenate %3, %7 in 1 : vector<128x32xf32>, vector<128x32xf32> -> vector<128x64xf32>
    %c0_8 = arith.constant 0 : index
    %c0_9 = arith.constant 0 : index
    %9 = vector.load %arg3[%c0_8, %c0_9] : memref<1x64xf32, #tpu.memory_space<vmem>>, vector<1x64xf32>
    %10 = vector.broadcast %9 : vector<1x64xf32> to vector<128x64xf32>
    %11 = arith.addf %8, %10 : vector<128x64xf32>
    %12 = arith.truncf %11 : vector<128x64xf32> to vector<128x64xbf16>
    %c0_10 = arith.constant 0 : index
    %c0_11 = arith.constant 0 : index
    %13 = vector.load %arg4[%c0_10, %c0_11] : memref<128x64xbf16, #tpu.memory_space<vmem>>, vector<128x64xbf16>
    tpu.vector_store %arg4[%c0_10, %c0_11], %12 {strides = array<i32>} : memref<128x64xbf16, #tpu.memory_space<vmem>>, vector<128x64xbf16>,
    return
  }
  func.func @transform_0(%arg0: i32) -> (i32, i32) {
    %c0_i32 = arith.constant 0 : i32
    %c0_i32_0 = arith.constant 0 : i32
    return %arg0, %c0_i32 : i32, i32
  }
  func.func @transform_1(%arg0: i32) -> (i32, i32, i32) {
    %c0_i32 = arith.constant 0 : i32
    %c0_i32_0 = arith.constant 0 : i32
    %c0_i32_1 = arith.constant 0 : i32
    %c0_i32_2 = arith.constant 0 : i32
    return %c0_i32, %c0_i32_0, %c0_i32_1 : i32, i32, i32
  }
  func.func @transform_2(%arg0: i32) -> (i32, i32) {
    %c0_i32 = arith.constant 0 : i32
    %c0_i32_0 = arith.constant 0 : i32
    %c0_i32_1 = arith.constant 0 : i32
    return %c0_i32, %c0_i32_0 : i32, i32
  }
  func.func @transform_3(%arg0: i32) -> (i32, i32) {
    %c0_i32 = arith.constant 0 : i32
    %c0_i32_0 = arith.constant 0 : i32
    return %arg0, %c0_i32 : i32, i32
  }
}

module attributes {stable_mosaic.version = 11 : i64} {
  func.func @kernel(%arg0: i32, %arg1: memref<128x576xbf16, #tpu.memory_space<vmem>>, %arg2: memref<2x288x32xbf16, #tpu.memory_space<vmem>>, %arg3: memref<1x64xf32, #tpu.memory_space<vmem>>, %arg4: memref<128x64xbf16, #tpu.memory_space<vmem>>, %arg5: memref<128x64xbf16, #tpu.memory_space<vmem>>) attributes {dimension_semantics = [#tpu.dimension_semantics<parallel>], iteration_bounds = array<i64: 1>, scalar_prefetch = 0 : i64, scratch_operands = 0 : i64, tpu.core_type = #tpu.core_type<tc>, window_params = [{transform_indices = @transform_0, window_bounds = array<i64: 128, 576>}, {pipeline_mode = #tpu.pipeline_mode<synchronous>, transform_indices = @transform_1, window_bounds = array<i64: 2, 288, 32>}, {pipeline_mode = #tpu.pipeline_mode<synchronous>, transform_indices = @transform_2, window_bounds = array<i64: 1, 64>}, {transform_indices = @transform_3, window_bounds = array<i64: 128, 64>}, {transform_indices = @transform_4, window_bounds = array<i64: 128, 64>}]} {
    %c0 = arith.constant 0 : index
    %c0_0 = arith.constant 0 : index
    %0 = vector.load %arg1[%c0, %c0_0] : memref<128x576xbf16, #tpu.memory_space<vmem>>, vector<128x288xbf16>
    %c0_1 = arith.constant 0 : index
    %c0_2 = arith.constant 0 : index
    %c0_3 = arith.constant 0 : index
    %1 = vector.load %arg2[%c0_1, %c0_2, %c0_3] : memref<2x288x32xbf16, #tpu.memory_space<vmem>>, vector<1x288x32xbf16>
    %2 = vector.shape_cast %1 : vector<1x288x32xbf16> to vector<288x32xbf16>
    %cst = arith.constant dense<0.000000e+00> : vector<128x32xf32>
    %3 = tpu.matmul %0, %2, %cst {dimension_numbers = #tpu.dot_dimension_numbers<[1], [0], [0], [1], [0, 0, 1, 1], [], []>} : vector<128x288xbf16>, vector<288x32xbf16>, vector<128x32xf32> -> vector<128x32xf32>
    %c0_4 = arith.constant 0 : index
    %c288 = arith.constant 288 : index
    %4 = vector.load %arg1[%c0_4, %c288] : memref<128x576xbf16, #tpu.memory_space<vmem>>, vector<128x288xbf16>
    %c1 = arith.constant 1 : index
    %c0_5 = arith.constant 0 : index
    %c0_6 = arith.constant 0 : index
    %5 = vector.load %arg2[%c1, %c0_5, %c0_6] : memref<2x288x32xbf16, #tpu.memory_space<vmem>>, vector<1x288x32xbf16>
    %6 = vector.shape_cast %5 : vector<1x288x32xbf16> to vector<288x32xbf16>
    %cst_7 = arith.constant dense<0.000000e+00> : vector<128x32xf32>
    %7 = tpu.matmul %4, %6, %cst_7 {dimension_numbers = #tpu.dot_dimension_numbers<[1], [0], [0], [1], [0, 0, 1, 1], [], []>} : vector<128x288xbf16>, vector<288x32xbf16>, vector<128x32xf32> -> vector<128x32xf32>
    %8 = tpu.concatenate %3, %7 in 1 : vector<128x32xf32>, vector<128x32xf32> -> vector<128x64xf32>
    %c0_8 = arith.constant 0 : index
    %c0_9 = arith.constant 0 : index
    %9 = vector.load %arg3[%c0_8, %c0_9] : memref<1x64xf32, #tpu.memory_space<vmem>>, vector<1x64xf32>
    %10 = vector.broadcast %9 : vector<1x64xf32> to vector<128x64xf32>
    %11 = arith.addf %8, %10 : vector<128x64xf32>
    %c0_10 = arith.constant 0 : index
    %c0_11 = arith.constant 0 : index
    %12 = vector.load %arg4[%c0_10, %c0_11] : memref<128x64xbf16, #tpu.memory_space<vmem>>, vector<128x64xbf16>
    %13 = arith.extf %12 : vector<128x64xbf16> to vector<128x64xf32>
    %14 = arith.addf %11, %13 : vector<128x64xf32>
    %cst_12 = arith.constant 0.000000e+00 : f32
    %15 = vector.broadcast %cst_12 : f32 to vector<128x64xf32>
    %16 = arith.maximumf %14, %15 : vector<128x64xf32>
    %17 = arith.truncf %16 : vector<128x64xf32> to vector<128x64xbf16>
    %c0_13 = arith.constant 0 : index
    %c0_14 = arith.constant 0 : index
    %18 = vector.load %arg5[%c0_13, %c0_14] : memref<128x64xbf16, #tpu.memory_space<vmem>>, vector<128x64xbf16>
    tpu.vector_store %arg5[%c0_13, %c0_14], %17 {strides = array<i32>} : memref<128x64xbf16, #tpu.memory_space<vmem>>, vector<128x64xbf16>,
    return
  }
  func.func @transform_0(%arg0: i32) -> (i32, i32) {
    %c0_i32 = arith.constant 0 : i32
    %c0_i32_0 = arith.constant 0 : i32
    return %arg0, %c0_i32 : i32, i32
  }
  func.func @transform_1(%arg0: i32) -> (i32, i32, i32) {
    %c0_i32 = arith.constant 0 : i32
    %c0_i32_0 = arith.constant 0 : i32
    %c0_i32_1 = arith.constant 0 : i32
    %c0_i32_2 = arith.constant 0 : i32
    return %c0_i32, %c0_i32_0, %c0_i32_1 : i32, i32, i32
  }
  func.func @transform_2(%arg0: i32) -> (i32, i32) {
    %c0_i32 = arith.constant 0 : i32
    %c0_i32_0 = arith.constant 0 : i32
    %c0_i32_1 = arith.constant 0 : i32
    return %c0_i32, %c0_i32_0 : i32, i32
  }
  func.func @transform_3(%arg0: i32) -> (i32, i32) {
    %c0_i32 = arith.constant 0 : i32
    %c0_i32_0 = arith.constant 0 : i32
    return %arg0, %c0_i32 : i32, i32
  }
  func.func @transform_4(%arg0: i32) -> (i32, i32) {
    %c0_i32 = arith.constant 0 : i32
    %c0_i32_0 = arith.constant 0 : i32
    return %arg0, %c0_i32 : i32, i32
  }
}

module attributes {stable_mosaic.version = 11 : i64} {
  func.func @kernel(%arg0: i32, %arg1: memref<32x576xbf16, #tpu.memory_space<vmem>>, %arg2: memref<2x288x64xbf16, #tpu.memory_space<vmem>>, %arg3: memref<1x128xf32, #tpu.memory_space<vmem>>, %arg4: memref<32x128xbf16, #tpu.memory_space<vmem>>) attributes {dimension_semantics = [#tpu.dimension_semantics<parallel>], iteration_bounds = array<i64: 1>, scalar_prefetch = 0 : i64, scratch_operands = 0 : i64, tpu.core_type = #tpu.core_type<tc>, window_params = [{transform_indices = @transform_0, window_bounds = array<i64: 32, 576>}, {pipeline_mode = #tpu.pipeline_mode<synchronous>, transform_indices = @transform_1, window_bounds = array<i64: 2, 288, 64>}, {pipeline_mode = #tpu.pipeline_mode<synchronous>, transform_indices = @transform_2, window_bounds = array<i64: 1, 128>}, {transform_indices = @transform_3, window_bounds = array<i64: 32, 128>}]} {
    %c0 = arith.constant 0 : index
    %c0_0 = arith.constant 0 : index
    %0 = vector.load %arg1[%c0, %c0_0] : memref<32x576xbf16, #tpu.memory_space<vmem>>, vector<32x288xbf16>
    %c0_1 = arith.constant 0 : index
    %c0_2 = arith.constant 0 : index
    %c0_3 = arith.constant 0 : index
    %1 = vector.load %arg2[%c0_1, %c0_2, %c0_3] : memref<2x288x64xbf16, #tpu.memory_space<vmem>>, vector<1x288x64xbf16>
    %2 = vector.shape_cast %1 : vector<1x288x64xbf16> to vector<288x64xbf16>
    %cst = arith.constant dense<0.000000e+00> : vector<32x64xf32>
    %3 = tpu.matmul %0, %2, %cst {dimension_numbers = #tpu.dot_dimension_numbers<[1], [0], [0], [1], [0, 0, 1, 1], [], []>} : vector<32x288xbf16>, vector<288x64xbf16>, vector<32x64xf32> -> vector<32x64xf32>
    %c0_4 = arith.constant 0 : index
    %c288 = arith.constant 288 : index
    %4 = vector.load %arg1[%c0_4, %c288] : memref<32x576xbf16, #tpu.memory_space<vmem>>, vector<32x288xbf16>
    %c1 = arith.constant 1 : index
    %c0_5 = arith.constant 0 : index
    %c0_6 = arith.constant 0 : index
    %5 = vector.load %arg2[%c1, %c0_5, %c0_6] : memref<2x288x64xbf16, #tpu.memory_space<vmem>>, vector<1x288x64xbf16>
    %6 = vector.shape_cast %5 : vector<1x288x64xbf16> to vector<288x64xbf16>
    %cst_7 = arith.constant dense<0.000000e+00> : vector<32x64xf32>
    %7 = tpu.matmul %4, %6, %cst_7 {dimension_numbers = #tpu.dot_dimension_numbers<[1], [0], [0], [1], [0, 0, 1, 1], [], []>} : vector<32x288xbf16>, vector<288x64xbf16>, vector<32x64xf32> -> vector<32x64xf32>
    %8 = tpu.concatenate %3, %7 in 1 : vector<32x64xf32>, vector<32x64xf32> -> vector<32x128xf32>
    %c0_8 = arith.constant 0 : index
    %c0_9 = arith.constant 0 : index
    %9 = vector.load %arg3[%c0_8, %c0_9] : memref<1x128xf32, #tpu.memory_space<vmem>>, vector<1x128xf32>
    %10 = vector.broadcast %9 : vector<1x128xf32> to vector<32x128xf32>
    %11 = arith.addf %8, %10 : vector<32x128xf32>
    %cst_10 = arith.constant 0.000000e+00 : f32
    %12 = vector.broadcast %cst_10 : f32 to vector<32x128xf32>
    %13 = arith.maximumf %11, %12 : vector<32x128xf32>
    %14 = arith.truncf %13 : vector<32x128xf32> to vector<32x128xbf16>
    %c0_11 = arith.constant 0 : index
    %c0_12 = arith.constant 0 : index
    %15 = vector.load %arg4[%c0_11, %c0_12] : memref<32x128xbf16, #tpu.memory_space<vmem>>, vector<32x128xbf16>
    tpu.vector_store %arg4[%c0_11, %c0_12], %14 {strides = array<i32>} : memref<32x128xbf16, #tpu.memory_space<vmem>>, vector<32x128xbf16>,
    return
  }
  func.func @transform_0(%arg0: i32) -> (i32, i32) {
    %c0_i32 = arith.constant 0 : i32
    %c0_i32_0 = arith.constant 0 : i32
    return %arg0, %c0_i32 : i32, i32
  }
  func.func @transform_1(%arg0: i32) -> (i32, i32, i32) {
    %c0_i32 = arith.constant 0 : i32
    %c0_i32_0 = arith.constant 0 : i32
    %c0_i32_1 = arith.constant 0 : i32
    %c0_i32_2 = arith.constant 0 : i32
    return %c0_i32, %c0_i32_0, %c0_i32_1 : i32, i32, i32
  }
  func.func @transform_2(%arg0: i32) -> (i32, i32) {
    %c0_i32 = arith.constant 0 : i32
    %c0_i32_0 = arith.constant 0 : i32
    %c0_i32_1 = arith.constant 0 : i32
    return %c0_i32, %c0_i32_0 : i32, i32
  }
  func.func @transform_3(%arg0: i32) -> (i32, i32) {
    %c0_i32 = arith.constant 0 : i32
    %c0_i32_0 = arith.constant 0 : i32
    return %arg0, %c0_i32 : i32, i32
  }
}

module attributes {stable_mosaic.version = 11 : i64} {
  func.func @kernel(%arg0: i32, %arg1: memref<32x64xbf16, #tpu.memory_space<vmem>>, %arg2: memref<2x32x64xbf16, #tpu.memory_space<vmem>>, %arg3: memref<1x128xf32, #tpu.memory_space<vmem>>, %arg4: memref<32x128xbf16, #tpu.memory_space<vmem>>) attributes {dimension_semantics = [#tpu.dimension_semantics<parallel>], iteration_bounds = array<i64: 1>, scalar_prefetch = 0 : i64, scratch_operands = 0 : i64, tpu.core_type = #tpu.core_type<tc>, window_params = [{transform_indices = @transform_0, window_bounds = array<i64: 32, 64>}, {pipeline_mode = #tpu.pipeline_mode<synchronous>, transform_indices = @transform_1, window_bounds = array<i64: 2, 32, 64>}, {pipeline_mode = #tpu.pipeline_mode<synchronous>, transform_indices = @transform_2, window_bounds = array<i64: 1, 128>}, {transform_indices = @transform_3, window_bounds = array<i64: 32, 128>}]} {
    %c0 = arith.constant 0 : index
    %c0_0 = arith.constant 0 : index
    %0 = vector.load %arg1[%c0, %c0_0] : memref<32x64xbf16, #tpu.memory_space<vmem>>, vector<32x32xbf16>
    %c0_1 = arith.constant 0 : index
    %c0_2 = arith.constant 0 : index
    %c0_3 = arith.constant 0 : index
    %1 = vector.load %arg2[%c0_1, %c0_2, %c0_3] : memref<2x32x64xbf16, #tpu.memory_space<vmem>>, vector<1x32x64xbf16>
    %2 = vector.shape_cast %1 : vector<1x32x64xbf16> to vector<32x64xbf16>
    %cst = arith.constant dense<0.000000e+00> : vector<32x64xf32>
    %3 = tpu.matmul %0, %2, %cst {dimension_numbers = #tpu.dot_dimension_numbers<[1], [0], [0], [1], [0, 0, 1, 1], [], []>} : vector<32x32xbf16>, vector<32x64xbf16>, vector<32x64xf32> -> vector<32x64xf32>
    %c0_4 = arith.constant 0 : index
    %c32 = arith.constant 32 : index
    %4 = vector.load %arg1[%c0_4, %c32] : memref<32x64xbf16, #tpu.memory_space<vmem>>, vector<32x32xbf16>
    %c1 = arith.constant 1 : index
    %c0_5 = arith.constant 0 : index
    %c0_6 = arith.constant 0 : index
    %5 = vector.load %arg2[%c1, %c0_5, %c0_6] : memref<2x32x64xbf16, #tpu.memory_space<vmem>>, vector<1x32x64xbf16>
    %6 = vector.shape_cast %5 : vector<1x32x64xbf16> to vector<32x64xbf16>
    %cst_7 = arith.constant dense<0.000000e+00> : vector<32x64xf32>
    %7 = tpu.matmul %4, %6, %cst_7 {dimension_numbers = #tpu.dot_dimension_numbers<[1], [0], [0], [1], [0, 0, 1, 1], [], []>} : vector<32x32xbf16>, vector<32x64xbf16>, vector<32x64xf32> -> vector<32x64xf32>
    %8 = tpu.concatenate %3, %7 in 1 : vector<32x64xf32>, vector<32x64xf32> -> vector<32x128xf32>
    %c0_8 = arith.constant 0 : index
    %c0_9 = arith.constant 0 : index
    %9 = vector.load %arg3[%c0_8, %c0_9] : memref<1x128xf32, #tpu.memory_space<vmem>>, vector<1x128xf32>
    %10 = vector.broadcast %9 : vector<1x128xf32> to vector<32x128xf32>
    %11 = arith.addf %8, %10 : vector<32x128xf32>
    %12 = arith.truncf %11 : vector<32x128xf32> to vector<32x128xbf16>
    %c0_10 = arith.constant 0 : index
    %c0_11 = arith.constant 0 : index
    %13 = vector.load %arg4[%c0_10, %c0_11] : memref<32x128xbf16, #tpu.memory_space<vmem>>, vector<32x128xbf16>
    tpu.vector_store %arg4[%c0_10, %c0_11], %12 {strides = array<i32>} : memref<32x128xbf16, #tpu.memory_space<vmem>>, vector<32x128xbf16>,
    return
  }
  func.func @transform_0(%arg0: i32) -> (i32, i32) {
    %c0_i32 = arith.constant 0 : i32
    %c0_i32_0 = arith.constant 0 : i32
    return %arg0, %c0_i32 : i32, i32
  }
  func.func @transform_1(%arg0: i32) -> (i32, i32, i32) {
    %c0_i32 = arith.constant 0 : i32
    %c0_i32_0 = arith.constant 0 : i32
    %c0_i32_1 = arith.constant 0 : i32
    %c0_i32_2 = arith.constant 0 : i32
    return %c0_i32, %c0_i32_0, %c0_i32_1 : i32, i32, i32
  }
  func.func @transform_2(%arg0: i32) -> (i32, i32) {
    %c0_i32 = arith.constant 0 : i32
    %c0_i32_0 = arith.constant 0 : i32
    %c0_i32_1 = arith.constant 0 : i32
    return %c0_i32, %c0_i32_0 : i32, i32
  }
  func.func @transform_3(%arg0: i32) -> (i32, i32) {
    %c0_i32 = arith.constant 0 : i32
    %c0_i32_0 = arith.constant 0 : i32
    return %arg0, %c0_i32 : i32, i32
  }
}

module attributes {stable_mosaic.version = 11 : i64} {
  func.func @kernel(%arg0: i32, %arg1: memref<32x1152xbf16, #tpu.memory_space<vmem>>, %arg2: memref<2x576x64xbf16, #tpu.memory_space<vmem>>, %arg3: memref<1x128xf32, #tpu.memory_space<vmem>>, %arg4: memref<32x128xbf16, #tpu.memory_space<vmem>>, %arg5: memref<32x128xbf16, #tpu.memory_space<vmem>>) attributes {dimension_semantics = [#tpu.dimension_semantics<parallel>], iteration_bounds = array<i64: 1>, scalar_prefetch = 0 : i64, scratch_operands = 0 : i64, tpu.core_type = #tpu.core_type<tc>, window_params = [{transform_indices = @transform_0, window_bounds = array<i64: 32, 1152>}, {pipeline_mode = #tpu.pipeline_mode<synchronous>, transform_indices = @transform_1, window_bounds = array<i64: 2, 576, 64>}, {pipeline_mode = #tpu.pipeline_mode<synchronous>, transform_indices = @transform_2, window_bounds = array<i64: 1, 128>}, {transform_indices = @transform_3, window_bounds = array<i64: 32, 128>}, {transform_indices = @transform_4, window_bounds = array<i64: 32, 128>}]} {
    %c0 = arith.constant 0 : index
    %c0_0 = arith.constant 0 : index
    %0 = vector.load %arg1[%c0, %c0_0] : memref<32x1152xbf16, #tpu.memory_space<vmem>>, vector<32x576xbf16>
    %c0_1 = arith.constant 0 : index
    %c0_2 = arith.constant 0 : index
    %c0_3 = arith.constant 0 : index
    %1 = vector.load %arg2[%c0_1, %c0_2, %c0_3] : memref<2x576x64xbf16, #tpu.memory_space<vmem>>, vector<1x576x64xbf16>
    %2 = vector.shape_cast %1 : vector<1x576x64xbf16> to vector<576x64xbf16>
    %cst = arith.constant dense<0.000000e+00> : vector<32x64xf32>
    %3 = tpu.matmul %0, %2, %cst {dimension_numbers = #tpu.dot_dimension_numbers<[1], [0], [0], [1], [0, 0, 1, 1], [], []>} : vector<32x576xbf16>, vector<576x64xbf16>, vector<32x64xf32> -> vector<32x64xf32>
    %c0_4 = arith.constant 0 : index
    %c576 = arith.constant 576 : index
    %4 = vector.load %arg1[%c0_4, %c576] : memref<32x1152xbf16, #tpu.memory_space<vmem>>, vector<32x576xbf16>
    %c1 = arith.constant 1 : index
    %c0_5 = arith.constant 0 : index
    %c0_6 = arith.constant 0 : index
    %5 = vector.load %arg2[%c1, %c0_5, %c0_6] : memref<2x576x64xbf16, #tpu.memory_space<vmem>>, vector<1x576x64xbf16>
    %6 = vector.shape_cast %5 : vector<1x576x64xbf16> to vector<576x64xbf16>
    %cst_7 = arith.constant dense<0.000000e+00> : vector<32x64xf32>
    %7 = tpu.matmul %4, %6, %cst_7 {dimension_numbers = #tpu.dot_dimension_numbers<[1], [0], [0], [1], [0, 0, 1, 1], [], []>} : vector<32x576xbf16>, vector<576x64xbf16>, vector<32x64xf32> -> vector<32x64xf32>
    %8 = tpu.concatenate %3, %7 in 1 : vector<32x64xf32>, vector<32x64xf32> -> vector<32x128xf32>
    %c0_8 = arith.constant 0 : index
    %c0_9 = arith.constant 0 : index
    %9 = vector.load %arg3[%c0_8, %c0_9] : memref<1x128xf32, #tpu.memory_space<vmem>>, vector<1x128xf32>
    %10 = vector.broadcast %9 : vector<1x128xf32> to vector<32x128xf32>
    %11 = arith.addf %8, %10 : vector<32x128xf32>
    %c0_10 = arith.constant 0 : index
    %c0_11 = arith.constant 0 : index
    %12 = vector.load %arg4[%c0_10, %c0_11] : memref<32x128xbf16, #tpu.memory_space<vmem>>, vector<32x128xbf16>
    %13 = arith.extf %12 : vector<32x128xbf16> to vector<32x128xf32>
    %14 = arith.addf %11, %13 : vector<32x128xf32>
    %cst_12 = arith.constant 0.000000e+00 : f32
    %15 = vector.broadcast %cst_12 : f32 to vector<32x128xf32>
    %16 = arith.maximumf %14, %15 : vector<32x128xf32>
    %17 = arith.truncf %16 : vector<32x128xf32> to vector<32x128xbf16>
    %c0_13 = arith.constant 0 : index
    %c0_14 = arith.constant 0 : index
    %18 = vector.load %arg5[%c0_13, %c0_14] : memref<32x128xbf16, #tpu.memory_space<vmem>>, vector<32x128xbf16>
    tpu.vector_store %arg5[%c0_13, %c0_14], %17 {strides = array<i32>} : memref<32x128xbf16, #tpu.memory_space<vmem>>, vector<32x128xbf16>,
    return
  }
  func.func @transform_0(%arg0: i32) -> (i32, i32) {
    %c0_i32 = arith.constant 0 : i32
    %c0_i32_0 = arith.constant 0 : i32
    return %arg0, %c0_i32 : i32, i32
  }
  func.func @transform_1(%arg0: i32) -> (i32, i32, i32) {
    %c0_i32 = arith.constant 0 : i32
    %c0_i32_0 = arith.constant 0 : i32
    %c0_i32_1 = arith.constant 0 : i32
    %c0_i32_2 = arith.constant 0 : i32
    return %c0_i32, %c0_i32_0, %c0_i32_1 : i32, i32, i32
  }
  func.func @transform_2(%arg0: i32) -> (i32, i32) {
    %c0_i32 = arith.constant 0 : i32
    %c0_i32_0 = arith.constant 0 : i32
    %c0_i32_1 = arith.constant 0 : i32
    return %c0_i32, %c0_i32_0 : i32, i32
  }
  func.func @transform_3(%arg0: i32) -> (i32, i32) {
    %c0_i32 = arith.constant 0 : i32
    %c0_i32_0 = arith.constant 0 : i32
    return %arg0, %c0_i32 : i32, i32
  }
  func.func @transform_4(%arg0: i32) -> (i32, i32) {
    %c0_i32 = arith.constant 0 : i32
    %c0_i32_0 = arith.constant 0 : i32
    return %arg0, %c0_i32 : i32, i32
  }
}

module attributes {stable_mosaic.version = 11 : i64} {
  func.func @kernel(%arg0: i32, %arg1: memref<8x1152xbf16, #tpu.memory_space<vmem>>, %arg2: memref<2x576x128xbf16, #tpu.memory_space<vmem>>, %arg3: memref<1x256xf32, #tpu.memory_space<vmem>>, %arg4: memref<8x256xbf16, #tpu.memory_space<vmem>>) attributes {dimension_semantics = [#tpu.dimension_semantics<parallel>], iteration_bounds = array<i64: 1>, scalar_prefetch = 0 : i64, scratch_operands = 0 : i64, tpu.core_type = #tpu.core_type<tc>, window_params = [{transform_indices = @transform_0, window_bounds = array<i64: 8, 1152>}, {pipeline_mode = #tpu.pipeline_mode<synchronous>, transform_indices = @transform_1, window_bounds = array<i64: 2, 576, 128>}, {pipeline_mode = #tpu.pipeline_mode<synchronous>, transform_indices = @transform_2, window_bounds = array<i64: 1, 256>}, {transform_indices = @transform_3, window_bounds = array<i64: 8, 256>}]} {
    %c0 = arith.constant 0 : index
    %c0_0 = arith.constant 0 : index
    %0 = vector.load %arg1[%c0, %c0_0] : memref<8x1152xbf16, #tpu.memory_space<vmem>>, vector<8x576xbf16>
    %c0_1 = arith.constant 0 : index
    %c0_2 = arith.constant 0 : index
    %c0_3 = arith.constant 0 : index
    %1 = vector.load %arg2[%c0_1, %c0_2, %c0_3] : memref<2x576x128xbf16, #tpu.memory_space<vmem>>, vector<1x576x128xbf16>
    %2 = vector.shape_cast %1 : vector<1x576x128xbf16> to vector<576x128xbf16>
    %cst = arith.constant dense<0.000000e+00> : vector<8x128xf32>
    %3 = tpu.matmul %0, %2, %cst {dimension_numbers = #tpu.dot_dimension_numbers<[1], [0], [0], [1], [0, 0, 1, 1], [], []>} : vector<8x576xbf16>, vector<576x128xbf16>, vector<8x128xf32> -> vector<8x128xf32>
    %c0_4 = arith.constant 0 : index
    %c576 = arith.constant 576 : index
    %4 = vector.load %arg1[%c0_4, %c576] : memref<8x1152xbf16, #tpu.memory_space<vmem>>, vector<8x576xbf16>
    %c1 = arith.constant 1 : index
    %c0_5 = arith.constant 0 : index
    %c0_6 = arith.constant 0 : index
    %5 = vector.load %arg2[%c1, %c0_5, %c0_6] : memref<2x576x128xbf16, #tpu.memory_space<vmem>>, vector<1x576x128xbf16>
    %6 = vector.shape_cast %5 : vector<1x576x128xbf16> to vector<576x128xbf16>
    %cst_7 = arith.constant dense<0.000000e+00> : vector<8x128xf32>
    %7 = tpu.matmul %4, %6, %cst_7 {dimension_numbers = #tpu.dot_dimension_numbers<[1], [0], [0], [1], [0, 0, 1, 1], [], []>} : vector<8x576xbf16>, vector<576x128xbf16>, vector<8x128xf32> -> vector<8x128xf32>
    %8 = tpu.concatenate %3, %7 in 1 : vector<8x128xf32>, vector<8x128xf32> -> vector<8x256xf32>
    %c0_8 = arith.constant 0 : index
    %c0_9 = arith.constant 0 : index
    %9 = vector.load %arg3[%c0_8, %c0_9] : memref<1x256xf32, #tpu.memory_space<vmem>>, vector<1x256xf32>
    %10 = vector.broadcast %9 : vector<1x256xf32> to vector<8x256xf32>
    %11 = arith.addf %8, %10 : vector<8x256xf32>
    %cst_10 = arith.constant 0.000000e+00 : f32
    %12 = vector.broadcast %cst_10 : f32 to vector<8x256xf32>
    %13 = arith.maximumf %11, %12 : vector<8x256xf32>
    %14 = arith.truncf %13 : vector<8x256xf32> to vector<8x256xbf16>
    %c0_11 = arith.constant 0 : index
    %c0_12 = arith.constant 0 : index
    %15 = vector.load %arg4[%c0_11, %c0_12] : memref<8x256xbf16, #tpu.memory_space<vmem>>, vector<8x256xbf16>
    tpu.vector_store %arg4[%c0_11, %c0_12], %14 {strides = array<i32>} : memref<8x256xbf16, #tpu.memory_space<vmem>>, vector<8x256xbf16>,
    return
  }
  func.func @transform_0(%arg0: i32) -> (i32, i32) {
    %c0_i32 = arith.constant 0 : i32
    %c0_i32_0 = arith.constant 0 : i32
    return %arg0, %c0_i32 : i32, i32
  }
  func.func @transform_1(%arg0: i32) -> (i32, i32, i32) {
    %c0_i32 = arith.constant 0 : i32
    %c0_i32_0 = arith.constant 0 : i32
    %c0_i32_1 = arith.constant 0 : i32
    %c0_i32_2 = arith.constant 0 : i32
    return %c0_i32, %c0_i32_0, %c0_i32_1 : i32, i32, i32
  }
  func.func @transform_2(%arg0: i32) -> (i32, i32) {
    %c0_i32 = arith.constant 0 : i32
    %c0_i32_0 = arith.constant 0 : i32
    %c0_i32_1 = arith.constant 0 : i32
    return %c0_i32, %c0_i32_0 : i32, i32
  }
  func.func @transform_3(%arg0: i32) -> (i32, i32) {
    %c0_i32 = arith.constant 0 : i32
    %c0_i32_0 = arith.constant 0 : i32
    return %arg0, %c0_i32 : i32, i32
  }
}

module attributes {stable_mosaic.version = 11 : i64} {
  func.func @kernel(%arg0: i32, %arg1: memref<8x128xbf16, #tpu.memory_space<vmem>>, %arg2: memref<2x64x128xbf16, #tpu.memory_space<vmem>>, %arg3: memref<1x256xf32, #tpu.memory_space<vmem>>, %arg4: memref<8x256xbf16, #tpu.memory_space<vmem>>) attributes {dimension_semantics = [#tpu.dimension_semantics<parallel>], iteration_bounds = array<i64: 1>, scalar_prefetch = 0 : i64, scratch_operands = 0 : i64, tpu.core_type = #tpu.core_type<tc>, window_params = [{transform_indices = @transform_0, window_bounds = array<i64: 8, 128>}, {pipeline_mode = #tpu.pipeline_mode<synchronous>, transform_indices = @transform_1, window_bounds = array<i64: 2, 64, 128>}, {pipeline_mode = #tpu.pipeline_mode<synchronous>, transform_indices = @transform_2, window_bounds = array<i64: 1, 256>}, {transform_indices = @transform_3, window_bounds = array<i64: 8, 256>}]} {
    %c0 = arith.constant 0 : index
    %c0_0 = arith.constant 0 : index
    %0 = vector.load %arg1[%c0, %c0_0] : memref<8x128xbf16, #tpu.memory_space<vmem>>, vector<8x64xbf16>
    %c0_1 = arith.constant 0 : index
    %c0_2 = arith.constant 0 : index
    %c0_3 = arith.constant 0 : index
    %1 = vector.load %arg2[%c0_1, %c0_2, %c0_3] : memref<2x64x128xbf16, #tpu.memory_space<vmem>>, vector<1x64x128xbf16>
    %2 = vector.shape_cast %1 : vector<1x64x128xbf16> to vector<64x128xbf16>
    %cst = arith.constant dense<0.000000e+00> : vector<8x128xf32>
    %3 = tpu.matmul %0, %2, %cst {dimension_numbers = #tpu.dot_dimension_numbers<[1], [0], [0], [1], [0, 0, 1, 1], [], []>} : vector<8x64xbf16>, vector<64x128xbf16>, vector<8x128xf32> -> vector<8x128xf32>
    %c0_4 = arith.constant 0 : index
    %c64 = arith.constant 64 : index
    %4 = vector.load %arg1[%c0_4, %c64] : memref<8x128xbf16, #tpu.memory_space<vmem>>, vector<8x64xbf16>
    %c1 = arith.constant 1 : index
    %c0_5 = arith.constant 0 : index
    %c0_6 = arith.constant 0 : index
    %5 = vector.load %arg2[%c1, %c0_5, %c0_6] : memref<2x64x128xbf16, #tpu.memory_space<vmem>>, vector<1x64x128xbf16>
    %6 = vector.shape_cast %5 : vector<1x64x128xbf16> to vector<64x128xbf16>
    %cst_7 = arith.constant dense<0.000000e+00> : vector<8x128xf32>
    %7 = tpu.matmul %4, %6, %cst_7 {dimension_numbers = #tpu.dot_dimension_numbers<[1], [0], [0], [1], [0, 0, 1, 1], [], []>} : vector<8x64xbf16>, vector<64x128xbf16>, vector<8x128xf32> -> vector<8x128xf32>
    %8 = tpu.concatenate %3, %7 in 1 : vector<8x128xf32>, vector<8x128xf32> -> vector<8x256xf32>
    %c0_8 = arith.constant 0 : index
    %c0_9 = arith.constant 0 : index
    %9 = vector.load %arg3[%c0_8, %c0_9] : memref<1x256xf32, #tpu.memory_space<vmem>>, vector<1x256xf32>
    %10 = vector.broadcast %9 : vector<1x256xf32> to vector<8x256xf32>
    %11 = arith.addf %8, %10 : vector<8x256xf32>
    %12 = arith.truncf %11 : vector<8x256xf32> to vector<8x256xbf16>
    %c0_10 = arith.constant 0 : index
    %c0_11 = arith.constant 0 : index
    %13 = vector.load %arg4[%c0_10, %c0_11] : memref<8x256xbf16, #tpu.memory_space<vmem>>, vector<8x256xbf16>
    tpu.vector_store %arg4[%c0_10, %c0_11], %12 {strides = array<i32>} : memref<8x256xbf16, #tpu.memory_space<vmem>>, vector<8x256xbf16>,
    return
  }
  func.func @transform_0(%arg0: i32) -> (i32, i32) {
    %c0_i32 = arith.constant 0 : i32
    %c0_i32_0 = arith.constant 0 : i32
    return %arg0, %c0_i32 : i32, i32
  }
  func.func @transform_1(%arg0: i32) -> (i32, i32, i32) {
    %c0_i32 = arith.constant 0 : i32
    %c0_i32_0 = arith.constant 0 : i32
    %c0_i32_1 = arith.constant 0 : i32
    %c0_i32_2 = arith.constant 0 : i32
    return %c0_i32, %c0_i32_0, %c0_i32_1 : i32, i32, i32
  }
  func.func @transform_2(%arg0: i32) -> (i32, i32) {
    %c0_i32 = arith.constant 0 : i32
    %c0_i32_0 = arith.constant 0 : i32
    %c0_i32_1 = arith.constant 0 : i32
    return %c0_i32, %c0_i32_0 : i32, i32
  }
  func.func @transform_3(%arg0: i32) -> (i32, i32) {
    %c0_i32 = arith.constant 0 : i32
    %c0_i32_0 = arith.constant 0 : i32
    return %arg0, %c0_i32 : i32, i32
  }
}

module attributes {stable_mosaic.version = 11 : i64} {
  func.func @kernel(%arg0: i32, %arg1: memref<8x2304xbf16, #tpu.memory_space<vmem>>, %arg2: memref<2x1152x128xbf16, #tpu.memory_space<vmem>>, %arg3: memref<1x256xf32, #tpu.memory_space<vmem>>, %arg4: memref<8x256xbf16, #tpu.memory_space<vmem>>, %arg5: memref<8x256xbf16, #tpu.memory_space<vmem>>) attributes {dimension_semantics = [#tpu.dimension_semantics<parallel>], iteration_bounds = array<i64: 1>, scalar_prefetch = 0 : i64, scratch_operands = 0 : i64, tpu.core_type = #tpu.core_type<tc>, window_params = [{transform_indices = @transform_0, window_bounds = array<i64: 8, 2304>}, {pipeline_mode = #tpu.pipeline_mode<synchronous>, transform_indices = @transform_1, window_bounds = array<i64: 2, 1152, 128>}, {pipeline_mode = #tpu.pipeline_mode<synchronous>, transform_indices = @transform_2, window_bounds = array<i64: 1, 256>}, {transform_indices = @transform_3, window_bounds = array<i64: 8, 256>}, {transform_indices = @transform_4, window_bounds = array<i64: 8, 256>}]} {
    %c0 = arith.constant 0 : index
    %c0_0 = arith.constant 0 : index
    %0 = vector.load %arg1[%c0, %c0_0] : memref<8x2304xbf16, #tpu.memory_space<vmem>>, vector<8x1152xbf16>
    %c0_1 = arith.constant 0 : index
    %c0_2 = arith.constant 0 : index
    %c0_3 = arith.constant 0 : index
    %1 = vector.load %arg2[%c0_1, %c0_2, %c0_3] : memref<2x1152x128xbf16, #tpu.memory_space<vmem>>, vector<1x1152x128xbf16>
    %2 = vector.shape_cast %1 : vector<1x1152x128xbf16> to vector<1152x128xbf16>
    %cst = arith.constant dense<0.000000e+00> : vector<8x128xf32>
    %3 = tpu.matmul %0, %2, %cst {dimension_numbers = #tpu.dot_dimension_numbers<[1], [0], [0], [1], [0, 0, 1, 1], [], []>} : vector<8x1152xbf16>, vector<1152x128xbf16>, vector<8x128xf32> -> vector<8x128xf32>
    %c0_4 = arith.constant 0 : index
    %c1152 = arith.constant 1152 : index
    %4 = vector.load %arg1[%c0_4, %c1152] : memref<8x2304xbf16, #tpu.memory_space<vmem>>, vector<8x1152xbf16>
    %c1 = arith.constant 1 : index
    %c0_5 = arith.constant 0 : index
    %c0_6 = arith.constant 0 : index
    %5 = vector.load %arg2[%c1, %c0_5, %c0_6] : memref<2x1152x128xbf16, #tpu.memory_space<vmem>>, vector<1x1152x128xbf16>
    %6 = vector.shape_cast %5 : vector<1x1152x128xbf16> to vector<1152x128xbf16>
    %cst_7 = arith.constant dense<0.000000e+00> : vector<8x128xf32>
    %7 = tpu.matmul %4, %6, %cst_7 {dimension_numbers = #tpu.dot_dimension_numbers<[1], [0], [0], [1], [0, 0, 1, 1], [], []>} : vector<8x1152xbf16>, vector<1152x128xbf16>, vector<8x128xf32> -> vector<8x128xf32>
    %8 = tpu.concatenate %3, %7 in 1 : vector<8x128xf32>, vector<8x128xf32> -> vector<8x256xf32>
    %c0_8 = arith.constant 0 : index
    %c0_9 = arith.constant 0 : index
    %9 = vector.load %arg3[%c0_8, %c0_9] : memref<1x256xf32, #tpu.memory_space<vmem>>, vector<1x256xf32>
    %10 = vector.broadcast %9 : vector<1x256xf32> to vector<8x256xf32>
    %11 = arith.addf %8, %10 : vector<8x256xf32>
    %c0_10 = arith.constant 0 : index
    %c0_11 = arith.constant 0 : index
    %12 = vector.load %arg4[%c0_10, %c0_11] : memref<8x256xbf16, #tpu.memory_space<vmem>>, vector<8x256xbf16>
    %13 = arith.extf %12 : vector<8x256xbf16> to vector<8x256xf32>
    %14 = arith.addf %11, %13 : vector<8x256xf32>
    %cst_12 = arith.constant 0.000000e+00 : f32
    %15 = vector.broadcast %cst_12 : f32 to vector<8x256xf32>
    %16 = arith.maximumf %14, %15 : vector<8x256xf32>
    %17 = arith.truncf %16 : vector<8x256xf32> to vector<8x256xbf16>
    %c0_13 = arith.constant 0 : index
    %c0_14 = arith.constant 0 : index
    %18 = vector.load %arg5[%c0_13, %c0_14] : memref<8x256xbf16, #tpu.memory_space<vmem>>, vector<8x256xbf16>
    tpu.vector_store %arg5[%c0_13, %c0_14], %17 {strides = array<i32>} : memref<8x256xbf16, #tpu.memory_space<vmem>>, vector<8x256xbf16>,
    return
  }
  func.func @transform_0(%arg0: i32) -> (i32, i32) {
    %c0_i32 = arith.constant 0 : i32
    %c0_i32_0 = arith.constant 0 : i32
    return %arg0, %c0_i32 : i32, i32
  }
  func.func @transform_1(%arg0: i32) -> (i32, i32, i32) {
    %c0_i32 = arith.constant 0 : i32
    %c0_i32_0 = arith.constant 0 : i32
    %c0_i32_1 = arith.constant 0 : i32
    %c0_i32_2 = arith.constant 0 : i32
    return %c0_i32, %c0_i32_0, %c0_i32_1 : i32, i32, i32
  }
  func.func @transform_2(%arg0: i32) -> (i32, i32) {
    %c0_i32 = arith.constant 0 : i32
    %c0_i32_0 = arith.constant 0 : i32
    %c0_i32_1 = arith.constant 0 : i32
    return %c0_i32, %c0_i32_0 : i32, i32
  }
  func.func @transform_3(%arg0: i32) -> (i32, i32) {
    %c0_i32 = arith.constant 0 : i32
    %c0_i32_0 = arith.constant 0 : i32
    return %arg0, %c0_i32 : i32, i32
  }
  func.func @transform_4(%arg0: i32) -> (i32, i32) {
    %c0_i32 = arith.constant 0 : i32
    %c0_i32_0 = arith.constant 0 : i32
    return %arg0, %c0_i32 : i32, i32
  }
}

module attributes {stable_mosaic.version = 11 : i64} {
  func.func @kernel(%arg0: i32, %arg1: memref<2x4x256xbf16, #tpu.memory_space<vmem>>, %arg2: memref<2x128x10xbf16, #tpu.memory_space<vmem>>, %arg3: memref<1x20xf32, #tpu.memory_space<vmem>>, %arg4: memref<2x20xf32, #tpu.memory_space<vmem>>) attributes {dimension_semantics = [#tpu.dimension_semantics<arbitrary>], iteration_bounds = array<i64: 1>, scalar_prefetch = 0 : i64, scratch_operands = 0 : i64, tpu.core_type = #tpu.core_type<tc>, window_params = [{pipeline_mode = #tpu.pipeline_mode<synchronous>, transform_indices = @transform_0, window_bounds = array<i64: 2, 4, 256>}, {pipeline_mode = #tpu.pipeline_mode<synchronous>, transform_indices = @transform_1, window_bounds = array<i64: 2, 128, 10>}, {pipeline_mode = #tpu.pipeline_mode<synchronous>, transform_indices = @transform_2, window_bounds = array<i64: 1, 20>}, {pipeline_mode = #tpu.pipeline_mode<synchronous>, transform_indices = @transform_3, window_bounds = array<i64: 2, 20>}]} {
    %c0 = arith.constant 0 : index
    %c0_0 = arith.constant 0 : index
    %c0_1 = arith.constant 0 : index
    %0 = vector.load %arg1[%c0, %c0_0, %c0_1] : memref<2x4x256xbf16, #tpu.memory_space<vmem>>, vector<2x4x256xbf16>
    %1 = arith.extf %0 : vector<2x4x256xbf16> to vector<2x4x256xf32>
    %cst = arith.constant dense<0.000000e+00> : vector<2x256xf32>
    %2 = vector.multi_reduction <add>, %1, %cst [1] : vector<2x4x256xf32> to vector<2x256xf32>
    %cst_2 = arith.constant 4.000000e+00 : f32
    %3 = vector.broadcast %cst_2 : f32 to vector<2x256xf32>
    %4 = arith.divf %2, %3 : vector<2x256xf32>
    %5 = arith.truncf %4 : vector<2x256xf32> to vector<2x256xbf16>
    %6 = vector.extract_strided_slice %5 {offsets = [0, 0], sizes = [2, 128], strides = [1, 1]} : vector<2x256xbf16> to vector<2x128xbf16>
    %c0_3 = arith.constant 0 : index
    %c0_4 = arith.constant 0 : index
    %c0_5 = arith.constant 0 : index
    %7 = vector.load %arg2[%c0_3, %c0_4, %c0_5] : memref<2x128x10xbf16, #tpu.memory_space<vmem>>, vector<1x128x10xbf16>
    %8 = vector.shape_cast %7 : vector<1x128x10xbf16> to vector<128x10xbf16>
    %cst_6 = arith.constant dense<0.000000e+00> : vector<2x10xf32>
    %9 = tpu.matmul %6, %8, %cst_6 {dimension_numbers = #tpu.dot_dimension_numbers<[1], [0], [0], [1], [0, 0, 1, 1], [], []>} : vector<2x128xbf16>, vector<128x10xbf16>, vector<2x10xf32> -> vector<2x10xf32>
    %10 = vector.extract_strided_slice %5 {offsets = [0, 128], sizes = [2, 128], strides = [1, 1]} : vector<2x256xbf16> to vector<2x128xbf16>
    %c1 = arith.constant 1 : index
    %c0_7 = arith.constant 0 : index
    %c0_8 = arith.constant 0 : index
    %11 = vector.load %arg2[%c1, %c0_7, %c0_8] : memref<2x128x10xbf16, #tpu.memory_space<vmem>>, vector<1x128x10xbf16>
    %12 = vector.shape_cast %11 : vector<1x128x10xbf16> to vector<128x10xbf16>
    %cst_9 = arith.constant dense<0.000000e+00> : vector<2x10xf32>
    %13 = tpu.matmul %10, %12, %cst_9 {dimension_numbers = #tpu.dot_dimension_numbers<[1], [0], [0], [1], [0, 0, 1, 1], [], []>} : vector<2x128xbf16>, vector<128x10xbf16>, vector<2x10xf32> -> vector<2x10xf32>
    %14 = tpu.concatenate %9, %13 in 1 : vector<2x10xf32>, vector<2x10xf32> -> vector<2x20xf32>
    %c0_10 = arith.constant 0 : index
    %c0_11 = arith.constant 0 : index
    %15 = vector.load %arg3[%c0_10, %c0_11] : memref<1x20xf32, #tpu.memory_space<vmem>>, vector<1x20xf32>
    %16 = vector.broadcast %15 : vector<1x20xf32> to vector<2x20xf32>
    %17 = arith.addf %14, %16 : vector<2x20xf32>
    %c0_12 = arith.constant 0 : index
    %c0_13 = arith.constant 0 : index
    %18 = vector.load %arg4[%c0_12, %c0_13] : memref<2x20xf32, #tpu.memory_space<vmem>>, vector<2x20xf32>
    tpu.vector_store %arg4[%c0_12, %c0_13], %17 {strides = array<i32>} : memref<2x20xf32, #tpu.memory_space<vmem>>, vector<2x20xf32>,
    return
  }
  func.func @transform_0(%arg0: i32) -> (i32, i32, i32) {
    %c0_i32 = arith.constant 0 : i32
    %c0_i32_0 = arith.constant 0 : i32
    %c0_i32_1 = arith.constant 0 : i32
    %c0_i32_2 = arith.constant 0 : i32
    return %c0_i32, %c0_i32_0, %c0_i32_1 : i32, i32, i32
  }
  func.func @transform_1(%arg0: i32) -> (i32, i32, i32) {
    %c0_i32 = arith.constant 0 : i32
    %c0_i32_0 = arith.constant 0 : i32
    %c0_i32_1 = arith.constant 0 : i32
    %c0_i32_2 = arith.constant 0 : i32
    return %c0_i32, %c0_i32_0, %c0_i32_1 : i32, i32, i32
  }
  func.func @transform_2(%arg0: i32) -> (i32, i32) {
    %c0_i32 = arith.constant 0 : i32
    %c0_i32_0 = arith.constant 0 : i32
    %c0_i32_1 = arith.constant 0 : i32
    return %c0_i32, %c0_i32_0 : i32, i32
  }
  func.func @transform_3(%arg0: i32) -> (i32, i32) {
    %c0_i32 = arith.constant 0 : i32
    %c0_i32_0 = arith.constant 0 : i32
    %c0_i32_1 = arith.constant 0 : i32
    return %c0_i32, %c0_i32_0 : i32, i32
  }
}

</mosaic_0001>

<bundles_post_ra>
// kernel: _lambda_.13
= control target key start
LH: loop header
LB: loop body
LE: loop exit
PB: predicated region body
PF: predicated region fallthrough
CT: control target
= control target key end

     0   :  { %8 = vsyncpa [#allocation3], 0  ;;  %s1507_s0 = inlined_call_operand.vmem [shape: bf16[512,27], index: 0, kind: input, shape index: {}]   ;;  %s1508_s1 = inlined_call_operand.hbm [shape: bf16[1,27,32], index: 1, kind: input, shape index: {}]   ;;  %s1509_s2 = inlined_call_operand.hbm [shape: f32[1,32], index: 2, kind: input, shape index: {}]   ;;  %s1510_s3 = inlined_call_operand.vmem [shape: bf16[512,32], index: 3, kind: output, shape index: {}]  }
   0x1   :  { %s16_s14 = sshll.u32 %s1508_s1, 4  ;;  %s17_s14 = int_to_ptr.hbm [resolvable:$true] %s16_s14 }
   0x2   :  { %9 = vsyncpa [#allocation5], 0  ;;  %s1026_s15 = smov [#allocation2]   ;;  %s30_s19 = sshll.u32 %s1509_s2, 4  ;;  %s31_s19 = int_to_ptr.hbm [resolvable:$true] %s30_s19 }
   0x3   :  { %s18_s16 = sshll.u32 %s1026_s15, 4  ;;  %s1027_s20 = smov 64   ;;  %s19_s16 = int_to_ptr.vmem [resolvable:$true] %s18_s16 }
   0x4   :  { %s1028_s21 = smov 4   ;;  %s1029_s22 = smov [#allocation4]  }
   0x5   :  { %24 = dma.hbm_to_vmem [thread:$0]  %s17_s14, 256, %s19_s16, [#allocation3], %s1027_s20, %s1027_s20, %s1028_s21  }
   0x6   :  { %s32_s23 = sshll.u32 %s1029_s22, 4  ;;  %s33_s23 = int_to_ptr.vmem [resolvable:$true] %s32_s23 }
   0x7   :  { %35 = dma.hbm_to_vmem [thread:$0]  %s31_s19, 16, %s33_s23, [#allocation5]  }
   0x8   :  { %1022 = dma.done.wait [#allocation3], 256  }
   0x9   :  { %1023 = vsyncadd [#allocation3], 4294967040 }
   0xa   :  { %1024 = dma.done.wait [#allocation5], 16  }
   0xb   :  { %1025 = vsyncadd [#allocation5], 4294967280  ;;  %vm385_vm0 = vcmask 1044480   ;;  %vm386_vm1 = vcmask 1045504   ;;  %v1030_v0 = vmov 65535   ;;  %v960_v7 = vld [vmem:[#allocation2] sm:$0xff] }
   0xc   :  { %v387_v1 = vsel %vm385_vm0, 4294967295, %v1030_v0  ;;  %v894_v2 = vld [vmem:[#allocation2 + $0x8] sm:$0xf]  ;;  %v961_v3 = vld [vmem:[#allocation2 + $0x8] sm:$0x30]  ;;  %v928_v8 = vld [vmem:[%s1507_s0] sm:$0xff] }
   0xd   :  { %v388_v4 = vsel %vm386_vm1, %v387_v1, 0  ;;  %v895_v5 = vor.u32 %v961_v3, %v894_v2  ;;  %v936_v9 = vld [vmem:[%s1507_s0 + $0x40] sm:$0xff]  ;;  %vm288_vm2 = vcmask 220160   ;;  %v929_v12 = vld [vmem:[%s1507_s0 + $0x8] sm:$0xff]  ;;  %v930_v16 = vld [vmem:[%s1507_s0 + $0x10] sm:$0xff]  ;;  %vm689_vm3 = vcmask 257024  }
   0xe   :  { %v944_v10 = vld [vmem:[%s1507_s0 + $0x80] sm:$0xff]  ;;  %v937_v13 = vld [vmem:[%s1507_s0 + $0x48] sm:$0xff]  ;;  %v938_v17 = vld [vmem:[%s1507_s0 + $0x50] sm:$0xff] }
   0xf   :  { %v390_v6 = vand.u32 %v895_v5, %v388_v4  ;;  %v952_v11 = vld [vmem:[%s1507_s0 + $0xc0] sm:$0xff]  ;;  %v945_v14 = vld [vmem:[%s1507_s0 + $0x88] sm:$0xff]  ;;  %v946_v18 = vld [vmem:[%s1507_s0 + $0x90] sm:$0xff] }
  0x10   :  { %v953_v15 = vld [vmem:[%s1507_s0 + $0xc8] sm:$0xff]  ;;  %v954_v19 = vld [vmem:[%s1507_s0 + $0xd0] sm:$0xff]  ;;  %v931_v20 = vld [vmem:[%s1507_s0 + $0x18] sm:$0xff] }
  0x11   :  { %398 = vmatpush.bf16.msra.mxu0 %v390_v6  ;;  %962 = vmatpush.bf16.msra.mxu1 %v390_v6  ;;  %v939_v21 = vld [vmem:[%s1507_s0 + $0x58] sm:$0xff]  ;;  %v932_v24 = vld [vmem:[%s1507_s0 + $0x20] sm:$0xff]  ;;  %v933_v28 = vld [vmem:[%s1507_s0 + $0x28] sm:$0xff] }
  0x12   :  { %963 = vmatpush.bf16.msra.mxu2 %v390_v6  ;;  %964 = vmatpush.bf16.msra.mxu3 %v390_v6  ;;  %v947_v22 = vld [vmem:[%s1507_s0 + $0x98] sm:$0xff]  ;;  %v940_v25 = vld [vmem:[%s1507_s0 + $0x60] sm:$0xff]  ;;  %v941_v29 = vld [vmem:[%s1507_s0 + $0x68] sm:$0xff] }
  0x13   :  { %v955_v23 = vld [vmem:[%s1507_s0 + $0xd8] sm:$0xff]  ;;  %v948_v26 = vld [vmem:[%s1507_s0 + $0xa0] sm:$0xff]  ;;  %v949_v30 = vld [vmem:[%s1507_s0 + $0xa8] sm:$0xff] }
  0x14   :  { %v956_v27 = vld [vmem:[%s1507_s0 + $0xe0] sm:$0xff]  ;;  %v957_v31 = vld [vmem:[%s1507_s0 + $0xe8] sm:$0xff]  ;;  %v934_v32 = vld [vmem:[%s1507_s0 + $0x30] sm:$0xff] }
  0x15   :  { %399 = vmatpush.bf16.msra.mxu0 %v960_v7  ;;  %965 = vmatpush.bf16.msra.mxu1 %v960_v7  ;;  %v942_v33 = vld [vmem:[%s1507_s0 + $0x70] sm:$0xff]  ;;  %v935_v36 = vld [vmem:[%s1507_s0 + $0x38] sm:$0xff] }
  0x16   :  { %966 = vmatpush.bf16.msra.mxu2 %v960_v7  ;;  %967 = vmatpush.bf16.msra.mxu3 %v960_v7  ;;  %v950_v34 = vld [vmem:[%s1507_s0 + $0xb0] sm:$0xff]  ;;  %v943_v37 = vld [vmem:[%s1507_s0 + $0x78] sm:$0xff] }
  0x17   :  { %v958_v35 = vld [vmem:[%s1507_s0 + $0xf0] sm:$0xff]  ;;  %v951_v38 = vld [vmem:[%s1507_s0 + $0xb8] sm:$0xff] }
  0x18   :  { %896 = vmatmul.msk.bf16.vlgmr.msra.gmra.mxu0 %vm288_vm2, %v928_v8  ;;  %904 = vmatmul.msk.bf16.vlgmr.msra.gmra.mxu1 %vm288_vm2, %v936_v9  ;;  %v959_v39 = vld [vmem:[%s1507_s0 + $0xf8] sm:$0xff]  ;;  %v1185_v40 = vld [vmem:[#allocation4] ss:$0 sm:$0xff] }
  0x19   :  { %912 = vmatmul.msk.bf16.vlgmr.msra.gmra.mxu2 %vm288_vm2, %v944_v10  ;;  %920 = vmatmul.msk.bf16.vlgmr.msra.gmra.mxu3 %vm288_vm2, %v952_v11 }
  0x28   :  { %897 = vmatmul.msk.bf16.gmra.mxu0 %vm288_vm2, %v929_v12  ;;  %905 = vmatmul.msk.bf16.gmra.mxu1 %vm288_vm2, %v937_v13 }
  0x29   :  { %913 = vmatmul.msk.bf16.gmra.mxu2 %vm288_vm2, %v945_v14  ;;  %921 = vmatmul.msk.bf16.gmra.mxu3 %vm288_vm2, %v953_v15 }
  0x38   :  { %898 = vmatmul.msk.bf16.gmra.mxu0 %vm288_vm2, %v930_v16  ;;  %906 = vmatmul.msk.bf16.gmra.mxu1 %vm288_vm2, %v938_v17 }
  0x39   :  { %914 = vmatmul.msk.bf16.gmra.mxu2 %vm288_vm2, %v946_v18  ;;  %922 = vmatmul.msk.bf16.gmra.mxu3 %vm288_vm2, %v954_v19 }
  0x48   :  { %899 = vmatmul.msk.bf16.gmra.mxu0 %vm288_vm2, %v931_v20  ;;  %907 = vmatmul.msk.bf16.gmra.mxu1 %vm288_vm2, %v939_v21 }
  0x49   :  { %915 = vmatmul.msk.bf16.gmra.mxu2 %vm288_vm2, %v947_v22  ;;  %923 = vmatmul.msk.bf16.gmra.mxu3 %vm288_vm2, %v955_v23 }
  0x58   :  { %900 = vmatmul.msk.bf16.gmra.mxu0 %vm288_vm2, %v932_v24  ;;  %908 = vmatmul.msk.bf16.gmra.mxu1 %vm288_vm2, %v940_v25 }
  0x59   :  { %916 = vmatmul.msk.bf16.gmra.mxu2 %vm288_vm2, %v948_v26  ;;  %924 = vmatmul.msk.bf16.gmra.mxu3 %vm288_vm2, %v956_v27 }
  0x68   :  { %901 = vmatmul.msk.bf16.gmra.mxu0 %vm288_vm2, %v933_v28  ;;  %909 = vmatmul.msk.bf16.gmra.mxu1 %vm288_vm2, %v941_v29 }
  0x69   :  { %917 = vmatmul.msk.bf16.gmra.mxu2 %vm288_vm2, %v949_v30  ;;  %925 = vmatmul.msk.bf16.gmra.mxu3 %vm288_vm2, %v957_v31 }
  0x78   :  { %902 = vmatmul.msk.bf16.gmra.mxu0 %vm288_vm2, %v934_v32  ;;  %910 = vmatmul.msk.bf16.gmra.mxu1 %vm288_vm2, %v942_v33 }
  0x79   :  { %918 = vmatmul.msk.bf16.gmra.mxu2 %vm288_vm2, %v950_v34  ;;  %926 = vmatmul.msk.bf16.gmra.mxu3 %vm288_vm2, %v958_v35 }
  0x88   :  { %903 = vmatmul.msk.bf16.gmra.mxu0 %vm288_vm2, %v935_v36  ;;  %911 = vmatmul.msk.bf16.gmra.mxu1 %vm288_vm2, %v943_v37 }
  0x89   :  { %919 = vmatmul.msk.bf16.gmra.mxu2 %vm288_vm2, %v951_v38  ;;  %927 = vmatmul.msk.bf16.gmra.mxu3 %vm288_vm2, %v959_v39 }
  0x95   :  { %v401_v41 = vpop.f32.mrf.mxu0  ;;  %v441_v42 = vpop.f32.mrf.mxu1 }
  0x96   :  { %v402_v43 = vadd.f32 %v1185_v40, %v401_v41  ;;  %v442_v44 = vadd.f32 %v1185_v40, %v441_v42 }
  0x98   :  { %v561_v45 = vmax.f32 %v402_v43, 0.0  ;;  %v577_v46 = vmax.f32 %v442_v44, 0.0 }
  0x9a   :  { %v625_v47 = vpack.c.bf16 %v561_v45, %v561_v45  ;;  %v641_v48 = vpack.c.bf16 %v577_v46, %v577_v46 }
  0x9c   :  { %690 = vst.msk [vmem:[%s1510_s3] sm:$0xf] %vm689_vm3, %v625_v47  ;;  %v481_v49 = vpop.f32.mrf.mxu2  ;;  %v521_v50 = vpop.f32.mrf.mxu3 }
  0x9d   :  { %706 = vst.msk [vmem:[%s1510_s3 + $0x40] sm:$0xf] %vm689_vm3, %v641_v48  ;;  %v482_v51 = vadd.f32 %v1185_v40, %v481_v49  ;;  %v522_v52 = vadd.f32 %v1185_v40, %v521_v50  ;;  %v403_v53 = vpop.f32.mrf.mxu0  ;;  %v443_v54 = vpop.f32.mrf.mxu1 }
  0x9e   :  { %v404_v55 = vadd.f32 %v1185_v40, %v403_v53  ;;  %v444_v56 = vadd.f32 %v1185_v40, %v443_v54 }
  0x9f   :  { %v593_v57 = vmax.f32 %v482_v51, 0.0  ;;  %v609_v58 = vmax.f32 %v522_v52, 0.0 }
  0xa0   :  { %v562_v59 = vmax.f32 %v404_v55, 0.0  ;;  %v578_v60 = vmax.f32 %v444_v56, 0.0 }
  0xa1   :  { %v657_v61 = vpack.c.bf16 %v593_v57, %v593_v57  ;;  %v673_v62 = vpack.c.bf16 %v609_v58, %v609_v58 }
  0xa2   :  { %v626_v63 = vpack.c.bf16 %v562_v59, %v562_v59  ;;  %v642_v0 = vpack.c.bf16 %v578_v60, %v578_v60 }
  0xa3   :  { %722 = vst.msk [vmem:[%s1510_s3 + $0x80] sm:$0xf] %vm689_vm3, %v657_v61 }
  0xa4   :  { %738 = vst.msk [vmem:[%s1510_s3 + $0xc0] sm:$0xf] %vm689_vm3, %v673_v62  ;;  %v483_v1 = vpop.f32.mrf.mxu2  ;;  %v523_v2 = vpop.f32.mrf.mxu3 }
  0xa5   :  { %691 = vst.msk [vmem:[%s1510_s3 + $0x4] sm:$0xf] %vm689_vm3, %v626_v63  ;;  %v484_v3 = vadd.f32 %v1185_v40, %v483_v1  ;;  %v524_v4 = vadd.f32 %v1185_v40, %v523_v2  ;;  %v406_v5 = vpop.f32.mrf.mxu0  ;;  %v446_v6 = vpop.f32.mrf.mxu1 }
  0xa6   :  { %707 = vst.msk [vmem:[%s1510_s3 + $0x44] sm:$0xf] %vm689_vm3, %v642_v0  ;;  %v407_v7 = vadd.f32 %v1185_v40, %v406_v5  ;;  %v447_v8 = vadd.f32 %v1185_v40, %v446_v6 }
  0xa7   :  { %v594_v9 = vmax.f32 %v484_v3, 0.0  ;;  %v610_v10 = vmax.f32 %v524_v4, 0.0 }
  0xa8   :  { %v563_v11 = vmax.f32 %v407_v7, 0.0  ;;  %v579_v12 = vmax.f32 %v447_v8, 0.0 }
  0xa9   :  { %v658_v13 = vpack.c.bf16 %v594_v9, %v594_v9  ;;  %v674_v14 = vpack.c.bf16 %v610_v10, %v610_v10 }
  0xaa   :  { %v627_v15 = vpack.c.bf16 %v563_v11, %v563_v11  ;;  %v643_v16 = vpack.c.bf16 %v579_v12, %v579_v12 }
  0xab   :  { %723 = vst.msk [vmem:[%s1510_s3 + $0x84] sm:$0xf] %vm689_vm3, %v658_v13 }
  0xac   :  { %739 = vst.msk [vmem:[%s1510_s3 + $0xc4] sm:$0xf] %vm689_vm3, %v674_v14  ;;  %v486_v17 = vpop.f32.mrf.mxu2  ;;  %v526_v18 = vpop.f32.mrf.mxu3 }
  0xad   :  { %692 = vst.msk [vmem:[%s1510_s3 + $0x8] sm:$0xf] %vm689_vm3, %v627_v15  ;;  %v487_v19 = vadd.f32 %v1185_v40, %v486_v17  ;;  %v527_v20 = vadd.f32 %v1185_v40, %v526_v18  ;;  %v408_v21 = vpop.f32.mrf.mxu0  ;;  %v448_v22 = vpop.f32.mrf.mxu1 }
  0xae   :  { %708 = vst.msk [vmem:[%s1510_s3 + $0x48] sm:$0xf] %vm689_vm3, %v643_v16  ;;  %v409_v23 = vadd.f32 %v1185_v40, %v408_v21  ;;  %v449_v24 = vadd.f32 %v1185_v40, %v448_v22 }
  0xaf   :  { %v595_v25 = vmax.f32 %v487_v19, 0.0  ;;  %v611_v26 = vmax.f32 %v527_v20, 0.0 }
  0xb0   :  { %v564_v27 = vmax.f32 %v409_v23, 0.0  ;;  %v580_v28 = vmax.f32 %v449_v24, 0.0 }
  0xb1   :  { %v659_v29 = vpack.c.bf16 %v595_v25, %v595_v25  ;;  %v675_v30 = vpack.c.bf16 %v611_v26, %v611_v26 }
  0xb2   :  { %v628_v31 = vpack.c.bf16 %v564_v27, %v564_v27  ;;  %v644_v32 = vpack.c.bf16 %v580_v28, %v580_v28 }
  0xb3   :  { %724 = vst.msk [vmem:[%s1510_s3 + $0x88] sm:$0xf] %vm689_vm3, %v659_v29 }
  0xb4   :  { %740 = vst.msk [vmem:[%s1510_s3 + $0xc8] sm:$0xf] %vm689_vm3, %v675_v30  ;;  %v488_v33 = vpop.f32.mrf.mxu2  ;;  %v528_v34 = vpop.f32.mrf.mxu3 }
  0xb5   :  { %693 = vst.msk [vmem:[%s1510_s3 + $0xc] sm:$0xf] %vm689_vm3, %v628_v31  ;;  %v489_v35 = vadd.f32 %v1185_v40, %v488_v33  ;;  %v529_v36 = vadd.f32 %v1185_v40, %v528_v34  ;;  %v411_v37 = vpop.f32.mrf.mxu0  ;;  %v451_v38 = vpop.f32.mrf.mxu1 }
  0xb6   :  { %709 = vst.msk [vmem:[%s1510_s3 + $0x4c] sm:$0xf] %vm689_vm3, %v644_v32  ;;  %v412_v39 = vadd.f32 %v1185_v40, %v411_v37  ;;  %v452_v41 = vadd.f32 %v1185_v40, %v451_v38 }
  0xb7   :  { %v596_v42 = vmax.f32 %v489_v35, 0.0  ;;  %v612_v43 = vmax.f32 %v529_v36, 0.0 }
  0xb8   :  { %v565_v44 = vmax.f32 %v412_v39, 0.0  ;;  %v581_v45 = vmax.f32 %v452_v41, 0.0 }
  0xb9   :  { %v660_v46 = vpack.c.bf16 %v596_v42, %v596_v42  ;;  %v676_v47 = vpack.c.bf16 %v612_v43, %v612_v43 }
  0xba   :  { %v629_v48 = vpack.c.bf16 %v565_v44, %v565_v44  ;;  %v645_v49 = vpack.c.bf16 %v581_v45, %v581_v45 }
  0xbb   :  { %725 = vst.msk [vmem:[%s1510_s3 + $0x8c] sm:$0xf] %vm689_vm3, %v660_v46 }
  0xbc   :  { %741 = vst.msk [vmem:[%s1510_s3 + $0xcc] sm:$0xf] %vm689_vm3, %v676_v47  ;;  %v491_v50 = vpop.f32.mrf.mxu2  ;;  %v531_v51 = vpop.f32.mrf.mxu3 }
  0xbd   :  { %694 = vst.msk [vmem:[%s1510_s3 + $0x10] sm:$0xf] %vm689_vm3, %v629_v48  ;;  %v492_v52 = vadd.f32 %v1185_v40, %v491_v50  ;;  %v532_v53 = vadd.f32 %v1185_v40, %v531_v51  ;;  %v413_v54 = vpop.f32.mrf.mxu0  ;;  %v453_v55 = vpop.f32.mrf.mxu1 }
  0xbe   :  { %710 = vst.msk [vmem:[%s1510_s3 + $0x50] sm:$0xf] %vm689_vm3, %v645_v49  ;;  %v414_v56 = vadd.f32 %v1185_v40, %v413_v54  ;;  %v454_v57 = vadd.f32 %v1185_v40, %v453_v55 }
  0xbf   :  { %v597_v58 = vmax.f32 %v492_v52, 0.0  ;;  %v613_v59 = vmax.f32 %v532_v53, 0.0 }
  0xc0   :  { %v566_v60 = vmax.f32 %v414_v56, 0.0  ;;  %v582_v61 = vmax.f32 %v454_v57, 0.0 }
  0xc1   :  { %v661_v62 = vpack.c.bf16 %v597_v58, %v597_v58  ;;  %v677_v63 = vpack.c.bf16 %v613_v59, %v613_v59 }
  0xc2   :  { %v630_v0 = vpack.c.bf16 %v566_v60, %v566_v60  ;;  %v646_v1 = vpack.c.bf16 %v582_v61, %v582_v61 }
  0xc3   :  { %726 = vst.msk [vmem:[%s1510_s3 + $0x90] sm:$0xf] %vm689_vm3, %v661_v62 }
  0xc4   :  { %742 = vst.msk [vmem:[%s1510_s3 + $0xd0] sm:$0xf] %vm689_vm3, %v677_v63  ;;  %v493_v2 = vpop.f32.mrf.mxu2  ;;  %v533_v3 = vpop.f32.mrf.mxu3 }
  0xc5   :  { %695 = vst.msk [vmem:[%s1510_s3 + $0x14] sm:$0xf] %vm689_vm3, %v630_v0  ;;  %v494_v4 = vadd.f32 %v1185_v40, %v493_v2  ;;  %v534_v5 = vadd.f32 %v1185_v40, %v533_v3  ;;  %v416_v6 = vpop.f32.mrf.mxu0  ;;  %v456_v7 = vpop.f32.mrf.mxu1 }
  0xc6   :  { %711 = vst.msk [vmem:[%s1510_s3 + $0x54] sm:$0xf] %vm689_vm3, %v646_v1  ;;  %v417_v8 = vadd.f32 %v1185_v40, %v416_v6  ;;  %v457_v9 = vadd.f32 %v1185_v40, %v456_v7 }
  0xc7   :  { %v598_v10 = vmax.f32 %v494_v4, 0.0  ;;  %v614_v11 = vmax.f32 %v534_v5, 0.0 }
  0xc8   :  { %v567_v12 = vmax.f32 %v417_v8, 0.0  ;;  %v583_v13 = vmax.f32 %v457_v9, 0.0 }
  0xc9   :  { %v662_v14 = vpack.c.bf16 %v598_v10, %v598_v10  ;;  %v678_v15 = vpack.c.bf16 %v614_v11, %v614_v11 }
  0xca   :  { %v631_v16 = vpack.c.bf16 %v567_v12, %v567_v12  ;;  %v647_v17 = vpack.c.bf16 %v583_v13, %v583_v13 }
  0xcb   :  { %727 = vst.msk [vmem:[%s1510_s3 + $0x94] sm:$0xf] %vm689_vm3, %v662_v14 }
  0xcc   :  { %743 = vst.msk [vmem:[%s1510_s3 + $0xd4] sm:$0xf] %vm689_vm3, %v678_v15  ;;  %v496_v18 = vpop.f32.mrf.mxu2  ;;  %v536_v19 = vpop.f32.mrf.mxu3 }
  0xcd   :  { %696 = vst.msk [vmem:[%s1510_s3 + $0x18] sm:$0xf] %vm689_vm3, %v631_v16  ;;  %v497_v20 = vadd.f32 %v1185_v40, %v496_v18  ;;  %v537_v21 = vadd.f32 %v1185_v40, %v536_v19  ;;  %v418_v22 = vpop.f32.mrf.mxu0  ;;  %v458_v23 = vpop.f32.mrf.mxu1 }
  0xce   :  { %712 = vst.msk [vmem:[%s1510_s3 + $0x58] sm:$0xf] %vm689_vm3, %v647_v17  ;;  %v419_v24 = vadd.f32 %v1185_v40, %v418_v22  ;;  %v459_v25 = vadd.f32 %v1185_v40, %v458_v23 }
  0xcf   :  { %v599_v26 = vmax.f32 %v497_v20, 0.0  ;;  %v615_v27 = vmax.f32 %v537_v21, 0.0 }
  0xd0   :  { %v568_v28 = vmax.f32 %v419_v24, 0.0  ;;  %v584_v29 = vmax.f32 %v459_v25, 0.0 }
  0xd1   :  { %v663_v30 = vpack.c.bf16 %v599_v26, %v599_v26  ;;  %v679_v31 = vpack.c.bf16 %v615_v27, %v615_v27 }
  0xd2   :  { %v632_v32 = vpack.c.bf16 %v568_v28, %v568_v28  ;;  %v648_v33 = vpack.c.bf16 %v584_v29, %v584_v29 }
  0xd3   :  { %728 = vst.msk [vmem:[%s1510_s3 + $0x98] sm:$0xf] %vm689_vm3, %v663_v30 }
  0xd4   :  { %744 = vst.msk [vmem:[%s1510_s3 + $0xd8] sm:$0xf] %vm689_vm3, %v679_v31  ;;  %v498_v34 = vpop.f32.mrf.mxu2  ;;  %v538_v35 = vpop.f32.mrf.mxu3 }
  0xd5   :  { %697 = vst.msk [vmem:[%s1510_s3 + $0x1c] sm:$0xf] %vm689_vm3, %v632_v32  ;;  %v499_v36 = vadd.f32 %v1185_v40, %v498_v34  ;;  %v539_v37 = vadd.f32 %v1185_v40, %v538_v35  ;;  %v421_v38 = vpop.f32.mrf.mxu0  ;;  %v461_v39 = vpop.f32.mrf.mxu1 }
  0xd6   :  { %713 = vst.msk [vmem:[%s1510_s3 + $0x5c] sm:$0xf] %vm689_vm3, %v648_v33  ;;  %v422_v41 = vadd.f32 %v1185_v40, %v421_v38  ;;  %v462_v42 = vadd.f32 %v1185_v40, %v461_v39 }
  0xd7   :  { %v600_v43 = vmax.f32 %v499_v36, 0.0  ;;  %v616_v44 = vmax.f32 %v539_v37, 0.0 }
  0xd8   :  { %v569_v45 = vmax.f32 %v422_v41, 0.0  ;;  %v585_v46 = vmax.f32 %v462_v42, 0.0 }
  0xd9   :  { %v664_v47 = vpack.c.bf16 %v600_v43, %v600_v43  ;;  %v680_v48 = vpack.c.bf16 %v616_v44, %v616_v44 }
  0xda   :  { %v633_v49 = vpack.c.bf16 %v569_v45, %v569_v45  ;;  %v649_v50 = vpack.c.bf16 %v585_v46, %v585_v46 }
  0xdb   :  { %729 = vst.msk [vmem:[%s1510_s3 + $0x9c] sm:$0xf] %vm689_vm3, %v664_v47 }
  0xdc   :  { %745 = vst.msk [vmem:[%s1510_s3 + $0xdc] sm:$0xf] %vm689_vm3, %v680_v48  ;;  %v501_v51 = vpop.f32.mrf.mxu2  ;;  %v541_v52 = vpop.f32.mrf.mxu3 }
  0xdd   :  { %698 = vst.msk [vmem:[%s1510_s3 + $0x20] sm:$0xf] %vm689_vm3, %v633_v49  ;;  %v502_v53 = vadd.f32 %v1185_v40, %v501_v51  ;;  %v542_v54 = vadd.f32 %v1185_v40, %v541_v52  ;;  %v423_v55 = vpop.f32.mrf.mxu0  ;;  %v463_v56 = vpop.f32.mrf.mxu1 }
  0xde   :  { %714 = vst.msk [vmem:[%s1510_s3 + $0x60] sm:$0xf] %vm689_vm3, %v649_v50  ;;  %v424_v57 = vadd.f32 %v1185_v40, %v423_v55  ;;  %v464_v58 = vadd.f32 %v1185_v40, %v463_v56 }
  0xdf   :  { %v601_v59 = vmax.f32 %v502_v53, 0.0  ;;  %v617_v60 = vmax.f32 %v542_v54, 0.0 }
  0xe0   :  { %v570_v61 = vmax.f32 %v424_v57, 0.0  ;;  %v586_v62 = vmax.f32 %v464_v58, 0.0 }
  0xe1   :  { %v665_v63 = vpack.c.bf16 %v601_v59, %v601_v59  ;;  %v681_v0 = vpack.c.bf16 %v617_v60, %v617_v60 }
  0xe2   :  { %v634_v1 = vpack.c.bf16 %v570_v61, %v570_v61  ;;  %v650_v2 = vpack.c.bf16 %v586_v62, %v586_v62 }
  0xe3   :  { %730 = vst.msk [vmem:[%s1510_s3 + $0xa0] sm:$0xf] %vm689_vm3, %v665_v63 }
  0xe4   :  { %746 = vst.msk [vmem:[%s1510_s3 + $0xe0] sm:$0xf] %vm689_vm3, %v681_v0  ;;  %v503_v3 = vpop.f32.mrf.mxu2  ;;  %v543_v4 = vpop.f32.mrf.mxu3 }
  0xe5   :  { %699 = vst.msk [vmem:[%s1510_s3 + $0x24] sm:$0xf] %vm689_vm3, %v634_v1  ;;  %v504_v5 = vadd.f32 %v1185_v40, %v503_v3  ;;  %v544_v6 = vadd.f32 %v1185_v40, %v543_v4  ;;  %v426_v7 = vpop.f32.mrf.mxu0  ;;  %v466_v8 = vpop.f32.mrf.mxu1 }
  0xe6   :  { %715 = vst.msk [vmem:[%s1510_s3 + $0x64] sm:$0xf] %vm689_vm3, %v650_v2  ;;  %v427_v9 = vadd.f32 %v1185_v40, %v426_v7  ;;  %v467_v10 = vadd.f32 %v1185_v40, %v466_v8 }
  0xe7   :  { %v602_v11 = vmax.f32 %v504_v5, 0.0  ;;  %v618_v12 = vmax.f32 %v544_v6, 0.0 }
  0xe8   :  { %v571_v13 = vmax.f32 %v427_v9, 0.0  ;;  %v587_v14 = vmax.f32 %v467_v10, 0.0 }
  0xe9   :  { %v666_v15 = vpack.c.bf16 %v602_v11, %v602_v11  ;;  %v682_v16 = vpack.c.bf16 %v618_v12, %v618_v12 }
  0xea   :  { %v635_v17 = vpack.c.bf16 %v571_v13, %v571_v13  ;;  %v651_v18 = vpack.c.bf16 %v587_v14, %v587_v14 }
  0xeb   :  { %731 = vst.msk [vmem:[%s1510_s3 + $0xa4] sm:$0xf] %vm689_vm3, %v666_v15 }
  0xec   :  { %747 = vst.msk [vmem:[%s1510_s3 + $0xe4] sm:$0xf] %vm689_vm3, %v682_v16  ;;  %v506_v19 = vpop.f32.mrf.mxu2  ;;  %v546_v20 = vpop.f32.mrf.mxu3 }
  0xed   :  { %700 = vst.msk [vmem:[%s1510_s3 + $0x28] sm:$0xf] %vm689_vm3, %v635_v17  ;;  %v507_v21 = vadd.f32 %v1185_v40, %v506_v19  ;;  %v547_v22 = vadd.f32 %v1185_v40, %v546_v20  ;;  %v428_v23 = vpop.f32.mrf.mxu0  ;;  %v468_v24 = vpop.f32.mrf.mxu1 }
  0xee   :  { %716 = vst.msk [vmem:[%s1510_s3 + $0x68] sm:$0xf] %vm689_vm3, %v651_v18  ;;  %v429_v25 = vadd.f32 %v1185_v40, %v428_v23  ;;  %v469_v26 = vadd.f32 %v1185_v40, %v468_v24 }
  0xef   :  { %v603_v27 = vmax.f32 %v507_v21, 0.0  ;;  %v619_v28 = vmax.f32 %v547_v22, 0.0 }
  0xf0   :  { %v572_v29 = vmax.f32 %v429_v25, 0.0  ;;  %v588_v30 = vmax.f32 %v469_v26, 0.0 }
  0xf1   :  { %v667_v31 = vpack.c.bf16 %v603_v27, %v603_v27  ;;  %v683_v32 = vpack.c.bf16 %v619_v28, %v619_v28 }
  0xf2   :  { %v636_v33 = vpack.c.bf16 %v572_v29, %v572_v29  ;;  %v652_v34 = vpack.c.bf16 %v588_v30, %v588_v30 }
  0xf3   :  { %732 = vst.msk [vmem:[%s1510_s3 + $0xa8] sm:$0xf] %vm689_vm3, %v667_v31 }
  0xf4   :  { %748 = vst.msk [vmem:[%s1510_s3 + $0xe8] sm:$0xf] %vm689_vm3, %v683_v32  ;;  %v508_v35 = vpop.f32.mrf.mxu2  ;;  %v548_v36 = vpop.f32.mrf.mxu3 }
  0xf5   :  { %701 = vst.msk [vmem:[%s1510_s3 + $0x2c] sm:$0xf] %vm689_vm3, %v636_v33  ;;  %v509_v37 = vadd.f32 %v1185_v40, %v508_v35  ;;  %v549_v38 = vadd.f32 %v1185_v40, %v548_v36  ;;  %v431_v39 = vpop.f32.mrf.mxu0  ;;  %v471_v41 = vpop.f32.mrf.mxu1 }
  0xf6   :  { %717 = vst.msk [vmem:[%s1510_s3 + $0x6c] sm:$0xf] %vm689_vm3, %v652_v34  ;;  %v432_v42 = vadd.f32 %v1185_v40, %v431_v39  ;;  %v472_v43 = vadd.f32 %v1185_v40, %v471_v41 }
  0xf7   :  { %v604_v44 = vmax.f32 %v509_v37, 0.0  ;;  %v620_v45 = vmax.f32 %v549_v38, 0.0 }
  0xf8   :  { %v573_v46 = vmax.f32 %v432_v42, 0.0  ;;  %v589_v47 = vmax.f32 %v472_v43, 0.0 }
  0xf9   :  { %v668_v48 = vpack.c.bf16 %v604_v44, %v604_v44  ;;  %v684_v49 = vpack.c.bf16 %v620_v45, %v620_v45 }
  0xfa   :  { %v637_v50 = vpack.c.bf16 %v573_v46, %v573_v46  ;;  %v653_v51 = vpack.c.bf16 %v589_v47, %v589_v47 }
  0xfb   :  { %733 = vst.msk [vmem:[%s1510_s3 + $0xac] sm:$0xf] %vm689_vm3, %v668_v48 }
  0xfc   :  { %749 = vst.msk [vmem:[%s1510_s3 + $0xec] sm:$0xf] %vm689_vm3, %v684_v49  ;;  %v511_v52 = vpop.f32.mrf.mxu2  ;;  %v551_v53 = vpop.f32.mrf.mxu3 }
  0xfd   :  { %702 = vst.msk [vmem:[%s1510_s3 + $0x30] sm:$0xf] %vm689_vm3, %v637_v50  ;;  %v512_v54 = vadd.f32 %v1185_v40, %v511_v52  ;;  %v552_v55 = vadd.f32 %v1185_v40, %v551_v53  ;;  %v433_v56 = vpop.f32.mrf.mxu0  ;;  %v473_v57 = vpop.f32.mrf.mxu1 }
  0xfe   :  { %718 = vst.msk [vmem:[%s1510_s3 + $0x70] sm:$0xf] %vm689_vm3, %v653_v51  ;;  %v434_v58 = vadd.f32 %v1185_v40, %v433_v56  ;;  %v474_v59 = vadd.f32 %v1185_v40, %v473_v57 }
  0xff   :  { %v605_v60 = vmax.f32 %v512_v54, 0.0  ;;  %v621_v61 = vmax.f32 %v552_v55, 0.0 }
 0x100   :  { %v574_v62 = vmax.f32 %v434_v58, 0.0  ;;  %v590_v63 = vmax.f32 %v474_v59, 0.0 }
 0x101   :  { %v669_v0 = vpack.c.bf16 %v605_v60, %v605_v60  ;;  %v685_v1 = vpack.c.bf16 %v621_v61, %v621_v61 }
 0x102   :  { %v638_v2 = vpack.c.bf16 %v574_v62, %v574_v62  ;;  %v654_v3 = vpack.c.bf16 %v590_v63, %v590_v63 }
 0x103   :  { %734 = vst.msk [vmem:[%s1510_s3 + $0xb0] sm:$0xf] %vm689_vm3, %v669_v0 }
 0x104   :  { %750 = vst.msk [vmem:[%s1510_s3 + $0xf0] sm:$0xf] %vm689_vm3, %v685_v1  ;;  %v513_v4 = vpop.f32.mrf.mxu2  ;;  %v553_v5 = vpop.f32.mrf.mxu3 }
 0x105   :  { %703 = vst.msk [vmem:[%s1510_s3 + $0x34] sm:$0xf] %vm689_vm3, %v638_v2  ;;  %v514_v6 = vadd.f32 %v1185_v40, %v513_v4  ;;  %v554_v7 = vadd.f32 %v1185_v40, %v553_v5  ;;  %v436_v8 = vpop.f32.mrf.mxu0  ;;  %v476_v9 = vpop.f32.mrf.mxu1 }
 0x106   :  { %719 = vst.msk [vmem:[%s1510_s3 + $0x74] sm:$0xf] %vm689_vm3, %v654_v3  ;;  %v437_v10 = vadd.f32 %v1185_v40, %v436_v8  ;;  %v477_v11 = vadd.f32 %v1185_v40, %v476_v9 }
 0x107   :  { %v606_v12 = vmax.f32 %v514_v6, 0.0  ;;  %v622_v13 = vmax.f32 %v554_v7, 0.0 }
 0x108   :  { %v575_v14 = vmax.f32 %v437_v10, 0.0  ;;  %v591_v15 = vmax.f32 %v477_v11, 0.0 }
 0x109   :  { %v670_v16 = vpack.c.bf16 %v606_v12, %v606_v12  ;;  %v686_v17 = vpack.c.bf16 %v622_v13, %v622_v13 }
 0x10a   :  { %v639_v18 = vpack.c.bf16 %v575_v14, %v575_v14  ;;  %v655_v19 = vpack.c.bf16 %v591_v15, %v591_v15 }
 0x10b   :  { %735 = vst.msk [vmem:[%s1510_s3 + $0xb4] sm:$0xf] %vm689_vm3, %v670_v16 }
 0x10c   :  { %751 = vst.msk [vmem:[%s1510_s3 + $0xf4] sm:$0xf] %vm689_vm3, %v686_v17  ;;  %v516_v20 = vpop.f32.mrf.mxu2  ;;  %v556_v21 = vpop.f32.mrf.mxu3 }
 0x10d   :  { %704 = vst.msk [vmem:[%s1510_s3 + $0x38] sm:$0xf] %vm689_vm3, %v639_v18  ;;  %v517_v22 = vadd.f32 %v1185_v40, %v516_v20  ;;  %v557_v23 = vadd.f32 %v1185_v40, %v556_v21  ;;  %v438_v24 = vpop.f32.mrf.mxu0  ;;  %v478_v25 = vpop.f32.mrf.mxu1 }
 0x10e   :  { %720 = vst.msk [vmem:[%s1510_s3 + $0x78] sm:$0xf] %vm689_vm3, %v655_v19  ;;  %v439_v26 = vadd.f32 %v1185_v40, %v438_v24  ;;  %v479_v27 = vadd.f32 %v1185_v40, %v478_v25 }
 0x10f   :  { %v607_v28 = vmax.f32 %v517_v22, 0.0  ;;  %v623_v29 = vmax.f32 %v557_v23, 0.0 }
 0x110   :  { %v576_v30 = vmax.f32 %v439_v26, 0.0  ;;  %v592_v31 = vmax.f32 %v479_v27, 0.0 }
 0x111   :  { %v671_v32 = vpack.c.bf16 %v607_v28, %v607_v28  ;;  %v687_v33 = vpack.c.bf16 %v623_v29, %v623_v29 }
 0x112   :  { %v640_v34 = vpack.c.bf16 %v576_v30, %v576_v30  ;;  %v656_v35 = vpack.c.bf16 %v592_v31, %v592_v31 }
 0x113   :  { %736 = vst.msk [vmem:[%s1510_s3 + $0xb8] sm:$0xf] %vm689_vm3, %v671_v32 }
 0x114   :  { %752 = vst.msk [vmem:[%s1510_s3 + $0xf8] sm:$0xf] %vm689_vm3, %v687_v33  ;;  %v518_v36 = vpop.f32.mrf.mxu2  ;;  %v558_v37 = vpop.f32.mrf.mxu3 }
 0x115   :  { %705 = vst.msk [vmem:[%s1510_s3 + $0x3c] sm:$0xf] %vm689_vm3, %v640_v34  ;;  %v519_v38 = vadd.f32 %v1185_v40, %v518_v36  ;;  %v559_v39 = vadd.f32 %v1185_v40, %v558_v37 }
 0x116   :  { %721 = vst.msk [vmem:[%s1510_s3 + $0x7c] sm:$0xf] %vm689_vm3, %v656_v35 }
 0x117   :  { %v608_v41 = vmax.f32 %v519_v38, 0.0  ;;  %v624_v42 = vmax.f32 %v559_v39, 0.0 }
 0x119   :  { %v672_v43 = vpack.c.bf16 %v608_v41, %v608_v41  ;;  %v688_v44 = vpack.c.bf16 %v624_v42, %v624_v42 }
 0x11b   :  { %737 = vst.msk [vmem:[%s1510_s3 + $0xbc] sm:$0xf] %vm689_vm3, %v672_v43 }
 0x11c   :  { %753 = vst.msk [vmem:[%s1510_s3 + $0xfc] sm:$0xf] %vm689_vm3, %v688_v44 }
 0x11d   :  { %758 = vsyncpa [#allocation3], 1 }
 0x11e   :  { %759 = vsyncpa [#allocation5], 1 }

// kernel: _lambda_.14
= control target key start
LH: loop header
LB: loop body
LE: loop exit
PB: predicated region body
PF: predicated region fallthrough
CT: control target
= control target key end

     0   :  { %s3295_s22 = smov 112   ;;  %vm439_vm0 = vcmask 130048   ;;  %vm1341_vm1 = vcmask 916480   ;;  %s3296_s28 = smov 16   ;;  %vm2410_vm2 = vcmask 257024   ;;  %s5200_s0 = inlined_call_operand.vmem [shape: bf16[512,288], index: 0, kind: input, shape index: {}]   ;;  %s5201_s1 = inlined_call_operand.vmem [shape: bf16[2,144,16], index: 1, kind: input, shape index: {}]   ;;  %s5202_s2 = inlined_call_operand.vmem [shape: f32[1,32], index: 2, kind: input, shape index: {}]   ;;  %s5203_s3 = inlined_call_operand.vmem [shape: bf16[512,32], index: 3, kind: output, shape index: {}]  }
   0x1   :  { %v2823_v0 = vld [vmem:[%s5200_s0 + $0x4] sm:$0xf]  ;;  %v3219_v1 = vld [vmem:[%s5200_s0 + $0xc] sm:$0xf0]  ;;  %v2831_v2 = vld [vmem:[%s5200_s0 + $0x1c] sm:$0xf] }
   0x2   :  { %v2824_v3 = vor.u32 %v3219_v1, %v2823_v0  ;;  %v3221_v4 = vld [vmem:[%s5200_s0 + $0x24] sm:$0xf0]  ;;  %v2839_v6 = vld [vmem:[%s5200_s0 + $0x34] sm:$0xf]  ;;  %v3223_v7 = vld [vmem:[%s5200_s0 + $0x3c] sm:$0xf0] }
   0x3   :  { %v2832_v5 = vor.u32 %v3221_v4, %v2831_v2  ;;  %v3218_v8 = vld [vmem:[%s5200_s0 + $0x8] sm:$0xf]  ;;  %v2825_v9 = vld [vmem:[%s5200_s0 + $0x10] sm:$0xf0]  ;;  %v2840_v10 = vor.u32 %v3223_v7, %v2839_v6  ;;  %v3220_v11 = vld [vmem:[%s5200_s0 + $0x20] sm:$0xf] }
   0x4   :  { %1213 = vrot.lane.b32.xlu0 %v2824_v3, %s3295_s22  ;;  %v2833_v12 = vld [vmem:[%s5200_s0 + $0x28] sm:$0xf0]  ;;  %v3289_v13 = vld [vmem:[%s5201_s1 + $0x80] sm:$0xff]  ;;  %v2828_v14 = vor.u32 %v3218_v8, %v2825_v9  ;;  %v3222_v15 = vld [vmem:[%s5200_s0 + $0x38] sm:$0xf] }
   0x5   :  { %1217 = vrot.lane.b32.xlu1 %v2832_v5, %s3295_s22  ;;  %1221 = vrot.lane.b32.xlu2 %v2840_v10, %s3295_s22  ;;  %v2841_v16 = vld [vmem:[%s5200_s0 + $0x40] sm:$0xf0]  ;;  %v2836_v17 = vor.u32 %v3220_v11, %v2833_v12  ;;  %v3288_v18 = vld [vmem:[%s5201_s1 + $0x78] sm:$0xff] }
   0x6   :  { %1556 = vmatpush.bf16.msra.mxu2 %v3289_v13  ;;  %v2844_v19 = vor.u32 %v3222_v15, %v2841_v16  ;;  %v2847_v20 = vld [vmem:[%s5200_s0 + $0x4c] sm:$0xf]  ;;  %v3225_v21 = vld [vmem:[%s5200_s0 + $0x54] sm:$0xf0]  ;;  %v3287_v22 = vld [vmem:[%s5201_s1 + $0x70] sm:$0xff] }
   0x7   :  { %v3224_v23 = vld [vmem:[%s5200_s0 + $0x50] sm:$0xf]  ;;  %v2849_v24 = vld [vmem:[%s5200_s0 + $0x58] sm:$0xf0]  ;;  %v2848_v25 = vor.u32 %v3225_v21, %v2847_v20  ;;  %v2855_v26 = vld [vmem:[%s5200_s0 + $0x64] sm:$0xf] }
   0x8   :  { %v3227_v27 = vld [vmem:[%s5200_s0 + $0x6c] sm:$0xf0]  ;;  %v2852_v28 = vor.u32 %v3224_v23, %v2849_v24  ;;  %v3286_v29 = vld [vmem:[%s5201_s1 + $0x68] sm:$0xff]  ;;  %v2857_v32 = vld [vmem:[%s5200_s0 + $0x70] sm:$0xf0] }
   0x9   :  { %v2856_v30 = vor.u32 %v3227_v27, %v2855_v26  ;;  %v3226_v31 = vld [vmem:[%s5200_s0 + $0x68] sm:$0xf]  ;;  %v3285_v33 = vld [vmem:[%s5201_s1 + $0x60] sm:$0xff]  ;;  %v2863_v34 = vld [vmem:[%s5200_s0 + $0x7c] sm:$0xf] }
   0xa   :  { %1557 = vmatpush.bf16.msra.mxu2 %v3288_v18  ;;  %v3229_v35 = vld [vmem:[%s5200_s0 + $0x84] sm:$0xf0]  ;;  %v2860_v36 = vor.u32 %v3226_v31, %v2857_v32  ;;  %v3228_v37 = vld [vmem:[%s5200_s0 + $0x80] sm:$0xf]  ;;  %v2865_v38 = vld [vmem:[%s5200_s0 + $0x88] sm:$0xf0] }
   0xb   :  { %v2864_v39 = vor.u32 %v3229_v35, %v2863_v34  ;;  %v3284_v40 = vld [vmem:[%s5201_s1 + $0x58] sm:$0xff]  ;;  %v2868_v41 = vor.u32 %v3228_v37, %v2865_v38  ;;  %v2871_v42 = vld [vmem:[%s5200_s0 + $0x94] sm:$0xf]  ;;  %v3231_v43 = vld [vmem:[%s5200_s0 + $0x9c] sm:$0xf0] }
   0xc   :  { %1215 = vrot.lane.b32.xlu0 %v2828_v14, %s3295_s22  ;;  %v3230_v44 = vld [vmem:[%s5200_s0 + $0x98] sm:$0xf]  ;;  %v2873_v45 = vld [vmem:[%s5200_s0 + $0xa0] sm:$0xf0]  ;;  %v2872_v46 = vor.u32 %v3231_v43, %v2871_v42  ;;  %v3283_v48 = vld [vmem:[%s5201_s1 + $0x50] sm:$0xff] }
   0xd   :  { %1219 = vrot.lane.b32.xlu1 %v2836_v17, %s3295_s22  ;;  %1223 = vrot.lane.b32.xlu2 %v2844_v19, %s3295_s22  ;;  %v2876_v47 = vor.u32 %v3230_v44, %v2873_v45  ;;  %v3290_v49 = vld [vmem:[%s5201_s1 + $0x88] sm:$0xff]  ;;  %v3232_v50 = vld [vmem:[%s5200_s0 + $0xb0] sm:$0xf] }
   0xe   :  { %1558 = vmatpush.bf16.msra.mxu2 %v3287_v22  ;;  %v2881_v51 = vld [vmem:[%s5200_s0 + $0xb8] sm:$0xf0]  ;;  %1732 = vmatpush.bf16.msra.mxu3 %v3290_v49  ;;  %v3282_v53 = vld [vmem:[%s5201_s1 + $0x48] sm:$0xff]  ;;  %v3233_v55 = vld [vmem:[%s5200_s0 + $0xb4] sm:$0xf0] }
   0xf   :  { %v2884_v52 = vor.u32 %v3232_v50, %v2881_v51  ;;  %v2879_v54 = vld [vmem:[%s5200_s0 + $0xac] sm:$0xf]  ;;  %v2887_v56 = vld [vmem:[%s5200_s0 + $0xc4] sm:$0xf]  ;;  %v3235_v58 = vld [vmem:[%s5200_s0 + $0xcc] sm:$0xf0] }
  0x10   :  { %v2880_v57 = vor.u32 %v3233_v55, %v2879_v54  ;;  %v2888_v59 = vor.u32 %v3235_v58, %v2887_v56  ;;  %v3234_v60 = vld [vmem:[%s5200_s0 + $0xc8] sm:$0xf]  ;;  %v2889_v61 = vld [vmem:[%s5200_s0 + $0xd0] sm:$0xf0]  ;;  %v3236_v62 = vld [vmem:[%s5200_s0 + $0xe0] sm:$0xf] }
  0x11   :  { %v2897_v63 = vld [vmem:[%s5200_s0 + $0xe8] sm:$0xf0]  ;;  %v2892_v0 = vor.u32 %v3234_v60, %v2889_v61  ;;  %v2903_v2 = vld [vmem:[%s5200_s0 + $0xf4] sm:$0xf]  ;;  %v3239_v3 = vld [vmem:[%s5200_s0 + $0xfc] sm:$0xf0] }
  0x12   :  { %1559 = vmatpush.bf16.msra.mxu2 %v3286_v29  ;;  %v2900_v1 = vor.u32 %v3236_v62, %v2897_v63  ;;  %v2911_v4 = vld [vmem:[%s5200_s0 + $0x10c] sm:$0xf]  ;;  %v2904_v5 = vor.u32 %v3239_v3, %v2903_v2  ;;  %v3241_v6 = vld [vmem:[%s5200_s0 + $0x114] sm:$0xf0]  ;;  %v2895_v7 = vld [vmem:[%s5200_s0 + $0xdc] sm:$0xf] }
  0x13   :  { %v3237_v8 = vld [vmem:[%s5200_s0 + $0xe4] sm:$0xf0]  ;;  %v2912_v9 = vor.u32 %v3241_v6, %v2911_v4  ;;  %v3240_v11 = vld [vmem:[%s5200_s0 + $0x110] sm:$0xf]  ;;  %v2913_v12 = vld [vmem:[%s5200_s0 + $0x118] sm:$0xf0] }
  0x14   :  { %1225 = vrot.lane.b32.xlu0 %v2848_v25, %s3295_s22  ;;  %v2896_v10 = vor.u32 %v3237_v8, %v2895_v7  ;;  %v3242_v13 = vld [vmem:[%s5200_s0 + $0x128] sm:$0xf]  ;;  %v2921_v14 = vld [vmem:[%s5200_s0 + $0x130] sm:$0xf0]  ;;  %v3238_v15 = vld [vmem:[%s5200_s0 + $0xf8] sm:$0xf]  ;;  %v2916_v18 = vor.u32 %v3240_v11, %v2913_v12 }
  0x15   :  { %1227 = vrot.lane.b32.xlu1 %v2852_v28, %s3295_s22  ;;  %1229 = vrot.lane.b32.xlu2 %v2856_v30, %s3295_s22  ;;  %v2905_v16 = vld [vmem:[%s5200_s0 + $0x100] sm:$0xf0]  ;;  %v2924_v19 = vor.u32 %v3242_v13, %v2921_v14  ;;  %v2927_v23 = vld [vmem:[%s5200_s0 + $0x13c] sm:$0xf] }
  0x16   :  { %1560 = vmatpush.bf16.msra.mxu2 %v3285_v33  ;;  %v2908_v20 = vor.u32 %v3238_v15, %v2905_v16  ;;  %v3245_v24 = vld [vmem:[%s5200_s0 + $0x144] sm:$0xf0]  ;;  %v2935_v25 = vld [vmem:[%s5200_s0 + $0x154] sm:$0xf]  ;;  %v3247_v27 = vld [vmem:[%s5200_s0 + $0x15c] sm:$0xf0] }
  0x17   :  { %v2928_v26 = vor.u32 %v3245_v24, %v2927_v23  ;;  %v2919_v28 = vld [vmem:[%s5200_s0 + $0x124] sm:$0xf]  ;;  %v3243_v29 = vld [vmem:[%s5200_s0 + $0x12c] sm:$0xf0]  ;;  %v2936_v31 = vor.u32 %v3247_v27, %v2935_v25  ;;  %v3246_v33 = vld [vmem:[%s5200_s0 + $0x158] sm:$0xf] }
  0x18   :  { %v2920_v32 = vor.u32 %v3243_v29, %v2919_v28  ;;  %v2937_v34 = vld [vmem:[%s5200_s0 + $0x160] sm:$0xf0]  ;;  %v3248_v35 = vld [vmem:[%s5200_s0 + $0x170] sm:$0xf]  ;;  %v3244_v37 = vld [vmem:[%s5200_s0 + $0x140] sm:$0xf] }
  0x19   :  { %v2929_v38 = vld [vmem:[%s5200_s0 + $0x148] sm:$0xf0]  ;;  %v2951_v44 = vld [vmem:[%s5200_s0 + $0x184] sm:$0xf]  ;;  %v3251_v45 = vld [vmem:[%s5200_s0 + $0x18c] sm:$0xf0] }
  0x1a   :  { %1561 = vmatpush.bf16.msra.mxu2 %v3284_v40  ;;  %v2943_v49 = vld [vmem:[%s5200_s0 + $0x16c] sm:$0xf]  ;;  %v3249_v50 = vld [vmem:[%s5200_s0 + $0x174] sm:$0xf0]  ;;  %v3252_v54 = vld [vmem:[%s5200_s0 + $0x1a0] sm:$0xf] }
  0x1b   :  { %v2961_v55 = vld [vmem:[%s5200_s0 + $0x1a8] sm:$0xf0]  ;;  %v3254_v56 = vld [vmem:[%s5200_s0 + $0x1b8] sm:$0xf]  ;;  %v3250_v58 = vld [vmem:[%s5200_s0 + $0x188] sm:$0xf] }
  0x1c   :  { %1231 = vrot.lane.b32.xlu0 %v2860_v36, %s3295_s22  ;;  %v2945_v36 = vld [vmem:[%s5200_s0 + $0x178] sm:$0xf0]  ;;  %v2964_v60 = vor.u32 %v3252_v54, %v2961_v55  ;;  %v2975_v2 = vld [vmem:[%s5200_s0 + $0x1cc] sm:$0xf]  ;;  %v3257_v3 = vld [vmem:[%s5200_s0 + $0x1d4] sm:$0xf0] }
  0x1d   :  { %1233 = vrot.lane.b32.xlu1 %v2864_v39, %s3295_s22  ;;  %1235 = vrot.lane.b32.xlu2 %v2868_v41, %s3295_s22  ;;  %v2940_v39 = vor.u32 %v3246_v33, %v2937_v34  ;;  %v2948_v40 = vor.u32 %v3248_v35, %v2945_v36  ;;  %v2932_v41 = vor.u32 %v3244_v37, %v2929_v38  ;;  %v2983_v4 = vld [vmem:[%s5200_s0 + $0x1e4] sm:$0xf]  ;;  %v3215_v6 = vld [vmem:[%s5201_s1 + $0x30] sm:$0xff] }
  0x1e   :  { %1562 = vmatpush.bf16.msra.mxu2 %v3283_v48  ;;  %v3253_v48 = vld [vmem:[%s5200_s0 + $0x1a4] sm:$0xf0]  ;;  %v2976_v7 = vor.u32 %v3257_v3, %v2975_v2  ;;  %v2985_v13 = vld [vmem:[%s5200_s0 + $0x1f0] sm:$0xf0]  ;;  %v3260_v14 = vld [vmem:[%s5200_s0 + $0x200] sm:$0xf] }
  0x1f   :  { %v3258_v12 = vld [vmem:[%s5200_s0 + $0x1e8] sm:$0xf]  ;;  %v2993_v15 = vld [vmem:[%s5200_s0 + $0x208] sm:$0xf0]  ;;  %v3213_v24 = vld [vmem:[%s5201_s1 + $0x20] sm:$0xff] }
  0x20   :  { %v3214_v16 = vld [vmem:[%s5201_s1 + $0x28] sm:$0xff]  ;;  %v3212_v27 = vld [vmem:[%s5201_s1 + $0x18] sm:$0xff]  ;;  %v2999_v28 = vld [vmem:[%s5200_s0 + $0x214] sm:$0xf] }
  0x21   :  { %v3263_v29 = vld [vmem:[%s5200_s0 + $0x21c] sm:$0xf0]  ;;  %v2991_v35 = vld [vmem:[%s5200_s0 + $0x1fc] sm:$0xf]  ;;  %v3261_v36 = vld [vmem:[%s5200_s0 + $0x204] sm:$0xf0] }
  0x22   :  { %1563 = vmatpush.bf16.msra.mxu2 %v3282_v53  ;;  %v2944_v53 = vor.u32 %v3249_v50, %v2943_v49  ;;  %v3000_v33 = vor.u32 %v3263_v29, %v2999_v28  ;;  %v2992_v37 = vor.u32 %v3261_v36, %v2991_v35  ;;  %v3217_v38 = vld [vmem:[%s5201_s1 + $0x40] sm:$0xff]  ;;  %v3146_v54 = vld [vmem:[%s5200_s0 + $0x8] sm:$0xf0]  ;;  %v3267_v2 = vld [vmem:[%s5200_s0 + $0x24c] sm:$0xf0] }
  0x23   :  { %712 = vmatpush.bf16.msra.mxu1 %v3217_v38  ;;  %v3145_v55 = vld [vmem:[%s5200_s0 + $0x4] sm:$0xf]  ;;  %v3277_v28 = vld [vmem:[%s5200_s0 + $0x2c4] sm:$0xf0]  ;;  %v3039_v29 = vld [vmem:[%s5200_s0 + $0x28c] sm:$0xf] }
  0x24   :  { %1237 = vrot.lane.b32.xlu0 %v2872_v46, %s3295_s22  ;;  %v2959_v46 = vld [vmem:[%s5200_s0 + $0x19c] sm:$0xf]  ;;  %v3057_v35 = vld [vmem:[%s5200_s0 + $0x2c8] sm:$0xf0]  ;;  %v3278_v36 = vld [vmem:[%s5200_s0 + $0x2d8] sm:$0xf] }
  0x25   :  { %1239 = vrot.lane.b32.xlu1 %v2876_v47, %s3295_s22  ;;  %1241 = vrot.lane.b32.xlu2 %v2880_v57, %s3295_s22  ;;  %v2952_v47 = vor.u32 %v3251_v45, %v2951_v44  ;;  %v2969_v57 = vld [vmem:[%s5200_s0 + $0x1c0] sm:$0xf0]  ;;  %v3262_v44 = vld [vmem:[%s5200_s0 + $0x218] sm:$0xf] }
  0x26   :  { %v2972_v61 = vor.u32 %v3254_v56, %v2969_v57  ;;  %v3001_v45 = vld [vmem:[%s5200_s0 + $0x220] sm:$0xf0]  ;;  %v3274_v38 = vld [vmem:[%s5200_s0 + $0x2a8] sm:$0xf] }
  0x27   :  { %v3004_v49 = vor.u32 %v3262_v44, %v3001_v45 }
  0x2c   :  { %1243 = vrot.lane.b32.xlu0 %v2884_v52, %s3295_s22  ;;  %v2960_v52 = vor.u32 %v3253_v48, %v2959_v46 }
  0x2d   :  { %1245 = vrot.lane.b32.xlu1 %v2888_v59, %s3295_s22  ;;  %1247 = vrot.lane.b32.xlu2 %v2892_v0, %s3295_s22  ;;  %v2953_v59 = vld [vmem:[%s5200_s0 + $0x190] sm:$0xf0] }
  0x2e   :  { %v2956_v62 = vor.u32 %v3250_v58, %v2953_v59  ;;  %v2483_v58 = vld [vmem:[%s5200_s0 + $0xc] sm:$0xf0] }
  0x2f   :  { %v2486_v59 = vor.u32 %v3145_v55, %v2483_v58  ;;  %v3071_v55 = vld [vmem:[%s5200_s0 + $0x2ec] sm:$0xf]  ;;  %v3063_v58 = vld [vmem:[%s5200_s0 + $0x2d4] sm:$0xf] }
  0x31   :  { %2771 = vmatmul.msk.bf16.vlgmr.msra.gmra.mxu1 %vm439_vm0, %v2486_v59 }
  0x34   :  { %1249 = vrot.lane.b32.xlu0 %v2896_v10, %s3295_s22  ;;  %v3255_v10 = vld [vmem:[%s5200_s0 + $0x1bc] sm:$0xf0] }
  0x35   :  { %1251 = vrot.lane.b32.xlu1 %v2900_v1, %s3295_s22  ;;  %1253 = vrot.lane.b32.xlu2 %v2904_v5, %s3295_s22  ;;  %v3216_v1 = vld [vmem:[%s5201_s1 + $0x38] sm:$0xff]  ;;  %v3259_v5 = vld [vmem:[%s5200_s0 + $0x1ec] sm:$0xf0] }
  0x36   :  { %536 = vmatpush.bf16.msra.mxu0 %v3216_v1  ;;  %v2984_v8 = vor.u32 %v3259_v5, %v2983_v4  ;;  %v3015_v1 = vld [vmem:[%s5200_s0 + $0x244] sm:$0xf]  ;;  %v3270_v5 = vld [vmem:[%s5200_s0 + $0x278] sm:$0xf] }
  0x37   :  { %v3016_v4 = vor.u32 %v3267_v2, %v3015_v1  ;;  %v3073_v1 = vld [vmem:[%s5200_s0 + $0x2f8] sm:$0xf0] }
  0x3a   :  { %537 = vmatpush.bf16.msra.mxu0 %v3215_v6  ;;  %v3033_v6 = vld [vmem:[%s5200_s0 + $0x280] sm:$0xf0] }
  0x3c   :  { %1255 = vrot.lane.b32.xlu0 %v2908_v20, %s3295_s22  ;;  %v2996_v20 = vor.u32 %v3260_v14, %v2993_v15 }
  0x3d   :  { %1257 = vrot.lane.b32.xlu1 %v2912_v9, %s3295_s22  ;;  %1259 = vrot.lane.b32.xlu2 %v2916_v18, %s3295_s22  ;;  %v2967_v9 = vld [vmem:[%s5200_s0 + $0x1b4] sm:$0xf]  ;;  %v2977_v18 = vld [vmem:[%s5200_s0 + $0x1d8] sm:$0xf0] }
  0x3e   :  { %v2968_v11 = vor.u32 %v3255_v10, %v2967_v9  ;;  %538 = vmatpush.bf16.msra.mxu0 %v3214_v16  ;;  %v3268_v9 = vld [vmem:[%s5200_s0 + $0x260] sm:$0xf]  ;;  %v3025_v10 = vld [vmem:[%s5200_s0 + $0x268] sm:$0xf0] }
  0x3f   :  { %v3028_v15 = vor.u32 %v3268_v9, %v3025_v10 }
  0x42   :  { %539 = vmatpush.bf16.msra.mxu0 %v3213_v24  ;;  %v3047_v24 = vld [vmem:[%s5200_s0 + $0x2a4] sm:$0xf] }
  0x44   :  { %1261 = vrot.lane.b32.xlu0 %v2920_v32, %s3295_s22  ;;  %v3211_v32 = vld [vmem:[%s5201_s1 + $0x10] sm:$0xff] }
  0x45   :  { %1263 = vrot.lane.b32.xlu1 %v2924_v19, %s3295_s22  ;;  %1265 = vrot.lane.b32.xlu2 %v2928_v26, %s3295_s22  ;;  %v2988_v19 = vor.u32 %v3258_v12, %v2985_v13  ;;  %v3036_v13 = vor.u32 %v3270_v5, %v3033_v6  ;;  %v2505_v5 = vld [vmem:[%s5200_s0 + $0x48] sm:$0xf]  ;;  %v3152_v6 = vld [vmem:[%s5200_s0 + $0x50] sm:$0xf0] }
  0x46   :  { %540 = vmatpush.bf16.msra.mxu0 %v3212_v27 }
  0x4a   :  { %541 = vmatpush.bf16.msra.mxu0 %v3211_v32 }
  0x4c   :  { %1267 = vrot.lane.b32.xlu0 %v2932_v41, %s3295_s22  ;;  %v3266_v41 = vld [vmem:[%s5200_s0 + $0x248] sm:$0xf] }
  0x4d   :  { %1269 = vrot.lane.b32.xlu1 %v2936_v31, %s3295_s22  ;;  %1271 = vrot.lane.b32.xlu2 %v2940_v39, %s3295_s22  ;;  %v3265_v31 = vld [vmem:[%s5200_s0 + $0x234] sm:$0xf0]  ;;  %v3264_v39 = vld [vmem:[%s5200_s0 + $0x230] sm:$0xf] }
  0x54   :  { %1273 = vrot.lane.b32.xlu0 %v2944_v53, %s3295_s22  ;;  %v2481_v53 = vld [vmem:[%s5200_s0] sm:$0xf] }
  0x55   :  { %1275 = vrot.lane.b32.xlu1 %v2948_v40, %s3295_s22  ;;  %1277 = vrot.lane.b32.xlu2 %v2952_v47, %s3295_s22  ;;  %v3009_v40 = vld [vmem:[%s5200_s0 + $0x238] sm:$0xf0]  ;;  %v2482_v57 = vor.u32 %v3146_v54, %v2481_v53 }
  0x56   :  { %v3012_v47 = vor.u32 %v3264_v39, %v3009_v40  ;;  %v3049_v39 = vld [vmem:[%s5200_s0 + $0x2b0] sm:$0xf0] }
  0x57   :  { %v3052_v44 = vor.u32 %v3274_v38, %v3049_v39  ;;  %v2523_v39 = vld [vmem:[%s5200_s0 + $0x84] sm:$0xf0] }
  0x5c   :  { %1279 = vrot.lane.b32.xlu0 %v2956_v62, %s3295_s22  ;;  %v3031_v62 = vld [vmem:[%s5200_s0 + $0x274] sm:$0xf] }
  0x5d   :  { %1281 = vrot.lane.b32.xlu1 %v2960_v52, %s3295_s22  ;;  %1283 = vrot.lane.b32.xlu2 %v2964_v60, %s3295_s22  ;;  %v3023_v60 = vld [vmem:[%s5200_s0 + $0x25c] sm:$0xf] }
  0x5f   :  { %v1222_v51 = vpop.permute.xlu2 %1221 }
  0x64   :  { %1285 = vrot.lane.b32.xlu0 %v2968_v11, %s3295_s22 }
  0x65   :  { %1287 = vrot.lane.b32.xlu1 %v2972_v61, %s3295_s22  ;;  %1289 = vrot.lane.b32.xlu2 %v2976_v7, %s3295_s22  ;;  %v3269_v61 = vld [vmem:[%s5200_s0 + $0x264] sm:$0xf0]  ;;  %v3272_v7 = vld [vmem:[%s5200_s0 + $0x290] sm:$0xf] }
  0x67   :  { %v1224_v63 = vpop.permute.xlu2 %1223 }
  0x68   :  { %v1344_v0 = vsel %vm1341_vm1, %v1222_v51, %v1224_v63  ;;  %v3209_v51 = vld [vmem:[%s5201_s1] sm:$0xff] }
  0x6d   :  { %1293 = vrot.lane.b32.xlu1 %v2984_v8, %s3295_s22  ;;  %1295 = vrot.lane.b32.xlu2 %v2988_v19, %s3295_s22  ;;  %v3041_v8 = vld [vmem:[%s5200_s0 + $0x298] sm:$0xf0] }
  0x6e   :  { %v3044_v14 = vor.u32 %v3272_v7, %v3041_v8  ;;  %v3147_v19 = vld [vmem:[%s5200_s0 + $0x1c] sm:$0xf]  ;;  %v3151_v7 = vld [vmem:[%s5200_s0 + $0x4c] sm:$0xf]  ;;  %v2506_v8 = vor.u32 %v3152_v6, %v2505_v5 }
  0x6f   :  { %v1230_v26 = vpop.permute.xlu2 %1229 }
  0x75   :  { %1299 = vrot.lane.b32.xlu1 %v2996_v20, %s3295_s22  ;;  %1301 = vrot.lane.b32.xlu2 %v3000_v33, %s3295_s22 }
  0x76   :  { %v1214_v17 = vpop.permute.xlu0 %1213 }
  0x77   :  { %v1218_v30 = vpop.permute.xlu1 %1217  ;;  %v1236_v46 = vpop.permute.xlu2 %1235 }
  0x7d   :  { %1307 = vrot.lane.b32.xlu2 %v3012_v47, %s3295_s22  ;;  %v2497_v47 = vld [vmem:[%s5200_s0 + $0x30] sm:$0xf] }
  0x7e   :  { %v1216_v21 = vpop.permute.xlu0 %1215 }
  0x7f   :  { %3113 = vmatmul.msk.bf16.vlgmr.msra.gmra.mxu3 %vm439_vm0, %v1216_v21  ;;  %v1342_v22 = vsel %vm1341_vm1, %v1214_v17, %v1216_v21  ;;  %v1220_v42 = vpop.permute.xlu1 %1219  ;;  %v3256_v17 = vld [vmem:[%s5200_s0 + $0x1d0] sm:$0xf]  ;;  %v3733_v56 = vpop.permute.xlu2 %1241 }
  0x80   :  { %1564 = vmatmul.bf16.vlgmr.msra.gmra.mxu2 %v1342_v22  ;;  %v1343_v43 = vsel %vm1341_vm1, %v1218_v30, %v1220_v42  ;;  %v2980_v21 = vor.u32 %v3256_v17, %v2977_v18  ;;  %v3007_v30 = vld [vmem:[%s5200_s0 + $0x22c] sm:$0xf]  ;;  %v2489_v17 = vld [vmem:[%s5200_s0 + $0x18] sm:$0xf]  ;;  %v3148_v18 = vld [vmem:[%s5200_s0 + $0x20] sm:$0xf0] }
  0x81   :  { %v3008_v34 = vor.u32 %v3265_v31, %v3007_v30  ;;  %v2490_v20 = vor.u32 %v3148_v18, %v2489_v17  ;;  %v3273_v30 = vld [vmem:[%s5200_s0 + $0x294] sm:$0xf0]  ;;  %v2513_v17 = vld [vmem:[%s5200_s0 + $0x60] sm:$0xf]  ;;  %v3154_v18 = vld [vmem:[%s5200_s0 + $0x68] sm:$0xf0] }
  0x82   :  { %1291 = vrot.lane.b32.xlu0 %v2980_v21, %s3295_s22  ;;  %v2491_v21 = vld [vmem:[%s5200_s0 + $0x24] sm:$0xf0]  ;;  %v3040_v33 = vor.u32 %v3273_v30, %v3039_v29 }
  0x83   :  { %1305 = vrot.lane.b32.xlu1 %v3008_v34, %s3295_s22  ;;  %v3276_v34 = vld [vmem:[%s5200_s0 + $0x2c0] sm:$0xf] }
  0x86   :  { %v1226_v23 = vpop.permute.xlu0 %1225 }
  0x87   :  { %v1228_v22 = vpop.permute.xlu1 %1227  ;;  %v3778_v12 = vpop.permute.xlu2 %1247 }
  0x88   :  { %v1345_v25 = vsel %vm1341_vm1, %v1226_v23, %v1228_v22  ;;  %v2494_v23 = vor.u32 %v3147_v19, %v2491_v21  ;;  %v3153_v19 = vld [vmem:[%s5200_s0 + $0x64] sm:$0xf]  ;;  %v2515_v21 = vld [vmem:[%s5200_s0 + $0x6c] sm:$0xf0] }
  0x8a   :  { %1297 = vrot.lane.b32.xlu0 %v2992_v37, %s3295_s22  ;;  %2772 = vmatmul.msk.bf16.gmra.mxu1 %vm439_vm0, %v2494_v23  ;;  %v3065_v37 = vld [vmem:[%s5200_s0 + $0x2e0] sm:$0xf0]  ;;  %v2518_v23 = vor.u32 %v3153_v19, %v2515_v21 }
  0x8e   :  { %v1232_v50 = vpop.permute.xlu0 %1231 }
  0x8f   :  { %3114 = vmatmul.msk.bf16.gmra.mxu3 %vm439_vm0, %v1220_v42  ;;  %v3017_v42 = vld [vmem:[%s5200_s0 + $0x250] sm:$0xf0]  ;;  %v1346_v52 = vsel %vm1341_vm1, %v1230_v26, %v1232_v50  ;;  %v1234_v11 = vpop.permute.xlu1 %1233  ;;  %v3055_v26 = vld [vmem:[%s5200_s0 + $0x2bc] sm:$0xf]  ;;  %v3815_v31 = vpop.permute.xlu2 %1253 }
  0x90   :  { %1569 = vmatmul.bf16.gmra.mxu2 %v1343_v43  ;;  %v3210_v43 = vld [vmem:[%s5201_s1 + $0x8] sm:$0xff]  ;;  %v3020_v48 = vor.u32 %v3266_v41, %v3017_v42  ;;  %v1347_v16 = vsel %vm1341_vm1, %v1234_v11, %v1236_v46  ;;  %v3056_v32 = vor.u32 %v3277_v28, %v3055_v26  ;;  %v3060_v42 = vor.u32 %v3276_v34, %v3057_v35  ;;  %v2521_v35 = vld [vmem:[%s5200_s0 + $0x78] sm:$0xf] }
  0x91   :  { %542 = vmatpush.bf16.msra.mxu0 %v3210_v43  ;;  %v3068_v43 = vor.u32 %v3278_v36, %v3065_v37  ;;  %v3156_v36 = vld [vmem:[%s5200_s0 + $0x80] sm:$0xf0]  ;;  %v3155_v37 = vld [vmem:[%s5200_s0 + $0x7c] sm:$0xf] }
  0x92   :  { %1311 = vrot.lane.b32.xlu1 %v3020_v48, %s3295_s22  ;;  %1303 = vrot.lane.b32.xlu0 %v3004_v49, %s3295_s22  ;;  %v3150_v48 = vld [vmem:[%s5200_s0 + $0x38] sm:$0xf0]  ;;  %v3149_v49 = vld [vmem:[%s5200_s0 + $0x34] sm:$0xf]  ;;  %v2522_v38 = vor.u32 %v3156_v36, %v2521_v35 }
  0x93   :  { %v2545_v35 = vld [vmem:[%s5200_s0 + $0xc0] sm:$0xf]  ;;  %v3162_v36 = vld [vmem:[%s5200_s0 + $0xc8] sm:$0xf0] }
  0x95   :  { %543 = vmatpush.bf16.msra.mxu0 %v3209_v51  ;;  %v2499_v51 = vld [vmem:[%s5200_s0 + $0x3c] sm:$0xf0] }
  0x96   :  { %v1238_v40 = vpop.permute.xlu0 %1237  ;;  %v2502_v53 = vor.u32 %v3149_v49, %v2499_v51 }
  0x97   :  { %v3839_v45 = vpop.permute.xlu2 %1259 }
  0x98   :  { %544 = vmatmul.bf16.vlgmr.msra.gmra.mxu0 %v2482_v57  ;;  %v3281_v57 = vld [vmem:[%s5200_s0 + $0x2f4] sm:$0xf0] }
  0x99   :  { %v3072_v59 = vor.u32 %v3281_v57, %v3071_v55  ;;  %v3158_v55 = vld [vmem:[%s5200_s0 + $0x98] sm:$0xf0]  ;;  %v3157_v57 = vld [vmem:[%s5200_s0 + $0x94] sm:$0xf] }
  0x9a   :  { %1309 = vrot.lane.b32.xlu0 %v3016_v4, %s3295_s22  ;;  %2773 = vmatmul.msk.bf16.gmra.mxu1 %vm439_vm0, %v2502_v53 }
  0x9f   :  { %3115 = vmatmul.msk.bf16.gmra.mxu3 %vm439_vm0, %v1224_v63  ;;  %v3024_v63 = vor.u32 %v3269_v61, %v3023_v60  ;;  %v3279_v60 = vld [vmem:[%s5200_s0 + $0x2dc] sm:$0xf0] }
  0xa0   :  { %1574 = vmatmul.bf16.gmra.mxu2 %v1344_v0  ;;  %v3271_v0 = vld [vmem:[%s5200_s0 + $0x27c] sm:$0xf0]  ;;  %v3064_v61 = vor.u32 %v3279_v60, %v3063_v58 }
  0xa1   :  { %v3032_v3 = vor.u32 %v3271_v0, %v3031_v62  ;;  %1313 = vrot.lane.b32.xlu2 %v3024_v63, %s3295_s22  ;;  %v3873_v62 = vpop.permute.xlu2 %1265  ;;  %v3280_v0 = vld [vmem:[%s5200_s0 + $0x2f0] sm:$0xf] }
  0xa2   :  { %1315 = vrot.lane.b32.xlu0 %v3028_v15, %s3295_s22 }
  0xa3   :  { %1317 = vrot.lane.b32.xlu1 %v3032_v3, %s3295_s22  ;;  %v3076_v3 = vor.u32 %v3280_v0, %v3073_v1 }
  0xa8   :  { %549 = vmatmul.bf16.gmra.mxu0 %v2490_v20  ;;  %v2514_v20 = vor.u32 %v3154_v18, %v2513_v17  ;;  %v2539_v17 = vld [vmem:[%s5200_s0 + $0xb4] sm:$0xf0] }
  0xa9   :  { %1319 = vrot.lane.b32.xlu2 %v3036_v13, %s3295_s22  ;;  %v3901_v9 = vpop.permute.xlu2 %1271 }
  0xaa   :  { %1321 = vrot.lane.b32.xlu0 %v3040_v33, %s3295_s22 }
  0xab   :  { %1323 = vrot.lane.b32.xlu1 %v3044_v14, %s3295_s22 }
  0xaf   :  { %3116 = vmatmul.msk.bf16.gmra.mxu3 %vm439_vm0, %v1228_v22  ;;  %v1240_v22 = vpop.permute.xlu1 %1239 }
  0xb0   :  { %1579 = vmatmul.bf16.gmra.mxu2 %v1345_v25  ;;  %v3275_v25 = vld [vmem:[%s5200_s0 + $0x2ac] sm:$0xf0] }
  0xb1   :  { %v3048_v27 = vor.u32 %v3275_v25, %v3047_v24  ;;  %v3906_v14 = vpop.permute.xlu2 %1277 }
  0xb2   :  { %1327 = vrot.lane.b32.xlu0 %v3052_v44, %s3295_s22 }
  0xb3   :  { %1325 = vrot.lane.b32.xlu2 %v3048_v27, %s3295_s22  ;;  %1329 = vrot.lane.b32.xlu1 %v3056_v32, %s3295_s22 }
  0xb7   :  { %v1246_v41 = vpop.permute.xlu1 %1245 }
  0xb9   :  { %v3929_v27 = vpop.permute.xlu2 %1283 }
  0xba   :  { %1333 = vrot.lane.b32.xlu0 %v3064_v61, %s3295_s22 }
  0xbb   :  { %1331 = vrot.lane.b32.xlu2 %v3060_v42, %s3295_s22  ;;  %1335 = vrot.lane.b32.xlu1 %v3068_v43, %s3295_s22 }
  0xbf   :  { %3117 = vmatmul.msk.bf16.gmra.mxu3 %vm439_vm0, %v1232_v50  ;;  %v2498_v50 = vor.u32 %v3150_v48, %v2497_v47  ;;  %v3858_v54 = vpop.permute.xlu1 %1251 }
  0xc0   :  { %1584 = vmatmul.bf16.gmra.mxu2 %v1346_v52  ;;  %v1244_v52 = vpop.permute.xlu0 %1243 }
  0xc1   :  { %554 = vmatmul.bf16.gmra.mxu0 %v2498_v50  ;;  %v1349_v4 = vsel %vm1341_vm1, %v3733_v56, %v1244_v52  ;;  %v2507_v56 = vld [vmem:[%s5200_s0 + $0x54] sm:$0xf0]  ;;  %v3939_v34 = vpop.permute.xlu2 %1289 }
  0xc2   :  { %1339 = vrot.lane.b32.xlu0 %v3076_v3, %s3295_s22  ;;  %v2510_v10 = vor.u32 %v3151_v7, %v2507_v56 }
  0xc3   :  { %1337 = vrot.lane.b32.xlu2 %v3072_v59, %s3295_s22 }
  0xc4   :  { %2774 = vmatmul.msk.bf16.gmra.mxu1 %vm439_vm0, %v2510_v10  ;;  %v2537_v10 = vld [vmem:[%s5200_s0 + $0xa8] sm:$0xf] }
  0xc7   :  { %v3883_v2 = vpop.permute.xlu1 %1257 }
  0xc8   :  { %v1250_v63 = vpop.permute.xlu0 %1249 }
  0xc9   :  { %v1351_v33 = vsel %vm1341_vm1, %v1250_v63, %v3858_v54  ;;  %v3961_v47 = vpop.permute.xlu2 %1295 }
  0xcf   :  { %3118 = vmatmul.msk.bf16.gmra.mxu3 %vm439_vm0, %v1236_v46  ;;  %v1348_v46 = vsel %vm1341_vm1, %v1238_v40, %v1240_v22  ;;  %v3904_v13 = vpop.permute.xlu1 %1263 }
  0xd0   :  { %1589 = vmatmul.bf16.gmra.mxu2 %v1347_v16  ;;  %v1256_v11 = vpop.permute.xlu0 %1255  ;;  %v1350_v16 = vsel %vm1341_vm1, %v1246_v41, %v3778_v12  ;;  %v2526_v41 = vor.u32 %v3155_v37, %v2523_v39  ;;  %v3161_v37 = vld [vmem:[%s5200_s0 + $0xc4] sm:$0xf]  ;;  %v2547_v39 = vld [vmem:[%s5200_s0 + $0xcc] sm:$0xf0] }
  0xd1   :  { %559 = vmatmul.bf16.gmra.mxu0 %v2506_v8  ;;  %v3983_v61 = vpop.permute.xlu2 %1301  ;;  %v1353_v8 = vsel %vm1341_vm1, %v3883_v2, %v3839_v45 }
  0xd4   :  { %2775 = vmatmul.msk.bf16.gmra.mxu1 %vm439_vm0, %v2518_v23 }
  0xd8   :  { %v3908_v15 = vpop.permute.xlu0 %1261 }
  0xd9   :  { %v3991_v7 = vpop.permute.xlu2 %1307 }
  0xdf   :  { %3119 = vmatmul.msk.bf16.gmra.mxu3 %vm439_vm0, %v1240_v22  ;;  %v3926_v22 = vpop.permute.xlu1 %1269 }
  0xe0   :  { %1594 = vmatmul.bf16.gmra.mxu2 %v1348_v46 }
  0xe1   :  { %564 = vmatmul.bf16.gmra.mxu0 %v2514_v20 }
  0xe4   :  { %2776 = vmatmul.msk.bf16.gmra.mxu1 %vm439_vm0, %v2526_v41 }
  0xe7   :  { %v3934_v29 = vpop.permute.xlu1 %1275 }
  0xef   :  { %3120 = vmatmul.msk.bf16.gmra.mxu3 %vm439_vm0, %v1244_v52  ;;  %v3958_v46 = vpop.permute.xlu1 %1281  ;;  %v1352_v52 = vsel %vm1341_vm1, %v3815_v31, %v1256_v11  ;;  %v2531_v31 = vld [vmem:[%s5200_s0 + $0x9c] sm:$0xf0] }
  0xf0   :  { %1599 = vmatmul.bf16.gmra.mxu2 %v1349_v4  ;;  %v2534_v59 = vor.u32 %v3157_v57, %v2531_v31 }
  0xf1   :  { %569 = vmatmul.bf16.gmra.mxu0 %v2522_v38  ;;  %v2546_v38 = vor.u32 %v3162_v36, %v2545_v35  ;;  %v2561_v36 = vld [vmem:[%s5200_s0 + $0xf0] sm:$0xf] }
  0xf4   :  { %2777 = vmatmul.msk.bf16.gmra.mxu1 %vm439_vm0, %v2534_v59 }
  0xf7   :  { %v3968_v53 = vpop.permute.xlu1 %1287 }
  0xff   :  { %3121 = vmatmul.msk.bf16.gmra.mxu3 %vm439_vm0, %v3778_v12  ;;  %v3932_v12 = vpop.permute.xlu0 %1267  ;;  %v3989_v3 = vpop.permute.xlu1 %1293 }
 0x100   :  { %1604 = vmatmul.bf16.gmra.mxu2 %v1350_v16  ;;  %v3159_v16 = vld [vmem:[%s5200_s0 + $0xac] sm:$0xf]  ;;  %v1355_v59 = vsel %vm1341_vm1, %v3873_v62, %v3932_v12 }
 0x101   :  { %v2542_v18 = vor.u32 %v3159_v16, %v2539_v17 }
 0x102   :  { %v1734_v24 = vpop.f32.mrf.mxu3 }
 0x103   :  { %v1565_v25 = vpop.f32.mrf.mxu2 }
 0x104   :  { %v1735_v26 = vadd.f32 %v1734_v24, %v1565_v25  ;;  %2778 = vmatmul.msk.bf16.gmra.mxu1 %vm439_vm0, %v2542_v18  ;;  %v4017_v24 = vpop.permute.xlu2 %1313 }
 0x106   :  { %1958 = vrot.lane.b32.xlu1 %v1735_v26, %s3296_s28 }
 0x107   :  { %v3955_v40 = vpop.permute.xlu0 %1273  ;;  %v4013_v20 = vpop.permute.xlu1 %1299 }
 0x10a   :  { %v1736_v28 = vpop.f32.mrf.mxu3 }
 0x10b   :  { %v1567_v30 = vpop.f32.mrf.mxu2 }
 0x10c   :  { %v1737_v32 = vadd.f32 %v1736_v28, %v1567_v30  ;;  %v4045_v41 = vpop.permute.xlu2 %1319 }
 0x10e   :  { %1960 = vrot.lane.b32.xlu2 %v1737_v32, %s3296_s28  ;;  %v1354_v32 = vsel %vm1341_vm1, %v3908_v15, %v3904_v13  ;;  %v4040_v15 = vpop.f32.mrf.mxu1 }
 0x10f   :  { %3122 = vmatmul.msk.bf16.gmra.mxu3 %vm439_vm0, %v3858_v54  ;;  %v3963_v49 = vpop.permute.xlu0 %1279  ;;  %v2529_v54 = vld [vmem:[%s5200_s0 + $0x90] sm:$0xf]  ;;  %v4021_v30 = vpop.permute.xlu1 %1305 }
 0x110   :  { %1609 = vmatmul.bf16.gmra.mxu2 %v1351_v33  ;;  %v2530_v58 = vor.u32 %v3158_v55, %v2529_v54 }
 0x112   :  { %v1739_v42 = vpop.f32.mrf.mxu3  ;;  %574 = vmatmul.bf16.gmra.mxu0 %v2530_v58 }
 0x113   :  { %v1570_v43 = vpop.f32.mrf.mxu2 }
 0x114   :  { %v1740_v44 = vadd.f32 %v1739_v42, %v1570_v43  ;;  %v2550_v42 = vor.u32 %v3161_v37, %v2547_v39  ;;  %v4053_v55 = vpop.permute.xlu2 %1325  ;;  %v3166_v37 = vld [vmem:[%s5200_s0 + $0xf8] sm:$0xf0] }
 0x115   :  { %v4027_v33 = vpop.f32.mrf.mxu0  ;;  %v2562_v39 = vor.u32 %v3166_v37, %v2561_v36  ;;  %v3168_v36 = vld [vmem:[%s5200_s0 + $0x110] sm:$0xf0]  ;;  %v3167_v37 = vld [vmem:[%s5200_s0 + $0x10c] sm:$0xf] }
 0x116   :  { %1962 = vrot.lane.b32.xlu0 %v1740_v44, %s3296_s28  ;;  %2779 = vmatmul.msk.bf16.gmra.mxu1 %vm439_vm0, %v2550_v42  ;;  %v2563_v42 = vld [vmem:[%s5200_s0 + $0xfc] sm:$0xf0] }
 0x117   :  { %v3986_v1 = vpop.permute.xlu0 %1285 }
 0x11a   :  { %v1741_v48 = vpop.f32.mrf.mxu3 }
 0x11b   :  { %v1572_v50 = vpop.f32.mrf.mxu2 }
 0x11c   :  { %v1742_v51 = vadd.f32 %v1741_v48, %v1572_v50  ;;  %v4082_v17 = vpop.permute.xlu2 %1331 }
 0x11e   :  { %1964 = vrot.lane.b32.xlu1 %v1742_v51, %s3296_s28  ;;  %v547_v51 = vpop.f32.mrf.mxu0 }
 0x11f   :  { %3123 = vmatmul.msk.bf16.gmra.mxu3 %vm439_vm0, %v1256_v11  ;;  %v3997_v56 = vpop.permute.xlu0 %1291  ;;  %v3160_v11 = vld [vmem:[%s5200_s0 + $0xb0] sm:$0xf0] }
 0x120   :  { %1614 = vmatmul.bf16.gmra.mxu2 %v1352_v52  ;;  %v2538_v2 = vor.u32 %v3160_v11, %v2537_v10  ;;  %v716_v52 = vpop.f32.mrf.mxu1 }
 0x122   :  { %v1744_v60 = vpop.f32.mrf.mxu3  ;;  %579 = vmatmul.bf16.gmra.mxu0 %v2538_v2 }
 0x123   :  { %v1575_v63 = vpop.f32.mrf.mxu2 }
 0x124   :  { %v1745_v0 = vadd.f32 %v1744_v60, %v1575_v63  ;;  %v2553_v63 = vld [vmem:[%s5200_s0 + $0xd8] sm:$0xf] }
 0x126   :  { %1966 = vrot.lane.b32.xlu2 %v1745_v0, %s3296_s28  ;;  %v4061_v60 = vpop.f32.mrf.mxu0  ;;  %v3164_v0 = vld [vmem:[%s5200_s0 + $0xe0] sm:$0xf0] }
 0x128   :  { %v4074_v62 = vpop.f32.mrf.mxu1 }
 0x12a   :  { %v1746_v4 = vpop.f32.mrf.mxu3 }
 0x12b   :  { %v1577_v5 = vpop.f32.mrf.mxu2 }
 0x12c   :  { %v1747_v6 = vadd.f32 %v1746_v4, %v1577_v5  ;;  %v3163_v4 = vld [vmem:[%s5200_s0 + $0xdc] sm:$0xf]  ;;  %v2554_v5 = vor.u32 %v3164_v0, %v2553_v63 }
 0x12e   :  { %1968 = vrot.lane.b32.xlu0 %v1747_v6, %s3296_s28  ;;  %v2555_v6 = vld [vmem:[%s5200_s0 + $0xe4] sm:$0xf0]  ;;  %v4087_v18 = vpop.f32.mrf.mxu0 }
 0x12f   :  { %3124 = vmatmul.msk.bf16.gmra.mxu3 %vm439_vm0, %v3839_v45  ;;  %v4019_v45 = vpop.permute.xlu0 %1297  ;;  %v2558_v10 = vor.u32 %v3163_v4, %v2555_v6 }
 0x130   :  { %1619 = vmatmul.bf16.gmra.mxu2 %v1353_v8 }
 0x131   :  { %2780 = vmatmul.msk.bf16.gmra.mxu1 %vm439_vm0, %v2558_v10 }
 0x132   :  { %v1749_v19 = vpop.f32.mrf.mxu3  ;;  %584 = vmatmul.bf16.gmra.mxu0 %v2546_v38  ;;  %v3165_v38 = vld [vmem:[%s5200_s0 + $0xf4] sm:$0xf] }
 0x133   :  { %v1580_v21 = vpop.f32.mrf.mxu2 }
 0x134   :  { %v1750_v23 = vadd.f32 %v1749_v19, %v1580_v21  ;;  %v4089_v19 = vpop.f32.mrf.mxu1 }
 0x136   :  { %1970 = vrot.lane.b32.xlu1 %v1750_v23, %s3296_s28 }
 0x137   :  { %v4047_v44 = vpop.permute.xlu0 %1303 }
 0x13a   :  { %v1751_v25 = vpop.f32.mrf.mxu3 }
 0x13b   :  { %v1582_v26 = vpop.f32.mrf.mxu2 }
 0x13c   :  { %v1752_v28 = vadd.f32 %v1751_v25, %v1582_v26 }
 0x13e   :  { %1972 = vrot.lane.b32.xlu2 %v1752_v28, %s3296_s28  ;;  %v1356_v28 = vsel %vm1341_vm1, %v3926_v22, %v3901_v9  ;;  %v4099_v35 = vpop.f32.mrf.mxu0  ;;  %v724_v22 = vpop.f32.mrf.mxu1 }
 0x13f   :  { %3125 = vmatmul.msk.bf16.gmra.mxu3 %vm439_vm0, %v3904_v13  ;;  %v4051_v13 = vpop.permute.xlu1 %1311  ;;  %v4055_v31 = vpop.permute.xlu0 %1309 }
 0x140   :  { %1624 = vmatmul.bf16.gmra.mxu2 %v1354_v32  ;;  %v4097_v32 = vpop.permute.xlu2 %1337 }
 0x142   :  { %v1754_v43 = vpop.f32.mrf.mxu3  ;;  %589 = vmatmul.bf16.gmra.mxu0 %v2554_v5 }
 0x143   :  { %v1585_v48 = vpop.f32.mrf.mxu2 }
 0x144   :  { %v1755_v50 = vadd.f32 %v1754_v43, %v1585_v48  ;;  %v2566_v48 = vor.u32 %v3165_v38, %v2563_v42 }
 0x146   :  { %1974 = vrot.lane.b32.xlu0 %v1755_v50, %s3296_s28  ;;  %2781 = vmatmul.msk.bf16.gmra.mxu1 %vm439_vm0, %v2566_v48  ;;  %v4126_v63 = vpop.f32.mrf.mxu0  ;;  %v4128_v0 = vpop.f32.mrf.mxu1 }
 0x147   :  { %v4079_v8 = vpop.permute.xlu1 %1317 }
 0x14a   :  { %v1756_v54 = vpop.f32.mrf.mxu3 }
 0x14b   :  { %v1587_v57 = vpop.f32.mrf.mxu2 }
 0x14c   :  { %v1757_v58 = vadd.f32 %v1756_v54, %v1587_v57 }
 0x14e   :  { %1976 = vrot.lane.b32.xlu1 %v1757_v58, %s3296_s28 }
 0x14f   :  { %3126 = vmatmul.msk.bf16.gmra.mxu3 %vm439_vm0, %v3932_v12  ;;  %v4085_v12 = vpop.permute.xlu0 %1315  ;;  %v4091_v23 = vpop.permute.xlu1 %1323 }
 0x150   :  { %1629 = vmatmul.bf16.gmra.mxu2 %v1355_v59  ;;  %v717_v59 = vadd.f32 %v716_v52, %v547_v51 }
 0x152   :  { %v1759_v11 = vpop.f32.mrf.mxu3  ;;  %594 = vmatmul.bf16.gmra.mxu0 %v2562_v39  ;;  %v2571_v39 = vld [vmem:[%s5200_s0 + $0x114] sm:$0xf0] }
 0x153   :  { %v1590_v16 = vpop.f32.mrf.mxu2  ;;  %v2574_v42 = vor.u32 %v3167_v37, %v2571_v39  ;;  %v2577_v37 = vld [vmem:[%s5200_s0 + $0x120] sm:$0xf]  ;;  %v2579_v39 = vld [vmem:[%s5200_s0 + $0x12c] sm:$0xf0] }
 0x154   :  { %v1760_v2 = vadd.f32 %v1759_v11, %v1590_v16 }
 0x156   :  { %1978 = vrot.lane.b32.xlu2 %v1760_v2, %s3296_s28  ;;  %v1357_v2 = vsel %vm1341_vm1, %v3955_v40, %v3934_v29  ;;  %v4153_v40 = vpop.f32.mrf.mxu1  ;;  %2782 = vmatmul.msk.bf16.gmra.mxu1 %vm439_vm0, %v2574_v42 }
 0x157   :  { %v4115_v43 = vpop.permute.xlu0 %1321  ;;  %v4118_v58 = vpop.permute.xlu1 %1329 }
 0x15a   :  { %v1761_v21 = vpop.f32.mrf.mxu3 }
 0x15b   :  { %v1592_v25 = vpop.f32.mrf.mxu2 }
 0x15c   :  { %v1762_v26 = vadd.f32 %v1761_v21, %v1592_v25 }
 0x15e   :  { %1980 = vrot.lane.b32.xlu0 %v1762_v26, %s3296_s28  ;;  %v4140_v26 = vpop.f32.mrf.mxu0 }
 0x15f   :  { %3127 = vmatmul.msk.bf16.gmra.mxu3 %vm439_vm0, %v3901_v9  ;;  %v4124_v9 = vld [vmem:[%s5202_s2] ss:$0 sm:$0xff]  ;;  %v4132_v11 = vpop.permute.xlu0 %1327  ;;  %v4138_v25 = vpop.permute.xlu1 %1335 }
 0x160   :  { %1634 = vmatmul.bf16.gmra.mxu2 %v1356_v28  ;;  %v2569_v28 = vld [vmem:[%s5200_s0 + $0x108] sm:$0xf] }
 0x161   :  { %v2570_v38 = vor.u32 %v3168_v36, %v2569_v28 }
 0x162   :  { %v1764_v50 = vpop.f32.mrf.mxu3 }
 0x163   :  { %v1595_v54 = vpop.f32.mrf.mxu2  ;;  %599 = vmatmul.bf16.gmra.mxu0 %v2570_v38  ;;  %v3170_v38 = vld [vmem:[%s5200_s0 + $0x128] sm:$0xf0] }
 0x164   :  { %v1765_v57 = vadd.f32 %v1764_v50, %v1595_v54 }
 0x166   :  { %1982 = vrot.lane.b32.xlu1 %v1765_v57, %s3296_s28  ;;  %v715_v57 = vadd.f32 %v4040_v15, %v4027_v33  ;;  %v1358_v33 = vsel %vm1341_vm1, %v3906_v14, %v3963_v49 }
 0x167   :  { %v4163_v54 = vpop.permute.xlu0 %1333 }
 0x168   :  { %v1961_v4 = vpop.permute.xlu2 %1960 }
 0x169   :  { %v2151_v5 = vsel %vm439_vm0, %v717_v59, %v1961_v4  ;;  %v4168_v59 = vpop.f32.mrf.mxu0  ;;  %v4170_v4 = vpop.f32.mrf.mxu1 }
 0x16a   :  { %v2219_v6 = vadd.f32 %v4124_v9, %v2151_v5  ;;  %v1766_v10 = vpop.f32.mrf.mxu3 }
 0x16b   :  { %v1597_v51 = vpop.f32.mrf.mxu2 }
 0x16c   :  { %v2283_v52 = vmax.f32 %v2219_v6, 0.0  ;;  %v1767_v16 = vadd.f32 %v1766_v10, %v1597_v51 }
 0x16e   :  { %v2347_v21 = vpack.c.bf16 %v2283_v52, %v2283_v52  ;;  %1984 = vrot.lane.b32.xlu2 %v1767_v16, %s3296_s28 }
 0x16f   :  { %3128 = vmatmul.msk.bf16.gmra.mxu3 %vm439_vm0, %v3934_v29  ;;  %v4179_v28 = vpop.permute.xlu0 %1339 }
 0x170   :  { %2412 = vst.msk [vmem:[%s5203_s3 + $0x4] sm:$0xf] %vm2410_vm2, %v2347_v21  ;;  %1639 = vmatmul.bf16.gmra.mxu2 %v1357_v2  ;;  %v725_v21 = vadd.f32 %v724_v22, %v4099_v35  ;;  %v3169_v35 = vld [vmem:[%s5200_s0 + $0x124] sm:$0xf]  ;;  %v2578_v22 = vor.u32 %v3170_v38, %v2577_v37  ;;  %v1359_v38 = vsel %vm1341_vm1, %v3958_v46, %v3929_v27 }
 0x171   :  { %v4181_v36 = vpop.f32.mrf.mxu0  ;;  %v4194_v14 = vpop.f32.mrf.mxu1  ;;  %v722_v46 = vadd.f32 %v4089_v19, %v4087_v18 }
 0x172   :  { %v1769_v48 = vpop.f32.mrf.mxu3 }
 0x173   :  { %v1600_v50 = vpop.f32.mrf.mxu2  ;;  %604 = vmatmul.bf16.gmra.mxu0 %v2578_v22 }
 0x174   :  { %v1770_v29 = vadd.f32 %v1769_v48, %v1600_v50  ;;  %v2582_v48 = vor.u32 %v3169_v35, %v2579_v39  ;;  %v2585_v39 = vld [vmem:[%s5200_s0 + $0x138] sm:$0xf] }
 0x176   :  { %1986 = vrot.lane.b32.xlu0 %v1770_v29, %s3296_s28  ;;  %2783 = vmatmul.msk.bf16.gmra.mxu1 %vm439_vm0, %v2582_v48  ;;  %v3171_v48 = vld [vmem:[%s5200_s0 + $0x13c] sm:$0xf] }
 0x178   :  { %v1959_v5 = vpop.permute.xlu1 %1958 }
 0x179   :  { %v2150_v6 = vsel %vm439_vm0, %v715_v57, %v1959_v5 }
 0x17a   :  { %v2218_v10 = vadd.f32 %v4124_v9, %v2150_v6  ;;  %v1771_v51 = vpop.f32.mrf.mxu3 }
 0x17b   :  { %v1602_v52 = vpop.f32.mrf.mxu2 }
 0x17c   :  { %v2282_v16 = vmax.f32 %v2218_v10, 0.0  ;;  %v1772_v2 = vadd.f32 %v1771_v51, %v1602_v52  ;;  %v720_v10 = vadd.f32 %v4074_v62, %v4061_v60  ;;  %v4209_v52 = vpop.f32.mrf.mxu0 }
 0x17e   :  { %v2346_v15 = vpack.c.bf16 %v2282_v16, %v2282_v16  ;;  %1988 = vrot.lane.b32.xlu1 %v1772_v2, %s3296_s28  ;;  %v4211_v16 = vpop.f32.mrf.mxu1 }
 0x17f   :  { %3129 = vmatmul.msk.bf16.gmra.mxu3 %vm439_vm0, %v3963_v49 }
 0x180   :  { %2411 = vst.msk [vmem:[%s5203_s3] sm:$0xf] %vm2410_vm2, %v2346_v15  ;;  %v1967_v42 = vpop.permute.xlu2 %1966  ;;  %1644 = vmatmul.bf16.gmra.mxu2 %v1358_v33 }
 0x181   :  { %v2154_v50 = vsel %vm439_vm0, %v725_v21, %v1967_v42  ;;  %v3172_v42 = vld [vmem:[%s5200_s0 + $0x140] sm:$0xf0] }
 0x182   :  { %v2222_v49 = vadd.f32 %v4124_v9, %v2154_v50  ;;  %v1774_v29 = vpop.f32.mrf.mxu3 }
 0x183   :  { %v1605_v57 = vpop.f32.mrf.mxu2 }
 0x184   :  { %v2286_v5 = vmax.f32 %v2222_v49, 0.0  ;;  %v1775_v6 = vadd.f32 %v1774_v29, %v1605_v57  ;;  %v4223_v22 = vpop.f32.mrf.mxu0  ;;  %v2586_v49 = vor.u32 %v3172_v42, %v2585_v39  ;;  %v2587_v29 = vld [vmem:[%s5200_s0 + $0x144] sm:$0xf0]  ;;  %v1360_v39 = vsel %vm1341_vm1, %v3986_v1, %v3968_v53 }
 0x185   :  { %v727_v1 = vadd.f32 %v4128_v0, %v4126_v63 }
 0x186   :  { %v2350_v51 = vpack.c.bf16 %v2286_v5, %v2286_v5  ;;  %1990 = vrot.lane.b32.xlu2 %v1775_v6, %s3296_s28  ;;  %v4238_v50 = vpop.f32.mrf.mxu1  ;;  %v2590_v5 = vor.u32 %v3171_v48, %v2587_v29  ;;  %609 = vmatmul.bf16.gmra.mxu0 %v2586_v49  ;;  %v3174_v49 = vld [vmem:[%s5200_s0 + $0x158] sm:$0xf0]  ;;  %v3173_v29 = vld [vmem:[%s5200_s0 + $0x154] sm:$0xf] }
 0x188   :  { %2415 = vst.msk [vmem:[%s5203_s3 + $0x10] sm:$0xf] %vm2410_vm2, %v2350_v51  ;;  %v1963_v2 = vpop.permute.xlu0 %1962  ;;  %2784 = vmatmul.msk.bf16.gmra.mxu1 %vm439_vm0, %v2590_v5 }
 0x189   :  { %v2152_v21 = vsel %vm439_vm0, %v720_v10, %v1963_v2  ;;  %v732_v2 = vadd.f32 %v4170_v4, %v4168_v59 }
 0x18a   :  { %v2220_v33 = vadd.f32 %v4124_v9, %v2152_v21  ;;  %v1776_v15 = vpop.f32.mrf.mxu3 }
 0x18b   :  { %v1607_v37 = vpop.f32.mrf.mxu2 }
 0x18c   :  { %v2284_v60 = vmax.f32 %v2220_v33, 0.0  ;;  %v1777_v62 = vadd.f32 %v1776_v15, %v1607_v37  ;;  %v4253_v33 = vpop.f32.mrf.mxu0 }
 0x18e   :  { %v2348_v35 = vpack.c.bf16 %v2284_v60, %v2284_v60  ;;  %1992 = vrot.lane.b32.xlu0 %v1777_v62, %s3296_s28  ;;  %v4255_v15 = vpop.f32.mrf.mxu1 }
 0x18f   :  { %3130 = vmatmul.msk.bf16.gmra.mxu3 %vm439_vm0, %v3929_v27 }
 0x190   :  { %2413 = vst.msk [vmem:[%s5203_s3 + $0x8] sm:$0xf] %vm2410_vm2, %v2348_v35  ;;  %v1965_v57 = vpop.permute.xlu1 %1964  ;;  %1649 = vmatmul.bf16.gmra.mxu2 %v1359_v38 }
 0x191   :  { %v2153_v18 = vsel %vm439_vm0, %v722_v46, %v1965_v57  ;;  %v2593_v46 = vld [vmem:[%s5200_s0 + $0x150] sm:$0xf] }
 0x192   :  { %v2221_v27 = vadd.f32 %v4124_v9, %v2153_v18  ;;  %v1779_v19 = vpop.f32.mrf.mxu3  ;;  %v2594_v5 = vor.u32 %v3174_v49, %v2593_v46  ;;  %v2595_v18 = vld [vmem:[%s5200_s0 + $0x15c] sm:$0xf0] }
 0x193   :  { %v1610_v6 = vpop.f32.mrf.mxu2 }
 0x194   :  { %v2285_v10 = vmax.f32 %v2221_v27, 0.0  ;;  %v1780_v51 = vadd.f32 %v1779_v19, %v1610_v6  ;;  %v4267_v48 = vpop.f32.mrf.mxu0  ;;  %v2598_v19 = vor.u32 %v3173_v29, %v2595_v18  ;;  %v2601_v29 = vld [vmem:[%s5200_s0 + $0x168] sm:$0xf] }
 0x196   :  { %v2349_v21 = vpack.c.bf16 %v2285_v10, %v2285_v10  ;;  %1994 = vrot.lane.b32.xlu1 %v1780_v51, %s3296_s28  ;;  %v4282_v57 = vpop.f32.mrf.mxu1  ;;  %614 = vmatmul.bf16.gmra.mxu0 %v2594_v5  ;;  %v2603_v5 = vld [vmem:[%s5200_s0 + $0x174] sm:$0xf0] }
 0x198   :  { %2414 = vst.msk [vmem:[%s5203_s3 + $0xc] sm:$0xf] %vm2410_vm2, %v2349_v21  ;;  %v1973_v37 = vpop.permute.xlu2 %1972  ;;  %2785 = vmatmul.msk.bf16.gmra.mxu1 %vm439_vm0, %v2598_v19 }
 0x199   :  { %v2157_v60 = vsel %vm439_vm0, %v732_v2, %v1973_v37  ;;  %v730_v2 = vadd.f32 %v4153_v40, %v4140_v26 }
 0x19a   :  { %v2225_v62 = vadd.f32 %v4124_v9, %v2157_v60  ;;  %v1781_v38 = vpop.f32.mrf.mxu3 }
 0x19b   :  { %v1612_v35 = vpop.f32.mrf.mxu2 }
 0x19c   :  { %v2289_v59 = vmax.f32 %v2225_v62, 0.0  ;;  %v1782_v4 = vadd.f32 %v1781_v38, %v1612_v35  ;;  %v4297_v37 = vpop.f32.mrf.mxu0 }
 0x19e   :  { %v2353_v42 = vpack.c.bf16 %v2289_v59, %v2289_v59  ;;  %1996 = vrot.lane.b32.xlu2 %v1782_v4, %s3296_s28  ;;  %v4299_v60 = vpop.f32.mrf.mxu1 }
 0x19f   :  { %3131 = vmatmul.msk.bf16.gmra.mxu3 %vm439_vm0, %v3968_v53 }
 0x1a0   :  { %2418 = vst.msk [vmem:[%s5203_s3 + $0x1c] sm:$0xf] %vm2410_vm2, %v2353_v42  ;;  %1654 = vmatmul.bf16.gmra.mxu2 %v1360_v39  ;;  %v1969_v27 = vpop.permute.xlu0 %1968  ;;  %v740_v39 = vadd.f32 %v4238_v50, %v4223_v22  ;;  %v1361_v42 = vsel %vm1341_vm1, %v3939_v34, %v3997_v56  ;;  %v3175_v22 = vld [vmem:[%s5200_s0 + $0x16c] sm:$0xf] }
 0x1a1   :  { %v2155_v63 = vsel %vm439_vm0, %v727_v1, %v1969_v27  ;;  %v3176_v1 = vld [vmem:[%s5200_s0 + $0x170] sm:$0xf0]  ;;  %v2606_v27 = vor.u32 %v3175_v22, %v2603_v5 }
 0x1a2   :  { %v2223_v53 = vadd.f32 %v4124_v9, %v2155_v63  ;;  %v1784_v0 = vpop.f32.mrf.mxu3  ;;  %v2602_v50 = vor.u32 %v3176_v1, %v2601_v29  ;;  %v3177_v29 = vld [vmem:[%s5200_s0 + $0x184] sm:$0xf] }
 0x1a3   :  { %v1615_v6 = vpop.f32.mrf.mxu2 }
 0x1a4   :  { %v2287_v10 = vmax.f32 %v2223_v53, 0.0  ;;  %v1785_v51 = vadd.f32 %v1784_v0, %v1615_v6  ;;  %v4313_v49 = vpop.f32.mrf.mxu0 }
 0x1a6   :  { %v2351_v21 = vpack.c.bf16 %v2287_v10, %v2287_v10  ;;  %1998 = vrot.lane.b32.xlu0 %v1785_v51, %s3296_s28  ;;  %v4326_v34 = vpop.f32.mrf.mxu1  ;;  %619 = vmatmul.bf16.gmra.mxu0 %v2602_v50  ;;  %v735_v10 = vadd.f32 %v4194_v14, %v4181_v36  ;;  %v2611_v50 = vld [vmem:[%s5200_s0 + $0x18c] sm:$0xf0] }
 0x1a8   :  { %2416 = vst.msk [vmem:[%s5203_s3 + $0x14] sm:$0xf] %vm2410_vm2, %v2351_v21  ;;  %v1971_v62 = vpop.permute.xlu1 %1970  ;;  %2786 = vmatmul.msk.bf16.gmra.mxu1 %vm439_vm0, %v2606_v27 }
 0x1a9   :  { %v2156_v38 = vsel %vm439_vm0, %v730_v2, %v1971_v62 }
 0x1aa   :  { %v2224_v35 = vadd.f32 %v4124_v9, %v2156_v38  ;;  %v1786_v59 = vpop.f32.mrf.mxu3 }
 0x1ab   :  { %v1617_v4 = vpop.f32.mrf.mxu2 }
 0x1ac   :  { %v2288_v26 = vmax.f32 %v2224_v35, 0.0  ;;  %v1787_v40 = vadd.f32 %v1786_v59, %v1617_v4  ;;  %v4341_v2 = vpop.f32.mrf.mxu0 }
 0x1ae   :  { %v2352_v46 = vpack.c.bf16 %v2288_v26, %v2288_v26  ;;  %2000 = vrot.lane.b32.xlu1 %v1787_v40, %s3296_s28  ;;  %v4343_v21 = vpop.f32.mrf.mxu1  ;;  %v1362_v26 = vsel %vm1341_vm1, %v3989_v3, %v3961_v47  ;;  %v737_v3 = vadd.f32 %v4211_v16, %v4209_v52 }
 0x1af   :  { %3132 = vmatmul.msk.bf16.gmra.mxu3 %vm439_vm0, %v3997_v56 }
 0x1b0   :  { %2417 = vst.msk [vmem:[%s5203_s3 + $0x18] sm:$0xf] %vm2410_vm2, %v2352_v46  ;;  %v1979_v18 = vpop.permute.xlu2 %1978  ;;  %1659 = vmatmul.bf16.gmra.mxu2 %v1361_v42  ;;  %v2609_v42 = vld [vmem:[%s5200_s0 + $0x180] sm:$0xf]  ;;  %v3178_v46 = vld [vmem:[%s5200_s0 + $0x188] sm:$0xf0] }
 0x1b1   :  { %v2160_v19 = vsel %vm439_vm0, %v740_v39, %v1979_v18  ;;  %v2610_v22 = vor.u32 %v3178_v46, %v2609_v42  ;;  %v2614_v18 = vor.u32 %v3177_v29, %v2611_v50  ;;  %v2619_v29 = vld [vmem:[%s5200_s0 + $0x1a4] sm:$0xf0] }
 0x1b2   :  { %v2228_v56 = vadd.f32 %v4124_v9, %v2160_v19  ;;  %v1789_v63 = vpop.f32.mrf.mxu3 }
 0x1b3   :  { %v1620_v53 = vpop.f32.mrf.mxu2 }
 0x1b4   :  { %v2292_v0 = vmax.f32 %v2228_v56, 0.0  ;;  %v1790_v6 = vadd.f32 %v1789_v63, %v1620_v53  ;;  %v4355_v39 = vpop.f32.mrf.mxu0  ;;  %v747_v63 = vadd.f32 %v4299_v60, %v4297_v37 }
 0x1b6   :  { %v2356_v51 = vpack.c.bf16 %v2292_v0, %v2292_v0  ;;  %2002 = vrot.lane.b32.xlu2 %v1790_v6, %s3296_s28  ;;  %v4370_v1 = vpop.f32.mrf.mxu1  ;;  %624 = vmatmul.bf16.gmra.mxu0 %v2610_v22 }
 0x1b8   :  { %2421 = vst.msk [vmem:[%s5203_s3 + $0x28] sm:$0xf] %vm2410_vm2, %v2356_v51  ;;  %v1975_v62 = vpop.permute.xlu0 %1974  ;;  %2787 = vmatmul.msk.bf16.gmra.mxu1 %vm439_vm0, %v2614_v18 }
 0x1b9   :  { %v2158_v38 = vsel %vm439_vm0, %v735_v10, %v1975_v62 }
 0x1ba   :  { %v2226_v35 = vadd.f32 %v4124_v9, %v2158_v38  ;;  %v1791_v59 = vpop.f32.mrf.mxu3 }
 0x1bb   :  { %v1622_v4 = vpop.f32.mrf.mxu2 }
 0x1bc   :  { %v2290_v36 = vmax.f32 %v2226_v35, 0.0  ;;  %v1792_v14 = vadd.f32 %v1791_v59, %v1622_v4  ;;  %v4385_v0 = vpop.f32.mrf.mxu0  ;;  %v1363_v59 = vsel %vm1341_vm1, %v4019_v45, %v4013_v20  ;;  %v742_v45 = vadd.f32 %v4255_v15, %v4253_v33 }
 0x1be   :  { %v2354_v40 = vpack.c.bf16 %v2290_v36, %v2290_v36  ;;  %2004 = vrot.lane.b32.xlu0 %v1792_v14, %s3296_s28  ;;  %v4387_v6 = vpop.f32.mrf.mxu1  ;;  %v2617_v14 = vld [vmem:[%s5200_s0 + $0x198] sm:$0xf] }
 0x1bf   :  { %3133 = vmatmul.msk.bf16.gmra.mxu3 %vm439_vm0, %v3961_v47 }
 0x1c0   :  { %2419 = vst.msk [vmem:[%s5203_s3 + $0x20] sm:$0xf] %vm2410_vm2, %v2354_v40  ;;  %v1977_v5 = vpop.permute.xlu1 %1976  ;;  %1664 = vmatmul.bf16.gmra.mxu2 %v1362_v26  ;;  %v3180_v26 = vld [vmem:[%s5200_s0 + $0x1a0] sm:$0xf0]  ;;  %v3179_v40 = vld [vmem:[%s5200_s0 + $0x19c] sm:$0xf] }
 0x1c1   :  { %v2159_v52 = vsel %vm439_vm0, %v737_v3, %v1977_v5  ;;  %v2618_v46 = vor.u32 %v3180_v26, %v2617_v14  ;;  %v2622_v22 = vor.u32 %v3179_v40, %v2619_v29 }
 0x1c2   :  { %v2227_v47 = vadd.f32 %v4124_v9, %v2159_v52  ;;  %v1794_v16 = vpop.f32.mrf.mxu3  ;;  %v745_v52 = vadd.f32 %v4282_v57, %v4267_v48 }
 0x1c3   :  { %v1625_v27 = vpop.f32.mrf.mxu2 }
 0x1c4   :  { %v2291_v19 = vmax.f32 %v2227_v47, 0.0  ;;  %v1795_v56 = vadd.f32 %v1794_v16, %v1625_v27  ;;  %v4399_v36 = vpop.f32.mrf.mxu0 }
 0x1c6   :  { %v2355_v53 = vpack.c.bf16 %v2291_v19, %v2291_v19  ;;  %2006 = vrot.lane.b32.xlu1 %v1795_v56, %s3296_s28  ;;  %v4414_v42 = vpop.f32.mrf.mxu1  ;;  %629 = vmatmul.bf16.gmra.mxu0 %v2618_v46 }
 0x1c8   :  { %2420 = vst.msk [vmem:[%s5203_s3 + $0x24] sm:$0xf] %vm2410_vm2, %v2355_v53  ;;  %v1985_v10 = vpop.permute.xlu2 %1984  ;;  %2788 = vmatmul.msk.bf16.gmra.mxu1 %vm439_vm0, %v2622_v22 }
 0x1c9   :  { %v2163_v51 = vsel %vm439_vm0, %v747_v63, %v1985_v10 }
 0x1ca   :  { %v2231_v62 = vadd.f32 %v4124_v9, %v2163_v51  ;;  %v1796_v38 = vpop.f32.mrf.mxu3  ;;  %v755_v51 = vadd.f32 %v4370_v1, %v4355_v39  ;;  %v3181_v39 = vld [vmem:[%s5200_s0 + $0x1b4] sm:$0xf] }
 0x1cb   :  { %v1627_v35 = vpop.f32.mrf.mxu2 }
 0x1cc   :  { %v2295_v37 = vmax.f32 %v2231_v62, 0.0  ;;  %v1797_v60 = vadd.f32 %v1796_v38, %v1627_v35  ;;  %v4429_v16 = vpop.f32.mrf.mxu0  ;;  %v1364_v62 = vsel %vm1341_vm1, %v3983_v61, %v4047_v44 }
 0x1ce   :  { %v2359_v4 = vpack.c.bf16 %v2295_v37, %v2295_v37  ;;  %2008 = vrot.lane.b32.xlu2 %v1797_v60, %s3296_s28  ;;  %v4431_v27 = vpop.f32.mrf.mxu1  ;;  %v2625_v37 = vld [vmem:[%s5200_s0 + $0x1b0] sm:$0xf]  ;;  %v3182_v60 = vld [vmem:[%s5200_s0 + $0x1b8] sm:$0xf0] }
 0x1cf   :  { %3134 = vmatmul.msk.bf16.gmra.mxu3 %vm439_vm0, %v4013_v20  ;;  %v2626_v1 = vor.u32 %v3182_v60, %v2625_v37 }
 0x1d0   :  { %2424 = vst.msk [vmem:[%s5203_s3 + $0x34] sm:$0xf] %vm2410_vm2, %v2359_v4  ;;  %1669 = vmatmul.bf16.gmra.mxu2 %v1363_v59  ;;  %v1981_v3 = vpop.permute.xlu0 %1980  ;;  %v2627_v59 = vld [vmem:[%s5200_s0 + $0x1bc] sm:$0xf0] }
 0x1d1   :  { %v2161_v33 = vsel %vm439_vm0, %v742_v45, %v1981_v3  ;;  %v2630_v14 = vor.u32 %v3181_v39, %v2627_v59  ;;  %v750_v3 = vadd.f32 %v4326_v34, %v4313_v49 }
 0x1d2   :  { %v2229_v20 = vadd.f32 %v4124_v9, %v2161_v33  ;;  %v1799_v15 = vpop.f32.mrf.mxu3 }
 0x1d3   :  { %v1630_v50 = vpop.f32.mrf.mxu2 }
 0x1d4   :  { %v2293_v5 = vmax.f32 %v2229_v20, 0.0  ;;  %v1800_v18 = vadd.f32 %v1799_v15, %v1630_v50  ;;  %v4445_v35 = vpop.f32.mrf.mxu0 }
 0x1d6   :  { %v2357_v47 = vpack.c.bf16 %v2293_v5, %v2293_v5  ;;  %2010 = vrot.lane.b32.xlu0 %v1800_v18, %s3296_s28  ;;  %v4458_v61 = vpop.f32.mrf.mxu1  ;;  %634 = vmatmul.bf16.gmra.mxu0 %v2626_v1  ;;  %v762_v1 = vadd.f32 %v4431_v27, %v4429_v16 }
 0x1d8   :  { %2422 = vst.msk [vmem:[%s5203_s3 + $0x2c] sm:$0xf] %vm2410_vm2, %v2357_v47  ;;  %v1983_v19 = vpop.permute.xlu1 %1982  ;;  %2789 = vmatmul.msk.bf16.gmra.mxu1 %vm439_vm0, %v2630_v14  ;;  %v1365_v47 = vsel %vm1341_vm1, %v4021_v30, %v3991_v7  ;;  %v752_v30 = vadd.f32 %v4343_v21, %v4341_v2 }
 0x1d9   :  { %v2162_v56 = vsel %vm439_vm0, %v745_v52, %v1983_v19 }
 0x1da   :  { %v2230_v63 = vadd.f32 %v4124_v9, %v2162_v56  ;;  %v1801_v53 = vpop.f32.mrf.mxu3 }
 0x1db   :  { %v1632_v10 = vpop.f32.mrf.mxu2 }
 0x1dc   :  { %v2294_v48 = vmax.f32 %v2230_v63, 0.0  ;;  %v1802_v57 = vadd.f32 %v1801_v53, %v1632_v10  ;;  %v4473_v33 = vpop.f32.mrf.mxu0  ;;  %v2633_v63 = vld [vmem:[%s5200_s0 + $0x1c8] sm:$0xf]  ;;  %v3184_v53 = vld [vmem:[%s5200_s0 + $0x1d0] sm:$0xf0] }
 0x1dd   :  { %v3183_v10 = vld [vmem:[%s5200_s0 + $0x1cc] sm:$0xf] }
 0x1de   :  { %v2358_v38 = vpack.c.bf16 %v2294_v48, %v2294_v48  ;;  %2012 = vrot.lane.b32.xlu1 %v1802_v57, %s3296_s28  ;;  %v4475_v20 = vpop.f32.mrf.mxu1  ;;  %v2634_v57 = vor.u32 %v3184_v53, %v2633_v63 }
 0x1df   :  { %3135 = vmatmul.msk.bf16.gmra.mxu3 %vm439_vm0, %v4047_v44 }
 0x1e0   :  { %2423 = vst.msk [vmem:[%s5203_s3 + $0x30] sm:$0xf] %vm2410_vm2, %v2358_v38  ;;  %v1991_v4 = vpop.permute.xlu2 %1990  ;;  %1674 = vmatmul.bf16.gmra.mxu2 %v1364_v62 }
 0x1e1   :  { %v2166_v26 = vsel %vm439_vm0, %v755_v51, %v1991_v4  ;;  %v2635_v51 = vld [vmem:[%s5200_s0 + $0x1d4] sm:$0xf0] }
 0x1e2   :  { %v2234_v44 = vadd.f32 %v4124_v9, %v2166_v26  ;;  %v1804_v40 = vpop.f32.mrf.mxu3  ;;  %v2638_v38 = vor.u32 %v3183_v10, %v2635_v51  ;;  %v760_v10 = vadd.f32 %v4414_v42, %v4399_v36 }
 0x1e3   :  { %v1635_v45 = vpop.f32.mrf.mxu2 }
 0x1e4   :  { %v2298_v46 = vmax.f32 %v2234_v44, 0.0  ;;  %v1805_v29 = vadd.f32 %v1804_v40, %v1635_v45  ;;  %v4487_v56 = vpop.f32.mrf.mxu0 }
 0x1e6   :  { %v2362_v22 = vpack.c.bf16 %v2298_v46, %v2298_v46  ;;  %2014 = vrot.lane.b32.xlu2 %v1805_v29, %s3296_s28  ;;  %v4502_v48 = vpop.f32.mrf.mxu1  ;;  %639 = vmatmul.bf16.gmra.mxu0 %v2634_v57  ;;  %v1366_v29 = vsel %vm1341_vm1, %v4055_v31, %v4051_v13  ;;  %v757_v31 = vadd.f32 %v4387_v6, %v4385_v0 }
 0x1e8   :  { %2427 = vst.msk [vmem:[%s5203_s3 + $0x40] sm:$0xf] %vm2410_vm2, %v2362_v22  ;;  %v1987_v15 = vpop.permute.xlu0 %1986  ;;  %2790 = vmatmul.msk.bf16.gmra.mxu1 %vm439_vm0, %v2638_v38 }
 0x1e9   :  { %v2164_v50 = vsel %vm439_vm0, %v750_v3, %v1987_v15  ;;  %v2641_v15 = vld [vmem:[%s5200_s0 + $0x1e0] sm:$0xf] }
 0x1ea   :  { %v2232_v5 = vadd.f32 %v4124_v9, %v2164_v50  ;;  %v1806_v18 = vpop.f32.mrf.mxu3  ;;  %v3186_v50 = vld [vmem:[%s5200_s0 + $0x1e8] sm:$0xf0] }
 0x1eb   :  { %v1637_v52 = vpop.f32.mrf.mxu2 }
 0x1ec   :  { %v2296_v49 = vmax.f32 %v2232_v5, 0.0  ;;  %v1807_v34 = vadd.f32 %v1806_v18, %v1637_v52  ;;  %v4517_v4 = vpop.f32.mrf.mxu0  ;;  %v3185_v5 = vld [vmem:[%s5200_s0 + $0x1e4] sm:$0xf]  ;;  %v2642_v52 = vor.u32 %v3186_v50, %v2641_v15  ;;  %v765_v15 = vadd.f32 %v4458_v61, %v4445_v35 }
 0x1ee   :  { %v2360_v19 = vpack.c.bf16 %v2296_v49, %v2296_v49  ;;  %2016 = vrot.lane.b32.xlu0 %v1807_v34, %s3296_s28  ;;  %v4519_v14 = vpop.f32.mrf.mxu1  ;;  %v2643_v49 = vld [vmem:[%s5200_s0 + $0x1ec] sm:$0xf0] }
 0x1ef   :  { %3136 = vmatmul.msk.bf16.gmra.mxu3 %vm439_vm0, %v3991_v7 }
 0x1f0   :  { %2425 = vst.msk [vmem:[%s5203_s3 + $0x38] sm:$0xf] %vm2410_vm2, %v2360_v19  ;;  %v1989_v62 = vpop.permute.xlu1 %1988  ;;  %1679 = vmatmul.bf16.gmra.mxu2 %v1365_v47  ;;  %v2646_v47 = vor.u32 %v3185_v5, %v2643_v49 }
 0x1f1   :  { %v2165_v2 = vsel %vm439_vm0, %v752_v30, %v1989_v62 }
 0x1f2   :  { %v2233_v7 = vadd.f32 %v4124_v9, %v2165_v2  ;;  %v1809_v21 = vpop.f32.mrf.mxu3 }
 0x1f3   :  { %v1640_v37 = vpop.f32.mrf.mxu2 }
 0x1f4   :  { %v2297_v60 = vmax.f32 %v2233_v7, 0.0  ;;  %v1810_v39 = vadd.f32 %v1809_v21, %v1640_v37  ;;  %v4531_v22 = vpop.f32.mrf.mxu0  ;;  %v770_v37 = vadd.f32 %v4502_v48, %v4487_v56  ;;  %v3187_v56 = vld [vmem:[%s5200_s0 + $0x1fc] sm:$0xf] }
 0x1f6   :  { %v2361_v59 = vpack.c.bf16 %v2297_v60, %v2297_v60  ;;  %2018 = vrot.lane.b32.xlu1 %v1810_v39, %s3296_s28  ;;  %v4546_v18 = vpop.f32.mrf.mxu1  ;;  %644 = vmatmul.bf16.gmra.mxu0 %v2642_v52  ;;  %v1367_v60 = vsel %vm1341_vm1, %v4017_v24, %v4085_v12 }
 0x1f8   :  { %2426 = vst.msk [vmem:[%s5203_s3 + $0x3c] sm:$0xf] %vm2410_vm2, %v2361_v59  ;;  %v1997_v26 = vpop.permute.xlu2 %1996  ;;  %2791 = vmatmul.msk.bf16.gmra.mxu1 %vm439_vm0, %v2646_v47  ;;  %v2649_v59 = vld [vmem:[%s5200_s0 + $0x1f8] sm:$0xf] }
 0x1f9   :  { %v2169_v44 = vsel %vm439_vm0, %v762_v1, %v1997_v26  ;;  %v3188_v26 = vld [vmem:[%s5200_s0 + $0x200] sm:$0xf0] }
 0x1fa   :  { %v2237_v40 = vadd.f32 %v4124_v9, %v2169_v44  ;;  %v1811_v45 = vpop.f32.mrf.mxu3  ;;  %v2650_v48 = vor.u32 %v3188_v26, %v2649_v59  ;;  %v2651_v44 = vld [vmem:[%s5200_s0 + $0x204] sm:$0xf0] }
 0x1fb   :  { %v1642_v46 = vpop.f32.mrf.mxu2 }
 0x1fc   :  { %v2301_v16 = vmax.f32 %v2237_v40, 0.0  ;;  %v1812_v27 = vadd.f32 %v1811_v45, %v1642_v46  ;;  %v4561_v57 = vpop.f32.mrf.mxu0  ;;  %v2654_v45 = vor.u32 %v3187_v56, %v2651_v44 }
 0x1fe   :  { %v2365_v3 = vpack.c.bf16 %v2301_v16, %v2301_v16  ;;  %2020 = vrot.lane.b32.xlu2 %v1812_v27, %s3296_s28  ;;  %v4563_v51 = vpop.f32.mrf.mxu1 }
 0x1ff   :  { %3137 = vmatmul.msk.bf16.gmra.mxu3 %vm439_vm0, %v4051_v13 }
 0x200   :  { %2430 = vst.msk [vmem:[%s5203_s3 + $0x4c] sm:$0xf] %vm2410_vm2, %v2365_v3  ;;  %1684 = vmatmul.bf16.gmra.mxu2 %v1366_v29  ;;  %v1993_v34 = vpop.permute.xlu0 %1992 }
 0x201   :  { %v2167_v0 = vsel %vm439_vm0, %v757_v31, %v1993_v34 }
 0x202   :  { %v2235_v13 = vadd.f32 %v4124_v9, %v2167_v0  ;;  %v1814_v6 = vpop.f32.mrf.mxu3 }
 0x203   :  { %v1645_v19 = vpop.f32.mrf.mxu2 }
 0x204   :  { %v2299_v63 = vmax.f32 %v2235_v13, 0.0  ;;  %v1815_v53 = vadd.f32 %v1814_v6, %v1645_v19  ;;  %v4577_v1 = vpop.f32.mrf.mxu0  ;;  %v1368_v13 = vsel %vm1341_vm1, %v4079_v8, %v4045_v41  ;;  %v767_v8 = vadd.f32 %v4475_v20, %v4473_v33 }
 0x206   :  { %v2363_v30 = vpack.c.bf16 %v2299_v63, %v2299_v63  ;;  %2022 = vrot.lane.b32.xlu0 %v1815_v53, %s3296_s28  ;;  %v4590_v24 = vpop.f32.mrf.mxu1  ;;  %649 = vmatmul.bf16.gmra.mxu0 %v2650_v48  ;;  %v2657_v63 = vld [vmem:[%s5200_s0 + $0x210] sm:$0xf]  ;;  %v3190_v53 = vld [vmem:[%s5200_s0 + $0x218] sm:$0xf0] }
 0x208   :  { %2428 = vst.msk [vmem:[%s5203_s3 + $0x44] sm:$0xf] %vm2410_vm2, %v2363_v30  ;;  %v1995_v62 = vpop.permute.xlu1 %1994  ;;  %2792 = vmatmul.msk.bf16.gmra.mxu1 %vm439_vm0, %v2654_v45  ;;  %v1369_v45 = vsel %vm1341_vm1, %v4115_v43, %v4091_v23  ;;  %v772_v43 = vadd.f32 %v4519_v14, %v4517_v4 }
 0x209   :  { %v2168_v38 = vsel %vm439_vm0, %v760_v10, %v1995_v62  ;;  %v3189_v10 = vld [vmem:[%s5200_s0 + $0x214] sm:$0xf]  ;;  %v2658_v62 = vor.u32 %v3190_v53, %v2657_v63 }
 0x20a   :  { %v2236_v2 = vadd.f32 %v4124_v9, %v2168_v38  ;;  %v1816_v7 = vpop.f32.mrf.mxu3  ;;  %v2659_v38 = vld [vmem:[%s5200_s0 + $0x21c] sm:$0xf0] }
 0x20b   :  { %v1647_v21 = vpop.f32.mrf.mxu2 }
 0x20c   :  { %v2300_v36 = vmax.f32 %v2236_v2, 0.0  ;;  %v1817_v42 = vadd.f32 %v1816_v7, %v1647_v21  ;;  %v4605_v5 = vpop.f32.mrf.mxu0  ;;  %v2662_v7 = vor.u32 %v3189_v10, %v2659_v38 }
 0x20e   :  { %v2364_v39 = vpack.c.bf16 %v2300_v36, %v2300_v36  ;;  %2024 = vrot.lane.b32.xlu1 %v1817_v42, %s3296_s28  ;;  %v4607_v31 = vpop.f32.mrf.mxu1 }
 0x20f   :  { %3138 = vmatmul.msk.bf16.gmra.mxu3 %vm439_vm0, %v4085_v12 }
 0x210   :  { %2429 = vst.msk [vmem:[%s5203_s3 + $0x48] sm:$0xf] %vm2410_vm2, %v2364_v39  ;;  %v2003_v40 = vpop.permute.xlu2 %2002  ;;  %1689 = vmatmul.bf16.gmra.mxu2 %v1367_v60 }
 0x211   :  { %v2172_v46 = vsel %vm439_vm0, %v770_v37, %v2003_v40  ;;  %v777_v37 = vadd.f32 %v4563_v51, %v4561_v57 }
 0x212   :  { %v2240_v12 = vadd.f32 %v4124_v9, %v2172_v46  ;;  %v1819_v16 = vpop.f32.mrf.mxu3 }
 0x213   :  { %v1650_v27 = vpop.f32.mrf.mxu2 }
 0x214   :  { %v2304_v29 = vmax.f32 %v2240_v12, 0.0  ;;  %v1820_v3 = vadd.f32 %v1819_v16, %v1650_v27  ;;  %v4619_v19 = vpop.f32.mrf.mxu0  ;;  %v2665_v16 = vld [vmem:[%s5200_s0 + $0x228] sm:$0xf]  ;;  %v3192_v27 = vld [vmem:[%s5200_s0 + $0x230] sm:$0xf0] }
 0x216   :  { %v2368_v50 = vpack.c.bf16 %v2304_v29, %v2304_v29  ;;  %2026 = vrot.lane.b32.xlu2 %v1820_v3, %s3296_s28  ;;  %v4634_v30 = vpop.f32.mrf.mxu1  ;;  %654 = vmatmul.bf16.gmra.mxu0 %v2658_v62  ;;  %v3191_v29 = vld [vmem:[%s5200_s0 + $0x22c] sm:$0xf] }
 0x217   :  { %v785_v38 = vadd.f32 %v4634_v30, %v4619_v19  ;;  %v3193_v19 = vld [vmem:[%s5200_s0 + $0x244] sm:$0xf] }
 0x218   :  { %2433 = vst.msk [vmem:[%s5203_s3 + $0x58] sm:$0xf] %vm2410_vm2, %v2368_v50  ;;  %v1999_v52 = vpop.permute.xlu0 %1998  ;;  %2793 = vmatmul.msk.bf16.gmra.mxu1 %vm439_vm0, %v2662_v7  ;;  %v2667_v50 = vld [vmem:[%s5200_s0 + $0x234] sm:$0xf0] }
 0x219   :  { %v2170_v49 = vsel %vm439_vm0, %v765_v15, %v1999_v52  ;;  %v2666_v15 = vor.u32 %v3192_v27, %v2665_v16 }
 0x21a   :  { %v2238_v34 = vadd.f32 %v4124_v9, %v2170_v49  ;;  %v1821_v47 = vpop.f32.mrf.mxu3  ;;  %v2670_v49 = vor.u32 %v3191_v29, %v2667_v50 }
 0x21b   :  { %v1652_v0 = vpop.f32.mrf.mxu2 }
 0x21c   :  { %v2302_v35 = vmax.f32 %v2238_v34, 0.0  ;;  %v1822_v61 = vadd.f32 %v1821_v47, %v1652_v0  ;;  %v4649_v39 = vpop.f32.mrf.mxu0 }
 0x21e   :  { %v2366_v6 = vpack.c.bf16 %v2302_v35, %v2302_v35  ;;  %2028 = vrot.lane.b32.xlu0 %v1822_v61, %s3296_s28  ;;  %v4651_v59 = vpop.f32.mrf.mxu1  ;;  %v775_v35 = vadd.f32 %v4546_v18, %v4531_v22 }
 0x21f   :  { %3139 = vmatmul.msk.bf16.gmra.mxu3 %vm439_vm0, %v4045_v41 }
 0x220   :  { %2431 = vst.msk [vmem:[%s5203_s3 + $0x50] sm:$0xf] %vm2410_vm2, %v2366_v6  ;;  %v2001_v2 = vpop.permute.xlu1 %2000  ;;  %1694 = vmatmul.bf16.gmra.mxu2 %v1368_v13 }
 0x221   :  { %v2171_v33 = vsel %vm439_vm0, %v767_v8, %v2001_v2  ;;  %v1370_v2 = vsel %vm1341_vm1, %v4053_v55, %v4132_v11 }
 0x222   :  { %v2239_v41 = vadd.f32 %v4124_v9, %v2171_v33  ;;  %v1824_v20 = vpop.f32.mrf.mxu3 }
 0x223   :  { %v1655_v21 = vpop.f32.mrf.mxu2 }
 0x224   :  { %v2303_v36 = vmax.f32 %v2239_v41, 0.0  ;;  %v1825_v42 = vadd.f32 %v1824_v20, %v1655_v21  ;;  %v4663_v12 = vpop.f32.mrf.mxu0  ;;  %v2673_v41 = vld [vmem:[%s5200_s0 + $0x240] sm:$0xf]  ;;  %v3194_v20 = vld [vmem:[%s5200_s0 + $0x248] sm:$0xf0] }
 0x225   :  { %v2674_v30 = vor.u32 %v3194_v20, %v2673_v41  ;;  %v2675_v21 = vld [vmem:[%s5200_s0 + $0x24c] sm:$0xf0]  ;;  %v1372_v41 = vsel %vm1341_vm1, %v4163_v54, %v4138_v25  ;;  %v787_v54 = vadd.f32 %v4651_v59, %v4649_v39 }
 0x226   :  { %v2367_v60 = vpack.c.bf16 %v2303_v36, %v2303_v36  ;;  %2030 = vrot.lane.b32.xlu1 %v1825_v42, %s3296_s28  ;;  %v4678_v3 = vpop.f32.mrf.mxu1  ;;  %659 = vmatmul.bf16.gmra.mxu0 %v2666_v15  ;;  %v2678_v42 = vor.u32 %v3193_v19, %v2675_v21  ;;  %v3198_v21 = vld [vmem:[%s5200_s0 + $0x278] sm:$0xf0] }
 0x228   :  { %2432 = vst.msk [vmem:[%s5203_s3 + $0x54] sm:$0xf] %vm2410_vm2, %v2367_v60  ;;  %v2009_v26 = vpop.permute.xlu2 %2008  ;;  %2794 = vmatmul.msk.bf16.gmra.mxu1 %vm439_vm0, %v2670_v49  ;;  %v3196_v49 = vld [vmem:[%s5200_s0 + $0x260] sm:$0xf0] }
 0x229   :  { %v2175_v56 = vsel %vm439_vm0, %v777_v37, %v2009_v26 }
 0x22a   :  { %v2243_v48 = vadd.f32 %v4124_v9, %v2175_v56  ;;  %v1826_v44 = vpop.f32.mrf.mxu3 }
 0x22b   :  { %v1657_v40 = vpop.f32.mrf.mxu2 }
 0x22c   :  { %v2307_v57 = vmax.f32 %v2243_v48, 0.0  ;;  %v1827_v51 = vadd.f32 %v1826_v44, %v1657_v40  ;;  %v4693_v13 = vpop.f32.mrf.mxu0  ;;  %v780_v44 = vadd.f32 %v4590_v24, %v4577_v1 }
 0x22e   :  { %v2371_v46 = vpack.c.bf16 %v2307_v57, %v2307_v57  ;;  %2032 = vrot.lane.b32.xlu2 %v1827_v51, %s3296_s28  ;;  %v4695_v6 = vpop.f32.mrf.mxu1 }
 0x22f   :  { %3140 = vmatmul.msk.bf16.gmra.mxu3 %vm439_vm0, %v4091_v23 }
 0x230   :  { %2436 = vst.msk [vmem:[%s5203_s3 + $0x64] sm:$0xf] %vm2410_vm2, %v2371_v46  ;;  %1699 = vmatmul.bf16.gmra.mxu2 %v1369_v45  ;;  %v2005_v52 = vpop.permute.xlu0 %2004  ;;  %v4749_v46 = vld [vmem:[%s5202_s2] ss:$0 sm:$0xff] }
 0x231   :  { %v2173_v4 = vsel %vm439_vm0, %v772_v43, %v2005_v52  ;;  %v1371_v43 = vsel %vm1341_vm1, %v4118_v58, %v4082_v17  ;;  %v2681_v52 = vld [vmem:[%s5200_s0 + $0x258] sm:$0xf]  ;;  %v782_v58 = vadd.f32 %v4607_v31, %v4605_v5 }
 0x232   :  { %v2241_v23 = vadd.f32 %v4124_v9, %v2173_v4  ;;  %v1829_v14 = vpop.f32.mrf.mxu3  ;;  %v3195_v4 = vld [vmem:[%s5200_s0 + $0x25c] sm:$0xf] }
 0x233   :  { %v1660_v34 = vpop.f32.mrf.mxu2 }
 0x234   :  { %v2305_v47 = vmax.f32 %v2241_v23, 0.0  ;;  %v1830_v0 = vadd.f32 %v1829_v14, %v1660_v34  ;;  %v4709_v33 = vpop.f32.mrf.mxu0  ;;  %v2682_v14 = vor.u32 %v3196_v49, %v2681_v52  ;;  %v2683_v34 = vld [vmem:[%s5200_s0 + $0x264] sm:$0xf0]  ;;  %v1373_v52 = vsel %vm1341_vm1, %v4097_v32, %v4179_v28 }
 0x236   :  { %v2369_v61 = vpack.c.bf16 %v2305_v47, %v2305_v47  ;;  %2034 = vrot.lane.b32.xlu0 %v1830_v0, %s3296_s28  ;;  %v4722_v55 = vpop.f32.mrf.mxu1  ;;  %664 = vmatmul.bf16.gmra.mxu0 %v2674_v30  ;;  %v2686_v0 = vor.u32 %v3195_v4, %v2683_v34  ;;  %v2689_v30 = vld [vmem:[%s5200_s0 + $0x270] sm:$0xf]  ;;  %v2699_v34 = vld [vmem:[%s5200_s0 + $0x294] sm:$0xf0] }
 0x238   :  { %2434 = vst.msk [vmem:[%s5203_s3 + $0x5c] sm:$0xf] %vm2410_vm2, %v2369_v61  ;;  %v2007_v63 = vpop.permute.xlu1 %2006  ;;  %2795 = vmatmul.msk.bf16.gmra.mxu1 %vm439_vm0, %v2678_v42 }
 0x239   :  { %v2174_v53 = vsel %vm439_vm0, %v775_v35, %v2007_v63 }
 0x23a   :  { %v2242_v10 = vadd.f32 %v4124_v9, %v2174_v53  ;;  %v1831_v8 = vpop.f32.mrf.mxu3  ;;  %v792_v53 = vadd.f32 %v4695_v6, %v4693_v13 }
 0x23b   :  { %v1662_v62 = vpop.f32.mrf.mxu2 }
 0x23c   :  { %v2306_v22 = vmax.f32 %v2242_v10, 0.0  ;;  %v1832_v18 = vadd.f32 %v1831_v8, %v1662_v62  ;;  %v4737_v57 = vpop.f32.mrf.mxu0 }
 0x23e   :  { %v2370_v7 = vpack.c.bf16 %v2306_v22, %v2306_v22  ;;  %2036 = vrot.lane.b32.xlu1 %v1832_v18, %s3296_s28  ;;  %v4739_v51 = vpop.f32.mrf.mxu1 }
 0x23f   :  { %3141 = vmatmul.msk.bf16.gmra.mxu3 %vm439_vm0, %v4132_v11 }
 0x240   :  { %2435 = vst.msk [vmem:[%s5203_s3 + $0x60] sm:$0xf] %vm2410_vm2, %v2370_v7  ;;  %v2015_v36 = vpop.permute.xlu2 %2014  ;;  %1704 = vmatmul.bf16.gmra.mxu2 %v1370_v2 }
 0x241   :  { %v2178_v37 = vsel %vm439_vm0, %v785_v38, %v2015_v36  ;;  %v3197_v36 = vld [vmem:[%s5200_s0 + $0x274] sm:$0xf] }
 0x242   :  { %v2246_v11 = vadd.f32 %v4124_v9, %v2178_v37  ;;  %v1834_v60 = vpop.f32.mrf.mxu3  ;;  %v2690_v37 = vor.u32 %v3198_v21, %v2689_v30  ;;  %v3202_v30 = vld [vmem:[%s5200_s0 + $0x2a8] sm:$0xf0]  ;;  %v3201_v21 = vld [vmem:[%s5200_s0 + $0x2a4] sm:$0xf] }
 0x243   :  { %v1665_v26 = vpop.f32.mrf.mxu2 }
 0x244   :  { %v2310_v56 = vmax.f32 %v2246_v11, 0.0  ;;  %v1835_v48 = vadd.f32 %v1834_v60, %v1665_v26  ;;  %v4756_v50 = vpop.f32.mrf.mxu0  ;;  %v2691_v11 = vld [vmem:[%s5200_s0 + $0x27c] sm:$0xf0] }
 0x245   :  { %v2694_v26 = vor.u32 %v3197_v36, %v2691_v11  ;;  %v797_v36 = vadd.f32 %v4739_v51, %v4737_v57  ;;  %v2707_v11 = vld [vmem:[%s5200_s0 + $0x2ac] sm:$0xf0] }
 0x246   :  { %v2374_v40 = vpack.c.bf16 %v2310_v56, %v2310_v56  ;;  %2038 = vrot.lane.b32.xlu2 %v1835_v48, %s3296_s28  ;;  %v4771_v23 = vpop.f32.mrf.mxu1  ;;  %669 = vmatmul.bf16.gmra.mxu0 %v2682_v14  ;;  %v3200_v14 = vld [vmem:[%s5200_s0 + $0x290] sm:$0xf0] }
 0x248   :  { %2439 = vst.msk [vmem:[%s5203_s3 + $0x70] sm:$0xf] %vm2410_vm2, %v2374_v40  ;;  %v2011_v9 = vpop.permute.xlu0 %2010  ;;  %2796 = vmatmul.msk.bf16.gmra.mxu1 %vm439_vm0, %v2686_v0  ;;  %v790_v40 = vadd.f32 %v4678_v3, %v4663_v12 }
 0x249   :  { %v2176_v45 = vsel %vm439_vm0, %v780_v44, %v2011_v9 }
 0x24a   :  { %v2244_v1 = vadd.f32 %v4749_v46, %v2176_v45  ;;  %v1836_v24 = vpop.f32.mrf.mxu3 }
 0x24b   :  { %v1667_v16 = vpop.f32.mrf.mxu2 }
 0x24c   :  { %v2308_v27 = vmax.f32 %v2244_v1, 0.0  ;;  %v1837_v29 = vadd.f32 %v1836_v24, %v1667_v16  ;;  %v4786_v8 = vpop.f32.mrf.mxu0 }
 0x24e   :  { %v2372_v15 = vpack.c.bf16 %v2308_v27, %v2308_v27  ;;  %2040 = vrot.lane.b32.xlu0 %v1837_v29, %s3296_s28  ;;  %v4788_v62 = vpop.f32.mrf.mxu1 }
 0x24f   :  { %3142 = vmatmul.msk.bf16.gmra.mxu3 %vm439_vm0, %v4082_v17 }
 0x250   :  { %2437 = vst.msk [vmem:[%s5203_s3 + $0x68] sm:$0xf] %vm2410_vm2, %v2372_v15  ;;  %v2013_v47 = vpop.permute.xlu1 %2012  ;;  %1709 = vmatmul.bf16.gmra.mxu2 %v1371_v43  ;;  %v800_v15 = vadd.f32 %v4771_v23, %v4756_v50  ;;  %v3199_v50 = vld [vmem:[%s5200_s0 + $0x28c] sm:$0xf] }
 0x251   :  { %v2177_v5 = vsel %vm439_vm0, %v782_v58, %v2013_v47  ;;  %v2697_v58 = vld [vmem:[%s5200_s0 + $0x288] sm:$0xf]  ;;  %v2702_v0 = vor.u32 %v3199_v50, %v2699_v34 }
 0x252   :  { %v2245_v17 = vadd.f32 %v4749_v46, %v2177_v5  ;;  %v1839_v31 = vpop.f32.mrf.mxu3  ;;  %v2698_v23 = vor.u32 %v3200_v14, %v2697_v58  ;;  %v802_v58 = vadd.f32 %v4788_v62, %v4786_v8 }
 0x253   :  { %v1670_v35 = vpop.f32.mrf.mxu2 }
 0x254   :  { %v2309_v61 = vmax.f32 %v2245_v17, 0.0  ;;  %v1840_v63 = vadd.f32 %v1839_v31, %v1670_v35  ;;  %v4800_v19 = vpop.f32.mrf.mxu0 }
 0x256   :  { %v2373_v10 = vpack.c.bf16 %v2309_v61, %v2309_v61  ;;  %2042 = vrot.lane.b32.xlu1 %v1840_v63, %s3296_s28  ;;  %v4815_v42 = vpop.f32.mrf.mxu1  ;;  %674 = vmatmul.bf16.gmra.mxu0 %v2690_v37  ;;  %v795_v63 = vadd.f32 %v4722_v55, %v4709_v33 }
 0x258   :  { %2438 = vst.msk [vmem:[%s5203_s3 + $0x6c] sm:$0xf] %vm2410_vm2, %v2373_v10  ;;  %v2021_v22 = vpop.permute.xlu2 %2020  ;;  %2797 = vmatmul.msk.bf16.gmra.mxu1 %vm439_vm0, %v2694_v26  ;;  %v2710_v26 = vor.u32 %v3201_v21, %v2707_v11 }
 0x259   :  { %v2181_v18 = vsel %vm439_vm0, %v792_v53, %v2021_v22 }
 0x25a   :  { %v2249_v38 = vadd.f32 %v4749_v46, %v2181_v18  ;;  %v1841_v2 = vpop.f32.mrf.mxu3 }
 0x25b   :  { %v1672_v7 = vpop.f32.mrf.mxu2 }
 0x25c   :  { %v2313_v13 = vmax.f32 %v2249_v38, 0.0  ;;  %v1842_v6 = vadd.f32 %v1841_v2, %v1672_v7  ;;  %v4830_v45 = vpop.f32.mrf.mxu0 }
 0x25e   :  { %v2377_v20 = vpack.c.bf16 %v2313_v13, %v2313_v13  ;;  %2044 = vrot.lane.b32.xlu2 %v1842_v6, %s3296_s28  ;;  %v4832_v1 = vpop.f32.mrf.mxu1 }
 0x25f   :  { %3143 = vmatmul.msk.bf16.gmra.mxu3 %vm439_vm0, %v4138_v25 }
 0x260   :  { %2442 = vst.msk [vmem:[%s5203_s3 + $0x7c] sm:$0xf] %vm2410_vm2, %v2377_v20  ;;  %1714 = vmatmul.bf16.gmra.mxu2 %v1372_v41  ;;  %v2017_v60 = vpop.permute.xlu0 %2016  ;;  %v2705_v20 = vld [vmem:[%s5200_s0 + $0x2a0] sm:$0xf] }
 0x261   :  { %v2179_v39 = vsel %vm439_vm0, %v787_v54, %v2017_v60  ;;  %v2706_v37 = vor.u32 %v3202_v30, %v2705_v20  ;;  %v3206_v20 = vld [vmem:[%s5200_s0 + $0x2d8] sm:$0xf0]  ;;  %v3205_v30 = vld [vmem:[%s5200_s0 + $0x2d4] sm:$0xf] }
 0x262   :  { %v2247_v25 = vadd.f32 %v4749_v46, %v2179_v39  ;;  %v1844_v59 = vpop.f32.mrf.mxu3 }
 0x263   :  { %v1675_v56 = vpop.f32.mrf.mxu2 }
 0x264   :  { %v2311_v48 = vmax.f32 %v2247_v25, 0.0  ;;  %v1845_v44 = vadd.f32 %v1844_v59, %v1675_v56  ;;  %v4846_v4 = vpop.f32.mrf.mxu0 }
 0x266   :  { %v2375_v9 = vpack.c.bf16 %v2311_v48, %v2311_v48  ;;  %2046 = vrot.lane.b32.xlu0 %v1845_v44, %s3296_s28  ;;  %v4859_v32 = vpop.f32.mrf.mxu1  ;;  %679 = vmatmul.bf16.gmra.mxu0 %v2698_v23  ;;  %v807_v48 = vadd.f32 %v4832_v1, %v4830_v45  ;;  %v2715_v23 = vld [vmem:[%s5200_s0 + $0x2c4] sm:$0xf0] }
 0x268   :  { %2440 = vst.msk [vmem:[%s5203_s3 + $0x74] sm:$0xf] %vm2410_vm2, %v2375_v9  ;;  %v2019_v24 = vpop.permute.xlu1 %2018  ;;  %2798 = vmatmul.msk.bf16.gmra.mxu1 %vm439_vm0, %v2702_v0 }
 0x269   :  { %v2180_v16 = vsel %vm439_vm0, %v790_v40, %v2019_v24 }
 0x26a   :  { %v2248_v27 = vadd.f32 %v4749_v46, %v2180_v16  ;;  %v1846_v29 = vpop.f32.mrf.mxu3 }
 0x26b   :  { %v1677_v43 = vpop.f32.mrf.mxu2 }
 0x26c   :  { %v2312_v12 = vmax.f32 %v2248_v27, 0.0  ;;  %v1847_v3 = vadd.f32 %v1846_v29, %v1677_v43  ;;  %v4874_v10 = vpop.f32.mrf.mxu0 }
 0x26e   :  { %v2376_v49 = vpack.c.bf16 %v2312_v12, %v2312_v12  ;;  %2048 = vrot.lane.b32.xlu1 %v1847_v3, %s3296_s28  ;;  %v4876_v22 = vpop.f32.mrf.mxu1 }
 0x26f   :  { %3144 = vmatmul.msk.bf16.gmra.mxu3 %vm439_vm0, %v4179_v28 }
 0x270   :  { %2441 = vst.msk [vmem:[%s5203_s3 + $0x78] sm:$0xf] %vm2410_vm2, %v2376_v49  ;;  %v2027_v47 = vpop.permute.xlu2 %2026  ;;  %1719 = vmatmul.bf16.gmra.mxu2 %v1373_v52  ;;  %v3204_v52 = vld [vmem:[%s5200_s0 + $0x2c0] sm:$0xf0]  ;;  %v3203_v49 = vld [vmem:[%s5200_s0 + $0x2bc] sm:$0xf] }
 0x271   :  { %v2184_v5 = vsel %vm439_vm0, %v800_v15, %v2027_v47  ;;  %v2713_v15 = vld [vmem:[%s5200_s0 + $0x2b8] sm:$0xf]  ;;  %v2718_v47 = vor.u32 %v3203_v49, %v2715_v23 }
 0x272   :  { %v2252_v28 = vadd.f32 %v4749_v46, %v2184_v5  ;;  %v1849_v17 = vpop.f32.mrf.mxu3  ;;  %v2714_v50 = vor.u32 %v3204_v52, %v2713_v15 }
 0x273   :  { %v1680_v31 = vpop.f32.mrf.mxu2 }
 0x274   :  { %v2316_v35 = vmax.f32 %v2252_v28, 0.0  ;;  %v1850_v61 = vadd.f32 %v1849_v17, %v1680_v31  ;;  %v4885_v41 = vpop.f32.mrf.mxu0  ;;  %v805_v31 = vadd.f32 %v4815_v42, %v4800_v19 }
 0x276   :  { %v2380_v53 = vpack.c.bf16 %v2316_v35, %v2316_v35  ;;  %2050 = vrot.lane.b32.xlu2 %v1850_v61, %s3296_s28  ;;  %v814_v54 = vpop.f32.mrf.mxu1  ;;  %684 = vmatmul.bf16.gmra.mxu0 %v2706_v37 }
 0x277   :  { %v815_v19 = vadd.f32 %v814_v54, %v4885_v41 }
 0x278   :  { %2445 = vst.msk [vmem:[%s5203_s3 + $0x88] sm:$0xf] %vm2410_vm2, %v2380_v53  ;;  %v2023_v18 = vpop.permute.xlu0 %2022  ;;  %2799 = vmatmul.msk.bf16.gmra.mxu1 %vm439_vm0, %v2710_v26 }
 0x279   :  { %v2182_v38 = vsel %vm439_vm0, %v795_v63, %v2023_v18 }
 0x27a   :  { %v2250_v2 = vadd.f32 %v4749_v46, %v2182_v38  ;;  %v1851_v7 = vpop.f32.mrf.mxu3 }
 0x27b   :  { %v1682_v13 = vpop.f32.mrf.mxu2 }
 0x27c   :  { %v2314_v33 = vmax.f32 %v2250_v2, 0.0  ;;  %v1852_v55 = vadd.f32 %v1851_v7, %v1682_v13  ;;  %v4911_v40 = vpop.f32.mrf.mxu0 }
 0x27e   :  { %v2378_v6 = vpack.c.bf16 %v2314_v33, %v2314_v33  ;;  %2052 = vrot.lane.b32.xlu0 %v1852_v55, %s3296_s28  ;;  %v4913_v9 = vpop.f32.mrf.mxu1 }
 0x280   :  { %2443 = vst.msk [vmem:[%s5203_s3 + $0x80] sm:$0xf] %vm2410_vm2, %v2378_v6  ;;  %v2025_v60 = vpop.permute.xlu1 %2024  ;;  %v2721_v6 = vld [vmem:[%s5200_s0 + $0x2d0] sm:$0xf] }
 0x281   :  { %v2183_v39 = vsel %vm439_vm0, %v797_v36, %v2025_v60  ;;  %v2722_v41 = vor.u32 %v3206_v20, %v2721_v6  ;;  %v2723_v36 = vld [vmem:[%s5200_s0 + $0x2dc] sm:$0xf0] }
 0x282   :  { %v2251_v25 = vadd.f32 %v4749_v46, %v2183_v39  ;;  %v1854_v59 = vpop.f32.mrf.mxu3  ;;  %v2726_v37 = vor.u32 %v3205_v30, %v2723_v36 }
 0x283   :  { %v1685_v57 = vpop.f32.mrf.mxu2 }
 0x284   :  { %v2315_v51 = vmax.f32 %v2251_v25, 0.0  ;;  %v1855_v56 = vadd.f32 %v1854_v59, %v1685_v57  ;;  %v4922_v3 = vpop.f32.mrf.mxu0  ;;  %v810_v57 = vadd.f32 %v4859_v32, %v4846_v4 }
 0x286   :  { %v2379_v44 = vpack.c.bf16 %v2315_v51, %v2315_v51  ;;  %2054 = vrot.lane.b32.xlu1 %v1855_v56, %s3296_s28  ;;  %v4935_v14 = vpop.f32.mrf.mxu1  ;;  %689 = vmatmul.bf16.gmra.mxu0 %v2714_v50 }
 0x287   :  { %v820_v36 = vadd.f32 %v4935_v14, %v4922_v3 }
 0x288   :  { %2444 = vst.msk [vmem:[%s5203_s3 + $0x84] sm:$0xf] %vm2410_vm2, %v2379_v44  ;;  %v2033_v24 = vpop.permute.xlu2 %2032  ;;  %2800 = vmatmul.msk.bf16.gmra.mxu1 %vm439_vm0, %v2718_v47 }
 0x289   :  { %v2187_v16 = vsel %vm439_vm0, %v807_v48, %v2033_v24 }
 0x28a   :  { %v2255_v27 = vadd.f32 %v4749_v46, %v2187_v16  ;;  %v1856_v29 = vpop.f32.mrf.mxu3 }
 0x28b   :  { %v1687_v43 = vpop.f32.mrf.mxu2 }
 0x28c   :  { %v2319_v45 = vmax.f32 %v2255_v27, 0.0  ;;  %v1857_v1 = vadd.f32 %v1856_v29, %v1687_v43  ;;  %v652_v61 = vpop.f32.mrf.mxu0 }
 0x28e   :  { %v2383_v12 = vpack.c.bf16 %v2319_v45, %v2319_v45  ;;  %2056 = vrot.lane.b32.xlu2 %v1857_v1, %s3296_s28  ;;  %v821_v63 = vpop.f32.mrf.mxu1  ;;  %v812_v1 = vadd.f32 %v4876_v22, %v4874_v10 }
 0x28f   :  { %v822_v47 = vadd.f32 %v821_v63, %v652_v61  ;;  %v2729_v63 = vld [vmem:[%s5200_s0 + $0x2e8] sm:$0xf] }
 0x290   :  { %2448 = vst.msk [vmem:[%s5203_s3 + $0x94] sm:$0xf] %vm2410_vm2, %v2383_v12  ;;  %v2029_v34 = vpop.permute.xlu0 %2028 }
 0x291   :  { %v2185_v0 = vsel %vm439_vm0, %v802_v58, %v2029_v34 }
 0x292   :  { %v2253_v5 = vadd.f32 %v4749_v46, %v2185_v0  ;;  %v1859_v8 = vpop.f32.mrf.mxu3 }
 0x293   :  { %v1690_v62 = vpop.f32.mrf.mxu2 }
 0x294   :  { %v2317_v28 = vmax.f32 %v2253_v5, 0.0  ;;  %v1860_v17 = vadd.f32 %v1859_v8, %v1690_v62  ;;  %v4958_v55 = vpop.f32.mrf.mxu0 }
 0x296   :  { %v2381_v35 = vpack.c.bf16 %v2317_v28, %v2317_v28  ;;  %2058 = vrot.lane.b32.xlu0 %v1860_v17, %s3296_s28  ;;  %v4969_v21 = vpop.f32.mrf.mxu1  ;;  %694 = vmatmul.bf16.gmra.mxu0 %v2722_v41 }
 0x298   :  { %2446 = vst.msk [vmem:[%s5203_s3 + $0x8c] sm:$0xf] %vm2410_vm2, %v2381_v35  ;;  %v2031_v53 = vpop.permute.xlu1 %2030  ;;  %2801 = vmatmul.msk.bf16.gmra.mxu1 %vm439_vm0, %v2726_v37 }
 0x299   :  { %v2186_v18 = vsel %vm439_vm0, %v805_v31, %v2031_v53  ;;  %v3208_v53 = vld [vmem:[%s5200_s0 + $0x2f0] sm:$0xf0] }
 0x29a   :  { %v2254_v38 = vadd.f32 %v4749_v46, %v2186_v18  ;;  %v1861_v2 = vpop.f32.mrf.mxu3  ;;  %v3207_v18 = vld [vmem:[%s5200_s0 + $0x2ec] sm:$0xf] }
 0x29b   :  { %v1692_v7 = vpop.f32.mrf.mxu2 }
 0x29c   :  { %v2318_v13 = vmax.f32 %v2254_v38, 0.0  ;;  %v1862_v33 = vadd.f32 %v1861_v2, %v1692_v7  ;;  %v4984_v56 = vpop.f32.mrf.mxu0  ;;  %v817_v38 = vadd.f32 %v4913_v9, %v4911_v40  ;;  %v2730_v7 = vor.u32 %v3208_v53, %v2729_v63 }
 0x29e   :  { %v2382_v42 = vpack.c.bf16 %v2318_v13, %v2318_v13  ;;  %2060 = vrot.lane.b32.xlu1 %v1862_v33, %s3296_s28  ;;  %v4986_v48 = vpop.f32.mrf.mxu1  ;;  %v2731_v13 = vld [vmem:[%s5200_s0 + $0x2f4] sm:$0xf0] }
 0x2a0   :  { %2447 = vst.msk [vmem:[%s5203_s3 + $0x90] sm:$0xf] %vm2410_vm2, %v2382_v42  ;;  %v2039_v54 = vpop.permute.xlu2 %2038  ;;  %v2734_v42 = vor.u32 %v3207_v18, %v2731_v13 }
 0x2a1   :  { %v2190_v11 = vsel %vm439_vm0, %v815_v19, %v2039_v54 }
 0x2a2   :  { %v2258_v60 = vadd.f32 %v4749_v46, %v2190_v11  ;;  %v1864_v26 = vpop.f32.mrf.mxu3 }
 0x2a3   :  { %v1695_v39 = vpop.f32.mrf.mxu2 }
 0x2a4   :  { %v2322_v25 = vmax.f32 %v2258_v60, 0.0  ;;  %v1865_v59 = vadd.f32 %v1864_v26, %v1695_v39  ;;  %v660_v45 = vpop.f32.mrf.mxu0 }
 0x2a6   :  { %v2386_v51 = vpack.c.bf16 %v2322_v25, %v2322_v25  ;;  %2062 = vrot.lane.b32.xlu2 %v1865_v59, %s3296_s28  ;;  %v829_v12 = vpop.f32.mrf.mxu1  ;;  %699 = vmatmul.bf16.gmra.mxu0 %v2730_v7 }
 0x2a7   :  { %v830_v3 = vadd.f32 %v829_v12, %v660_v45 }
 0x2a8   :  { %2451 = vst.msk [vmem:[%s5203_s3 + $0xa0] sm:$0xf] %vm2410_vm2, %v2386_v51  ;;  %v2035_v44 = vpop.permute.xlu0 %2034  ;;  %2802 = vmatmul.msk.bf16.gmra.mxu1 %vm439_vm0, %v2734_v42 }
 0x2a9   :  { %v2188_v24 = vsel %vm439_vm0, %v810_v57, %v2035_v44 }
 0x2aa   :  { %v2256_v16 = vadd.f32 %v4749_v46, %v2188_v24  ;;  %v1866_v27 = vpop.f32.mrf.mxu3 }
 0x2ab   :  { %v1697_v29 = vpop.f32.mrf.mxu2 }
 0x2ac   :  { %v2320_v4 = vmax.f32 %v2256_v16, 0.0  ;;  %v1867_v32 = vadd.f32 %v1866_v27, %v1697_v29  ;;  %v5004_v10 = vpop.f32.mrf.mxu0 }
 0x2ae   :  { %v2384_v43 = vpack.c.bf16 %v2320_v4, %v2320_v4  ;;  %2064 = vrot.lane.b32.xlu0 %v1867_v32, %s3296_s28  ;;  %v5006_v22 = vpop.f32.mrf.mxu1 }
 0x2b0   :  { %2449 = vst.msk [vmem:[%s5203_s3 + $0x98] sm:$0xf] %vm2410_vm2, %v2384_v43  ;;  %v2037_v15 = vpop.permute.xlu1 %2036 }
 0x2b1   :  { %v2189_v52 = vsel %vm439_vm0, %v812_v1, %v2037_v15  ;;  %v825_v1 = vadd.f32 %v4969_v21, %v4958_v55 }
 0x2b2   :  { %v2257_v49 = vadd.f32 %v4749_v46, %v2189_v52  ;;  %v1869_v58 = vpop.f32.mrf.mxu3 }
 0x2b3   :  { %v1700_v50 = vpop.f32.mrf.mxu2 }
 0x2b4   :  { %v2321_v23 = vmax.f32 %v2257_v49, 0.0  ;;  %v1870_v34 = vadd.f32 %v1869_v58, %v1700_v50  ;;  %v5026_v2 = vpop.f32.mrf.mxu0 }
 0x2b6   :  { %v2385_v0 = vpack.c.bf16 %v2321_v23, %v2321_v23  ;;  %2066 = vrot.lane.b32.xlu1 %v1870_v34, %s3296_s28  ;;  %v5035_v19 = vpop.f32.mrf.mxu1 }
 0x2b8   :  { %2450 = vst.msk [vmem:[%s5203_s3 + $0x9c] sm:$0xf] %vm2410_vm2, %v2385_v0  ;;  %v2045_v5 = vpop.permute.xlu2 %2044  ;;  %v827_v0 = vadd.f32 %v4986_v48, %v4984_v56 }
 0x2b9   :  { %v2193_v8 = vsel %vm439_vm0, %v822_v47, %v2045_v5 }
 0x2ba   :  { %v2261_v62 = vadd.f32 %v4749_v46, %v2193_v8  ;;  %v1871_v28 = vpop.f32.mrf.mxu3 }
 0x2bb   :  { %v1702_v17 = vpop.f32.mrf.mxu2 }
 0x2bc   :  { %v2325_v31 = vmax.f32 %v2261_v62, 0.0  ;;  %v1872_v35 = vadd.f32 %v1871_v28, %v1702_v17  ;;  %v667_v60 = vpop.f32.mrf.mxu0 }
 0x2be   :  { %v2389_v61 = vpack.c.bf16 %v2325_v31, %v2325_v31  ;;  %2068 = vrot.lane.b32.xlu2 %v1872_v35, %s3296_s28  ;;  %v836_v25 = vpop.f32.mrf.mxu1 }
 0x2c0   :  { %2454 = vst.msk [vmem:[%s5203_s3 + $0xac] sm:$0xf] %vm2410_vm2, %v2389_v61  ;;  %v2041_v33 = vpop.permute.xlu0 %2040  ;;  %v837_v61 = vadd.f32 %v836_v25, %v667_v60 }
 0x2c1   :  { %v2191_v6 = vsel %vm439_vm0, %v817_v38, %v2041_v33 }
 0x2c2   :  { %v2259_v40 = vadd.f32 %v4749_v46, %v2191_v6  ;;  %v1874_v9 = vpop.f32.mrf.mxu3 }
 0x2c3   :  { %v1705_v20 = vpop.f32.mrf.mxu2 }
 0x2c4   :  { %v2323_v30 = vmax.f32 %v2259_v40, 0.0  ;;  %v1875_v41 = vadd.f32 %v1874_v9, %v1705_v20  ;;  %v5056_v4 = vpop.f32.mrf.mxu0  ;;  %v832_v40 = vadd.f32 %v5006_v22, %v5004_v10 }
 0x2c6   :  { %v2387_v54 = vpack.c.bf16 %v2323_v30, %v2323_v30  ;;  %2070 = vrot.lane.b32.xlu0 %v1875_v41, %s3296_s28  ;;  %v5058_v45 = vpop.f32.mrf.mxu1 }
 0x2c8   :  { %2452 = vst.msk [vmem:[%s5203_s3 + $0xa4] sm:$0xf] %vm2410_vm2, %v2387_v54  ;;  %v2043_v37 = vpop.permute.xlu1 %2042 }
 0x2c9   :  { %v2192_v11 = vsel %vm439_vm0, %v820_v36, %v2043_v37 }
 0x2ca   :  { %v2260_v26 = vadd.f32 %v4749_v46, %v2192_v11  ;;  %v1876_v39 = vpop.f32.mrf.mxu3 }
 0x2cb   :  { %v1707_v59 = vpop.f32.mrf.mxu2 }
 0x2cc   :  { %v2324_v57 = vmax.f32 %v2260_v26, 0.0  ;;  %v1877_v51 = vadd.f32 %v1876_v39, %v1707_v59  ;;  %v5069_v47 = vpop.f32.mrf.mxu0  ;;  %v835_v26 = vadd.f32 %v5035_v19, %v5026_v2 }
 0x2ce   :  { %v2388_v14 = vpack.c.bf16 %v2324_v57, %v2324_v57  ;;  %2072 = vrot.lane.b32.xlu1 %v1877_v51, %s3296_s28  ;;  %v5072_v21 = vpop.f32.mrf.mxu1 }
 0x2d0   :  { %2453 = vst.msk [vmem:[%s5203_s3 + $0xa8] sm:$0xf] %vm2410_vm2, %v2388_v14  ;;  %v2051_v44 = vpop.permute.xlu2 %2050 }
 0x2d1   :  { %v2196_v24 = vsel %vm439_vm0, %v830_v3, %v2051_v44 }
 0x2d2   :  { %v2264_v16 = vadd.f32 %v4749_v46, %v2196_v24  ;;  %v1879_v27 = vpop.f32.mrf.mxu3 }
 0x2d3   :  { %v1710_v29 = vpop.f32.mrf.mxu2 }
 0x2d4   :  { %v2328_v32 = vmax.f32 %v2264_v16, 0.0  ;;  %v1880_v43 = vadd.f32 %v1879_v27, %v1710_v29  ;;  %v675_v53 = vpop.f32.mrf.mxu0 }
 0x2d6   :  { %v2392_v12 = vpack.c.bf16 %v2328_v32, %v2328_v32  ;;  %2074 = vrot.lane.b32.xlu2 %v1880_v43, %s3296_s28  ;;  %v844_v48 = vpop.f32.mrf.mxu1  ;;  %v840_v32 = vadd.f32 %v5058_v45, %v5056_v4 }
 0x2d7   :  { %v845_v2 = vadd.f32 %v844_v48, %v675_v53 }
 0x2d8   :  { %2457 = vst.msk [vmem:[%s5203_s3 + $0xb8] sm:$0xf] %vm2410_vm2, %v2392_v12  ;;  %v2047_v15 = vpop.permute.xlu0 %2046 }
 0x2d9   :  { %v2194_v52 = vsel %vm439_vm0, %v825_v1, %v2047_v15 }
 0x2da   :  { %v2262_v49 = vadd.f32 %v4749_v46, %v2194_v52  ;;  %v1881_v58 = vpop.f32.mrf.mxu3 }
 0x2db   :  { %v1712_v50 = vpop.f32.mrf.mxu2 }
 0x2dc   :  { %v2326_v23 = vmax.f32 %v2262_v49, 0.0  ;;  %v1882_v34 = vadd.f32 %v1881_v58, %v1712_v50  ;;  %v677_v30 = vpop.f32.mrf.mxu0 }
 0x2de   :  { %v2390_v55 = vpack.c.bf16 %v2326_v23, %v2326_v23  ;;  %2076 = vrot.lane.b32.xlu0 %v1882_v34, %s3296_s28  ;;  %v846_v54 = vpop.f32.mrf.mxu1  ;;  %v842_v23 = vadd.f32 %v5072_v21, %v5069_v47 }
 0x2e0   :  { %2455 = vst.msk [vmem:[%s5203_s3 + $0xb0] sm:$0xf] %vm2410_vm2, %v2390_v55  ;;  %v2049_v5 = vpop.permute.xlu1 %2048 }
 0x2e1   :  { %v2195_v8 = vsel %vm439_vm0, %v827_v0, %v2049_v5 }
 0x2e2   :  { %v2263_v62 = vadd.f32 %v4749_v46, %v2195_v8  ;;  %v1884_v28 = vpop.f32.mrf.mxu3 }
 0x2e3   :  { %v1715_v17 = vpop.f32.mrf.mxu2 }
 0x2e4   :  { %v2327_v31 = vmax.f32 %v2263_v62, 0.0  ;;  %v1885_v35 = vadd.f32 %v1884_v28, %v1715_v17  ;;  %v680_v51 = vpop.f32.mrf.mxu0 }
 0x2e6   :  { %v2391_v63 = vpack.c.bf16 %v2327_v31, %v2327_v31  ;;  %2078 = vrot.lane.b32.xlu1 %v1885_v35, %s3296_s28  ;;  %v849_v44 = vpop.f32.mrf.mxu1 }
 0x2e8   :  { %2456 = vst.msk [vmem:[%s5203_s3 + $0xb4] sm:$0xf] %vm2410_vm2, %v2391_v63  ;;  %v2057_v56 = vpop.permute.xlu2 %2056  ;;  %v847_v63 = vadd.f32 %v846_v54, %v677_v30 }
 0x2e9   :  { %v2199_v18 = vsel %vm439_vm0, %v837_v61, %v2057_v56 }
 0x2ea   :  { %v2267_v38 = vadd.f32 %v4749_v46, %v2199_v18  ;;  %v1886_v7 = vpop.f32.mrf.mxu3 }
 0x2eb   :  { %v1717_v13 = vpop.f32.mrf.mxu2 }
 0x2ec   :  { %v2331_v33 = vmax.f32 %v2267_v38, 0.0  ;;  %v1887_v42 = vadd.f32 %v1886_v7, %v1717_v13  ;;  %v682_v43 = vpop.f32.mrf.mxu0  ;;  %v850_v13 = vadd.f32 %v849_v44, %v680_v51 }
 0x2ee   :  { %v2395_v6 = vpack.c.bf16 %v2331_v33, %v2331_v33  ;;  %2080 = vrot.lane.b32.xlu2 %v1887_v42, %s3296_s28  ;;  %v851_v12 = vpop.f32.mrf.mxu1 }
 0x2ef   :  { %v852_v8 = vadd.f32 %v851_v12, %v682_v43 }
 0x2f0   :  { %2460 = vst.msk [vmem:[%s5203_s3 + $0xc4] sm:$0xf] %vm2410_vm2, %v2395_v6  ;;  %v2053_v9 = vpop.permute.xlu0 %2052 }
 0x2f1   :  { %v2197_v20 = vsel %vm439_vm0, %v832_v40, %v2053_v9 }
 0x2f2   :  { %v2265_v41 = vadd.f32 %v4749_v46, %v2197_v20  ;;  %v1889_v36 = vpop.f32.mrf.mxu3 }
 0x2f3   :  { %v1720_v37 = vpop.f32.mrf.mxu2 }
 0x2f4   :  { %v2329_v11 = vmax.f32 %v2265_v41, 0.0  ;;  %v1890_v60 = vadd.f32 %v1889_v36, %v1720_v37  ;;  %v685_v34 = vpop.f32.mrf.mxu0 }
 0x2f6   :  { %v2393_v10 = vpack.c.bf16 %v2329_v11, %v2329_v11  ;;  %2082 = vrot.lane.b32.xlu0 %v1890_v60, %s3296_s28  ;;  %v854_v45 = vpop.f32.mrf.mxu1 }
 0x2f8   :  { %2458 = vst.msk [vmem:[%s5203_s3 + $0xbc] sm:$0xf] %vm2410_vm2, %v2393_v10  ;;  %v2055_v22 = vpop.permute.xlu1 %2054 }
 0x2f9   :  { %v2198_v39 = vsel %vm439_vm0, %v835_v26, %v2055_v22  ;;  %v855_v26 = vadd.f32 %v854_v45, %v685_v34 }
 0x2fa   :  { %v2266_v25 = vadd.f32 %v4749_v46, %v2198_v39  ;;  %v1891_v59 = vpop.f32.mrf.mxu3 }
 0x2fb   :  { %v1722_v57 = vpop.f32.mrf.mxu2 }
 0x2fc   :  { %v2330_v3 = vmax.f32 %v2266_v25, 0.0  ;;  %v1892_v14 = vadd.f32 %v1891_v59, %v1722_v57  ;;  %v687_v28 = vpop.f32.mrf.mxu0 }
 0x2fe   :  { %v2394_v19 = vpack.c.bf16 %v2330_v3, %v2330_v3  ;;  %2084 = vrot.lane.b32.xlu1 %v1892_v14, %s3296_s28  ;;  %v856_v31 = vpop.f32.mrf.mxu1 }
 0x2ff   :  { %v857_v14 = vadd.f32 %v856_v31, %v687_v28 }
 0x300   :  { %2459 = vst.msk [vmem:[%s5203_s3 + $0xc0] sm:$0xf] %vm2410_vm2, %v2394_v19  ;;  %v2063_v24 = vpop.permute.xlu2 %2062 }
 0x301   :  { %v2202_v16 = vsel %vm439_vm0, %v845_v2, %v2063_v24 }
 0x302   :  { %v2270_v27 = vadd.f32 %v4749_v46, %v2202_v16 }
 0x304   :  { %v2334_v29 = vmax.f32 %v2270_v27, 0.0  ;;  %v690_v18 = vpop.f32.mrf.mxu0 }
 0x306   :  { %v2398_v1 = vpack.c.bf16 %v2334_v29, %v2334_v29  ;;  %v859_v7 = vpop.f32.mrf.mxu1 }
 0x307   :  { %v860_v20 = vadd.f32 %v859_v7, %v690_v18 }
 0x308   :  { %2463 = vst.msk [vmem:[%s5203_s3 + $0xd0] sm:$0xf] %vm2410_vm2, %v2398_v1  ;;  %v2059_v15 = vpop.permute.xlu0 %2058 }
 0x309   :  { %v2200_v52 = vsel %vm439_vm0, %v840_v32, %v2059_v15 }
 0x30a   :  { %v2268_v49 = vadd.f32 %v4749_v46, %v2200_v52 }
 0x30c   :  { %v2332_v58 = vmax.f32 %v2268_v49, 0.0  ;;  %v692_v30 = vpop.f32.mrf.mxu0 }
 0x30e   :  { %v2396_v50 = vpack.c.bf16 %v2332_v58, %v2332_v58  ;;  %v861_v36 = vpop.f32.mrf.mxu1 }
 0x30f   :  { %v862_v49 = vadd.f32 %v861_v36, %v692_v30 }
 0x310   :  { %2461 = vst.msk [vmem:[%s5203_s3 + $0xc8] sm:$0xf] %vm2410_vm2, %v2396_v50  ;;  %v2061_v4 = vpop.permute.xlu1 %2060 }
 0x311   :  { %v2201_v55 = vsel %vm439_vm0, %v842_v23, %v2061_v4 }
 0x312   :  { %v2269_v0 = vadd.f32 %v4749_v46, %v2201_v55 }
 0x314   :  { %v2333_v5 = vmax.f32 %v2269_v0, 0.0  ;;  %v695_v22 = vpop.f32.mrf.mxu0 }
 0x316   :  { %v2397_v62 = vpack.c.bf16 %v2333_v5, %v2333_v5  ;;  %v864_v25 = vpop.f32.mrf.mxu1 }
 0x317   :  { %v865_v4 = vadd.f32 %v864_v25, %v695_v22 }
 0x318   :  { %2462 = vst.msk [vmem:[%s5203_s3 + $0xcc] sm:$0xf] %vm2410_vm2, %v2397_v62  ;;  %v2069_v47 = vpop.permute.xlu2 %2068 }
 0x319   :  { %v2205_v21 = vsel %vm439_vm0, %v852_v8, %v2069_v47 }
 0x31a   :  { %v2273_v17 = vadd.f32 %v4749_v46, %v2205_v21 }
 0x31c   :  { %v2337_v35 = vmax.f32 %v2273_v17, 0.0  ;;  %v697_v24 = vpop.f32.mrf.mxu0 }
 0x31e   :  { %v2401_v61 = vpack.c.bf16 %v2337_v35, %v2337_v35  ;;  %v866_v16 = vpop.f32.mrf.mxu1 }
 0x31f   :  { %v867_v29 = vadd.f32 %v866_v16, %v697_v24 }
 0x320   :  { %2466 = vst.msk [vmem:[%s5203_s3 + $0xdc] sm:$0xf] %vm2410_vm2, %v2401_v61  ;;  %v2065_v53 = vpop.permute.xlu0 %2064 }
 0x321   :  { %v2203_v56 = vsel %vm439_vm0, %v847_v63, %v2065_v53 }
 0x322   :  { %v2271_v48 = vadd.f32 %v4749_v46, %v2203_v56 }
 0x324   :  { %v2335_v38 = vmax.f32 %v2271_v48, 0.0  ;;  %v700_v47 = vpop.f32.mrf.mxu0 }
 0x326   :  { %v2399_v33 = vpack.c.bf16 %v2335_v38, %v2335_v38  ;;  %v869_v21 = vpop.f32.mrf.mxu1 }
 0x327   :  { %v870_v28 = vadd.f32 %v869_v21, %v700_v47 }
 0x328   :  { %2464 = vst.msk [vmem:[%s5203_s3 + $0xd4] sm:$0xf] %vm2410_vm2, %v2399_v33  ;;  %v2067_v42 = vpop.permute.xlu1 %2066 }
 0x329   :  { %v2204_v6 = vsel %vm439_vm0, %v850_v13, %v2067_v42 }
 0x32a   :  { %v2272_v40 = vadd.f32 %v4749_v46, %v2204_v6 }
 0x32c   :  { %v2336_v9 = vmax.f32 %v2272_v40, 0.0  ;;  %v702_v61 = vpop.f32.mrf.mxu0 }
 0x32e   :  { %v2400_v41 = vpack.c.bf16 %v2336_v9, %v2336_v9  ;;  %v871_v63 = vpop.f32.mrf.mxu1 }
 0x32f   :  { %v872_v48 = vadd.f32 %v871_v63, %v702_v61 }
 0x330   :  { %2465 = vst.msk [vmem:[%s5203_s3 + $0xd8] sm:$0xf] %vm2410_vm2, %v2400_v41  ;;  %v2075_v54 = vpop.permute.xlu2 %2074 }
 0x331   :  { %v2208_v37 = vsel %vm439_vm0, %v860_v20, %v2075_v54 }
 0x332   :  { %v2276_v11 = vadd.f32 %v4749_v46, %v2208_v37 }
 0x334   :  { %v2340_v60 = vmax.f32 %v2276_v11, 0.0 }
 0x336   :  { %v2404_v10 = vpack.c.bf16 %v2340_v60, %v2340_v60 }
 0x338   :  { %2469 = vst.msk [vmem:[%s5203_s3 + $0xe8] sm:$0xf] %vm2410_vm2, %v2404_v10  ;;  %v2071_v39 = vpop.permute.xlu0 %2070 }
 0x339   :  { %v2206_v59 = vsel %vm439_vm0, %v855_v26, %v2071_v39 }
 0x33a   :  { %v2274_v57 = vadd.f32 %v4749_v46, %v2206_v59 }
 0x33c   :  { %v2338_v51 = vmax.f32 %v2274_v57, 0.0 }
 0x33e   :  { %v2402_v3 = vpack.c.bf16 %v2338_v51, %v2338_v51 }
 0x340   :  { %2467 = vst.msk [vmem:[%s5203_s3 + $0xe0] sm:$0xf] %vm2410_vm2, %v2402_v3  ;;  %v2073_v44 = vpop.permute.xlu1 %2072 }
 0x341   :  { %v2207_v2 = vsel %vm439_vm0, %v857_v14, %v2073_v44 }
 0x342   :  { %v2275_v19 = vadd.f32 %v4749_v46, %v2207_v2 }
 0x344   :  { %v2339_v27 = vmax.f32 %v2275_v19, 0.0 }
 0x346   :  { %v2403_v32 = vpack.c.bf16 %v2339_v27, %v2339_v27 }
 0x348   :  { %2468 = vst.msk [vmem:[%s5203_s3 + $0xe4] sm:$0xf] %vm2410_vm2, %v2403_v32  ;;  %v2081_v43 = vpop.permute.xlu2 %2080 }
 0x349   :  { %v2211_v1 = vsel %vm439_vm0, %v867_v29, %v2081_v43 }
 0x34a   :  { %v2279_v12 = vadd.f32 %v4749_v46, %v2211_v1 }
 0x34c   :  { %v2343_v15 = vmax.f32 %v2279_v12, 0.0 }
 0x34e   :  { %v2407_v52 = vpack.c.bf16 %v2343_v15, %v2343_v15 }
 0x350   :  { %2472 = vst.msk [vmem:[%s5203_s3 + $0xf4] sm:$0xf] %vm2410_vm2, %v2407_v52  ;;  %v2077_v58 = vpop.permute.xlu0 %2076 }
 0x351   :  { %v2209_v50 = vsel %vm439_vm0, %v862_v49, %v2077_v58 }
 0x352   :  { %v2277_v23 = vadd.f32 %v4749_v46, %v2209_v50 }
 0x354   :  { %v2341_v34 = vmax.f32 %v2277_v23, 0.0 }
 0x356   :  { %v2405_v45 = vpack.c.bf16 %v2341_v34, %v2341_v34 }
 0x358   :  { %2470 = vst.msk [vmem:[%s5203_s3 + $0xec] sm:$0xf] %vm2410_vm2, %v2405_v45  ;;  %v2079_v55 = vpop.permute.xlu1 %2078 }
 0x359   :  { %v2210_v0 = vsel %vm439_vm0, %v865_v4, %v2079_v55 }
 0x35a   :  { %v2278_v5 = vadd.f32 %v4749_v46, %v2210_v0 }
 0x35c   :  { %v2342_v8 = vmax.f32 %v2278_v5, 0.0 }
 0x35e   :  { %v2406_v62 = vpack.c.bf16 %v2342_v8, %v2342_v8 }
 0x360   :  { %2471 = vst.msk [vmem:[%s5203_s3 + $0xf0] sm:$0xf] %vm2410_vm2, %v2406_v62 }
 0x368   :  { %v2083_v17 = vpop.permute.xlu0 %2082 }
 0x369   :  { %v2212_v31 = vsel %vm439_vm0, %v870_v28, %v2083_v17 }
 0x36a   :  { %v2280_v35 = vadd.f32 %v4749_v46, %v2212_v31 }
 0x36c   :  { %v2344_v53 = vmax.f32 %v2280_v35, 0.0 }
 0x36e   :  { %v2408_v56 = vpack.c.bf16 %v2344_v53, %v2344_v53 }
 0x370   :  { %2473 = vst.msk [vmem:[%s5203_s3 + $0xf8] sm:$0xf] %vm2410_vm2, %v2408_v56  ;;  %v2085_v18 = vpop.permute.xlu1 %2084 }
 0x371   :  { %v2213_v38 = vsel %vm439_vm0, %v872_v48, %v2085_v18 }
 0x372   :  { %v2281_v7 = vadd.f32 %v4749_v46, %v2213_v38 }
 0x374   :  { %v2345_v13 = vmax.f32 %v2281_v7, 0.0 }
 0x376   :  { %v2409_v33 = vpack.c.bf16 %v2345_v13, %v2345_v13 }
 0x378   :  { %2474 = vst.msk [vmem:[%s5203_s3 + $0xfc] sm:$0xf] %vm2410_vm2, %v2409_v33 }

// kernel: _lambda_.15
= control target key start
LH: loop header
LB: loop body
LE: loop exit
PB: predicated region body
PF: predicated region fallthrough
CT: control target
= control target key end

     0   :  { %s3650_s25 = smov 112   ;;  %vm442_vm0 = vcmask 130048   ;;  %vm1344_vm1 = vcmask 916480   ;;  %s3651_s17 = smov 16   ;;  %vm2605_vm2 = vcmask 257024   ;;  %s5717_s0 = inlined_call_operand.vmem [shape: bf16[512,288], index: 0, kind: input, shape index: {}]   ;;  %s5718_s1 = inlined_call_operand.vmem [shape: bf16[2,144,16], index: 1, kind: input, shape index: {}]   ;;  %s5719_s2 = inlined_call_operand.vmem [shape: f32[1,32], index: 2, kind: input, shape index: {}]   ;;  %s5720_s3 = inlined_call_operand.vmem [shape: bf16[512,32], index: 3, kind: input, shape index: {}]   ;;  %s5721_s4 = inlined_call_operand.vmem [shape: bf16[512,32], index: 4, kind: output, shape index: {}]  }
   0x1   :  { %v3018_v0 = vld [vmem:[%s5717_s0 + $0x4] sm:$0xf]  ;;  %v3414_v1 = vld [vmem:[%s5717_s0 + $0xc] sm:$0xf0]  ;;  %v3026_v2 = vld [vmem:[%s5717_s0 + $0x1c] sm:$0xf] }
   0x2   :  { %v3019_v3 = vor.u32 %v3414_v1, %v3018_v0  ;;  %v3416_v4 = vld [vmem:[%s5717_s0 + $0x24] sm:$0xf0]  ;;  %v3034_v6 = vld [vmem:[%s5717_s0 + $0x34] sm:$0xf]  ;;  %v3418_v7 = vld [vmem:[%s5717_s0 + $0x3c] sm:$0xf0] }
   0x3   :  { %v3027_v5 = vor.u32 %v3416_v4, %v3026_v2  ;;  %v3413_v8 = vld [vmem:[%s5717_s0 + $0x8] sm:$0xf]  ;;  %v3020_v9 = vld [vmem:[%s5717_s0 + $0x10] sm:$0xf0]  ;;  %v3035_v10 = vor.u32 %v3418_v7, %v3034_v6  ;;  %v3415_v11 = vld [vmem:[%s5717_s0 + $0x20] sm:$0xf] }
   0x4   :  { %1216 = vrot.lane.b32.xlu0 %v3019_v3, %s3650_s25  ;;  %v3028_v12 = vld [vmem:[%s5717_s0 + $0x28] sm:$0xf0]  ;;  %v3484_v13 = vld [vmem:[%s5718_s1 + $0x80] sm:$0xff]  ;;  %v3023_v14 = vor.u32 %v3413_v8, %v3020_v9  ;;  %v3417_v15 = vld [vmem:[%s5717_s0 + $0x38] sm:$0xf] }
   0x5   :  { %1220 = vrot.lane.b32.xlu1 %v3027_v5, %s3650_s25  ;;  %1224 = vrot.lane.b32.xlu2 %v3035_v10, %s3650_s25  ;;  %v3036_v16 = vld [vmem:[%s5717_s0 + $0x40] sm:$0xf0]  ;;  %v3031_v17 = vor.u32 %v3415_v11, %v3028_v12  ;;  %v3483_v18 = vld [vmem:[%s5718_s1 + $0x78] sm:$0xff] }
   0x6   :  { %1559 = vmatpush.bf16.msra.mxu2 %v3484_v13  ;;  %v3039_v19 = vor.u32 %v3417_v15, %v3036_v16  ;;  %v3042_v20 = vld [vmem:[%s5717_s0 + $0x4c] sm:$0xf]  ;;  %v3420_v21 = vld [vmem:[%s5717_s0 + $0x54] sm:$0xf0]  ;;  %v3482_v22 = vld [vmem:[%s5718_s1 + $0x70] sm:$0xff] }
   0x7   :  { %v3419_v23 = vld [vmem:[%s5717_s0 + $0x50] sm:$0xf]  ;;  %v3044_v24 = vld [vmem:[%s5717_s0 + $0x58] sm:$0xf0]  ;;  %v3043_v25 = vor.u32 %v3420_v21, %v3042_v20  ;;  %v3050_v26 = vld [vmem:[%s5717_s0 + $0x64] sm:$0xf] }
   0x8   :  { %v3422_v27 = vld [vmem:[%s5717_s0 + $0x6c] sm:$0xf0]  ;;  %v3047_v28 = vor.u32 %v3419_v23, %v3044_v24  ;;  %v3481_v29 = vld [vmem:[%s5718_s1 + $0x68] sm:$0xff]  ;;  %v3052_v32 = vld [vmem:[%s5717_s0 + $0x70] sm:$0xf0] }
   0x9   :  { %v3051_v30 = vor.u32 %v3422_v27, %v3050_v26  ;;  %v3421_v31 = vld [vmem:[%s5717_s0 + $0x68] sm:$0xf]  ;;  %v3480_v33 = vld [vmem:[%s5718_s1 + $0x60] sm:$0xff]  ;;  %v3058_v34 = vld [vmem:[%s5717_s0 + $0x7c] sm:$0xf] }
   0xa   :  { %1560 = vmatpush.bf16.msra.mxu2 %v3483_v18  ;;  %v3424_v35 = vld [vmem:[%s5717_s0 + $0x84] sm:$0xf0]  ;;  %v3055_v36 = vor.u32 %v3421_v31, %v3052_v32  ;;  %v3423_v37 = vld [vmem:[%s5717_s0 + $0x80] sm:$0xf]  ;;  %v3060_v38 = vld [vmem:[%s5717_s0 + $0x88] sm:$0xf0] }
   0xb   :  { %v3059_v39 = vor.u32 %v3424_v35, %v3058_v34  ;;  %v3479_v40 = vld [vmem:[%s5718_s1 + $0x58] sm:$0xff]  ;;  %v3063_v41 = vor.u32 %v3423_v37, %v3060_v38  ;;  %v3066_v42 = vld [vmem:[%s5717_s0 + $0x94] sm:$0xf]  ;;  %v3426_v43 = vld [vmem:[%s5717_s0 + $0x9c] sm:$0xf0] }
   0xc   :  { %1218 = vrot.lane.b32.xlu0 %v3023_v14, %s3650_s25  ;;  %v3425_v44 = vld [vmem:[%s5717_s0 + $0x98] sm:$0xf]  ;;  %v3068_v45 = vld [vmem:[%s5717_s0 + $0xa0] sm:$0xf0]  ;;  %v3067_v46 = vor.u32 %v3426_v43, %v3066_v42  ;;  %v3478_v48 = vld [vmem:[%s5718_s1 + $0x50] sm:$0xff] }
   0xd   :  { %1222 = vrot.lane.b32.xlu1 %v3031_v17, %s3650_s25  ;;  %1226 = vrot.lane.b32.xlu2 %v3039_v19, %s3650_s25  ;;  %v3071_v47 = vor.u32 %v3425_v44, %v3068_v45  ;;  %v3485_v49 = vld [vmem:[%s5718_s1 + $0x88] sm:$0xff]  ;;  %v3427_v50 = vld [vmem:[%s5717_s0 + $0xb0] sm:$0xf] }
   0xe   :  { %1561 = vmatpush.bf16.msra.mxu2 %v3482_v22  ;;  %v3076_v51 = vld [vmem:[%s5717_s0 + $0xb8] sm:$0xf0]  ;;  %1735 = vmatpush.bf16.msra.mxu3 %v3485_v49  ;;  %v3477_v53 = vld [vmem:[%s5718_s1 + $0x48] sm:$0xff]  ;;  %v3428_v55 = vld [vmem:[%s5717_s0 + $0xb4] sm:$0xf0] }
   0xf   :  { %v3079_v52 = vor.u32 %v3427_v50, %v3076_v51  ;;  %v3074_v54 = vld [vmem:[%s5717_s0 + $0xac] sm:$0xf]  ;;  %v3082_v56 = vld [vmem:[%s5717_s0 + $0xc4] sm:$0xf]  ;;  %v3430_v58 = vld [vmem:[%s5717_s0 + $0xcc] sm:$0xf0] }
  0x10   :  { %v3075_v57 = vor.u32 %v3428_v55, %v3074_v54  ;;  %v3083_v59 = vor.u32 %v3430_v58, %v3082_v56  ;;  %v3429_v60 = vld [vmem:[%s5717_s0 + $0xc8] sm:$0xf]  ;;  %v3084_v61 = vld [vmem:[%s5717_s0 + $0xd0] sm:$0xf0]  ;;  %v3431_v62 = vld [vmem:[%s5717_s0 + $0xe0] sm:$0xf] }
  0x11   :  { %v3092_v63 = vld [vmem:[%s5717_s0 + $0xe8] sm:$0xf0]  ;;  %v3087_v0 = vor.u32 %v3429_v60, %v3084_v61  ;;  %v3098_v2 = vld [vmem:[%s5717_s0 + $0xf4] sm:$0xf]  ;;  %v3434_v3 = vld [vmem:[%s5717_s0 + $0xfc] sm:$0xf0] }
  0x12   :  { %1562 = vmatpush.bf16.msra.mxu2 %v3481_v29  ;;  %v3095_v1 = vor.u32 %v3431_v62, %v3092_v63  ;;  %v3106_v4 = vld [vmem:[%s5717_s0 + $0x10c] sm:$0xf]  ;;  %v3099_v5 = vor.u32 %v3434_v3, %v3098_v2  ;;  %v3436_v6 = vld [vmem:[%s5717_s0 + $0x114] sm:$0xf0]  ;;  %v3090_v7 = vld [vmem:[%s5717_s0 + $0xdc] sm:$0xf] }
  0x13   :  { %v3432_v8 = vld [vmem:[%s5717_s0 + $0xe4] sm:$0xf0]  ;;  %v3107_v9 = vor.u32 %v3436_v6, %v3106_v4  ;;  %v3435_v11 = vld [vmem:[%s5717_s0 + $0x110] sm:$0xf]  ;;  %v3108_v12 = vld [vmem:[%s5717_s0 + $0x118] sm:$0xf0] }
  0x14   :  { %1228 = vrot.lane.b32.xlu0 %v3043_v25, %s3650_s25  ;;  %v3091_v10 = vor.u32 %v3432_v8, %v3090_v7  ;;  %v3437_v13 = vld [vmem:[%s5717_s0 + $0x128] sm:$0xf]  ;;  %v3116_v14 = vld [vmem:[%s5717_s0 + $0x130] sm:$0xf0]  ;;  %v3433_v15 = vld [vmem:[%s5717_s0 + $0xf8] sm:$0xf]  ;;  %v3111_v18 = vor.u32 %v3435_v11, %v3108_v12 }
  0x15   :  { %1230 = vrot.lane.b32.xlu1 %v3047_v28, %s3650_s25  ;;  %1232 = vrot.lane.b32.xlu2 %v3051_v30, %s3650_s25  ;;  %v3100_v16 = vld [vmem:[%s5717_s0 + $0x100] sm:$0xf0]  ;;  %v3119_v19 = vor.u32 %v3437_v13, %v3116_v14  ;;  %v3122_v23 = vld [vmem:[%s5717_s0 + $0x13c] sm:$0xf] }
  0x16   :  { %1563 = vmatpush.bf16.msra.mxu2 %v3480_v33  ;;  %v3103_v20 = vor.u32 %v3433_v15, %v3100_v16  ;;  %v3440_v24 = vld [vmem:[%s5717_s0 + $0x144] sm:$0xf0]  ;;  %v3130_v25 = vld [vmem:[%s5717_s0 + $0x154] sm:$0xf]  ;;  %v3442_v27 = vld [vmem:[%s5717_s0 + $0x15c] sm:$0xf0] }
  0x17   :  { %v3123_v26 = vor.u32 %v3440_v24, %v3122_v23  ;;  %v3114_v28 = vld [vmem:[%s5717_s0 + $0x124] sm:$0xf]  ;;  %v3438_v29 = vld [vmem:[%s5717_s0 + $0x12c] sm:$0xf0]  ;;  %v3131_v31 = vor.u32 %v3442_v27, %v3130_v25  ;;  %v3441_v33 = vld [vmem:[%s5717_s0 + $0x158] sm:$0xf] }
  0x18   :  { %v3115_v32 = vor.u32 %v3438_v29, %v3114_v28  ;;  %v3132_v34 = vld [vmem:[%s5717_s0 + $0x160] sm:$0xf0]  ;;  %v3443_v35 = vld [vmem:[%s5717_s0 + $0x170] sm:$0xf]  ;;  %v3439_v37 = vld [vmem:[%s5717_s0 + $0x140] sm:$0xf] }
  0x19   :  { %v3124_v38 = vld [vmem:[%s5717_s0 + $0x148] sm:$0xf0]  ;;  %v3146_v44 = vld [vmem:[%s5717_s0 + $0x184] sm:$0xf]  ;;  %v3446_v45 = vld [vmem:[%s5717_s0 + $0x18c] sm:$0xf0] }
  0x1a   :  { %1564 = vmatpush.bf16.msra.mxu2 %v3479_v40  ;;  %v3138_v49 = vld [vmem:[%s5717_s0 + $0x16c] sm:$0xf]  ;;  %v3444_v50 = vld [vmem:[%s5717_s0 + $0x174] sm:$0xf0]  ;;  %v3447_v54 = vld [vmem:[%s5717_s0 + $0x1a0] sm:$0xf] }
  0x1b   :  { %v3156_v55 = vld [vmem:[%s5717_s0 + $0x1a8] sm:$0xf0]  ;;  %v3449_v56 = vld [vmem:[%s5717_s0 + $0x1b8] sm:$0xf]  ;;  %v3445_v58 = vld [vmem:[%s5717_s0 + $0x188] sm:$0xf] }
  0x1c   :  { %1234 = vrot.lane.b32.xlu0 %v3055_v36, %s3650_s25  ;;  %v3140_v36 = vld [vmem:[%s5717_s0 + $0x178] sm:$0xf0]  ;;  %v3159_v60 = vor.u32 %v3447_v54, %v3156_v55  ;;  %v3170_v2 = vld [vmem:[%s5717_s0 + $0x1cc] sm:$0xf]  ;;  %v3452_v3 = vld [vmem:[%s5717_s0 + $0x1d4] sm:$0xf0] }
  0x1d   :  { %1236 = vrot.lane.b32.xlu1 %v3059_v39, %s3650_s25  ;;  %1238 = vrot.lane.b32.xlu2 %v3063_v41, %s3650_s25  ;;  %v3135_v39 = vor.u32 %v3441_v33, %v3132_v34  ;;  %v3143_v40 = vor.u32 %v3443_v35, %v3140_v36  ;;  %v3127_v41 = vor.u32 %v3439_v37, %v3124_v38  ;;  %v3178_v4 = vld [vmem:[%s5717_s0 + $0x1e4] sm:$0xf]  ;;  %v3410_v6 = vld [vmem:[%s5718_s1 + $0x30] sm:$0xff] }
  0x1e   :  { %1565 = vmatpush.bf16.msra.mxu2 %v3478_v48  ;;  %v3448_v48 = vld [vmem:[%s5717_s0 + $0x1a4] sm:$0xf0]  ;;  %v3171_v7 = vor.u32 %v3452_v3, %v3170_v2  ;;  %v3180_v13 = vld [vmem:[%s5717_s0 + $0x1f0] sm:$0xf0]  ;;  %v3455_v14 = vld [vmem:[%s5717_s0 + $0x200] sm:$0xf] }
  0x1f   :  { %v3453_v12 = vld [vmem:[%s5717_s0 + $0x1e8] sm:$0xf]  ;;  %v3188_v15 = vld [vmem:[%s5717_s0 + $0x208] sm:$0xf0]  ;;  %v3408_v24 = vld [vmem:[%s5718_s1 + $0x20] sm:$0xff] }
  0x20   :  { %v3409_v16 = vld [vmem:[%s5718_s1 + $0x28] sm:$0xff]  ;;  %v3407_v27 = vld [vmem:[%s5718_s1 + $0x18] sm:$0xff]  ;;  %v3194_v28 = vld [vmem:[%s5717_s0 + $0x214] sm:$0xf] }
  0x21   :  { %v3458_v29 = vld [vmem:[%s5717_s0 + $0x21c] sm:$0xf0]  ;;  %v3186_v35 = vld [vmem:[%s5717_s0 + $0x1fc] sm:$0xf]  ;;  %v3456_v36 = vld [vmem:[%s5717_s0 + $0x204] sm:$0xf0] }
  0x22   :  { %1566 = vmatpush.bf16.msra.mxu2 %v3477_v53  ;;  %v3139_v53 = vor.u32 %v3444_v50, %v3138_v49  ;;  %v3195_v33 = vor.u32 %v3458_v29, %v3194_v28  ;;  %v3187_v37 = vor.u32 %v3456_v36, %v3186_v35  ;;  %v3412_v38 = vld [vmem:[%s5718_s1 + $0x40] sm:$0xff]  ;;  %v3341_v54 = vld [vmem:[%s5717_s0 + $0x8] sm:$0xf0]  ;;  %v3462_v2 = vld [vmem:[%s5717_s0 + $0x24c] sm:$0xf0] }
  0x23   :  { %715 = vmatpush.bf16.msra.mxu1 %v3412_v38  ;;  %v3340_v55 = vld [vmem:[%s5717_s0 + $0x4] sm:$0xf]  ;;  %v3472_v28 = vld [vmem:[%s5717_s0 + $0x2c4] sm:$0xf0]  ;;  %v3234_v29 = vld [vmem:[%s5717_s0 + $0x28c] sm:$0xf] }
  0x24   :  { %1240 = vrot.lane.b32.xlu0 %v3067_v46, %s3650_s25  ;;  %v3154_v46 = vld [vmem:[%s5717_s0 + $0x19c] sm:$0xf]  ;;  %v3252_v35 = vld [vmem:[%s5717_s0 + $0x2c8] sm:$0xf0]  ;;  %v3473_v36 = vld [vmem:[%s5717_s0 + $0x2d8] sm:$0xf] }
  0x25   :  { %1242 = vrot.lane.b32.xlu1 %v3071_v47, %s3650_s25  ;;  %1244 = vrot.lane.b32.xlu2 %v3075_v57, %s3650_s25  ;;  %v3147_v47 = vor.u32 %v3446_v45, %v3146_v44  ;;  %v3164_v57 = vld [vmem:[%s5717_s0 + $0x1c0] sm:$0xf0]  ;;  %v3457_v44 = vld [vmem:[%s5717_s0 + $0x218] sm:$0xf] }
  0x26   :  { %v3167_v61 = vor.u32 %v3449_v56, %v3164_v57  ;;  %v3196_v45 = vld [vmem:[%s5717_s0 + $0x220] sm:$0xf0]  ;;  %v3469_v38 = vld [vmem:[%s5717_s0 + $0x2a8] sm:$0xf] }
  0x27   :  { %v3199_v49 = vor.u32 %v3457_v44, %v3196_v45 }
  0x2c   :  { %1246 = vrot.lane.b32.xlu0 %v3079_v52, %s3650_s25  ;;  %v3155_v52 = vor.u32 %v3448_v48, %v3154_v46 }
  0x2d   :  { %1248 = vrot.lane.b32.xlu1 %v3083_v59, %s3650_s25  ;;  %1250 = vrot.lane.b32.xlu2 %v3087_v0, %s3650_s25  ;;  %v3148_v59 = vld [vmem:[%s5717_s0 + $0x190] sm:$0xf0] }
  0x2e   :  { %v3151_v62 = vor.u32 %v3445_v58, %v3148_v59  ;;  %v2678_v58 = vld [vmem:[%s5717_s0 + $0xc] sm:$0xf0] }
  0x2f   :  { %v2681_v59 = vor.u32 %v3340_v55, %v2678_v58  ;;  %v3266_v55 = vld [vmem:[%s5717_s0 + $0x2ec] sm:$0xf]  ;;  %v3258_v58 = vld [vmem:[%s5717_s0 + $0x2d4] sm:$0xf] }
  0x31   :  { %2966 = vmatmul.msk.bf16.vlgmr.msra.gmra.mxu1 %vm442_vm0, %v2681_v59 }
  0x34   :  { %1252 = vrot.lane.b32.xlu0 %v3091_v10, %s3650_s25  ;;  %v3450_v10 = vld [vmem:[%s5717_s0 + $0x1bc] sm:$0xf0] }
  0x35   :  { %1254 = vrot.lane.b32.xlu1 %v3095_v1, %s3650_s25  ;;  %1256 = vrot.lane.b32.xlu2 %v3099_v5, %s3650_s25  ;;  %v3411_v1 = vld [vmem:[%s5718_s1 + $0x38] sm:$0xff]  ;;  %v3454_v5 = vld [vmem:[%s5717_s0 + $0x1ec] sm:$0xf0] }
  0x36   :  { %539 = vmatpush.bf16.msra.mxu0 %v3411_v1  ;;  %v3179_v8 = vor.u32 %v3454_v5, %v3178_v4  ;;  %v3210_v1 = vld [vmem:[%s5717_s0 + $0x244] sm:$0xf]  ;;  %v3465_v5 = vld [vmem:[%s5717_s0 + $0x278] sm:$0xf] }
  0x37   :  { %v3211_v4 = vor.u32 %v3462_v2, %v3210_v1  ;;  %v3268_v1 = vld [vmem:[%s5717_s0 + $0x2f8] sm:$0xf0] }
  0x3a   :  { %540 = vmatpush.bf16.msra.mxu0 %v3410_v6  ;;  %v3228_v6 = vld [vmem:[%s5717_s0 + $0x280] sm:$0xf0] }
  0x3c   :  { %1258 = vrot.lane.b32.xlu0 %v3103_v20, %s3650_s25  ;;  %v3191_v20 = vor.u32 %v3455_v14, %v3188_v15 }
  0x3d   :  { %1260 = vrot.lane.b32.xlu1 %v3107_v9, %s3650_s25  ;;  %1262 = vrot.lane.b32.xlu2 %v3111_v18, %s3650_s25  ;;  %v3162_v9 = vld [vmem:[%s5717_s0 + $0x1b4] sm:$0xf]  ;;  %v3172_v18 = vld [vmem:[%s5717_s0 + $0x1d8] sm:$0xf0] }
  0x3e   :  { %v3163_v11 = vor.u32 %v3450_v10, %v3162_v9  ;;  %541 = vmatpush.bf16.msra.mxu0 %v3409_v16  ;;  %v3463_v9 = vld [vmem:[%s5717_s0 + $0x260] sm:$0xf]  ;;  %v3220_v10 = vld [vmem:[%s5717_s0 + $0x268] sm:$0xf0] }
  0x3f   :  { %v3223_v15 = vor.u32 %v3463_v9, %v3220_v10 }
  0x42   :  { %542 = vmatpush.bf16.msra.mxu0 %v3408_v24  ;;  %v3242_v24 = vld [vmem:[%s5717_s0 + $0x2a4] sm:$0xf] }
  0x44   :  { %1264 = vrot.lane.b32.xlu0 %v3115_v32, %s3650_s25  ;;  %v3406_v32 = vld [vmem:[%s5718_s1 + $0x10] sm:$0xff] }
  0x45   :  { %1266 = vrot.lane.b32.xlu1 %v3119_v19, %s3650_s25  ;;  %1268 = vrot.lane.b32.xlu2 %v3123_v26, %s3650_s25  ;;  %v3183_v19 = vor.u32 %v3453_v12, %v3180_v13  ;;  %v3231_v13 = vor.u32 %v3465_v5, %v3228_v6  ;;  %v2700_v5 = vld [vmem:[%s5717_s0 + $0x48] sm:$0xf]  ;;  %v3347_v6 = vld [vmem:[%s5717_s0 + $0x50] sm:$0xf0] }
  0x46   :  { %543 = vmatpush.bf16.msra.mxu0 %v3407_v27 }
  0x4a   :  { %544 = vmatpush.bf16.msra.mxu0 %v3406_v32 }
  0x4c   :  { %1270 = vrot.lane.b32.xlu0 %v3127_v41, %s3650_s25  ;;  %v3461_v41 = vld [vmem:[%s5717_s0 + $0x248] sm:$0xf] }
  0x4d   :  { %1272 = vrot.lane.b32.xlu1 %v3131_v31, %s3650_s25  ;;  %1274 = vrot.lane.b32.xlu2 %v3135_v39, %s3650_s25  ;;  %v3460_v31 = vld [vmem:[%s5717_s0 + $0x234] sm:$0xf0]  ;;  %v3459_v39 = vld [vmem:[%s5717_s0 + $0x230] sm:$0xf] }
  0x54   :  { %1276 = vrot.lane.b32.xlu0 %v3139_v53, %s3650_s25  ;;  %v2676_v53 = vld [vmem:[%s5717_s0] sm:$0xf] }
  0x55   :  { %1278 = vrot.lane.b32.xlu1 %v3143_v40, %s3650_s25  ;;  %1280 = vrot.lane.b32.xlu2 %v3147_v47, %s3650_s25  ;;  %v3204_v40 = vld [vmem:[%s5717_s0 + $0x238] sm:$0xf0]  ;;  %v2677_v57 = vor.u32 %v3341_v54, %v2676_v53 }
  0x56   :  { %v3207_v47 = vor.u32 %v3459_v39, %v3204_v40  ;;  %v3244_v39 = vld [vmem:[%s5717_s0 + $0x2b0] sm:$0xf0] }
  0x57   :  { %v3247_v44 = vor.u32 %v3469_v38, %v3244_v39  ;;  %v2718_v39 = vld [vmem:[%s5717_s0 + $0x84] sm:$0xf0] }
  0x5c   :  { %1282 = vrot.lane.b32.xlu0 %v3151_v62, %s3650_s25  ;;  %v3226_v62 = vld [vmem:[%s5717_s0 + $0x274] sm:$0xf] }
  0x5d   :  { %1284 = vrot.lane.b32.xlu1 %v3155_v52, %s3650_s25  ;;  %1286 = vrot.lane.b32.xlu2 %v3159_v60, %s3650_s25  ;;  %v3218_v60 = vld [vmem:[%s5717_s0 + $0x25c] sm:$0xf] }
  0x5f   :  { %v1225_v51 = vpop.permute.xlu2 %1224 }
  0x64   :  { %1288 = vrot.lane.b32.xlu0 %v3163_v11, %s3650_s25 }
  0x65   :  { %1290 = vrot.lane.b32.xlu1 %v3167_v61, %s3650_s25  ;;  %1292 = vrot.lane.b32.xlu2 %v3171_v7, %s3650_s25  ;;  %v3464_v61 = vld [vmem:[%s5717_s0 + $0x264] sm:$0xf0]  ;;  %v3467_v7 = vld [vmem:[%s5717_s0 + $0x290] sm:$0xf] }
  0x67   :  { %v1227_v63 = vpop.permute.xlu2 %1226 }
  0x68   :  { %v1347_v0 = vsel %vm1344_vm1, %v1225_v51, %v1227_v63  ;;  %v3404_v51 = vld [vmem:[%s5718_s1] sm:$0xff] }
  0x6d   :  { %1296 = vrot.lane.b32.xlu1 %v3179_v8, %s3650_s25  ;;  %1298 = vrot.lane.b32.xlu2 %v3183_v19, %s3650_s25  ;;  %v3236_v8 = vld [vmem:[%s5717_s0 + $0x298] sm:$0xf0] }
  0x6e   :  { %v3239_v14 = vor.u32 %v3467_v7, %v3236_v8  ;;  %v3342_v19 = vld [vmem:[%s5717_s0 + $0x1c] sm:$0xf]  ;;  %v3346_v7 = vld [vmem:[%s5717_s0 + $0x4c] sm:$0xf]  ;;  %v2701_v8 = vor.u32 %v3347_v6, %v2700_v5 }
  0x6f   :  { %v1233_v26 = vpop.permute.xlu2 %1232 }
  0x75   :  { %1302 = vrot.lane.b32.xlu1 %v3191_v20, %s3650_s25  ;;  %1304 = vrot.lane.b32.xlu2 %v3195_v33, %s3650_s25 }
  0x76   :  { %v1217_v17 = vpop.permute.xlu0 %1216 }
  0x77   :  { %v1221_v30 = vpop.permute.xlu1 %1220  ;;  %v1239_v46 = vpop.permute.xlu2 %1238 }
  0x7d   :  { %1310 = vrot.lane.b32.xlu2 %v3207_v47, %s3650_s25  ;;  %v2692_v47 = vld [vmem:[%s5717_s0 + $0x30] sm:$0xf] }
  0x7e   :  { %v1219_v21 = vpop.permute.xlu0 %1218 }
  0x7f   :  { %3308 = vmatmul.msk.bf16.vlgmr.msra.gmra.mxu3 %vm442_vm0, %v1219_v21  ;;  %v1345_v22 = vsel %vm1344_vm1, %v1217_v17, %v1219_v21  ;;  %v1223_v42 = vpop.permute.xlu1 %1222  ;;  %v3451_v17 = vld [vmem:[%s5717_s0 + $0x1d0] sm:$0xf]  ;;  %v4093_v56 = vpop.permute.xlu2 %1244 }
  0x80   :  { %1567 = vmatmul.bf16.vlgmr.msra.gmra.mxu2 %v1345_v22  ;;  %v1346_v43 = vsel %vm1344_vm1, %v1221_v30, %v1223_v42  ;;  %v3175_v21 = vor.u32 %v3451_v17, %v3172_v18  ;;  %v3202_v30 = vld [vmem:[%s5717_s0 + $0x22c] sm:$0xf]  ;;  %v2684_v17 = vld [vmem:[%s5717_s0 + $0x18] sm:$0xf]  ;;  %v3343_v18 = vld [vmem:[%s5717_s0 + $0x20] sm:$0xf0] }
  0x81   :  { %v3203_v34 = vor.u32 %v3460_v31, %v3202_v30  ;;  %v2685_v20 = vor.u32 %v3343_v18, %v2684_v17  ;;  %v3468_v30 = vld [vmem:[%s5717_s0 + $0x294] sm:$0xf0]  ;;  %v2708_v17 = vld [vmem:[%s5717_s0 + $0x60] sm:$0xf]  ;;  %v3349_v18 = vld [vmem:[%s5717_s0 + $0x68] sm:$0xf0] }
  0x82   :  { %1294 = vrot.lane.b32.xlu0 %v3175_v21, %s3650_s25  ;;  %v2686_v21 = vld [vmem:[%s5717_s0 + $0x24] sm:$0xf0]  ;;  %v3235_v33 = vor.u32 %v3468_v30, %v3234_v29 }
  0x83   :  { %1308 = vrot.lane.b32.xlu1 %v3203_v34, %s3650_s25  ;;  %v3471_v34 = vld [vmem:[%s5717_s0 + $0x2c0] sm:$0xf] }
  0x86   :  { %v1229_v23 = vpop.permute.xlu0 %1228 }
  0x87   :  { %v1231_v22 = vpop.permute.xlu1 %1230  ;;  %v4138_v12 = vpop.permute.xlu2 %1250 }
  0x88   :  { %v1348_v25 = vsel %vm1344_vm1, %v1229_v23, %v1231_v22  ;;  %v2689_v23 = vor.u32 %v3342_v19, %v2686_v21  ;;  %v3348_v19 = vld [vmem:[%s5717_s0 + $0x64] sm:$0xf]  ;;  %v2710_v21 = vld [vmem:[%s5717_s0 + $0x6c] sm:$0xf0] }
  0x8a   :  { %1300 = vrot.lane.b32.xlu0 %v3187_v37, %s3650_s25  ;;  %2967 = vmatmul.msk.bf16.gmra.mxu1 %vm442_vm0, %v2689_v23  ;;  %v3260_v37 = vld [vmem:[%s5717_s0 + $0x2e0] sm:$0xf0]  ;;  %v2713_v23 = vor.u32 %v3348_v19, %v2710_v21 }
  0x8e   :  { %v1235_v50 = vpop.permute.xlu0 %1234 }
  0x8f   :  { %3309 = vmatmul.msk.bf16.gmra.mxu3 %vm442_vm0, %v1223_v42  ;;  %v3212_v42 = vld [vmem:[%s5717_s0 + $0x250] sm:$0xf0]  ;;  %v1349_v52 = vsel %vm1344_vm1, %v1233_v26, %v1235_v50  ;;  %v1237_v11 = vpop.permute.xlu1 %1236  ;;  %v3250_v26 = vld [vmem:[%s5717_s0 + $0x2bc] sm:$0xf]  ;;  %v4175_v31 = vpop.permute.xlu2 %1256 }
  0x90   :  { %1572 = vmatmul.bf16.gmra.mxu2 %v1346_v43  ;;  %v3405_v43 = vld [vmem:[%s5718_s1 + $0x8] sm:$0xff]  ;;  %v3215_v48 = vor.u32 %v3461_v41, %v3212_v42  ;;  %v1350_v16 = vsel %vm1344_vm1, %v1237_v11, %v1239_v46  ;;  %v3251_v32 = vor.u32 %v3472_v28, %v3250_v26  ;;  %v3255_v42 = vor.u32 %v3471_v34, %v3252_v35  ;;  %v2716_v35 = vld [vmem:[%s5717_s0 + $0x78] sm:$0xf] }
  0x91   :  { %545 = vmatpush.bf16.msra.mxu0 %v3405_v43  ;;  %v3263_v43 = vor.u32 %v3473_v36, %v3260_v37  ;;  %v3351_v36 = vld [vmem:[%s5717_s0 + $0x80] sm:$0xf0]  ;;  %v3350_v37 = vld [vmem:[%s5717_s0 + $0x7c] sm:$0xf] }
  0x92   :  { %1314 = vrot.lane.b32.xlu1 %v3215_v48, %s3650_s25  ;;  %1306 = vrot.lane.b32.xlu0 %v3199_v49, %s3650_s25  ;;  %v3345_v48 = vld [vmem:[%s5717_s0 + $0x38] sm:$0xf0]  ;;  %v3344_v49 = vld [vmem:[%s5717_s0 + $0x34] sm:$0xf]  ;;  %v2717_v38 = vor.u32 %v3351_v36, %v2716_v35 }
  0x93   :  { %v2740_v35 = vld [vmem:[%s5717_s0 + $0xc0] sm:$0xf]  ;;  %v3357_v36 = vld [vmem:[%s5717_s0 + $0xc8] sm:$0xf0] }
  0x95   :  { %546 = vmatpush.bf16.msra.mxu0 %v3404_v51  ;;  %v2694_v51 = vld [vmem:[%s5717_s0 + $0x3c] sm:$0xf0] }
  0x96   :  { %v1241_v40 = vpop.permute.xlu0 %1240  ;;  %v2697_v53 = vor.u32 %v3344_v49, %v2694_v51 }
  0x97   :  { %v4199_v45 = vpop.permute.xlu2 %1262 }
  0x98   :  { %547 = vmatmul.bf16.vlgmr.msra.gmra.mxu0 %v2677_v57  ;;  %v3476_v57 = vld [vmem:[%s5717_s0 + $0x2f4] sm:$0xf0] }
  0x99   :  { %v3267_v59 = vor.u32 %v3476_v57, %v3266_v55  ;;  %v3353_v55 = vld [vmem:[%s5717_s0 + $0x98] sm:$0xf0]  ;;  %v3352_v57 = vld [vmem:[%s5717_s0 + $0x94] sm:$0xf] }
  0x9a   :  { %1312 = vrot.lane.b32.xlu0 %v3211_v4, %s3650_s25  ;;  %2968 = vmatmul.msk.bf16.gmra.mxu1 %vm442_vm0, %v2697_v53 }
  0x9f   :  { %3310 = vmatmul.msk.bf16.gmra.mxu3 %vm442_vm0, %v1227_v63  ;;  %v3219_v63 = vor.u32 %v3464_v61, %v3218_v60  ;;  %v3474_v60 = vld [vmem:[%s5717_s0 + $0x2dc] sm:$0xf0] }
  0xa0   :  { %1577 = vmatmul.bf16.gmra.mxu2 %v1347_v0  ;;  %v3466_v0 = vld [vmem:[%s5717_s0 + $0x27c] sm:$0xf0]  ;;  %v3259_v61 = vor.u32 %v3474_v60, %v3258_v58 }
  0xa1   :  { %v3227_v3 = vor.u32 %v3466_v0, %v3226_v62  ;;  %1316 = vrot.lane.b32.xlu2 %v3219_v63, %s3650_s25  ;;  %v4233_v62 = vpop.permute.xlu2 %1268  ;;  %v3475_v0 = vld [vmem:[%s5717_s0 + $0x2f0] sm:$0xf] }
  0xa2   :  { %1318 = vrot.lane.b32.xlu0 %v3223_v15, %s3650_s25 }
  0xa3   :  { %1320 = vrot.lane.b32.xlu1 %v3227_v3, %s3650_s25  ;;  %v3271_v3 = vor.u32 %v3475_v0, %v3268_v1 }
  0xa8   :  { %552 = vmatmul.bf16.gmra.mxu0 %v2685_v20  ;;  %v2709_v20 = vor.u32 %v3349_v18, %v2708_v17  ;;  %v2734_v17 = vld [vmem:[%s5717_s0 + $0xb4] sm:$0xf0] }
  0xa9   :  { %1322 = vrot.lane.b32.xlu2 %v3231_v13, %s3650_s25  ;;  %v4261_v9 = vpop.permute.xlu2 %1274 }
  0xaa   :  { %1324 = vrot.lane.b32.xlu0 %v3235_v33, %s3650_s25 }
  0xab   :  { %1326 = vrot.lane.b32.xlu1 %v3239_v14, %s3650_s25 }
  0xaf   :  { %3311 = vmatmul.msk.bf16.gmra.mxu3 %vm442_vm0, %v1231_v22  ;;  %v1243_v22 = vpop.permute.xlu1 %1242 }
  0xb0   :  { %1582 = vmatmul.bf16.gmra.mxu2 %v1348_v25  ;;  %v3470_v25 = vld [vmem:[%s5717_s0 + $0x2ac] sm:$0xf0] }
  0xb1   :  { %v3243_v27 = vor.u32 %v3470_v25, %v3242_v24  ;;  %v4266_v14 = vpop.permute.xlu2 %1280 }
  0xb2   :  { %1330 = vrot.lane.b32.xlu0 %v3247_v44, %s3650_s25 }
  0xb3   :  { %1328 = vrot.lane.b32.xlu2 %v3243_v27, %s3650_s25  ;;  %1332 = vrot.lane.b32.xlu1 %v3251_v32, %s3650_s25 }
  0xb7   :  { %v1249_v41 = vpop.permute.xlu1 %1248 }
  0xb9   :  { %v4289_v27 = vpop.permute.xlu2 %1286 }
  0xba   :  { %1336 = vrot.lane.b32.xlu0 %v3259_v61, %s3650_s25 }
  0xbb   :  { %1334 = vrot.lane.b32.xlu2 %v3255_v42, %s3650_s25  ;;  %1338 = vrot.lane.b32.xlu1 %v3263_v43, %s3650_s25 }
  0xbf   :  { %3312 = vmatmul.msk.bf16.gmra.mxu3 %vm442_vm0, %v1235_v50  ;;  %v2693_v50 = vor.u32 %v3345_v48, %v2692_v47  ;;  %v4218_v54 = vpop.permute.xlu1 %1254 }
  0xc0   :  { %1587 = vmatmul.bf16.gmra.mxu2 %v1349_v52  ;;  %v1247_v52 = vpop.permute.xlu0 %1246 }
  0xc1   :  { %557 = vmatmul.bf16.gmra.mxu0 %v2693_v50  ;;  %v1352_v4 = vsel %vm1344_vm1, %v4093_v56, %v1247_v52  ;;  %v2702_v56 = vld [vmem:[%s5717_s0 + $0x54] sm:$0xf0]  ;;  %v4299_v34 = vpop.permute.xlu2 %1292 }
  0xc2   :  { %1342 = vrot.lane.b32.xlu0 %v3271_v3, %s3650_s25  ;;  %v2705_v10 = vor.u32 %v3346_v7, %v2702_v56 }
  0xc3   :  { %1340 = vrot.lane.b32.xlu2 %v3267_v59, %s3650_s25 }
  0xc4   :  { %2969 = vmatmul.msk.bf16.gmra.mxu1 %vm442_vm0, %v2705_v10  ;;  %v2732_v10 = vld [vmem:[%s5717_s0 + $0xa8] sm:$0xf] }
  0xc7   :  { %v4243_v2 = vpop.permute.xlu1 %1260 }
  0xc8   :  { %v1253_v63 = vpop.permute.xlu0 %1252 }
  0xc9   :  { %v1354_v33 = vsel %vm1344_vm1, %v1253_v63, %v4218_v54  ;;  %v4321_v47 = vpop.permute.xlu2 %1298 }
  0xcf   :  { %3313 = vmatmul.msk.bf16.gmra.mxu3 %vm442_vm0, %v1239_v46  ;;  %v1351_v46 = vsel %vm1344_vm1, %v1241_v40, %v1243_v22  ;;  %v4264_v13 = vpop.permute.xlu1 %1266 }
  0xd0   :  { %1592 = vmatmul.bf16.gmra.mxu2 %v1350_v16  ;;  %v1259_v11 = vpop.permute.xlu0 %1258  ;;  %v1353_v16 = vsel %vm1344_vm1, %v1249_v41, %v4138_v12  ;;  %v2721_v41 = vor.u32 %v3350_v37, %v2718_v39  ;;  %v3356_v37 = vld [vmem:[%s5717_s0 + $0xc4] sm:$0xf]  ;;  %v2742_v39 = vld [vmem:[%s5717_s0 + $0xcc] sm:$0xf0] }
  0xd1   :  { %562 = vmatmul.bf16.gmra.mxu0 %v2701_v8  ;;  %v4343_v61 = vpop.permute.xlu2 %1304  ;;  %v1356_v8 = vsel %vm1344_vm1, %v4243_v2, %v4199_v45 }
  0xd4   :  { %2970 = vmatmul.msk.bf16.gmra.mxu1 %vm442_vm0, %v2713_v23 }
  0xd8   :  { %v4268_v15 = vpop.permute.xlu0 %1264 }
  0xd9   :  { %v4351_v7 = vpop.permute.xlu2 %1310 }
  0xdf   :  { %3314 = vmatmul.msk.bf16.gmra.mxu3 %vm442_vm0, %v1243_v22  ;;  %v4286_v22 = vpop.permute.xlu1 %1272 }
  0xe0   :  { %1597 = vmatmul.bf16.gmra.mxu2 %v1351_v46 }
  0xe1   :  { %567 = vmatmul.bf16.gmra.mxu0 %v2709_v20 }
  0xe4   :  { %2971 = vmatmul.msk.bf16.gmra.mxu1 %vm442_vm0, %v2721_v41 }
  0xe7   :  { %v4294_v29 = vpop.permute.xlu1 %1278 }
  0xef   :  { %3315 = vmatmul.msk.bf16.gmra.mxu3 %vm442_vm0, %v1247_v52  ;;  %v4318_v46 = vpop.permute.xlu1 %1284  ;;  %v1355_v52 = vsel %vm1344_vm1, %v4175_v31, %v1259_v11  ;;  %v2726_v31 = vld [vmem:[%s5717_s0 + $0x9c] sm:$0xf0] }
  0xf0   :  { %1602 = vmatmul.bf16.gmra.mxu2 %v1352_v4  ;;  %v2729_v59 = vor.u32 %v3352_v57, %v2726_v31 }
  0xf1   :  { %572 = vmatmul.bf16.gmra.mxu0 %v2717_v38  ;;  %v2741_v38 = vor.u32 %v3357_v36, %v2740_v35  ;;  %v2756_v36 = vld [vmem:[%s5717_s0 + $0xf0] sm:$0xf] }
  0xf4   :  { %2972 = vmatmul.msk.bf16.gmra.mxu1 %vm442_vm0, %v2729_v59 }
  0xf7   :  { %v4328_v53 = vpop.permute.xlu1 %1290 }
  0xff   :  { %3316 = vmatmul.msk.bf16.gmra.mxu3 %vm442_vm0, %v4138_v12  ;;  %v4292_v12 = vpop.permute.xlu0 %1270  ;;  %v4349_v3 = vpop.permute.xlu1 %1296 }
 0x100   :  { %1607 = vmatmul.bf16.gmra.mxu2 %v1353_v16  ;;  %v3354_v16 = vld [vmem:[%s5717_s0 + $0xac] sm:$0xf]  ;;  %v1358_v59 = vsel %vm1344_vm1, %v4233_v62, %v4292_v12 }
 0x101   :  { %v2737_v18 = vor.u32 %v3354_v16, %v2734_v17 }
 0x102   :  { %v1737_v24 = vpop.f32.mrf.mxu3 }
 0x103   :  { %v1568_v25 = vpop.f32.mrf.mxu2 }
 0x104   :  { %v1738_v26 = vadd.f32 %v1737_v24, %v1568_v25  ;;  %2973 = vmatmul.msk.bf16.gmra.mxu1 %vm442_vm0, %v2737_v18  ;;  %v4377_v24 = vpop.permute.xlu2 %1316 }
 0x106   :  { %1961 = vrot.lane.b32.xlu1 %v1738_v26, %s3651_s17 }
 0x107   :  { %v4315_v40 = vpop.permute.xlu0 %1276  ;;  %v4373_v20 = vpop.permute.xlu1 %1302 }
 0x10a   :  { %v1739_v28 = vpop.f32.mrf.mxu3 }
 0x10b   :  { %v1570_v30 = vpop.f32.mrf.mxu2 }
 0x10c   :  { %v1740_v32 = vadd.f32 %v1739_v28, %v1570_v30  ;;  %v4405_v41 = vpop.permute.xlu2 %1322 }
 0x10e   :  { %1963 = vrot.lane.b32.xlu2 %v1740_v32, %s3651_s17  ;;  %v1357_v32 = vsel %vm1344_vm1, %v4268_v15, %v4264_v13  ;;  %v4400_v15 = vpop.f32.mrf.mxu1 }
 0x10f   :  { %3317 = vmatmul.msk.bf16.gmra.mxu3 %vm442_vm0, %v4218_v54  ;;  %v4323_v49 = vpop.permute.xlu0 %1282  ;;  %v2724_v54 = vld [vmem:[%s5717_s0 + $0x90] sm:$0xf]  ;;  %v4381_v30 = vpop.permute.xlu1 %1308 }
 0x110   :  { %1612 = vmatmul.bf16.gmra.mxu2 %v1354_v33  ;;  %v2725_v58 = vor.u32 %v3353_v55, %v2724_v54 }
 0x112   :  { %v1742_v42 = vpop.f32.mrf.mxu3  ;;  %577 = vmatmul.bf16.gmra.mxu0 %v2725_v58 }
 0x113   :  { %v1573_v43 = vpop.f32.mrf.mxu2 }
 0x114   :  { %v1743_v44 = vadd.f32 %v1742_v42, %v1573_v43  ;;  %v2745_v42 = vor.u32 %v3356_v37, %v2742_v39  ;;  %v4413_v55 = vpop.permute.xlu2 %1328  ;;  %v3361_v37 = vld [vmem:[%s5717_s0 + $0xf8] sm:$0xf0] }
 0x115   :  { %v4387_v33 = vpop.f32.mrf.mxu0  ;;  %v2757_v39 = vor.u32 %v3361_v37, %v2756_v36  ;;  %v2764_v37 = vld [vmem:[%s5717_s0 + $0x108] sm:$0xf] }
 0x116   :  { %1965 = vrot.lane.b32.xlu0 %v1743_v44, %s3651_s17  ;;  %2974 = vmatmul.msk.bf16.gmra.mxu1 %vm442_vm0, %v2745_v42  ;;  %v2758_v42 = vld [vmem:[%s5717_s0 + $0xfc] sm:$0xf0] }
 0x117   :  { %v4346_v1 = vpop.permute.xlu0 %1288 }
 0x11a   :  { %v1744_v48 = vpop.f32.mrf.mxu3 }
 0x11b   :  { %v1575_v50 = vpop.f32.mrf.mxu2 }
 0x11c   :  { %v1745_v51 = vadd.f32 %v1744_v48, %v1575_v50  ;;  %v4442_v17 = vpop.permute.xlu2 %1334 }
 0x11e   :  { %1967 = vrot.lane.b32.xlu1 %v1745_v51, %s3651_s17  ;;  %v550_v51 = vpop.f32.mrf.mxu0 }
 0x11f   :  { %3318 = vmatmul.msk.bf16.gmra.mxu3 %vm442_vm0, %v1259_v11  ;;  %v4357_v56 = vpop.permute.xlu0 %1294  ;;  %v3355_v11 = vld [vmem:[%s5717_s0 + $0xb0] sm:$0xf0] }
 0x120   :  { %1617 = vmatmul.bf16.gmra.mxu2 %v1355_v52  ;;  %v2733_v2 = vor.u32 %v3355_v11, %v2732_v10  ;;  %v719_v52 = vpop.f32.mrf.mxu1 }
 0x122   :  { %v1747_v60 = vpop.f32.mrf.mxu3  ;;  %582 = vmatmul.bf16.gmra.mxu0 %v2733_v2 }
 0x123   :  { %v1578_v63 = vpop.f32.mrf.mxu2 }
 0x124   :  { %v1748_v0 = vadd.f32 %v1747_v60, %v1578_v63  ;;  %v2748_v63 = vld [vmem:[%s5717_s0 + $0xd8] sm:$0xf] }
 0x126   :  { %1969 = vrot.lane.b32.xlu2 %v1748_v0, %s3651_s17  ;;  %v4421_v60 = vpop.f32.mrf.mxu0  ;;  %v3359_v0 = vld [vmem:[%s5717_s0 + $0xe0] sm:$0xf0] }
 0x128   :  { %v4434_v62 = vpop.f32.mrf.mxu1 }
 0x12a   :  { %v1749_v4 = vpop.f32.mrf.mxu3 }
 0x12b   :  { %v1580_v5 = vpop.f32.mrf.mxu2 }
 0x12c   :  { %v1750_v6 = vadd.f32 %v1749_v4, %v1580_v5  ;;  %v3358_v4 = vld [vmem:[%s5717_s0 + $0xdc] sm:$0xf]  ;;  %v2749_v5 = vor.u32 %v3359_v0, %v2748_v63  ;;  %v4489_v63 = vld [vmem:[%s5719_s2] ss:$0 sm:$0xff] }
 0x12e   :  { %1971 = vrot.lane.b32.xlu0 %v1750_v6, %s3651_s17  ;;  %v2750_v6 = vld [vmem:[%s5717_s0 + $0xe4] sm:$0xf0]  ;;  %v4447_v18 = vpop.f32.mrf.mxu0 }
 0x12f   :  { %3319 = vmatmul.msk.bf16.gmra.mxu3 %vm442_vm0, %v4199_v45  ;;  %v4379_v45 = vpop.permute.xlu0 %1300  ;;  %v2753_v10 = vor.u32 %v3358_v4, %v2750_v6 }
 0x130   :  { %1622 = vmatmul.bf16.gmra.mxu2 %v1356_v8 }
 0x131   :  { %2975 = vmatmul.msk.bf16.gmra.mxu1 %vm442_vm0, %v2753_v10 }
 0x132   :  { %v1752_v19 = vpop.f32.mrf.mxu3  ;;  %587 = vmatmul.bf16.gmra.mxu0 %v2741_v38  ;;  %v3360_v38 = vld [vmem:[%s5717_s0 + $0xf4] sm:$0xf] }
 0x133   :  { %v1583_v21 = vpop.f32.mrf.mxu2 }
 0x134   :  { %v1753_v23 = vadd.f32 %v1752_v19, %v1583_v21  ;;  %v4449_v19 = vpop.f32.mrf.mxu1 }
 0x136   :  { %1973 = vrot.lane.b32.xlu1 %v1753_v23, %s3651_s17 }
 0x137   :  { %v4407_v44 = vpop.permute.xlu0 %1306 }
 0x13a   :  { %v1754_v25 = vpop.f32.mrf.mxu3 }
 0x13b   :  { %v1585_v26 = vpop.f32.mrf.mxu2 }
 0x13c   :  { %v1755_v28 = vadd.f32 %v1754_v25, %v1585_v26 }
 0x13e   :  { %1975 = vrot.lane.b32.xlu2 %v1755_v28, %s3651_s17  ;;  %v1359_v28 = vsel %vm1344_vm1, %v4286_v22, %v4261_v9  ;;  %v4459_v35 = vpop.f32.mrf.mxu0  ;;  %v4472_v22 = vpop.f32.mrf.mxu1 }
 0x13f   :  { %3320 = vmatmul.msk.bf16.gmra.mxu3 %vm442_vm0, %v4264_v13  ;;  %v4411_v13 = vpop.permute.xlu1 %1314  ;;  %v4415_v31 = vpop.permute.xlu0 %1312 }
 0x140   :  { %1627 = vmatmul.bf16.gmra.mxu2 %v1357_v32  ;;  %v4457_v32 = vpop.permute.xlu2 %1340 }
 0x142   :  { %v1757_v43 = vpop.f32.mrf.mxu3  ;;  %592 = vmatmul.bf16.gmra.mxu0 %v2749_v5 }
 0x143   :  { %v1588_v48 = vpop.f32.mrf.mxu2 }
 0x144   :  { %v1758_v50 = vadd.f32 %v1757_v43, %v1588_v48  ;;  %v2761_v48 = vor.u32 %v3360_v38, %v2758_v42  ;;  %v3363_v38 = vld [vmem:[%s5717_s0 + $0x110] sm:$0xf0]  ;;  %v3362_v42 = vld [vmem:[%s5717_s0 + $0x10c] sm:$0xf] }
 0x146   :  { %1977 = vrot.lane.b32.xlu0 %v1758_v50, %s3651_s17  ;;  %2976 = vmatmul.msk.bf16.gmra.mxu1 %vm442_vm0, %v2761_v48  ;;  %v4491_v0 = vpop.f32.mrf.mxu0  ;;  %v4493_v4 = vpop.f32.mrf.mxu1  ;;  %v2766_v48 = vld [vmem:[%s5717_s0 + $0x114] sm:$0xf0] }
 0x147   :  { %v4439_v8 = vpop.permute.xlu1 %1320 }
 0x14a   :  { %v1759_v54 = vpop.f32.mrf.mxu3 }
 0x14b   :  { %v1590_v57 = vpop.f32.mrf.mxu2 }
 0x14c   :  { %v1760_v58 = vadd.f32 %v1759_v54, %v1590_v57 }
 0x14e   :  { %1979 = vrot.lane.b32.xlu1 %v1760_v58, %s3651_s17  ;;  %v4505_v36 = vpop.f32.mrf.mxu0 }
 0x14f   :  { %3321 = vmatmul.msk.bf16.gmra.mxu3 %vm442_vm0, %v4292_v12  ;;  %v4445_v12 = vpop.permute.xlu0 %1318  ;;  %v4451_v23 = vpop.permute.xlu1 %1326 }
 0x150   :  { %1632 = vmatmul.bf16.gmra.mxu2 %v1358_v59  ;;  %v3487_v59 = vld [vmem:[%s5720_s3] sm:$0xff]  }
 0x151   :  { %v3489_v5 = vunpack.c.h.bf16 %v3487_v59 }
 0x152   :  { %v1762_v11 = vpop.f32.mrf.mxu3  ;;  %597 = vmatmul.bf16.gmra.mxu0 %v2757_v39  ;;  %v2765_v39 = vor.u32 %v3363_v38, %v2764_v37 }
 0x153   :  { %v1593_v16 = vpop.f32.mrf.mxu2 }
 0x154   :  { %v1763_v2 = vadd.f32 %v1762_v11, %v1593_v16 }
 0x156   :  { %1981 = vrot.lane.b32.xlu2 %v1763_v2, %s3651_s17 }
 0x157   :  { %v4477_v43 = vpop.permute.xlu0 %1324  ;;  %v4480_v58 = vpop.permute.xlu1 %1332 }
 0x15a   :  { %v1764_v21 = vpop.f32.mrf.mxu3 }
 0x15b   :  { %v1595_v25 = vpop.f32.mrf.mxu2 }
 0x15c   :  { %v1765_v26 = vadd.f32 %v1764_v21, %v1595_v25  ;;  %v1360_v25 = vsel %vm1344_vm1, %v4315_v40, %v4294_v29  ;;  %v4515_v40 = vpop.f32.mrf.mxu1 }
 0x15e   :  { %1983 = vrot.lane.b32.xlu0 %v1765_v26, %s3651_s17 }
 0x15f   :  { %3322 = vmatmul.msk.bf16.gmra.mxu3 %vm442_vm0, %v4261_v9  ;;  %v720_v9 = vadd.f32 %v719_v52, %v550_v51  ;;  %v4497_v11 = vpop.permute.xlu0 %1330 }
 0x160   :  { %1637 = vmatmul.bf16.gmra.mxu2 %v1359_v28  ;;  %v4503_v28 = vpop.permute.xlu1 %1338 }
 0x162   :  { %v1767_v50 = vpop.f32.mrf.mxu3  ;;  %602 = vmatmul.bf16.gmra.mxu0 %v2765_v39  ;;  %v728_v39 = vadd.f32 %v4472_v22, %v4459_v35  ;;  %v2772_v35 = vld [vmem:[%s5717_s0 + $0x120] sm:$0xf]  ;;  %v3365_v22 = vld [vmem:[%s5717_s0 + $0x128] sm:$0xf0] }
 0x163   :  { %v1598_v54 = vpop.f32.mrf.mxu2 }
 0x164   :  { %v1768_v57 = vadd.f32 %v1767_v50, %v1598_v54  ;;  %v2769_v54 = vor.u32 %v3362_v42, %v2766_v48 }
 0x166   :  { %1985 = vrot.lane.b32.xlu1 %v1768_v57, %s3651_s17  ;;  %2977 = vmatmul.msk.bf16.gmra.mxu1 %vm442_vm0, %v2769_v54  ;;  %v3364_v54 = vld [vmem:[%s5717_s0 + $0x124] sm:$0xf] }
 0x168   :  { %v1964_v6 = vpop.permute.xlu2 %1963 }
 0x169   :  { %v2154_v10 = vsel %vm442_vm0, %v720_v9, %v1964_v6  ;;  %v718_v6 = vadd.f32 %v4400_v15, %v4387_v33  ;;  %v4544_v33 = vld [vmem:[%s5720_s3 + $0x10] sm:$0xff]   ;;  %v1361_v15 = vsel %vm1344_vm1, %v4266_v14, %v4323_v49  ;;  %v2773_v14 = vor.u32 %v3365_v22, %v2772_v35 }
 0x16a   :  { %v2222_v51 = vadd.f32 %v4489_v63, %v2154_v10  ;;  %v1769_v52 = vpop.f32.mrf.mxu3  ;;  %v4533_v10 = vpop.f32.mrf.mxu0 }
 0x16b   :  { %v1600_v16 = vpop.f32.mrf.mxu2 }
 0x16c   :  { %v2414_v2 = vadd.f32 %v3489_v5, %v2222_v51  ;;  %v1770_v21 = vadd.f32 %v1769_v52, %v1600_v16  ;;  %v4528_v5 = vpop.permute.xlu0 %1336  ;;  %v4535_v51 = vpop.f32.mrf.mxu1  ;;  %v3488_v52 = vunpack.c.l.bf16 %v3487_v59 }
 0x16e   :  { %v2478_v26 = vmax.f32 %v2414_v2, 0.0  ;;  %1987 = vrot.lane.b32.xlu2 %v1770_v21, %s3651_s17 }
 0x16f   :  { %3323 = vmatmul.msk.bf16.gmra.mxu3 %vm442_vm0, %v4294_v29 }
 0x170   :  { %v2542_v50 = vpack.c.bf16 %v2478_v26, %v2478_v26  ;;  %1642 = vmatmul.bf16.gmra.mxu2 %v1360_v25 }
 0x172   :  { %2607 = vst.msk [vmem:[%s5721_s4 + $0x4] sm:$0xf] %vm2605_vm2, %v2542_v50  ;;  %v1772_v29 = vpop.f32.mrf.mxu3  ;;  %v4552_v48 = vpop.f32.mrf.mxu0  ;;  %607 = vmatmul.bf16.gmra.mxu0 %v2773_v14 }
 0x173   :  { %v1603_v57 = vpop.f32.mrf.mxu2 }
 0x174   :  { %v1773_v9 = vadd.f32 %v1772_v29, %v1603_v57  ;;  %v4550_v42 = vpop.permute.xlu0 %1342  ;;  %v4562_v50 = vpop.f32.mrf.mxu1  ;;  %v2774_v29 = vld [vmem:[%s5717_s0 + $0x12c] sm:$0xf0] }
 0x176   :  { %1989 = vrot.lane.b32.xlu0 %v1773_v9, %s3651_s17  ;;  %v3496_v9 = vunpack.c.l.bf16 %v4544_v33 }
 0x178   :  { %v1962_v16 = vpop.permute.xlu1 %1961 }
 0x179   :  { %v2153_v2 = vsel %vm442_vm0, %v718_v6, %v1962_v16 }
 0x17a   :  { %v2221_v21 = vadd.f32 %v4489_v63, %v2153_v2  ;;  %v1774_v25 = vpop.f32.mrf.mxu3 }
 0x17b   :  { %v1605_v26 = vpop.f32.mrf.mxu2 }
 0x17c   :  { %v2413_v37 = vadd.f32 %v3488_v52, %v2221_v21  ;;  %v1775_v38 = vadd.f32 %v1774_v25, %v1605_v26  ;;  %v2777_v52 = vor.u32 %v3364_v54, %v2774_v29 }
 0x17e   :  { %v2477_v59 = vmax.f32 %v2413_v37, 0.0  ;;  %1991 = vrot.lane.b32.xlu1 %v1775_v38, %s3651_s17  ;;  %2978 = vmatmul.msk.bf16.gmra.mxu1 %vm442_vm0, %v2777_v52  ;;  %v723_v37 = vadd.f32 %v4434_v62, %v4421_v60  ;;  %v3614_v38 = vld [vmem:[%s5720_s3 + $0x8] sm:$0xff]  }
 0x17f   :  { %3324 = vmatmul.msk.bf16.gmra.mxu3 %vm442_vm0, %v4323_v49  ;;  %v3492_v22 = vunpack.c.l.bf16 %v3614_v38 }
 0x180   :  { %v2541_v57 = vpack.c.bf16 %v2477_v59, %v2477_v59  ;;  %v1970_v6 = vpop.permute.xlu2 %1969  ;;  %1647 = vmatmul.bf16.gmra.mxu2 %v1361_v15  ;;  %v4584_v15 = vpop.f32.mrf.mxu0 }
 0x181   :  { %v2157_v16 = vsel %vm442_vm0, %v728_v39, %v1970_v6  ;;  %v4586_v59 = vpop.f32.mrf.mxu1  ;;  %v1362_v6 = vsel %vm1344_vm1, %v4318_v46, %v4289_v27 }
 0x182   :  { %2606 = vst.msk [vmem:[%s5721_s4] sm:$0xf] %vm2605_vm2, %v2541_v57  ;;  %v2225_v49 = vadd.f32 %v4489_v63, %v2157_v16  ;;  %v1777_v2 = vpop.f32.mrf.mxu3 }
 0x183   :  { %v1608_v21 = vpop.f32.mrf.mxu2 }
 0x184   :  { %v2417_v25 = vadd.f32 %v3496_v9, %v2225_v49  ;;  %v1778_v26 = vadd.f32 %v1777_v2, %v1608_v21  ;;  %v2780_v49 = vld [vmem:[%s5717_s0 + $0x138] sm:$0xf]  ;;  %v3367_v2 = vld [vmem:[%s5717_s0 + $0x140] sm:$0xf0]  ;;  %v725_v21 = vadd.f32 %v4449_v19, %v4447_v18 }
 0x186   :  { %v2481_v39 = vmax.f32 %v2417_v25, 0.0  ;;  %1993 = vrot.lane.b32.xlu2 %v1778_v26, %s3651_s17  ;;  %v2781_v25 = vor.u32 %v3367_v2, %v2780_v49  ;;  %v3366_v26 = vld [vmem:[%s5717_s0 + $0x13c] sm:$0xf] }
 0x188   :  { %v2545_v35 = vpack.c.bf16 %v2481_v39, %v2481_v39  ;;  %v1966_v14 = vpop.permute.xlu0 %1965  ;;  %v4598_v16 = vpop.f32.mrf.mxu0  ;;  %612 = vmatmul.bf16.gmra.mxu0 %v2781_v25 }
 0x189   :  { %v2155_v54 = vsel %vm442_vm0, %v723_v37, %v1966_v14  ;;  %v4610_v46 = vpop.f32.mrf.mxu1  ;;  %v2782_v37 = vld [vmem:[%s5717_s0 + $0x144] sm:$0xf0] }
 0x18a   :  { %2610 = vst.msk [vmem:[%s5721_s4 + $0x10] sm:$0xf] %vm2605_vm2, %v2545_v35  ;;  %v2223_v60 = vadd.f32 %v4489_v63, %v2155_v54  ;;  %v1779_v62 = vpop.f32.mrf.mxu3  ;;  %v3493_v35 = vunpack.c.h.bf16 %v3614_v38  ;;  %v2785_v14 = vor.u32 %v3366_v26, %v2782_v37  ;;  %v735_v38 = vadd.f32 %v4535_v51, %v4533_v10 }
 0x18b   :  { %v1610_v29 = vpop.f32.mrf.mxu2 }
 0x18c   :  { %v2415_v57 = vadd.f32 %v3492_v22, %v2223_v60  ;;  %v1780_v9 = vadd.f32 %v1779_v62, %v1610_v29  ;;  %v3616_v29 = vld [vmem:[%s5720_s3 + $0x18] sm:$0xff]  }
 0x18d   :  { %v3501_v49 = vunpack.c.h.bf16 %v3616_v29 }
 0x18e   :  { %v2479_v52 = vmax.f32 %v2415_v57, 0.0  ;;  %1995 = vrot.lane.b32.xlu0 %v1780_v9, %s3651_s17  ;;  %2979 = vmatmul.msk.bf16.gmra.mxu1 %vm442_vm0, %v2785_v14  ;;  %v2788_v14 = vld [vmem:[%s5717_s0 + $0x150] sm:$0xf] }
 0x18f   :  { %3325 = vmatmul.msk.bf16.gmra.mxu3 %vm442_vm0, %v4289_v27 }
 0x190   :  { %v2543_v39 = vpack.c.bf16 %v2479_v52, %v2479_v52  ;;  %v1968_v22 = vpop.permute.xlu1 %1967  ;;  %1652 = vmatmul.bf16.gmra.mxu2 %v1362_v6  ;;  %v4631_v9 = vpop.f32.mrf.mxu0 }
 0x191   :  { %v2156_v18 = vsel %vm442_vm0, %v725_v21, %v1968_v22  ;;  %v4633_v6 = vpop.f32.mrf.mxu1 }
 0x192   :  { %2608 = vst.msk [vmem:[%s5721_s4 + $0x8] sm:$0xf] %vm2605_vm2, %v2543_v39  ;;  %v2224_v27 = vadd.f32 %v4489_v63, %v2156_v18  ;;  %v1782_v19 = vpop.f32.mrf.mxu3  ;;  %v1363_v39 = vsel %vm1344_vm1, %v4346_v1, %v4328_v53  ;;  %v3369_v18 = vld [vmem:[%s5717_s0 + $0x158] sm:$0xf0] }
 0x193   :  { %v1613_v54 = vpop.f32.mrf.mxu2 }
 0x194   :  { %v2416_v60 = vadd.f32 %v3493_v35, %v2224_v27  ;;  %v1783_v62 = vadd.f32 %v1782_v19, %v1613_v54  ;;  %v730_v27 = vadd.f32 %v4493_v4, %v4491_v0  ;;  %v2789_v19 = vor.u32 %v3369_v18, %v2788_v14  ;;  %v3368_v54 = vld [vmem:[%s5717_s0 + $0x154] sm:$0xf] }
 0x196   :  { %v2480_v57 = vmax.f32 %v2416_v60, 0.0  ;;  %1997 = vrot.lane.b32.xlu1 %v1783_v62, %s3651_s17  ;;  %v2790_v60 = vld [vmem:[%s5717_s0 + $0x15c] sm:$0xf0] }
 0x197   :  { %v2793_v0 = vor.u32 %v3368_v54, %v2790_v60  ;;  %v1364_v54 = vsel %vm1344_vm1, %v4299_v34, %v4357_v56  ;;  %v3370_v34 = vld [vmem:[%s5717_s0 + $0x16c] sm:$0xf] }
 0x198   :  { %v2544_v52 = vpack.c.bf16 %v2480_v57, %v2480_v57  ;;  %v1976_v2 = vpop.permute.xlu2 %1975  ;;  %v4645_v22 = vpop.f32.mrf.mxu0  ;;  %617 = vmatmul.bf16.gmra.mxu0 %v2789_v19  ;;  %v743_v19 = vadd.f32 %v4610_v46, %v4598_v16  ;;  %v3371_v16 = vld [vmem:[%s5717_s0 + $0x170] sm:$0xf0] }
 0x199   :  { %v2160_v21 = vsel %vm442_vm0, %v735_v38, %v1976_v2  ;;  %v4657_v1 = vpop.f32.mrf.mxu1  ;;  %v3497_v38 = vunpack.c.h.bf16 %v4544_v33  ;;  %v733_v33 = vadd.f32 %v4515_v40, %v4505_v36 }
 0x19a   :  { %2609 = vst.msk [vmem:[%s5721_s4 + $0xc] sm:$0xf] %vm2605_vm2, %v2544_v52  ;;  %v2228_v10 = vadd.f32 %v4489_v63, %v2160_v21  ;;  %v1784_v51 = vpop.f32.mrf.mxu3 }
 0x19b   :  { %v1615_v25 = vpop.f32.mrf.mxu2 }
 0x19c   :  { %v2420_v26 = vadd.f32 %v3501_v49, %v2228_v10  ;;  %v1785_v37 = vadd.f32 %v1784_v51, %v1615_v25 }
 0x19e   :  { %v2484_v35 = vmax.f32 %v2420_v26, 0.0  ;;  %1999 = vrot.lane.b32.xlu2 %v1785_v37, %s3651_s17  ;;  %2980 = vmatmul.msk.bf16.gmra.mxu1 %vm442_vm0, %v2793_v0  ;;  %v3500_v37 = vunpack.c.l.bf16 %v3616_v29  ;;  %v4691_v29 = vld [vmem:[%s5720_s3 + $0x28] sm:$0xff]   ;;  %v2798_v0 = vld [vmem:[%s5717_s0 + $0x174] sm:$0xf0] }
 0x19f   :  { %3326 = vmatmul.msk.bf16.gmra.mxu3 %vm442_vm0, %v4328_v53 }
 0x1a0   :  { %v2548_v62 = vpack.c.bf16 %v2484_v35, %v2484_v35  ;;  %1657 = vmatmul.bf16.gmra.mxu2 %v1363_v39  ;;  %v1972_v57 = vpop.permute.xlu0 %1971  ;;  %v4676_v51 = vpop.f32.mrf.mxu0 }
 0x1a1   :  { %v2158_v4 = vsel %vm442_vm0, %v730_v27, %v1972_v57  ;;  %v4678_v25 = vpop.f32.mrf.mxu1 }
 0x1a2   :  { %2613 = vst.msk [vmem:[%s5721_s4 + $0x1c] sm:$0xf] %vm2605_vm2, %v2548_v62  ;;  %v2226_v53 = vadd.f32 %v4489_v63, %v2158_v4  ;;  %v1787_v52 = vpop.f32.mrf.mxu3 }
 0x1a3   :  { %v1618_v49 = vpop.f32.mrf.mxu2 }
 0x1a4   :  { %v2418_v2 = vadd.f32 %v3497_v38, %v2226_v53  ;;  %v1788_v21 = vadd.f32 %v1787_v52, %v1618_v49  ;;  %v2796_v38 = vld [vmem:[%s5717_s0 + $0x168] sm:$0xf]  ;;  %v3508_v53 = vunpack.c.l.bf16 %v4691_v29  ;;  %v2801_v49 = vor.u32 %v3370_v34, %v2798_v0  ;;  %v2804_v0 = vld [vmem:[%s5717_s0 + $0x180] sm:$0xf] }
 0x1a5   :  { %v2797_v57 = vor.u32 %v3371_v16, %v2796_v38  ;;  %v1365_v16 = vsel %vm1344_vm1, %v4349_v3, %v4321_v47 }
 0x1a6   :  { %v2482_v10 = vmax.f32 %v2418_v2, 0.0  ;;  %2001 = vrot.lane.b32.xlu0 %v1788_v21, %s3651_s17 }
 0x1a8   :  { %v2546_v26 = vpack.c.bf16 %v2482_v10, %v2482_v10  ;;  %v1974_v39 = vpop.permute.xlu1 %1973  ;;  %v4697_v62 = vpop.f32.mrf.mxu0  ;;  %622 = vmatmul.bf16.gmra.mxu0 %v2797_v57 }
 0x1a9   :  { %v2159_v35 = vsel %vm442_vm0, %v733_v33, %v1974_v39  ;;  %v4707_v46 = vpop.f32.mrf.mxu1  ;;  %v3617_v39 = vld [vmem:[%s5720_s3 + $0x20] sm:$0xff]  }
 0x1aa   :  { %2611 = vst.msk [vmem:[%s5721_s4 + $0x14] sm:$0xf] %vm2605_vm2, %v2546_v26  ;;  %v2227_v14 = vadd.f32 %v4489_v63, %v2159_v35  ;;  %v1789_v36 = vpop.f32.mrf.mxu3 }
 0x1ab   :  { %v1620_v40 = vpop.f32.mrf.mxu2 }
 0x1ac   :  { %v2419_v18 = vadd.f32 %v3500_v37, %v2227_v14  ;;  %v1790_v27 = vadd.f32 %v1789_v36, %v1620_v40  ;;  %v738_v37 = vadd.f32 %v4562_v50, %v4552_v48 }
 0x1ae   :  { %v2483_v60 = vmax.f32 %v2419_v18, 0.0  ;;  %2003 = vrot.lane.b32.xlu1 %v1790_v27, %s3651_s17  ;;  %2981 = vmatmul.msk.bf16.gmra.mxu1 %vm442_vm0, %v2801_v49  ;;  %v3504_v18 = vunpack.c.l.bf16 %v3617_v39  ;;  %v3372_v49 = vld [vmem:[%s5717_s0 + $0x184] sm:$0xf] }
 0x1af   :  { %3327 = vmatmul.msk.bf16.gmra.mxu3 %vm442_vm0, %v4357_v56 }
 0x1b0   :  { %v2547_v4 = vpack.c.bf16 %v2483_v60, %v2483_v60  ;;  %v1982_v52 = vpop.permute.xlu2 %1981  ;;  %1662 = vmatmul.bf16.gmra.mxu2 %v1364_v54  ;;  %v4729_v14 = vpop.f32.mrf.mxu0 }
 0x1b1   :  { %v2163_v2 = vsel %vm442_vm0, %v743_v19, %v1982_v52  ;;  %v4731_v36 = vpop.f32.mrf.mxu1 }
 0x1b2   :  { %2612 = vst.msk [vmem:[%s5721_s4 + $0x18] sm:$0xf] %vm2605_vm2, %v2547_v4  ;;  %v2231_v56 = vadd.f32 %v4489_v63, %v2163_v2  ;;  %v1792_v21 = vpop.f32.mrf.mxu3  ;;  %v3373_v4 = vld [vmem:[%s5717_s0 + $0x188] sm:$0xf0]  ;;  %v2806_v2 = vld [vmem:[%s5717_s0 + $0x18c] sm:$0xf0] }
 0x1b3   :  { %v1623_v33 = vpop.f32.mrf.mxu2  ;;  %v2805_v52 = vor.u32 %v3373_v4, %v2804_v0  ;;  %v1366_v0 = vsel %vm1344_vm1, %v4379_v45, %v4373_v20 }
 0x1b4   :  { %v2423_v10 = vadd.f32 %v3508_v53, %v2231_v56  ;;  %v1793_v26 = vadd.f32 %v1792_v21, %v1623_v33  ;;  %v740_v53 = vadd.f32 %v4586_v59, %v4584_v15  ;;  %v3505_v21 = vunpack.c.h.bf16 %v3617_v39 }
 0x1b5   :  { %v750_v39 = vadd.f32 %v4678_v25, %v4676_v51 }
 0x1b6   :  { %v2487_v35 = vmax.f32 %v2423_v10, 0.0  ;;  %2005 = vrot.lane.b32.xlu2 %v1793_v26, %s3651_s17  ;;  %v2809_v10 = vor.u32 %v3372_v49, %v2806_v2  ;;  %v3375_v49 = vld [vmem:[%s5717_s0 + $0x1a0] sm:$0xf0]  ;;  %v745_v2 = vadd.f32 %v4633_v6, %v4631_v9 }
 0x1b8   :  { %v2551_v40 = vpack.c.bf16 %v2487_v35, %v2487_v35  ;;  %v1978_v27 = vpop.permute.xlu0 %1977  ;;  %v4743_v34 = vpop.f32.mrf.mxu0  ;;  %627 = vmatmul.bf16.gmra.mxu0 %v2805_v52  ;;  %v2812_v52 = vld [vmem:[%s5717_s0 + $0x198] sm:$0xf] }
 0x1b9   :  { %v2161_v19 = vsel %vm442_vm0, %v738_v37, %v1978_v27  ;;  %v4755_v3 = vpop.f32.mrf.mxu1 }
 0x1ba   :  { %2616 = vst.msk [vmem:[%s5721_s4 + $0x28] sm:$0xf] %vm2605_vm2, %v2551_v40  ;;  %v2229_v48 = vadd.f32 %v4489_v63, %v2161_v19  ;;  %v1794_v50 = vpop.f32.mrf.mxu3  ;;  %v3619_v40 = vld [vmem:[%s5720_s3 + $0x30] sm:$0xff]  }
 0x1bb   :  { %v1625_v54 = vpop.f32.mrf.mxu2 }
 0x1bc   :  { %v2421_v60 = vadd.f32 %v3504_v18, %v2229_v48  ;;  %v1795_v38 = vadd.f32 %v1794_v50, %v1625_v54  ;;  %v3513_v50 = vunpack.c.h.bf16 %v3619_v40 }
 0x1be   :  { %v2485_v57 = vmax.f32 %v2421_v60, 0.0  ;;  %2007 = vrot.lane.b32.xlu0 %v1795_v38, %s3651_s17  ;;  %2982 = vmatmul.msk.bf16.gmra.mxu1 %vm442_vm0, %v2809_v10 }
 0x1bf   :  { %3328 = vmatmul.msk.bf16.gmra.mxu3 %vm442_vm0, %v4321_v47 }
 0x1c0   :  { %v2549_v56 = vpack.c.bf16 %v2485_v57, %v2485_v57  ;;  %v1980_v33 = vpop.permute.xlu1 %1979  ;;  %1667 = vmatmul.bf16.gmra.mxu2 %v1365_v16  ;;  %v4776_v27 = vpop.f32.mrf.mxu0 }
 0x1c1   :  { %v2162_v15 = vsel %vm442_vm0, %v740_v53, %v1980_v33  ;;  %v4778_v19 = vpop.f32.mrf.mxu1  ;;  %v2814_v33 = vld [vmem:[%s5717_s0 + $0x1a4] sm:$0xf0] }
 0x1c2   :  { %2614 = vst.msk [vmem:[%s5721_s4 + $0x20] sm:$0xf] %vm2605_vm2, %v2549_v56  ;;  %v2230_v47 = vadd.f32 %v4489_v63, %v2162_v15  ;;  %v1797_v59 = vpop.f32.mrf.mxu3  ;;  %v2813_v56 = vor.u32 %v3375_v49, %v2812_v52  ;;  %v3509_v15 = vunpack.c.h.bf16 %v4691_v29  ;;  %v748_v29 = vadd.f32 %v4657_v1, %v4645_v22  ;;  %v2820_v49 = vld [vmem:[%s5717_s0 + $0x1b0] sm:$0xf] }
 0x1c3   :  { %v1628_v26 = vpop.f32.mrf.mxu2 }
 0x1c4   :  { %v2422_v37 = vadd.f32 %v3505_v21, %v2230_v47  ;;  %v1798_v35 = vadd.f32 %v1797_v59, %v1628_v26  ;;  %v3374_v21 = vld [vmem:[%s5717_s0 + $0x19c] sm:$0xf] }
 0x1c5   :  { %v2817_v9 = vor.u32 %v3374_v21, %v2814_v33 }
 0x1c6   :  { %v2486_v18 = vmax.f32 %v2422_v37, 0.0  ;;  %2009 = vrot.lane.b32.xlu1 %v1798_v35, %s3651_s17 }
 0x1c8   :  { %v2550_v48 = vpack.c.bf16 %v2486_v18, %v2486_v18  ;;  %v1988_v54 = vpop.permute.xlu2 %1987  ;;  %v4790_v53 = vpop.f32.mrf.mxu0  ;;  %632 = vmatmul.bf16.gmra.mxu0 %v2813_v56  ;;  %v2822_v56 = vld [vmem:[%s5717_s0 + $0x1bc] sm:$0xf0] }
 0x1c9   :  { %v2166_v60 = vsel %vm442_vm0, %v750_v39, %v1988_v54  ;;  %v4802_v45 = vpop.f32.mrf.mxu1  ;;  %v3512_v54 = vunpack.c.l.bf16 %v3619_v40  ;;  %v4836_v40 = vld [vmem:[%s5720_s3 + $0x40] sm:$0xff]  }
 0x1ca   :  { %2615 = vst.msk [vmem:[%s5721_s4 + $0x24] sm:$0xf] %vm2605_vm2, %v2550_v48  ;;  %v2234_v51 = vadd.f32 %v4489_v63, %v2166_v60  ;;  %v1799_v25 = vpop.f32.mrf.mxu3  ;;  %v3520_v33 = vunpack.c.l.bf16 %v4836_v40 }
 0x1cb   :  { %v1630_v38 = vpop.f32.mrf.mxu2 }
 0x1cc   :  { %v2426_v16 = vadd.f32 %v3513_v50, %v2234_v51  ;;  %v1800_v57 = vadd.f32 %v1799_v25, %v1630_v38 }
 0x1ce   :  { %v2490_v4 = vmax.f32 %v2426_v16, 0.0  ;;  %2011 = vrot.lane.b32.xlu2 %v1800_v57, %s3651_s17  ;;  %2983 = vmatmul.msk.bf16.gmra.mxu1 %vm442_vm0, %v2817_v9  ;;  %v758_v57 = vadd.f32 %v4755_v3, %v4743_v34  ;;  %v3377_v34 = vld [vmem:[%s5717_s0 + $0x1b8] sm:$0xf0] }
 0x1cf   :  { %3329 = vmatmul.msk.bf16.gmra.mxu3 %vm442_vm0, %v4373_v20 }
 0x1d0   :  { %v2554_v10 = vpack.c.bf16 %v2490_v4, %v2490_v4  ;;  %1672 = vmatmul.bf16.gmra.mxu2 %v1366_v0  ;;  %v1984_v47 = vpop.permute.xlu0 %1983  ;;  %v4821_v18 = vpop.f32.mrf.mxu0  ;;  %v1367_v0 = vsel %vm1344_vm1, %v4343_v61, %v4407_v44  ;;  %v3376_v61 = vld [vmem:[%s5717_s0 + $0x1b4] sm:$0xf] }
 0x1d1   :  { %v2164_v6 = vsel %vm442_vm0, %v745_v2, %v1984_v47  ;;  %v4823_v48 = vpop.f32.mrf.mxu1  ;;  %v2821_v2 = vor.u32 %v3377_v34, %v2820_v49  ;;  %v755_v49 = vadd.f32 %v4731_v36, %v4729_v14 }
 0x1d2   :  { %2619 = vst.msk [vmem:[%s5721_s4 + $0x34] sm:$0xf] %vm2605_vm2, %v2554_v10  ;;  %v2232_v20 = vadd.f32 %v4489_v63, %v2164_v6  ;;  %v1802_v59 = vpop.f32.mrf.mxu3 }
 0x1d3   :  { %v1633_v26 = vpop.f32.mrf.mxu2 }
 0x1d4   :  { %v2424_v37 = vadd.f32 %v3509_v15, %v2232_v20  ;;  %v1803_v35 = vadd.f32 %v1802_v59, %v1633_v26  ;;  %v2825_v15 = vor.u32 %v3376_v61, %v2822_v56  ;;  %v753_v26 = vadd.f32 %v4707_v46, %v4697_v62  ;;  %v2830_v61 = vld [vmem:[%s5717_s0 + $0x1d4] sm:$0xf0] }
 0x1d6   :  { %v2488_v39 = vmax.f32 %v2424_v37, 0.0  ;;  %2013 = vrot.lane.b32.xlu0 %v1803_v35, %s3651_s17  ;;  %v3620_v37 = vld [vmem:[%s5720_s3 + $0x38] sm:$0xff]  }
 0x1d8   :  { %v2552_v50 = vpack.c.bf16 %v2488_v39, %v2488_v39  ;;  %v1986_v60 = vpop.permute.xlu1 %1985  ;;  %v4842_v52 = vpop.f32.mrf.mxu0  ;;  %637 = vmatmul.bf16.gmra.mxu0 %v2821_v2  ;;  %v3378_v2 = vld [vmem:[%s5717_s0 + $0x1cc] sm:$0xf] }
 0x1d9   :  { %v2165_v51 = vsel %vm442_vm0, %v748_v29, %v1986_v60  ;;  %v4852_v3 = vpop.f32.mrf.mxu1 }
 0x1da   :  { %2617 = vst.msk [vmem:[%s5721_s4 + $0x2c] sm:$0xf] %vm2605_vm2, %v2552_v50  ;;  %v2233_v25 = vadd.f32 %v4489_v63, %v2165_v51  ;;  %v1804_v22 = vpop.f32.mrf.mxu3 }
 0x1db   :  { %v1635_v1 = vpop.f32.mrf.mxu2 }
 0x1dc   :  { %v2425_v38 = vadd.f32 %v3512_v54, %v2233_v25  ;;  %v1805_v16 = vadd.f32 %v1804_v22, %v1635_v1  ;;  %v3516_v54 = vunpack.c.l.bf16 %v3620_v37 }
 0x1de   :  { %v2489_v4 = vmax.f32 %v2425_v38, 0.0  ;;  %2015 = vrot.lane.b32.xlu1 %v1805_v16, %s3651_s17  ;;  %2984 = vmatmul.msk.bf16.gmra.mxu1 %vm442_vm0, %v2825_v15  ;;  %v1368_v38 = vsel %vm1344_vm1, %v4381_v30, %v4351_v7 }
 0x1df   :  { %3330 = vmatmul.msk.bf16.gmra.mxu3 %vm442_vm0, %v4407_v44 }
 0x1e0   :  { %v2553_v21 = vpack.c.bf16 %v2489_v4, %v2489_v4  ;;  %v1994_v10 = vpop.permute.xlu2 %1993  ;;  %1677 = vmatmul.bf16.gmra.mxu2 %v1367_v0  ;;  %v4874_v29 = vpop.f32.mrf.mxu0  ;;  %v2828_v0 = vld [vmem:[%s5717_s0 + $0x1c8] sm:$0xf]  ;;  %v3379_v4 = vld [vmem:[%s5717_s0 + $0x1d0] sm:$0xf0] }
 0x1e1   :  { %v2169_v47 = vsel %vm442_vm0, %v758_v57, %v1994_v10  ;;  %v4876_v39 = vpop.f32.mrf.mxu1  ;;  %v2829_v34 = vor.u32 %v3379_v4, %v2828_v0  ;;  %v2833_v10 = vor.u32 %v3378_v2, %v2830_v61  ;;  %v3380_v4 = vld [vmem:[%s5717_s0 + $0x1e4] sm:$0xf]  ;;  %v3521_v2 = vunpack.c.h.bf16 %v4836_v40 }
 0x1e2   :  { %2618 = vst.msk [vmem:[%s5721_s4 + $0x30] sm:$0xf] %vm2605_vm2, %v2553_v21  ;;  %v2237_v44 = vadd.f32 %v4489_v63, %v2169_v47  ;;  %v1807_v9 = vpop.f32.mrf.mxu3  ;;  %v3517_v21 = vunpack.c.h.bf16 %v3620_v37  ;;  %v763_v40 = vadd.f32 %v4802_v45, %v4790_v53 }
 0x1e3   :  { %v1638_v6 = vpop.f32.mrf.mxu2 }
 0x1e4   :  { %v2429_v20 = vadd.f32 %v3520_v33, %v2237_v44  ;;  %v1808_v59 = vadd.f32 %v1807_v9, %v1638_v6  ;;  %v765_v9 = vadd.f32 %v4823_v48, %v4821_v18  ;;  %v3622_v6 = vld [vmem:[%s5720_s3 + $0x48] sm:$0xff]  }
 0x1e6   :  { %v2493_v35 = vmax.f32 %v2429_v20, 0.0  ;;  %2017 = vrot.lane.b32.xlu2 %v1808_v59, %s3651_s17 }
 0x1e8   :  { %v2557_v50 = vpack.c.bf16 %v2493_v35, %v2493_v35  ;;  %v1990_v60 = vpop.permute.xlu0 %1989  ;;  %v4888_v57 = vpop.f32.mrf.mxu0  ;;  %642 = vmatmul.bf16.gmra.mxu0 %v2829_v34  ;;  %v3525_v35 = vunpack.c.h.bf16 %v3622_v6 }
 0x1e9   :  { %v2167_v51 = vsel %vm442_vm0, %v753_v26, %v1990_v60  ;;  %v4900_v30 = vpop.f32.mrf.mxu1 }
 0x1ea   :  { %2622 = vst.msk [vmem:[%s5721_s4 + $0x40] sm:$0xf] %vm2605_vm2, %v2557_v50  ;;  %v2235_v62 = vadd.f32 %v4489_v63, %v2167_v51  ;;  %v1809_v46 = vpop.f32.mrf.mxu3 }
 0x1eb   :  { %v1640_v25 = vpop.f32.mrf.mxu2 }
 0x1ec   :  { %v2427_v22 = vadd.f32 %v3516_v54, %v2235_v62  ;;  %v1810_v1 = vadd.f32 %v1809_v46, %v1640_v25  ;;  %v1369_v46 = vsel %vm1344_vm1, %v4415_v31, %v4411_v13 }
 0x1ee   :  { %v2491_v16 = vmax.f32 %v2427_v22, 0.0  ;;  %2019 = vrot.lane.b32.xlu0 %v1810_v1, %s3651_s17  ;;  %2985 = vmatmul.msk.bf16.gmra.mxu1 %vm442_vm0, %v2833_v10  ;;  %v2836_v1 = vld [vmem:[%s5717_s0 + $0x1e0] sm:$0xf] }
 0x1ef   :  { %3331 = vmatmul.msk.bf16.gmra.mxu3 %vm442_vm0, %v4351_v7 }
 0x1f0   :  { %v2555_v56 = vpack.c.bf16 %v2491_v16, %v2491_v16  ;;  %v1992_v33 = vpop.permute.xlu1 %1991  ;;  %1682 = vmatmul.bf16.gmra.mxu2 %v1368_v38  ;;  %v4921_v59 = vpop.f32.mrf.mxu0  ;;  %v3381_v38 = vld [vmem:[%s5717_s0 + $0x1e8] sm:$0xf0]  ;;  %v760_v16 = vadd.f32 %v4778_v19, %v4776_v27 }
 0x1f1   :  { %v2168_v14 = vsel %vm442_vm0, %v755_v49, %v1992_v33  ;;  %v4923_v26 = vpop.f32.mrf.mxu1  ;;  %v2837_v0 = vor.u32 %v3381_v38, %v2836_v1  ;;  %v2838_v49 = vld [vmem:[%s5717_s0 + $0x1ec] sm:$0xf0] }
 0x1f2   :  { %2620 = vst.msk [vmem:[%s5721_s4 + $0x38] sm:$0xf] %vm2605_vm2, %v2555_v56  ;;  %v2236_v7 = vadd.f32 %v4489_v63, %v2168_v14  ;;  %v1812_v36 = vpop.f32.mrf.mxu3  ;;  %v2841_v27 = vor.u32 %v3380_v4, %v2838_v49 }
 0x1f3   :  { %v1643_v15 = vpop.f32.mrf.mxu2 }
 0x1f4   :  { %v2428_v47 = vadd.f32 %v3517_v21, %v2236_v7  ;;  %v1813_v44 = vadd.f32 %v1812_v36, %v1643_v15 }
 0x1f6   :  { %v2492_v20 = vmax.f32 %v2428_v47, 0.0  ;;  %2021 = vrot.lane.b32.xlu1 %v1813_v44, %s3651_s17  ;;  %v3524_v47 = vunpack.c.l.bf16 %v3622_v6  ;;  %v4981_v6 = vld [vmem:[%s5720_s3 + $0x58] sm:$0xff]  }
 0x1f8   :  { %v2556_v37 = vpack.c.bf16 %v2492_v20, %v2492_v20  ;;  %v2000_v50 = vpop.permute.xlu2 %1999  ;;  %v4935_v22 = vpop.f32.mrf.mxu0  ;;  %647 = vmatmul.bf16.gmra.mxu0 %v2837_v0 }
 0x1f9   :  { %v2172_v54 = vsel %vm442_vm0, %v765_v9, %v2000_v50  ;;  %v773_v50 = vadd.f32 %v4900_v30, %v4888_v57  ;;  %v3383_v57 = vld [vmem:[%s5717_s0 + $0x200] sm:$0xf0] }
 0x1fa   :  { %2621 = vst.msk [vmem:[%s5721_s4 + $0x3c] sm:$0xf] %vm2605_vm2, %v2556_v37  ;;  %v2240_v18 = vadd.f32 %v4489_v63, %v2172_v54  ;;  %v1814_v48 = vpop.f32.mrf.mxu3  ;;  %v1370_v54 = vsel %vm1344_vm1, %v4377_v24, %v4445_v12  ;;  %v3382_v24 = vld [vmem:[%s5717_s0 + $0x1fc] sm:$0xf] }
 0x1fb   :  { %v1645_v60 = vpop.f32.mrf.mxu2  ;;  %v4947_v31 = vpop.f32.mrf.mxu1 }
 0x1fc   :  { %v2432_v51 = vadd.f32 %v3525_v35, %v2240_v18  ;;  %v1815_v62 = vadd.f32 %v1814_v48, %v1645_v60  ;;  %v2844_v60 = vld [vmem:[%s5717_s0 + $0x1f8] sm:$0xf] }
 0x1fe   :  { %v2496_v25 = vmax.f32 %v2432_v51, 0.0  ;;  %2023 = vrot.lane.b32.xlu2 %v1815_v62, %s3651_s17  ;;  %2986 = vmatmul.msk.bf16.gmra.mxu1 %vm442_vm0, %v2841_v27  ;;  %v2845_v51 = vor.u32 %v3383_v57, %v2844_v60  ;;  %v2846_v62 = vld [vmem:[%s5717_s0 + $0x204] sm:$0xf0] }
 0x1ff   :  { %3332 = vmatmul.msk.bf16.gmra.mxu3 %vm442_vm0, %v4411_v13  ;;  %v2849_v38 = vor.u32 %v3382_v24, %v2846_v62 }
 0x200   :  { %v2560_v34 = vpack.c.bf16 %v2496_v25, %v2496_v25  ;;  %1687 = vmatmul.bf16.gmra.mxu2 %v1369_v46  ;;  %v1996_v61 = vpop.permute.xlu0 %1995  ;;  %v4966_v7 = vpop.f32.mrf.mxu0  ;;  %v3532_v25 = vunpack.c.l.bf16 %v4981_v6 }
 0x201   :  { %v2170_v19 = vsel %vm442_vm0, %v760_v16, %v1996_v61  ;;  %v3623_v61 = vld [vmem:[%s5720_s3 + $0x50] sm:$0xff]  }
 0x202   :  { %2625 = vst.msk [vmem:[%s5721_s4 + $0x4c] sm:$0xf] %vm2605_vm2, %v2560_v34  ;;  %v2238_v13 = vadd.f32 %v4489_v63, %v2170_v19  ;;  %v1817_v56 = vpop.f32.mrf.mxu3 }
 0x203   :  { %v1648_v21 = vpop.f32.mrf.mxu2  ;;  %v4968_v36 = vpop.f32.mrf.mxu1 }
 0x204   :  { %v2430_v33 = vadd.f32 %v3521_v2, %v2238_v13  ;;  %v1818_v10 = vadd.f32 %v1817_v56, %v1648_v21  ;;  %v768_v2 = vadd.f32 %v4852_v3, %v4842_v52  ;;  %v3528_v21 = vunpack.c.l.bf16 %v3623_v61 }
 0x206   :  { %v2494_v14 = vmax.f32 %v2430_v33, 0.0  ;;  %2025 = vrot.lane.b32.xlu0 %v1818_v10, %s3651_s17 }
 0x208   :  { %v2558_v15 = vpack.c.bf16 %v2494_v14, %v2494_v14  ;;  %v1998_v44 = vpop.permute.xlu1 %1997  ;;  %v4987_v48 = vpop.f32.mrf.mxu0  ;;  %652 = vmatmul.bf16.gmra.mxu0 %v2845_v51 }
 0x209   :  { %v2171_v9 = vsel %vm442_vm0, %v763_v40, %v1998_v44 }
 0x20a   :  { %2623 = vst.msk [vmem:[%s5721_s4 + $0x44] sm:$0xf] %vm2605_vm2, %v2558_v15  ;;  %v2239_v20 = vadd.f32 %v4489_v63, %v2171_v9  ;;  %v1819_v53 = vpop.f32.mrf.mxu3 }
 0x20b   :  { %v1650_v45 = vpop.f32.mrf.mxu2  ;;  %v4997_v30 = vpop.f32.mrf.mxu1 }
 0x20c   :  { %v2431_v37 = vadd.f32 %v3524_v47, %v2239_v20  ;;  %v1820_v35 = vadd.f32 %v1819_v53, %v1650_v45  ;;  %v1371_v47 = vsel %vm1344_vm1, %v4439_v8, %v4405_v41  ;;  %v2852_v20 = vld [vmem:[%s5717_s0 + $0x210] sm:$0xf]  ;;  %v3385_v53 = vld [vmem:[%s5717_s0 + $0x218] sm:$0xf0]  ;;  %v770_v45 = vadd.f32 %v4876_v39, %v4874_v29 }
 0x20e   :  { %v2495_v18 = vmax.f32 %v2431_v37, 0.0  ;;  %2027 = vrot.lane.b32.xlu1 %v1820_v35, %s3651_s17  ;;  %2987 = vmatmul.msk.bf16.gmra.mxu1 %vm442_vm0, %v2849_v38  ;;  %v2853_v37 = vor.u32 %v3385_v53, %v2852_v20  ;;  %v3384_v35 = vld [vmem:[%s5717_s0 + $0x214] sm:$0xf] }
 0x20f   :  { %3333 = vmatmul.msk.bf16.gmra.mxu3 %vm442_vm0, %v4445_v12 }
 0x210   :  { %v2559_v46 = vpack.c.bf16 %v2495_v18, %v2495_v18  ;;  %v2006_v1 = vpop.permute.xlu2 %2005  ;;  %1692 = vmatmul.bf16.gmra.mxu2 %v1370_v54  ;;  %v5019_v19 = vpop.f32.mrf.mxu0  ;;  %v3529_v18 = vunpack.c.h.bf16 %v3623_v61 }
 0x211   :  { %v2175_v16 = vsel %vm442_vm0, %v773_v50, %v2006_v1  ;;  %v2854_v50 = vld [vmem:[%s5717_s0 + $0x21c] sm:$0xf0] }
 0x212   :  { %2624 = vst.msk [vmem:[%s5721_s4 + $0x48] sm:$0xf] %vm2605_vm2, %v2559_v46  ;;  %v2243_v12 = vadd.f32 %v4489_v63, %v2175_v16  ;;  %v1822_v0 = vpop.f32.mrf.mxu3  ;;  %v2857_v57 = vor.u32 %v3384_v35, %v2854_v50  ;;  %v780_v46 = vadd.f32 %v4968_v36, %v4966_v7 }
 0x213   :  { %v1653_v4 = vpop.f32.mrf.mxu2  ;;  %v5021_v13 = vpop.f32.mrf.mxu1 }
 0x214   :  { %v2435_v49 = vadd.f32 %v3532_v25, %v2243_v12  ;;  %v1823_v34 = vadd.f32 %v1822_v0, %v1653_v4  ;;  %v3625_v25 = vld [vmem:[%s5720_s3 + $0x60] sm:$0xff]  }
 0x215   :  { %v3537_v0 = vunpack.c.h.bf16 %v3625_v25 }
 0x216   :  { %v2499_v27 = vmax.f32 %v2435_v49, 0.0  ;;  %2029 = vrot.lane.b32.xlu2 %v1823_v34, %s3651_s17 }
 0x218   :  { %v2563_v56 = vpack.c.bf16 %v2499_v27, %v2499_v27  ;;  %v2002_v33 = vpop.permute.xlu0 %2001  ;;  %v5033_v9 = vpop.f32.mrf.mxu0  ;;  %657 = vmatmul.bf16.gmra.mxu0 %v2853_v37  ;;  %v1372_v27 = vsel %vm1344_vm1, %v4477_v43, %v4451_v23  ;;  %v778_v37 = vadd.f32 %v4947_v31, %v4935_v22 }
 0x219   :  { %v2173_v10 = vsel %vm442_vm0, %v768_v2, %v2002_v33  ;;  %v2860_v33 = vld [vmem:[%s5717_s0 + $0x228] sm:$0xf] }
 0x21a   :  { %2628 = vst.msk [vmem:[%s5721_s4 + $0x58] sm:$0xf] %vm2605_vm2, %v2563_v56  ;;  %v2241_v52 = vadd.f32 %v4489_v63, %v2173_v10  ;;  %v1824_v3 = vpop.f32.mrf.mxu3  ;;  %v775_v10 = vadd.f32 %v4923_v26, %v4921_v59 }
 0x21b   :  { %v1655_v40 = vpop.f32.mrf.mxu2  ;;  %v5045_v8 = vpop.f32.mrf.mxu1 }
 0x21c   :  { %v2433_v14 = vadd.f32 %v3528_v21, %v2241_v52  ;;  %v1825_v15 = vadd.f32 %v1824_v3, %v1655_v40  ;;  %v3386_v3 = vld [vmem:[%s5717_s0 + $0x22c] sm:$0xf]  ;;  %v2862_v40 = vld [vmem:[%s5717_s0 + $0x234] sm:$0xf0] }
 0x21d   :  { %v2865_v59 = vor.u32 %v3386_v3, %v2862_v40 }
 0x21e   :  { %v2497_v44 = vmax.f32 %v2433_v14, 0.0  ;;  %2031 = vrot.lane.b32.xlu0 %v1825_v15, %s3651_s17  ;;  %2988 = vmatmul.msk.bf16.gmra.mxu1 %vm442_vm0, %v2857_v57  ;;  %v3533_v15 = vunpack.c.h.bf16 %v4981_v6 }
 0x21f   :  { %3334 = vmatmul.msk.bf16.gmra.mxu3 %vm442_vm0, %v4405_v41 }
 0x220   :  { %v2561_v54 = vpack.c.bf16 %v2497_v44, %v2497_v44  ;;  %v2004_v60 = vpop.permute.xlu1 %2003  ;;  %1697 = vmatmul.bf16.gmra.mxu2 %v1371_v47  ;;  %v5066_v38 = vpop.f32.mrf.mxu0 }
 0x221   :  { %v2174_v29 = vsel %vm442_vm0, %v770_v45, %v2004_v60  ;;  %v3536_v60 = vunpack.c.l.bf16 %v3625_v25 }
 0x222   :  { %2626 = vst.msk [vmem:[%s5721_s4 + $0x50] sm:$0xf] %vm2605_vm2, %v2561_v54  ;;  %v2242_v41 = vadd.f32 %v4489_v63, %v2174_v29  ;;  %v1827_v39 = vpop.f32.mrf.mxu3 }
 0x223   :  { %v1658_v51 = vpop.f32.mrf.mxu2  ;;  %v5068_v16 = vpop.f32.mrf.mxu1 }
 0x224   :  { %v2434_v24 = vadd.f32 %v3529_v18, %v2242_v41  ;;  %v1828_v62 = vadd.f32 %v1827_v39, %v1658_v51 }
 0x226   :  { %v2498_v1 = vmax.f32 %v2434_v24, 0.0  ;;  %2033 = vrot.lane.b32.xlu1 %v1828_v62, %s3651_s17  ;;  %v788_v24 = vadd.f32 %v5045_v8, %v5033_v9  ;;  %v5131_v62 = vld [vmem:[%s5720_s3 + $0x70] sm:$0xff]   ;;  %v3389_v9 = vld [vmem:[%s5717_s0 + $0x248] sm:$0xf0] }
 0x228   :  { %v2562_v12 = vpack.c.bf16 %v2498_v1, %v2498_v1  ;;  %v2012_v4 = vpop.permute.xlu2 %2011  ;;  %v5080_v21 = vpop.f32.mrf.mxu0 }
 0x229   :  { %v2178_v49 = vsel %vm442_vm0, %v780_v46, %v2012_v4  ;;  %v1373_v46 = vsel %vm1344_vm1, %v4413_v55, %v4497_v11  ;;  %v3388_v55 = vld [vmem:[%s5717_s0 + $0x244] sm:$0xf]  ;;  %v2870_v4 = vld [vmem:[%s5717_s0 + $0x24c] sm:$0xf0] }
 0x22a   :  { %2627 = vst.msk [vmem:[%s5721_s4 + $0x54] sm:$0xf] %vm2605_vm2, %v2562_v12  ;;  %v2246_v7 = vadd.f32 %v4489_v63, %v2178_v49  ;;  %v1829_v36 = vpop.f32.mrf.mxu3  ;;  %v3387_v63 = vld [vmem:[%s5717_s0 + $0x230] sm:$0xf0]  ;;  %v2868_v12 = vld [vmem:[%s5717_s0 + $0x240] sm:$0xf] }
 0x22b   :  { %v1660_v34 = vpop.f32.mrf.mxu2  ;;  %v5092_v43 = vpop.f32.mrf.mxu1  ;;  %v2861_v52 = vor.u32 %v3387_v63, %v2860_v33  ;;  %v783_v63 = vadd.f32 %v4997_v30, %v4987_v48 }
 0x22c   :  { %v2438_v2 = vadd.f32 %v3537_v0, %v2246_v7  ;;  %v1830_v61 = vadd.f32 %v1829_v36, %v1660_v34  ;;  %v2869_v0 = vor.u32 %v3389_v9, %v2868_v12  ;;  %v3544_v7 = vunpack.c.l.bf16 %v5131_v62  ;;  %v3628_v12 = vld [vmem:[%s5720_s3 + $0x78] sm:$0xff]  }
 0x22d   :  { %662 = vmatmul.bf16.gmra.mxu0 %v2861_v52  ;;  %v2873_v34 = vor.u32 %v3388_v55, %v2870_v4 }
 0x22e   :  { %v2502_v56 = vmax.f32 %v2438_v2, 0.0  ;;  %2035 = vrot.lane.b32.xlu2 %v1830_v61, %s3651_s17  ;;  %2989 = vmatmul.msk.bf16.gmra.mxu1 %vm442_vm0, %v2865_v59 }
 0x22f   :  { %3335 = vmatmul.msk.bf16.gmra.mxu3 %vm442_vm0, %v4451_v23  ;;  %v5109_v23 = vld [vmem:[%s5719_s2] ss:$0 sm:$0xff] }
 0x230   :  { %v2566_v14 = vpack.c.bf16 %v2502_v56, %v2502_v56  ;;  %1702 = vmatmul.bf16.gmra.mxu2 %v1372_v27  ;;  %v2008_v47 = vpop.permute.xlu0 %2007  ;;  %v5116_v50 = vpop.f32.mrf.mxu0 }
 0x231   :  { %v2176_v26 = vsel %vm442_vm0, %v775_v10, %v2008_v47  ;;  %v3626_v10 = vld [vmem:[%s5720_s3 + $0x68] sm:$0xff]  }
 0x232   :  { %2631 = vst.msk [vmem:[%s5721_s4 + $0x64] sm:$0xf] %vm2605_vm2, %v2566_v14  ;;  %v2244_v44 = vadd.f32 %v5109_v23, %v2176_v26  ;;  %v1832_v20 = vpop.f32.mrf.mxu3 }
 0x233   :  { %v1663_v6 = vpop.f32.mrf.mxu2  ;;  %v5118_v54 = vpop.f32.mrf.mxu1 }
 0x234   :  { %v2436_v53 = vadd.f32 %v3533_v15, %v2244_v44  ;;  %v1833_v45 = vadd.f32 %v1832_v20, %v1663_v6  ;;  %v3540_v15 = vunpack.c.l.bf16 %v3626_v10  ;;  %v1374_v6 = vsel %vm1344_vm1, %v4480_v58, %v4442_v17 }
 0x236   :  { %v2500_v35 = vmax.f32 %v2436_v53, 0.0  ;;  %2037 = vrot.lane.b32.xlu0 %v1833_v45, %s3651_s17 }
 0x238   :  { %v2564_v18 = vpack.c.bf16 %v2500_v35, %v2500_v35  ;;  %v2010_v57 = vpop.permute.xlu1 %2009  ;;  %v5137_v1 = vpop.f32.mrf.mxu0  ;;  %v3391_v35 = vld [vmem:[%s5717_s0 + $0x260] sm:$0xf0] }
 0x239   :  { %v2177_v29 = vsel %vm442_vm0, %v778_v37, %v2010_v57  ;;  %v2876_v37 = vld [vmem:[%s5717_s0 + $0x258] sm:$0xf]  ;;  %v3390_v57 = vld [vmem:[%s5717_s0 + $0x25c] sm:$0xf] }
 0x23a   :  { %2629 = vst.msk [vmem:[%s5721_s4 + $0x5c] sm:$0xf] %vm2605_vm2, %v2564_v18  ;;  %v2245_v41 = vadd.f32 %v5109_v23, %v2177_v29  ;;  %v1834_v22 = vpop.f32.mrf.mxu3  ;;  %v785_v18 = vadd.f32 %v5021_v13, %v5019_v19  ;;  %v2878_v29 = vld [vmem:[%s5717_s0 + $0x264] sm:$0xf0] }
 0x23b   :  { %v1665_v31 = vpop.f32.mrf.mxu2  ;;  %v5147_v8 = vpop.f32.mrf.mxu1 }
 0x23c   :  { %v2437_v39 = vadd.f32 %v3536_v60, %v2245_v41  ;;  %v1835_v51 = vadd.f32 %v1834_v22, %v1665_v31  ;;  %v2877_v60 = vor.u32 %v3391_v35, %v2876_v37  ;;  %v3541_v22 = vunpack.c.h.bf16 %v3626_v10 }
 0x23d   :  { %667 = vmatmul.bf16.gmra.mxu0 %v2869_v0  ;;  %v790_v10 = vadd.f32 %v5068_v16, %v5066_v38 }
 0x23e   :  { %v2501_v25 = vmax.f32 %v2437_v39, 0.0  ;;  %2039 = vrot.lane.b32.xlu1 %v1835_v51, %s3651_s17  ;;  %2990 = vmatmul.msk.bf16.gmra.mxu1 %vm442_vm0, %v2873_v34  ;;  %v2881_v39 = vor.u32 %v3390_v57, %v2878_v29 }
 0x23f   :  { %3336 = vmatmul.msk.bf16.gmra.mxu3 %vm442_vm0, %v4497_v11 }
 0x240   :  { %v2565_v49 = vpack.c.bf16 %v2501_v25, %v2501_v25  ;;  %v2018_v36 = vpop.permute.xlu2 %2017  ;;  %1707 = vmatmul.bf16.gmra.mxu2 %v1373_v46  ;;  %v5169_v3 = vpop.f32.mrf.mxu0  ;;  %v795_v25 = vadd.f32 %v5118_v54, %v5116_v50 }
 0x241   :  { %v2181_v2 = vsel %vm442_vm0, %v788_v24, %v2018_v36 }
 0x242   :  { %2630 = vst.msk [vmem:[%s5721_s4 + $0x60] sm:$0xf] %vm2605_vm2, %v2565_v49  ;;  %v2249_v11 = vadd.f32 %v5109_v23, %v2181_v2  ;;  %v1837_v61 = vpop.f32.mrf.mxu3  ;;  %v3549_v49 = vunpack.c.h.bf16 %v3628_v12 }
 0x243   :  { %v1668_v27 = vpop.f32.mrf.mxu2  ;;  %v5171_v40 = vpop.f32.mrf.mxu1 }
 0x244   :  { %v2441_v56 = vadd.f32 %v3544_v7, %v2249_v11  ;;  %v1838_v33 = vadd.f32 %v1837_v61, %v1668_v27  ;;  %v1375_v61 = vsel %vm1344_vm1, %v4528_v5, %v4503_v28 }
 0x246   :  { %v2505_v52 = vmax.f32 %v2441_v56, 0.0  ;;  %2041 = vrot.lane.b32.xlu2 %v1838_v33, %s3651_s17  ;;  %v2884_v33 = vld [vmem:[%s5717_s0 + $0x270] sm:$0xf] }
 0x248   :  { %v2569_v14 = vpack.c.bf16 %v2505_v52, %v2505_v52  ;;  %v2014_v47 = vpop.permute.xlu0 %2013  ;;  %v5183_v45 = vpop.f32.mrf.mxu0 }
 0x249   :  { %v2179_v59 = vsel %vm442_vm0, %v783_v63, %v2014_v47  ;;  %v3393_v63 = vld [vmem:[%s5717_s0 + $0x278] sm:$0xf0] }
 0x24a   :  { %2634 = vst.msk [vmem:[%s5721_s4 + $0x70] sm:$0xf] %vm2605_vm2, %v2569_v14  ;;  %v2247_v48 = vadd.f32 %v5109_v23, %v2179_v59  ;;  %v1839_v30 = vpop.f32.mrf.mxu3  ;;  %v2885_v52 = vor.u32 %v3393_v63, %v2884_v33  ;;  %v3392_v14 = vld [vmem:[%s5717_s0 + $0x274] sm:$0xf]  ;;  %v3545_v59 = vunpack.c.h.bf16 %v5131_v62  ;;  %v793_v62 = vadd.f32 %v5092_v43, %v5080_v21 }
 0x24b   :  { %v1670_v26 = vpop.f32.mrf.mxu2  ;;  %v5195_v58 = vpop.f32.mrf.mxu1 }
 0x24c   :  { %v2439_v44 = vadd.f32 %v3540_v15, %v2247_v48  ;;  %v1840_v20 = vadd.f32 %v1839_v30, %v1670_v26  ;;  %v2886_v15 = vld [vmem:[%s5717_s0 + $0x27c] sm:$0xf0] }
 0x24d   :  { %672 = vmatmul.bf16.gmra.mxu0 %v2877_v60  ;;  %v2889_v38 = vor.u32 %v3392_v14, %v2886_v15 }
 0x24e   :  { %v2503_v53 = vmax.f32 %v2439_v44, 0.0  ;;  %2043 = vrot.lane.b32.xlu0 %v1840_v20, %s3651_s17  ;;  %2991 = vmatmul.msk.bf16.gmra.mxu1 %vm442_vm0, %v2881_v39  ;;  %v5276_v39 = vld [vmem:[%s5720_s3 + $0x88] sm:$0xff]  }
 0x24f   :  { %3337 = vmatmul.msk.bf16.gmra.mxu3 %vm442_vm0, %v4442_v17 }
 0x250   :  { %v2567_v41 = vpack.c.bf16 %v2503_v53, %v2503_v53  ;;  %v2016_v31 = vpop.permute.xlu1 %2015  ;;  %1712 = vmatmul.bf16.gmra.mxu2 %v1374_v6  ;;  %v5216_v0 = vpop.f32.mrf.mxu0 }
 0x251   :  { %v2180_v19 = vsel %vm442_vm0, %v785_v18, %v2016_v31  ;;  %v3548_v18 = vunpack.c.l.bf16 %v3628_v12  ;;  %v803_v31 = vadd.f32 %v5195_v58, %v5183_v45  ;;  %v3395_v45 = vld [vmem:[%s5717_s0 + $0x290] sm:$0xf0]  ;;  %v3556_v12 = vunpack.c.l.bf16 %v5276_v39 }
 0x252   :  { %2632 = vst.msk [vmem:[%s5721_s4 + $0x68] sm:$0xf] %vm2605_vm2, %v2567_v41  ;;  %v2248_v17 = vadd.f32 %v5109_v23, %v2180_v19  ;;  %v1842_v13 = vpop.f32.mrf.mxu3  ;;  %v1376_v19 = vsel %vm1344_vm1, %v4457_v32, %v4550_v42  ;;  %v3394_v32 = vld [vmem:[%s5717_s0 + $0x28c] sm:$0xf] }
 0x253   :  { %v1673_v51 = vpop.f32.mrf.mxu2  ;;  %v5218_v55 = vpop.f32.mrf.mxu1 }
 0x254   :  { %v2440_v24 = vadd.f32 %v3541_v22, %v2248_v17  ;;  %v1843_v46 = vadd.f32 %v1842_v13, %v1673_v51  ;;  %v2892_v51 = vld [vmem:[%s5717_s0 + $0x288] sm:$0xf] }
 0x256   :  { %v2504_v9 = vmax.f32 %v2440_v24, 0.0  ;;  %2045 = vrot.lane.b32.xlu1 %v1843_v46, %s3651_s17  ;;  %v2893_v24 = vor.u32 %v3395_v45, %v2892_v51  ;;  %v2894_v46 = vld [vmem:[%s5717_s0 + $0x294] sm:$0xf0] }
 0x258   :  { %v2568_v4 = vpack.c.bf16 %v2504_v9, %v2504_v9  ;;  %v2024_v7 = vpop.permute.xlu2 %2023  ;;  %v5230_v56 = vpop.f32.mrf.mxu0 }
 0x259   :  { %v2184_v36 = vsel %vm442_vm0, %v795_v25, %v2024_v7 }
 0x25a   :  { %2633 = vst.msk [vmem:[%s5721_s4 + $0x6c] sm:$0xf] %vm2605_vm2, %v2568_v4  ;;  %v2252_v50 = vadd.f32 %v5109_v23, %v2184_v36  ;;  %v1844_v54 = vpop.f32.mrf.mxu3  ;;  %v2897_v4 = vor.u32 %v3394_v32, %v2894_v46 }
 0x25b   :  { %v1675_v34 = vpop.f32.mrf.mxu2  ;;  %v5242_v5 = vpop.f32.mrf.mxu1 }
 0x25c   :  { %v2444_v2 = vadd.f32 %v3549_v49, %v2252_v50  ;;  %v1845_v11 = vadd.f32 %v1844_v54, %v1675_v34  ;;  %v798_v34 = vadd.f32 %v5147_v8, %v5137_v1 }
 0x25d   :  { %677 = vmatmul.bf16.gmra.mxu0 %v2885_v52 }
 0x25e   :  { %v2508_v27 = vmax.f32 %v2444_v2, 0.0  ;;  %2047 = vrot.lane.b32.xlu2 %v1845_v11, %s3651_s17  ;;  %2992 = vmatmul.msk.bf16.gmra.mxu1 %vm442_vm0, %v2889_v38  ;;  %v3629_v2 = vld [vmem:[%s5720_s3 + $0x80] sm:$0xff]  }
 0x25f   :  { %3338 = vmatmul.msk.bf16.gmra.mxu3 %vm442_vm0, %v4503_v28  ;;  %v3552_v63 = vunpack.c.l.bf16 %v3629_v2  ;;  %v2900_v38 = vld [vmem:[%s5717_s0 + $0x2a0] sm:$0xf] }
 0x260   :  { %v2572_v47 = vpack.c.bf16 %v2508_v27, %v2508_v27  ;;  %1717 = vmatmul.bf16.gmra.mxu2 %v1375_v61  ;;  %v2020_v48 = vpop.permute.xlu0 %2019  ;;  %v5261_v53 = vpop.f32.mrf.mxu0 }
 0x261   :  { %v2182_v16 = vsel %vm442_vm0, %v790_v10, %v2020_v48 }
 0x262   :  { %2637 = vst.msk [vmem:[%s5721_s4 + $0x7c] sm:$0xf] %vm2605_vm2, %v2572_v47  ;;  %v2250_v28 = vadd.f32 %v5109_v23, %v2182_v16  ;;  %v1847_v30 = vpop.f32.mrf.mxu3  ;;  %v3397_v16 = vld [vmem:[%s5717_s0 + $0x2a8] sm:$0xf0] }
 0x263   :  { %v1678_v26 = vpop.f32.mrf.mxu2  ;;  %v5263_v37 = vpop.f32.mrf.mxu1 }
 0x264   :  { %v2442_v44 = vadd.f32 %v3545_v59, %v2250_v28  ;;  %v1848_v20 = vadd.f32 %v1847_v30, %v1678_v26  ;;  %v800_v28 = vadd.f32 %v5171_v40, %v5169_v3  ;;  %v2901_v26 = vor.u32 %v3397_v16, %v2900_v38 }
 0x266   :  { %v2506_v6 = vmax.f32 %v2442_v44, 0.0  ;;  %2049 = vrot.lane.b32.xlu0 %v1848_v20, %s3651_s17  ;;  %v3396_v44 = vld [vmem:[%s5717_s0 + $0x2a4] sm:$0xf]  ;;  %v2902_v20 = vld [vmem:[%s5717_s0 + $0x2ac] sm:$0xf0] }
 0x268   :  { %v2570_v35 = vpack.c.bf16 %v2506_v6, %v2506_v6  ;;  %v2022_v60 = vpop.permute.xlu1 %2021  ;;  %v5282_v13 = vpop.f32.mrf.mxu0  ;;  %v3553_v6 = vunpack.c.h.bf16 %v3629_v2  ;;  %v3557_v2 = vunpack.c.h.bf16 %v5276_v39  ;;  %v808_v39 = vadd.f32 %v5242_v5, %v5230_v56 }
 0x269   :  { %v2183_v57 = vsel %vm442_vm0, %v793_v62, %v2022_v60 }
 0x26a   :  { %2635 = vst.msk [vmem:[%s5721_s4 + $0x74] sm:$0xf] %vm2605_vm2, %v2570_v35  ;;  %v2251_v29 = vadd.f32 %v5109_v23, %v2183_v57  ;;  %v1849_v21 = vpop.f32.mrf.mxu3 }
 0x26b   :  { %v1680_v43 = vpop.f32.mrf.mxu2  ;;  %v5292_v58 = vpop.f32.mrf.mxu1 }
 0x26c   :  { %v2443_v41 = vadd.f32 %v3548_v18, %v2251_v29  ;;  %v1850_v22 = vadd.f32 %v1849_v21, %v1680_v43  ;;  %v2905_v18 = vor.u32 %v3396_v44, %v2902_v20  ;;  %v810_v43 = vadd.f32 %v5263_v37, %v5261_v53 }
 0x26d   :  { %682 = vmatmul.bf16.gmra.mxu0 %v2893_v24 }
 0x26e   :  { %v2507_v17 = vmax.f32 %v2443_v41, 0.0  ;;  %2051 = vrot.lane.b32.xlu1 %v1850_v22, %s3651_s17  ;;  %2993 = vmatmul.msk.bf16.gmra.mxu1 %vm442_vm0, %v2897_v4  ;;  %v3631_v41 = vld [vmem:[%s5720_s3 + $0x90] sm:$0xff]   ;;  %v2908_v4 = vld [vmem:[%s5717_s0 + $0x2b8] sm:$0xf] }
 0x26f   :  { %3339 = vmatmul.msk.bf16.gmra.mxu3 %vm442_vm0, %v4550_v42  ;;  %v3561_v51 = vunpack.c.h.bf16 %v3631_v41 }
 0x270   :  { %v2571_v25 = vpack.c.bf16 %v2507_v17, %v2507_v17  ;;  %v2030_v9 = vpop.permute.xlu2 %2029  ;;  %1722 = vmatmul.bf16.gmra.mxu2 %v1376_v19  ;;  %v5314_v61 = vpop.f32.mrf.mxu0 }
 0x271   :  { %v2187_v49 = vsel %vm442_vm0, %v803_v31, %v2030_v9 }
 0x272   :  { %2636 = vst.msk [vmem:[%s5721_s4 + $0x78] sm:$0xf] %vm2605_vm2, %v2571_v25  ;;  %v2255_v42 = vadd.f32 %v5109_v23, %v2187_v49  ;;  %v1852_v7 = vpop.f32.mrf.mxu3  ;;  %v3399_v49 = vld [vmem:[%s5717_s0 + $0x2c0] sm:$0xf0] }
 0x273   :  { %v1683_v36 = vpop.f32.mrf.mxu2  ;;  %v5316_v27 = vpop.f32.mrf.mxu1 }
 0x274   :  { %v2447_v50 = vadd.f32 %v3556_v12, %v2255_v42  ;;  %v1853_v54 = vadd.f32 %v1852_v7, %v1683_v36  ;;  %v805_v42 = vadd.f32 %v5218_v55, %v5216_v0  ;;  %v2909_v36 = vor.u32 %v3399_v49, %v2908_v4 }
 0x276   :  { %v2511_v11 = vmax.f32 %v2447_v50, 0.0  ;;  %2053 = vrot.lane.b32.xlu2 %v1853_v54, %s3651_s17  ;;  %v3398_v50 = vld [vmem:[%s5717_s0 + $0x2bc] sm:$0xf]  ;;  %v2910_v54 = vld [vmem:[%s5717_s0 + $0x2c4] sm:$0xf0] }
 0x278   :  { %v2575_v33 = vpack.c.bf16 %v2511_v11, %v2511_v11  ;;  %v2026_v10 = vpop.permute.xlu0 %2025  ;;  %v5325_v48 = vpop.f32.mrf.mxu0 }
 0x279   :  { %v2185_v52 = vsel %vm442_vm0, %v798_v34, %v2026_v10 }
 0x27a   :  { %2640 = vst.msk [vmem:[%s5721_s4 + $0x88] sm:$0xf] %vm2605_vm2, %v2575_v33  ;;  %v2253_v1 = vadd.f32 %v5109_v23, %v2185_v52  ;;  %v1854_v8 = vpop.f32.mrf.mxu3  ;;  %v2913_v33 = vor.u32 %v3398_v50, %v2910_v54 }
 0x27b   :  { %v1685_v14 = vpop.f32.mrf.mxu2  ;;  %v5335_v30 = vpop.f32.mrf.mxu1 }
 0x27c   :  { %v2445_v15 = vadd.f32 %v3552_v63, %v2253_v1  ;;  %v1855_v47 = vadd.f32 %v1854_v8, %v1685_v14  ;;  %v818_v20 = vadd.f32 %v5335_v30, %v5325_v48  ;;  %v3400_v30 = vld [vmem:[%s5717_s0 + $0x2d4] sm:$0xf] }
 0x27d   :  { %687 = vmatmul.bf16.gmra.mxu0 %v2901_v26 }
 0x27e   :  { %v2509_v59 = vmax.f32 %v2445_v15, 0.0  ;;  %2055 = vrot.lane.b32.xlu0 %v1855_v47, %s3651_s17  ;;  %2994 = vmatmul.msk.bf16.gmra.mxu1 %vm442_vm0, %v2905_v18  ;;  %v2916_v18 = vld [vmem:[%s5717_s0 + $0x2d0] sm:$0xf] }
 0x280   :  { %v2573_v62 = vpack.c.bf16 %v2509_v59, %v2509_v59  ;;  %v2028_v35 = vpop.permute.xlu1 %2027  ;;  %v5356_v31 = vpop.f32.mrf.mxu0  ;;  %v3560_v59 = vunpack.c.l.bf16 %v3631_v41 }
 0x281   :  { %v2186_v60 = vsel %vm442_vm0, %v800_v28, %v2028_v35 }
 0x282   :  { %2638 = vst.msk [vmem:[%s5721_s4 + $0x80] sm:$0xf] %vm2605_vm2, %v2573_v62  ;;  %v2254_v3 = vadd.f32 %v5109_v23, %v2186_v60  ;;  %v1857_v40 = vpop.f32.mrf.mxu3  ;;  %v5411_v62 = vld [vmem:[%s5720_s3 + $0xa0] sm:$0xff]   ;;  %v3401_v60 = vld [vmem:[%s5717_s0 + $0x2d8] sm:$0xf0] }
 0x283   :  { %v1688_v57 = vpop.f32.mrf.mxu2  ;;  %v5358_v19 = vpop.f32.mrf.mxu1  ;;  %v2917_v48 = vor.u32 %v3401_v60, %v2916_v18  ;;  %v2924_v60 = vld [vmem:[%s5717_s0 + $0x2e8] sm:$0xf] }
 0x284   :  { %v2446_v29 = vadd.f32 %v3553_v6, %v2254_v3  ;;  %v1858_v21 = vadd.f32 %v1857_v40, %v1688_v57  ;;  %v2918_v40 = vld [vmem:[%s5717_s0 + $0x2dc] sm:$0xf0] }
 0x286   :  { %v2510_v22 = vmax.f32 %v2446_v29, 0.0  ;;  %2057 = vrot.lane.b32.xlu1 %v1858_v21, %s3651_s17  ;;  %v3568_v29 = vunpack.c.l.bf16 %v5411_v62 }
 0x288   :  { %v2574_v17 = vpack.c.bf16 %v2510_v22, %v2510_v22  ;;  %v2036_v45 = vpop.permute.xlu2 %2035  ;;  %v5367_v9 = vpop.f32.mrf.mxu0 }
 0x289   :  { %v2190_v24 = vsel %vm442_vm0, %v810_v43, %v2036_v45  ;;  %v2921_v43 = vor.u32 %v3400_v30, %v2918_v40  ;;  %v820_v30 = vadd.f32 %v5358_v19, %v5356_v31 }
 0x28a   :  { %2639 = vst.msk [vmem:[%s5721_s4 + $0x84] sm:$0xf] %vm2605_vm2, %v2574_v17  ;;  %v2258_v53 = vadd.f32 %v5109_v23, %v2190_v24  ;;  %v1859_v37 = vpop.f32.mrf.mxu3 }
 0x28b   :  { %v1690_v32 = vpop.f32.mrf.mxu2  ;;  %v5377_v7 = vpop.f32.mrf.mxu1 }
 0x28c   :  { %v2450_v46 = vadd.f32 %v3561_v51, %v2258_v53  ;;  %v1860_v25 = vadd.f32 %v1859_v37, %v1690_v32  ;;  %v813_v53 = vadd.f32 %v5292_v58, %v5282_v13  ;;  %v3632_v37 = vld [vmem:[%s5720_s3 + $0x98] sm:$0xff]  }
 0x28d   :  { %692 = vmatmul.bf16.gmra.mxu0 %v2909_v36  ;;  %v3564_v4 = vunpack.c.l.bf16 %v3632_v37 }
 0x28e   :  { %v2514_v12 = vmax.f32 %v2450_v46, 0.0  ;;  %2059 = vrot.lane.b32.xlu2 %v1860_v25, %s3651_s17  ;;  %2995 = vmatmul.msk.bf16.gmra.mxu1 %vm442_vm0, %v2913_v33 }
 0x290   :  { %v2578_v34 = vpack.c.bf16 %v2514_v12, %v2514_v12  ;;  %v2032_v11 = vpop.permute.xlu0 %2031  ;;  %v5396_v14 = vpop.f32.mrf.mxu0 }
 0x291   :  { %v2188_v63 = vsel %vm442_vm0, %v805_v42, %v2032_v11  ;;  %v815_v11 = vadd.f32 %v5316_v27, %v5314_v61  ;;  %v3634_v27 = vld [vmem:[%s5720_s3 + $0xa8] sm:$0xff]  }
 0x292   :  { %2643 = vst.msk [vmem:[%s5721_s4 + $0x94] sm:$0xf] %vm2605_vm2, %v2578_v34  ;;  %v2256_v0 = vadd.f32 %v5109_v23, %v2188_v63  ;;  %v1862_v55 = vpop.f32.mrf.mxu3 }
 0x293   :  { %v1693_v10 = vpop.f32.mrf.mxu2  ;;  %v5398_v15 = vpop.f32.mrf.mxu1 }
 0x294   :  { %v2448_v52 = vadd.f32 %v3557_v2, %v2256_v0  ;;  %v1863_v1 = vadd.f32 %v1862_v55, %v1693_v10  ;;  %v3565_v0 = vunpack.c.h.bf16 %v3632_v37  ;;  %v825_v61 = vadd.f32 %v5398_v15, %v5396_v14 }
 0x295   :  { %v823_v37 = vadd.f32 %v5377_v7, %v5367_v9 }
 0x296   :  { %v2512_v8 = vmax.f32 %v2448_v52, 0.0  ;;  %2061 = vrot.lane.b32.xlu0 %v1863_v1, %s3651_s17 }
 0x298   :  { %v2576_v47 = vpack.c.bf16 %v2512_v8, %v2512_v8  ;;  %v2034_v38 = vpop.permute.xlu1 %2033  ;;  %v5414_v35 = vpop.f32.mrf.mxu0 }
 0x299   :  { %v2189_v16 = vsel %vm442_vm0, %v808_v39, %v2034_v38 }
 0x29a   :  { %2641 = vst.msk [vmem:[%s5721_s4 + $0x8c] sm:$0xf] %vm2605_vm2, %v2576_v47  ;;  %v2257_v28 = vadd.f32 %v5109_v23, %v2189_v16  ;;  %v1864_v56 = vpop.f32.mrf.mxu3 }
 0x29b   :  { %v1695_v5 = vpop.f32.mrf.mxu2  ;;  %v5422_v3 = vpop.f32.mrf.mxu1 }
 0x29c   :  { %v2449_v26 = vadd.f32 %v3560_v59, %v2257_v28  ;;  %v1865_v44 = vadd.f32 %v1864_v56, %v1695_v5  ;;  %v3573_v56 = vunpack.c.h.bf16 %v3634_v27 }
 0x29d   :  { %697 = vmatmul.bf16.gmra.mxu0 %v2917_v48  ;;  %v3403_v48 = vld [vmem:[%s5717_s0 + $0x2f0] sm:$0xf0] }
 0x29e   :  { %v2513_v6 = vmax.f32 %v2449_v26, 0.0  ;;  %2063 = vrot.lane.b32.xlu1 %v1865_v44, %s3651_s17  ;;  %2996 = vmatmul.msk.bf16.gmra.mxu1 %vm442_vm0, %v2921_v43 }
 0x2a0   :  { %v2577_v57 = vpack.c.bf16 %v2513_v6, %v2513_v6  ;;  %v2042_v21 = vpop.permute.xlu2 %2041  ;;  %v5444_v46 = vpop.f32.mrf.mxu0 }
 0x2a1   :  { %v2193_v41 = vsel %vm442_vm0, %v818_v20, %v2042_v21  ;;  %v2926_v21 = vld [vmem:[%s5717_s0 + $0x2f4] sm:$0xf0] }
 0x2a2   :  { %2642 = vst.msk [vmem:[%s5721_s4 + $0x90] sm:$0xf] %vm2605_vm2, %v2577_v57  ;;  %v2261_v22 = vadd.f32 %v5109_v23, %v2193_v41  ;;  %v1867_v17 = vpop.f32.mrf.mxu3  ;;  %v2925_v57 = vor.u32 %v3403_v48, %v2924_v60  ;;  %v3569_v41 = vunpack.c.h.bf16 %v5411_v62 }
 0x2a3   :  { %v1698_v51 = vpop.f32.mrf.mxu2  ;;  %v5446_v25 = vpop.f32.mrf.mxu1 }
 0x2a4   :  { %v2453_v45 = vadd.f32 %v3568_v29, %v2261_v22  ;;  %v1868_v24 = vadd.f32 %v1867_v17, %v1698_v51  ;;  %v3402_v29 = vld [vmem:[%s5717_s0 + $0x2ec] sm:$0xf]  ;;  %v830_v48 = vadd.f32 %v5446_v25, %v5444_v46  ;;  %v3637_v46 = vld [vmem:[%s5720_s3 + $0xc0] sm:$0xff]  }
 0x2a5   :  { %v2929_v51 = vor.u32 %v3402_v29, %v2926_v21 }
 0x2a6   :  { %v2517_v32 = vmax.f32 %v2453_v45, 0.0  ;;  %2065 = vrot.lane.b32.xlu2 %v1868_v24, %s3651_s17 }
 0x2a8   :  { %v2581_v12 = vpack.c.bf16 %v2517_v32, %v2517_v32  ;;  %v2038_v49 = vpop.permute.xlu0 %2037 }
 0x2a9   :  { %v2191_v42 = vsel %vm442_vm0, %v813_v53, %v2038_v49 }
 0x2aa   :  { %2646 = vst.msk [vmem:[%s5721_s4 + $0xa0] sm:$0xf] %vm2605_vm2, %v2581_v12  ;;  %v2259_v13 = vadd.f32 %v5109_v23, %v2191_v42  ;;  %v1869_v58 = vpop.f32.mrf.mxu3  ;;  %v5455_v2 = vpop.f32.mrf.mxu0 }
 0x2ab   :  { %v1700_v36 = vpop.f32.mrf.mxu2  ;;  %v5459_v33 = vpop.f32.mrf.mxu1 }
 0x2ac   :  { %v2451_v50 = vadd.f32 %v3564_v4, %v2259_v13  ;;  %v1870_v54 = vadd.f32 %v1869_v58, %v1700_v36  ;;  %v3572_v4 = vunpack.c.l.bf16 %v3634_v27  ;;  %v828_v27 = vadd.f32 %v5422_v3, %v5414_v35 }
 0x2ad   :  { %702 = vmatmul.bf16.gmra.mxu0 %v2925_v57 }
 0x2ae   :  { %v2515_v34 = vmax.f32 %v2451_v50, 0.0  ;;  %2067 = vrot.lane.b32.xlu0 %v1870_v54, %s3651_s17  ;;  %2997 = vmatmul.msk.bf16.gmra.mxu1 %vm442_vm0, %v2929_v51 }
 0x2b0   :  { %v2579_v63 = vpack.c.bf16 %v2515_v34, %v2515_v34  ;;  %v2040_v55 = vpop.permute.xlu1 %2039  ;;  %v833_v34 = vadd.f32 %v5459_v33, %v5455_v2 }
 0x2b1   :  { %v2192_v10 = vsel %vm442_vm0, %v815_v11, %v2040_v55  ;;  %v5524_v11 = vld [vmem:[%s5720_s3 + $0xb8] sm:$0xff]  }
 0x2b2   :  { %2644 = vst.msk [vmem:[%s5721_s4 + $0x98] sm:$0xf] %vm2605_vm2, %v2579_v63  ;;  %v2260_v52 = vadd.f32 %v5109_v23, %v2192_v10  ;;  %v1872_v1 = vpop.f32.mrf.mxu3  ;;  %v5473_v38 = vpop.f32.mrf.mxu0  ;;  %v3580_v55 = vunpack.c.l.bf16 %v5524_v11 }
 0x2b3   :  { %v1703_v39 = vpop.f32.mrf.mxu2  ;;  %v5475_v16 = vpop.f32.mrf.mxu1 }
 0x2b4   :  { %v2452_v8 = vadd.f32 %v3565_v0, %v2260_v52  ;;  %v1873_v47 = vadd.f32 %v1872_v1, %v1703_v39 }
 0x2b6   :  { %v2516_v59 = vmax.f32 %v2452_v8, 0.0  ;;  %2069 = vrot.lane.b32.xlu1 %v1873_v47, %s3651_s17 }
 0x2b8   :  { %v2580_v28 = vpack.c.bf16 %v2516_v59, %v2516_v59  ;;  %v2048_v5 = vpop.permute.xlu2 %2047  ;;  %v3635_v59 = vld [vmem:[%s5720_s3 + $0xb0] sm:$0xff]  }
 0x2b9   :  { %v2196_v26 = vsel %vm442_vm0, %v825_v61, %v2048_v5  ;;  %v3576_v5 = vunpack.c.l.bf16 %v3635_v59  ;;  %v3577_v57 = vunpack.c.h.bf16 %v3635_v59 }
 0x2ba   :  { %2645 = vst.msk [vmem:[%s5721_s4 + $0x9c] sm:$0xf] %vm2605_vm2, %v2580_v28  ;;  %v2264_v14 = vadd.f32 %v5109_v23, %v2196_v26  ;;  %v1874_v15 = vpop.f32.mrf.mxu3  ;;  %v5492_v40 = vpop.f32.mrf.mxu0 }
 0x2bb   :  { %v1705_v44 = vpop.f32.mrf.mxu2  ;;  %v5501_v17 = vpop.f32.mrf.mxu1 }
 0x2bc   :  { %v2456_v20 = vadd.f32 %v3573_v56, %v2264_v14  ;;  %v1875_v6 = vadd.f32 %v1874_v15, %v1705_v44 }
 0x2be   :  { %v2520_v18 = vmax.f32 %v2456_v20, 0.0  ;;  %2071 = vrot.lane.b32.xlu2 %v1875_v6, %s3651_s17 }
 0x2c0   :  { %v2584_v43 = vpack.c.bf16 %v2520_v18, %v2520_v18  ;;  %v2044_v22 = vpop.permute.xlu0 %2043 }
 0x2c1   :  { %v2194_v31 = vsel %vm442_vm0, %v820_v30, %v2044_v22 }
 0x2c2   :  { %2649 = vst.msk [vmem:[%s5721_s4 + $0xac] sm:$0xf] %vm2605_vm2, %v2584_v43  ;;  %v2262_v19 = vadd.f32 %v5109_v23, %v2194_v31  ;;  %v1877_v45 = vpop.f32.mrf.mxu3  ;;  %v670_v13 = vpop.f32.mrf.mxu0 }
 0x2c3   :  { %v1708_v24 = vpop.f32.mrf.mxu2  ;;  %v839_v50 = vpop.f32.mrf.mxu1 }
 0x2c4   :  { %v2454_v53 = vadd.f32 %v3569_v41, %v2262_v19  ;;  %v1878_v62 = vadd.f32 %v1877_v45, %v1708_v24  ;;  %v840_v19 = vadd.f32 %v839_v50, %v670_v13 }
 0x2c6   :  { %v2518_v32 = vmax.f32 %v2454_v53, 0.0  ;;  %2073 = vrot.lane.b32.xlu0 %v1878_v62, %s3651_s17  ;;  %v3585_v53 = vunpack.c.h.bf16 %v3637_v46 }
 0x2c8   :  { %v2582_v12 = vpack.c.bf16 %v2518_v32, %v2518_v32  ;;  %v2046_v49 = vpop.permute.xlu1 %2045 }
 0x2c9   :  { %v2195_v42 = vsel %vm442_vm0, %v823_v37, %v2046_v49 }
 0x2ca   :  { %2647 = vst.msk [vmem:[%s5721_s4 + $0xa4] sm:$0xf] %vm2605_vm2, %v2582_v12  ;;  %v2263_v58 = vadd.f32 %v5109_v23, %v2195_v42  ;;  %v1879_v36 = vpop.f32.mrf.mxu3  ;;  %v5534_v39 = vpop.f32.mrf.mxu0 }
 0x2cb   :  { %v1710_v54 = vpop.f32.mrf.mxu2  ;;  %v5536_v61 = vpop.f32.mrf.mxu1 }
 0x2cc   :  { %v2455_v9 = vadd.f32 %v3572_v4, %v2263_v58  ;;  %v1880_v7 = vadd.f32 %v1879_v36, %v1710_v54  ;;  %v835_v36 = vadd.f32 %v5475_v16, %v5473_v38  ;;  %v3581_v54 = vunpack.c.h.bf16 %v5524_v11 }
 0x2cd   :  { %v838_v11 = vadd.f32 %v5501_v17, %v5492_v40 }
 0x2ce   :  { %v2519_v63 = vmax.f32 %v2455_v9, 0.0  ;;  %2075 = vrot.lane.b32.xlu1 %v1880_v7, %s3651_s17 }
 0x2d0   :  { %v2583_v0 = vpack.c.bf16 %v2519_v63, %v2519_v63  ;;  %v2054_v10 = vpop.permute.xlu2 %2053 }
 0x2d1   :  { %v2199_v52 = vsel %vm442_vm0, %v833_v34, %v2054_v10 }
 0x2d2   :  { %2648 = vst.msk [vmem:[%s5721_s4 + $0xa8] sm:$0xf] %vm2605_vm2, %v2583_v0  ;;  %v2267_v2 = vadd.f32 %v5109_v23, %v2199_v52  ;;  %v1882_v33 = vpop.f32.mrf.mxu3  ;;  %v5550_v6 = vpop.f32.mrf.mxu0 }
 0x2d3   :  { %v1713_v1 = vpop.f32.mrf.mxu2  ;;  %v5553_v60 = vpop.f32.mrf.mxu1 }
 0x2d4   :  { %v2459_v8 = vadd.f32 %v3580_v55, %v2267_v2  ;;  %v1883_v47 = vadd.f32 %v1882_v33, %v1713_v1  ;;  %v3584_v33 = vunpack.c.l.bf16 %v3637_v46 }
 0x2d6   :  { %v2523_v28 = vmax.f32 %v2459_v8, 0.0  ;;  %2077 = vrot.lane.b32.xlu2 %v1883_v47, %s3651_s17 }
 0x2d8   :  { %v2587_v56 = vpack.c.bf16 %v2523_v28, %v2523_v28  ;;  %v2050_v26 = vpop.permute.xlu0 %2049 }
 0x2d9   :  { %v2197_v14 = vsel %vm442_vm0, %v828_v27, %v2050_v26  ;;  %v3639_v26 = vld [vmem:[%s5720_s3 + $0xd0] sm:$0xff]  }
 0x2da   :  { %2652 = vst.msk [vmem:[%s5721_s4 + $0xb8] sm:$0xf] %vm2605_vm2, %v2587_v56  ;;  %v2265_v15 = vadd.f32 %v5109_v23, %v2197_v14  ;;  %v1884_v35 = vpop.f32.mrf.mxu3  ;;  %v678_v45 = vpop.f32.mrf.mxu0 }
 0x2db   :  { %v1715_v3 = vpop.f32.mrf.mxu2  ;;  %v847_v37 = vpop.f32.mrf.mxu1 }
 0x2dc   :  { %v2457_v44 = vadd.f32 %v3576_v5, %v2265_v15  ;;  %v1885_v20 = vadd.f32 %v1884_v35, %v1715_v3  ;;  %v848_v5 = vadd.f32 %v847_v37, %v678_v45  ;;  %v3592_v35 = vunpack.c.l.bf16 %v3639_v26 }
 0x2de   :  { %v2521_v18 = vmax.f32 %v2457_v44, 0.0  ;;  %2079 = vrot.lane.b32.xlu0 %v1885_v20, %s3651_s17 }
 0x2e0   :  { %v2585_v30 = vpack.c.bf16 %v2521_v18, %v2521_v18  ;;  %v2052_v29 = vpop.permute.xlu1 %2051 }
 0x2e1   :  { %v2198_v21 = vsel %vm442_vm0, %v830_v48, %v2052_v29  ;;  %v843_v48 = vadd.f32 %v5536_v61, %v5534_v39 }
 0x2e2   :  { %2650 = vst.msk [vmem:[%s5721_s4 + $0xb0] sm:$0xf] %vm2605_vm2, %v2585_v30  ;;  %v2266_v43 = vadd.f32 %v5109_v23, %v2198_v21  ;;  %v1887_v41 = vpop.f32.mrf.mxu3  ;;  %v5578_v34 = vpop.f32.mrf.mxu0  ;;  %v3638_v30 = vld [vmem:[%s5720_s3 + $0xc8] sm:$0xff]  }
 0x2e3   :  { %v1718_v22 = vpop.f32.mrf.mxu2  ;;  %v5585_v55 = vpop.f32.mrf.mxu1  ;;  %v3589_v45 = vunpack.c.h.bf16 %v3638_v30 }
 0x2e4   :  { %v2458_v51 = vadd.f32 %v3577_v57, %v2266_v43  ;;  %v1888_v31 = vadd.f32 %v1887_v41, %v1718_v22  ;;  %v3588_v41 = vunpack.c.l.bf16 %v3638_v30 }
 0x2e6   :  { %v2522_v25 = vmax.f32 %v2458_v51, 0.0  ;;  %2081 = vrot.lane.b32.xlu1 %v1888_v31, %s3651_s17 }
 0x2e8   :  { %v2586_v24 = vpack.c.bf16 %v2522_v25, %v2522_v25  ;;  %v2060_v62 = vpop.permute.xlu2 %2059 }
 0x2e9   :  { %v2202_v32 = vsel %vm442_vm0, %v840_v19, %v2060_v62  ;;  %v845_v19 = vadd.f32 %v5553_v60, %v5550_v6  ;;  %v3640_v6 = vld [vmem:[%s5720_s3 + $0xd8] sm:$0xff]  }
 0x2ea   :  { %2651 = vst.msk [vmem:[%s5721_s4 + $0xb4] sm:$0xf] %vm2605_vm2, %v2586_v24  ;;  %v2270_v12 = vadd.f32 %v5109_v23, %v2202_v32  ;;  %v1889_v4 = vpop.f32.mrf.mxu3  ;;  %v683_v28 = vpop.f32.mrf.mxu0 }
 0x2eb   :  { %v1720_v49 = vpop.f32.mrf.mxu2  ;;  %v852_v17 = vpop.f32.mrf.mxu1 }
 0x2ec   :  { %v2462_v42 = vadd.f32 %v3585_v53, %v2270_v12  ;;  %v1890_v13 = vadd.f32 %v1889_v4, %v1720_v49  ;;  %v3597_v49 = vunpack.c.h.bf16 %v3640_v6 }
 0x2ee   :  { %v2526_v58 = vmax.f32 %v2462_v42, 0.0  ;;  %2083 = vrot.lane.b32.xlu2 %v1890_v13, %s3651_s17 }
 0x2f0   :  { %v2590_v50 = vpack.c.bf16 %v2526_v58, %v2526_v58  ;;  %v2056_v9 = vpop.permute.xlu0 %2055 }
 0x2f1   :  { %v2200_v7 = vsel %vm442_vm0, %v835_v36, %v2056_v9 }
 0x2f2   :  { %2655 = vst.msk [vmem:[%s5721_s4 + $0xc4] sm:$0xf] %vm2605_vm2, %v2590_v50  ;;  %v2268_v63 = vadd.f32 %v5109_v23, %v2200_v7  ;;  %v1892_v0 = vpop.f32.mrf.mxu3  ;;  %v685_v57 = vpop.f32.mrf.mxu0  ;;  %v850_v7 = vadd.f32 %v5585_v55, %v5578_v34  ;;  %v853_v55 = vadd.f32 %v852_v17, %v683_v28 }
 0x2f3   :  { %v1723_v10 = vpop.f32.mrf.mxu2  ;;  %v854_v21 = vpop.f32.mrf.mxu1 }
 0x2f4   :  { %v2460_v38 = vadd.f32 %v3581_v54, %v2268_v63  ;;  %v1893_v16 = vadd.f32 %v1892_v0, %v1723_v10  ;;  %v855_v12 = vadd.f32 %v854_v21, %v685_v57  ;;  %v3593_v0 = vunpack.c.h.bf16 %v3639_v26 }
 0x2f6   :  { %v2524_v52 = vmax.f32 %v2460_v38, 0.0  ;;  %2085 = vrot.lane.b32.xlu0 %v1893_v16, %s3651_s17 }
 0x2f8   :  { %v2588_v2 = vpack.c.bf16 %v2524_v52, %v2524_v52  ;;  %v2058_v1 = vpop.permute.xlu1 %2057 }
 0x2f9   :  { %v2201_v8 = vsel %vm442_vm0, %v838_v11, %v2058_v1  ;;  %v3596_v1 = vunpack.c.l.bf16 %v3640_v6 }
 0x2fa   :  { %2653 = vst.msk [vmem:[%s5721_s4 + $0xbc] sm:$0xf] %vm2605_vm2, %v2588_v2  ;;  %v2269_v47 = vadd.f32 %v5109_v23, %v2201_v8  ;;  %v1894_v27 = vpop.f32.mrf.mxu3  ;;  %v688_v46 = vpop.f32.mrf.mxu0 }
 0x2fb   :  { %v1725_v59 = vpop.f32.mrf.mxu2  ;;  %v857_v53 = vpop.f32.mrf.mxu1 }
 0x2fc   :  { %v2461_v56 = vadd.f32 %v3584_v33, %v2269_v47  ;;  %v1895_v40 = vadd.f32 %v1894_v27, %v1725_v59 }
 0x2fe   :  { %v2525_v14 = vmax.f32 %v2461_v56, 0.0  ;;  %2087 = vrot.lane.b32.xlu1 %v1895_v40, %s3651_s17  ;;  %v3642_v40 = vld [vmem:[%s5720_s3 + $0xe8] sm:$0xff]  }
 0x300   :  { %v2589_v15 = vpack.c.bf16 %v2525_v14, %v2525_v14  ;;  %v2066_v3 = vpop.permute.xlu2 %2065  ;;  %v3604_v14 = vunpack.c.l.bf16 %v3642_v40 }
 0x301   :  { %v2205_v44 = vsel %vm442_vm0, %v848_v5, %v2066_v3 }
 0x302   :  { %2654 = vst.msk [vmem:[%s5721_s4 + $0xc0] sm:$0xf] %vm2605_vm2, %v2589_v15  ;;  %v2273_v20 = vadd.f32 %v5109_v23, %v2205_v44  ;;  %v690_v58 = vpop.f32.mrf.mxu0 }
 0x303   :  { %v859_v50 = vpop.f32.mrf.mxu1 }
 0x304   :  { %v2465_v18 = vadd.f32 %v3592_v35, %v2273_v20  ;;  %v858_v20 = vadd.f32 %v857_v53, %v688_v46 }
 0x306   :  { %v2529_v29 = vmax.f32 %v2465_v18, 0.0  ;;  %v3641_v18 = vld [vmem:[%s5720_s3 + $0xe0] sm:$0xff]  }
 0x308   :  { %v2593_v43 = vpack.c.bf16 %v2529_v29, %v2529_v29  ;;  %v2062_v22 = vpop.permute.xlu0 %2061  ;;  %v3600_v29 = vunpack.c.l.bf16 %v3641_v18 }
 0x309   :  { %v2203_v51 = vsel %vm442_vm0, %v843_v48, %v2062_v22 }
 0x30a   :  { %2658 = vst.msk [vmem:[%s5721_s4 + $0xd0] sm:$0xf] %vm2605_vm2, %v2593_v43  ;;  %v2271_v31 = vadd.f32 %v5109_v23, %v2203_v51  ;;  %v693_v11 = vpop.f32.mrf.mxu0 }
 0x30b   :  { %v862_v34 = vpop.f32.mrf.mxu1 }
 0x30c   :  { %v2463_v39 = vadd.f32 %v3588_v41, %v2271_v31  ;;  %v863_v56 = vadd.f32 %v862_v34, %v693_v11 }
 0x30e   :  { %v2527_v61 = vmax.f32 %v2463_v39, 0.0  ;;  %v860_v39 = vadd.f32 %v859_v50, %v690_v58 }
 0x310   :  { %v2591_v25 = vpack.c.bf16 %v2527_v61, %v2527_v61  ;;  %v2064_v24 = vpop.permute.xlu1 %2063 }
 0x311   :  { %v2204_v62 = vsel %vm442_vm0, %v845_v19, %v2064_v24  ;;  %v3601_v19 = vunpack.c.h.bf16 %v3641_v18 }
 0x312   :  { %2656 = vst.msk [vmem:[%s5721_s4 + $0xc8] sm:$0xf] %vm2605_vm2, %v2591_v25  ;;  %v2272_v37 = vadd.f32 %v5109_v23, %v2204_v62  ;;  %v695_v28 = vpop.f32.mrf.mxu0 }
 0x313   :  { %v864_v5 = vpop.f32.mrf.mxu1 }
 0x314   :  { %v2464_v32 = vadd.f32 %v3589_v45, %v2272_v37 }
 0x316   :  { %v2528_v60 = vmax.f32 %v2464_v32, 0.0  ;;  %v3643_v32 = vld [vmem:[%s5720_s3 + $0xf0] sm:$0xff]  }
 0x317   :  { %v3608_v11 = vunpack.c.l.bf16 %v3643_v32 }
 0x318   :  { %v2592_v4 = vpack.c.bf16 %v2528_v60, %v2528_v60  ;;  %v2072_v42 = vpop.permute.xlu2 %2071  ;;  %v3609_v60 = vunpack.c.h.bf16 %v3643_v32 }
 0x319   :  { %v2208_v13 = vsel %vm442_vm0, %v855_v12, %v2072_v42 }
 0x31a   :  { %2657 = vst.msk [vmem:[%s5721_s4 + $0xcc] sm:$0xf] %vm2605_vm2, %v2592_v4  ;;  %v2276_v36 = vadd.f32 %v5109_v23, %v2208_v13  ;;  %v5644_v23 = vld [vmem:[%s5719_s2] ss:$0 sm:$0xff]  ;;  %v698_v30 = vpop.f32.mrf.mxu0 }
 0x31b   :  { %v867_v43 = vpop.f32.mrf.mxu1 }
 0x31c   :  { %v2468_v54 = vadd.f32 %v3597_v49, %v2276_v36  ;;  %v865_v36 = vadd.f32 %v864_v5, %v695_v28 }
 0x31e   :  { %v2532_v9 = vmax.f32 %v2468_v54, 0.0  ;;  %v3605_v54 = vunpack.c.h.bf16 %v3642_v40 }
 0x320   :  { %v2596_v63 = vpack.c.bf16 %v2532_v9, %v2532_v9  ;;  %v2068_v10 = vpop.permute.xlu0 %2067 }
 0x321   :  { %v2206_v38 = vsel %vm442_vm0, %v850_v7, %v2068_v10  ;;  %v868_v10 = vadd.f32 %v867_v43, %v698_v30 }
 0x322   :  { %2661 = vst.msk [vmem:[%s5721_s4 + $0xdc] sm:$0xf] %vm2605_vm2, %v2596_v63  ;;  %v2274_v16 = vadd.f32 %v5644_v23, %v2206_v38  ;;  %v700_v24 = vpop.f32.mrf.mxu0 }
 0x323   :  { %v869_v53 = vpop.f32.mrf.mxu1 }
 0x324   :  { %v2466_v52 = vadd.f32 %v3593_v0, %v2274_v16  ;;  %v870_v37 = vadd.f32 %v869_v53, %v700_v24 }
 0x326   :  { %v2530_v2 = vmax.f32 %v2466_v52, 0.0 }
 0x328   :  { %v2594_v33 = vpack.c.bf16 %v2530_v2, %v2530_v2  ;;  %v2070_v8 = vpop.permute.xlu1 %2069 }
 0x329   :  { %v2207_v47 = vsel %vm442_vm0, %v853_v55, %v2070_v8 }
 0x32a   :  { %2659 = vst.msk [vmem:[%s5721_s4 + $0xd4] sm:$0xf] %vm2605_vm2, %v2594_v33  ;;  %v2275_v27 = vadd.f32 %v5644_v23, %v2207_v47  ;;  %v703_v8 = vpop.f32.mrf.mxu0 }
 0x32b   :  { %v872_v47 = vpop.f32.mrf.mxu1 }
 0x32c   :  { %v2467_v59 = vadd.f32 %v3596_v1, %v2275_v27  ;;  %v873_v27 = vadd.f32 %v872_v47, %v703_v8 }
 0x32e   :  { %v2531_v17 = vmax.f32 %v2467_v59, 0.0  ;;  %v3644_v59 = vld [vmem:[%s5720_s3 + $0xf8] sm:$0xff]  }
 0x330   :  { %v2595_v26 = vpack.c.bf16 %v2531_v17, %v2531_v17  ;;  %v2078_v15 = vpop.permute.xlu2 %2077 }
 0x331   :  { %v2211_v35 = vsel %vm442_vm0, %v863_v56, %v2078_v15  ;;  %v3612_v56 = vunpack.c.l.bf16 %v3644_v59 }
 0x332   :  { %2660 = vst.msk [vmem:[%s5721_s4 + $0xd8] sm:$0xf] %vm2605_vm2, %v2595_v26  ;;  %v2279_v3 = vadd.f32 %v5644_v23, %v2211_v35  ;;  %v705_v5 = vpop.f32.mrf.mxu0 }
 0x333   :  { %v874_v26 = vpop.f32.mrf.mxu1 }
 0x334   :  { %v2471_v44 = vadd.f32 %v3604_v14, %v2279_v3  ;;  %v875_v35 = vadd.f32 %v874_v26, %v705_v5 }
 0x336   :  { %v2535_v48 = vmax.f32 %v2471_v44, 0.0  ;;  %v3613_v44 = vunpack.c.h.bf16 %v3644_v59 }
 0x338   :  { %v2599_v57 = vpack.c.bf16 %v2535_v48, %v2535_v48  ;;  %v2074_v21 = vpop.permute.xlu0 %2073 }
 0x339   :  { %v2209_v41 = vsel %vm442_vm0, %v858_v20, %v2074_v21 }
 0x33a   :  { %2664 = vst.msk [vmem:[%s5721_s4 + $0xe8] sm:$0xf] %vm2605_vm2, %v2599_v57  ;;  %v2277_v22 = vadd.f32 %v5644_v23, %v2209_v41 }
 0x33c   :  { %v2469_v51 = vadd.f32 %v3600_v29, %v2277_v22 }
 0x33e   :  { %v2533_v31 = vmax.f32 %v2469_v51, 0.0 }
 0x340   :  { %v2597_v61 = vpack.c.bf16 %v2533_v31, %v2533_v31  ;;  %v2076_v46 = vpop.permute.xlu1 %2075 }
 0x341   :  { %v2210_v25 = vsel %vm442_vm0, %v860_v39, %v2076_v46 }
 0x342   :  { %2662 = vst.msk [vmem:[%s5721_s4 + $0xe0] sm:$0xf] %vm2605_vm2, %v2597_v61  ;;  %v2278_v45 = vadd.f32 %v5644_v23, %v2210_v25 }
 0x344   :  { %v2470_v62 = vadd.f32 %v3601_v19, %v2278_v45 }
 0x346   :  { %v2534_v12 = vmax.f32 %v2470_v62, 0.0 }
 0x348   :  { %v2598_v6 = vpack.c.bf16 %v2534_v12, %v2534_v12  ;;  %v2084_v4 = vpop.permute.xlu2 %2083 }
 0x349   :  { %v2214_v49 = vsel %vm442_vm0, %v870_v37, %v2084_v4 }
 0x34a   :  { %2663 = vst.msk [vmem:[%s5721_s4 + $0xe4] sm:$0xf] %vm2605_vm2, %v2598_v6  ;;  %v2282_v42 = vadd.f32 %v5644_v23, %v2214_v49 }
 0x34c   :  { %v2474_v13 = vadd.f32 %v3609_v60, %v2282_v42 }
 0x34e   :  { %v2538_v58 = vmax.f32 %v2474_v13, 0.0 }
 0x350   :  { %v2602_v50 = vpack.c.bf16 %v2538_v58, %v2538_v58  ;;  %v2080_v9 = vpop.permute.xlu0 %2079 }
 0x351   :  { %v2212_v7 = vsel %vm442_vm0, %v865_v36, %v2080_v9 }
 0x352   :  { %2667 = vst.msk [vmem:[%s5721_s4 + $0xf4] sm:$0xf] %vm2605_vm2, %v2602_v50  ;;  %v2280_v63 = vadd.f32 %v5644_v23, %v2212_v7 }
 0x354   :  { %v2472_v0 = vadd.f32 %v3605_v54, %v2280_v63 }
 0x356   :  { %v2536_v38 = vmax.f32 %v2472_v0, 0.0 }
 0x358   :  { %v2600_v16 = vpack.c.bf16 %v2536_v38, %v2536_v38  ;;  %v2082_v52 = vpop.permute.xlu1 %2081 }
 0x359   :  { %v2213_v34 = vsel %vm442_vm0, %v868_v10, %v2082_v52 }
 0x35a   :  { %2665 = vst.msk [vmem:[%s5721_s4 + $0xec] sm:$0xf] %vm2605_vm2, %v2600_v16  ;;  %v2281_v55 = vadd.f32 %v5644_v23, %v2213_v34 }
 0x35c   :  { %v2473_v2 = vadd.f32 %v3608_v11, %v2281_v55 }
 0x35e   :  { %v2537_v33 = vmax.f32 %v2473_v2, 0.0 }
 0x360   :  { %v2601_v1 = vpack.c.bf16 %v2537_v33, %v2537_v33 }
 0x362   :  { %2666 = vst.msk [vmem:[%s5721_s4 + $0xf0] sm:$0xf] %vm2605_vm2, %v2601_v1 }
 0x368   :  { %v2086_v40 = vpop.permute.xlu0 %2085 }
 0x369   :  { %v2215_v28 = vsel %vm442_vm0, %v873_v27, %v2086_v40 }
 0x36a   :  { %v2283_v17 = vadd.f32 %v5644_v23, %v2215_v28 }
 0x36c   :  { %v2475_v14 = vadd.f32 %v3612_v56, %v2283_v17 }
 0x36e   :  { %v2539_v15 = vmax.f32 %v2475_v14, 0.0 }
 0x370   :  { %v2603_v3 = vpack.c.bf16 %v2539_v15, %v2539_v15  ;;  %v2088_v20 = vpop.permute.xlu1 %2087 }
 0x371   :  { %v2216_v18 = vsel %vm442_vm0, %v875_v35, %v2088_v20 }
 0x372   :  { %2668 = vst.msk [vmem:[%s5721_s4 + $0xf8] sm:$0xf] %vm2605_vm2, %v2603_v3  ;;  %v2284_v48 = vadd.f32 %v5644_v23, %v2216_v18 }
 0x374   :  { %v2476_v30 = vadd.f32 %v3613_v44, %v2284_v48 }
 0x376   :  { %v2540_v57 = vmax.f32 %v2476_v30, 0.0 }
 0x378   :  { %v2604_v29 = vpack.c.bf16 %v2540_v57, %v2540_v57 }
 0x37a   :  { %2669 = vst.msk [vmem:[%s5721_s4 + $0xfc] sm:$0xf] %vm2605_vm2, %v2604_v29 }

// kernel: _lambda_.16
= control target key start
LH: loop header
LB: loop body
LE: loop exit
PB: predicated region body
PF: predicated region fallthrough
CT: control target
= control target key end

     0   :  { %s1063_s22 = smov 112   ;;  %vm175_vm0 = vcmask 130048   ;;  %vm429_vm1 = vcmask 916480   ;;  %s1064_s17 = smov 32   ;;  %vm686_vm2 = vcmask 261120   ;;  %vm755_vm3 = vcmask 519168   ;;  %s1488_s0 = inlined_call_operand.vmem [shape: bf16[128,288], index: 0, kind: input, shape index: {}]   ;;  %s1489_s1 = inlined_call_operand.vmem [shape: bf16[2,144,32], index: 1, kind: input, shape index: {}]   ;;  %s1490_s2 = inlined_call_operand.vmem [shape: f32[1,64], index: 2, kind: input, shape index: {}]   ;;  %s1491_s3 = inlined_call_operand.vmem [shape: bf16[128,64], index: 3, kind: output, shape index: {}]  }
   0x1   :  { %v904_v0 = vld [vmem:[%s1488_s0 + $0x4] sm:$0xf]  ;;  %v1036_v1 = vld [vmem:[%s1488_s0 + $0xc] sm:$0xf0]  ;;  %v912_v2 = vld [vmem:[%s1488_s0 + $0x1c] sm:$0xf] }
   0x2   :  { %v905_v3 = vor.u32 %v1036_v1, %v904_v0  ;;  %v1038_v4 = vld [vmem:[%s1488_s0 + $0x24] sm:$0xf0]  ;;  %v920_v6 = vld [vmem:[%s1488_s0 + $0x34] sm:$0xf]  ;;  %v1040_v7 = vld [vmem:[%s1488_s0 + $0x3c] sm:$0xf0] }
   0x3   :  { %v913_v5 = vor.u32 %v1038_v4, %v912_v2  ;;  %v1035_v8 = vld [vmem:[%s1488_s0 + $0x8] sm:$0xf]  ;;  %v906_v9 = vld [vmem:[%s1488_s0 + $0x10] sm:$0xf0]  ;;  %v921_v10 = vor.u32 %v1040_v7, %v920_v6  ;;  %v1037_v11 = vld [vmem:[%s1488_s0 + $0x20] sm:$0xf] }
   0x4   :  { %397 = vrot.lane.b32.xlu0 %v905_v3, %s1063_s22  ;;  %v914_v12 = vld [vmem:[%s1488_s0 + $0x28] sm:$0xf0]  ;;  %v1058_v13 = vld [vmem:[%s1489_s1 + $0x80] sm:$0xff]  ;;  %v909_v14 = vor.u32 %v1035_v8, %v906_v9  ;;  %v1039_v15 = vld [vmem:[%s1488_s0 + $0x38] sm:$0xf] }
   0x5   :  { %401 = vrot.lane.b32.xlu1 %v913_v5, %s1063_s22  ;;  %405 = vrot.lane.b32.xlu2 %v921_v10, %s1063_s22  ;;  %v922_v16 = vld [vmem:[%s1488_s0 + $0x40] sm:$0xf0]  ;;  %v917_v17 = vor.u32 %v1037_v11, %v914_v12  ;;  %v1057_v18 = vld [vmem:[%s1489_s1 + $0x78] sm:$0xff] }
   0x6   :  { %524 = vmatpush.bf16.msra.mxu2 %v1058_v13  ;;  %v925_v19 = vor.u32 %v1039_v15, %v922_v16  ;;  %v928_v20 = vld [vmem:[%s1488_s0 + $0x4c] sm:$0xf]  ;;  %v1042_v21 = vld [vmem:[%s1488_s0 + $0x54] sm:$0xf0]  ;;  %v1056_v22 = vld [vmem:[%s1489_s1 + $0x70] sm:$0xff] }
   0x7   :  { %v1041_v23 = vld [vmem:[%s1488_s0 + $0x50] sm:$0xf]  ;;  %v930_v24 = vld [vmem:[%s1488_s0 + $0x58] sm:$0xf0]  ;;  %v929_v25 = vor.u32 %v1042_v21, %v928_v20  ;;  %v936_v26 = vld [vmem:[%s1488_s0 + $0x64] sm:$0xf] }
   0x8   :  { %v1044_v27 = vld [vmem:[%s1488_s0 + $0x6c] sm:$0xf0]  ;;  %v933_v28 = vor.u32 %v1041_v23, %v930_v24  ;;  %v1055_v29 = vld [vmem:[%s1489_s1 + $0x68] sm:$0xff]  ;;  %v938_v32 = vld [vmem:[%s1488_s0 + $0x70] sm:$0xf0] }
   0x9   :  { %v937_v30 = vor.u32 %v1044_v27, %v936_v26  ;;  %v1043_v31 = vld [vmem:[%s1488_s0 + $0x68] sm:$0xf]  ;;  %v1054_v33 = vld [vmem:[%s1489_s1 + $0x60] sm:$0xff]  ;;  %v944_v34 = vld [vmem:[%s1488_s0 + $0x7c] sm:$0xf] }
   0xa   :  { %525 = vmatpush.bf16.msra.mxu2 %v1057_v18  ;;  %v1046_v35 = vld [vmem:[%s1488_s0 + $0x84] sm:$0xf0]  ;;  %v941_v36 = vor.u32 %v1043_v31, %v938_v32  ;;  %v1045_v37 = vld [vmem:[%s1488_s0 + $0x80] sm:$0xf]  ;;  %v946_v38 = vld [vmem:[%s1488_s0 + $0x88] sm:$0xf0] }
   0xb   :  { %v945_v39 = vor.u32 %v1046_v35, %v944_v34  ;;  %v1053_v40 = vld [vmem:[%s1489_s1 + $0x58] sm:$0xff]  ;;  %v949_v41 = vor.u32 %v1045_v37, %v946_v38  ;;  %v952_v42 = vld [vmem:[%s1488_s0 + $0x94] sm:$0xf]  ;;  %v1048_v43 = vld [vmem:[%s1488_s0 + $0x9c] sm:$0xf0] }
   0xc   :  { %399 = vrot.lane.b32.xlu0 %v909_v14, %s1063_s22  ;;  %v1047_v44 = vld [vmem:[%s1488_s0 + $0x98] sm:$0xf]  ;;  %v954_v45 = vld [vmem:[%s1488_s0 + $0xa0] sm:$0xf0]  ;;  %v953_v46 = vor.u32 %v1048_v43, %v952_v42  ;;  %v1052_v48 = vld [vmem:[%s1489_s1 + $0x50] sm:$0xff] }
   0xd   :  { %403 = vrot.lane.b32.xlu1 %v917_v17, %s1063_s22  ;;  %407 = vrot.lane.b32.xlu2 %v925_v19, %s1063_s22  ;;  %v957_v47 = vor.u32 %v1047_v44, %v954_v45  ;;  %v1059_v49 = vld [vmem:[%s1489_s1 + $0x88] sm:$0xff]  ;;  %v1049_v50 = vld [vmem:[%s1488_s0 + $0xb0] sm:$0xf] }
   0xe   :  { %526 = vmatpush.bf16.msra.mxu2 %v1056_v22  ;;  %v962_v51 = vld [vmem:[%s1488_s0 + $0xb8] sm:$0xf0]  ;;  %580 = vmatpush.bf16.msra.mxu3 %v1059_v49  ;;  %v1051_v53 = vld [vmem:[%s1489_s1 + $0x48] sm:$0xff]  ;;  %v1050_v55 = vld [vmem:[%s1488_s0 + $0xb4] sm:$0xf0] }
   0xf   :  { %v965_v52 = vor.u32 %v1049_v50, %v962_v51  ;;  %v960_v54 = vld [vmem:[%s1488_s0 + $0xac] sm:$0xf]  ;;  %v1033_v2 = vld [vmem:[%s1489_s1 + $0x38] sm:$0xff]  ;;  %v1032_v3 = vld [vmem:[%s1489_s1 + $0x30] sm:$0xff] }
  0x10   :  { %v961_v56 = vor.u32 %v1050_v55, %v960_v54  ;;  %200 = vmatpush.bf16.msra.mxu0 %v1033_v2  ;;  %v1031_v4 = vld [vmem:[%s1489_s1 + $0x28] sm:$0xff]  ;;  %v1030_v7 = vld [vmem:[%s1489_s1 + $0x20] sm:$0xff]  ;;  %v1029_v9 = vld [vmem:[%s1489_s1 + $0x18] sm:$0xff] }
  0x11   :  { %v1034_v10 = vld [vmem:[%s1489_s1 + $0x40] sm:$0xff]  ;;  %v1028_v11 = vld [vmem:[%s1489_s1 + $0x10] sm:$0xff]  ;;  %v1027_v12 = vld [vmem:[%s1489_s1 + $0x8] sm:$0xff] }
  0x12   :  { %527 = vmatpush.bf16.msra.mxu2 %v1055_v29  ;;  %256 = vmatpush.bf16.msra.mxu1 %v1034_v10  ;;  %v1026_v15 = vld [vmem:[%s1489_s1] sm:$0xff]  ;;  %v1011_v18 = vld [vmem:[%s1488_s0 + $0x8] sm:$0xf0]  ;;  %v780_v21 = vld [vmem:[%s1488_s0 + $0xc] sm:$0xf0] }
  0x13   :  { %v778_v17 = vld [vmem:[%s1488_s0] sm:$0xf]  ;;  %v1010_v19 = vld [vmem:[%s1488_s0 + $0x4] sm:$0xf]  ;;  %v786_v26 = vld [vmem:[%s1488_s0 + $0x18] sm:$0xf] }
  0x14   :  { %409 = vrot.lane.b32.xlu0 %v929_v25, %s1063_s22  ;;  %201 = vmatpush.bf16.msra.mxu0 %v1032_v3  ;;  %v779_v20 = vor.u32 %v1011_v18, %v778_v17  ;;  %v783_v22 = vor.u32 %v1010_v19, %v780_v21  ;;  %v1013_v27 = vld [vmem:[%s1488_s0 + $0x20] sm:$0xf0]  ;;  %v794_v34 = vld [vmem:[%s1488_s0 + $0x30] sm:$0xf]  ;;  %v1015_v35 = vld [vmem:[%s1488_s0 + $0x38] sm:$0xf0] }
  0x15   :  { %411 = vrot.lane.b32.xlu1 %v933_v28, %s1063_s22  ;;  %413 = vrot.lane.b32.xlu2 %v937_v30, %s1063_s22  ;;  %v1012_v28 = vld [vmem:[%s1488_s0 + $0x1c] sm:$0xf]  ;;  %v787_v29 = vor.u32 %v1013_v27, %v786_v26  ;;  %v788_v30 = vld [vmem:[%s1488_s0 + $0x24] sm:$0xf0] }
  0x16   :  { %528 = vmatpush.bf16.msra.mxu2 %v1054_v33  ;;  %876 = vmatmul.msk.bf16.vlgmr.msra.gmra.mxu1 %vm175_vm0, %v783_v22  ;;  %v791_v31 = vor.u32 %v1012_v28, %v788_v30  ;;  %v796_v37 = vld [vmem:[%s1488_s0 + $0x3c] sm:$0xf0]  ;;  %v802_v44 = vld [vmem:[%s1488_s0 + $0x48] sm:$0xf]  ;;  %v1017_v45 = vld [vmem:[%s1488_s0 + $0x50] sm:$0xf0] }
  0x17   :  { %v810_v50 = vld [vmem:[%s1488_s0 + $0x60] sm:$0xf]  ;;  %v1019_v51 = vld [vmem:[%s1488_s0 + $0x68] sm:$0xf0]  ;;  %v812_v54 = vld [vmem:[%s1488_s0 + $0x6c] sm:$0xf0] }
  0x18   :  { %202 = vmatpush.bf16.msra.mxu0 %v1031_v4  ;;  %v820_v2 = vld [vmem:[%s1488_s0 + $0x84] sm:$0xf0]  ;;  %v826_v10 = vld [vmem:[%s1488_s0 + $0x90] sm:$0xf]  ;;  %v1024_v30 = vld [vmem:[%s1488_s0 + $0xac] sm:$0xf] }
  0x19   :  { %v834_v28 = vld [vmem:[%s1488_s0 + $0xa8] sm:$0xf] }
  0x1a   :  { %529 = vmatpush.bf16.msra.mxu2 %v1053_v40 }
  0x1c   :  { %415 = vrot.lane.b32.xlu0 %v941_v36, %s1063_s22  ;;  %203 = vmatpush.bf16.msra.mxu0 %v1030_v7  ;;  %v1014_v36 = vld [vmem:[%s1488_s0 + $0x34] sm:$0xf] }
  0x1d   :  { %417 = vrot.lane.b32.xlu1 %v945_v39, %s1063_s22  ;;  %419 = vrot.lane.b32.xlu2 %v949_v41, %s1063_s22  ;;  %v795_v39 = vor.u32 %v1015_v35, %v794_v34  ;;  %v799_v40 = vor.u32 %v1014_v36, %v796_v37 }
  0x1e   :  { %530 = vmatpush.bf16.msra.mxu2 %v1052_v48  ;;  %v804_v48 = vld [vmem:[%s1488_s0 + $0x54] sm:$0xf0] }
  0x20   :  { %204 = vmatpush.bf16.msra.mxu0 %v1029_v9 }
  0x22   :  { %531 = vmatpush.bf16.msra.mxu2 %v1051_v53  ;;  %v811_v53 = vor.u32 %v1019_v51, %v810_v50 }
  0x24   :  { %421 = vrot.lane.b32.xlu0 %v953_v46, %s1063_s22  ;;  %205 = vmatpush.bf16.msra.mxu0 %v1028_v11  ;;  %v1016_v46 = vld [vmem:[%s1488_s0 + $0x4c] sm:$0xf]  ;;  %v1023_v11 = vld [vmem:[%s1488_s0 + $0x98] sm:$0xf0] }
  0x25   :  { %423 = vrot.lane.b32.xlu1 %v957_v47, %s1063_s22  ;;  %425 = vrot.lane.b32.xlu2 %v961_v56, %s1063_s22  ;;  %v803_v47 = vor.u32 %v1017_v45, %v802_v44  ;;  %v807_v49 = vor.u32 %v1016_v46, %v804_v48 }
  0x26   :  { %877 = vmatmul.msk.bf16.gmra.mxu1 %vm175_vm0, %v791_v31 }
  0x28   :  { %206 = vmatpush.bf16.msra.mxu0 %v1027_v12  ;;  %v1022_v12 = vld [vmem:[%s1488_s0 + $0x94] sm:$0xf] }
  0x2c   :  { %427 = vrot.lane.b32.xlu0 %v965_v52, %s1063_s22  ;;  %207 = vmatpush.bf16.msra.mxu0 %v1026_v15  ;;  %v1018_v52 = vld [vmem:[%s1488_s0 + $0x64] sm:$0xf] }
  0x2d   :  { %v815_v55 = vor.u32 %v1018_v52, %v812_v54 }
  0x2f   :  { %208 = vmatmul.bf16.vlgmr.msra.gmra.mxu0 %v779_v20 }
  0x36   :  { %878 = vmatmul.msk.bf16.gmra.mxu1 %vm175_vm0, %v799_v40 }
  0x3f   :  { %213 = vmatmul.bf16.gmra.mxu0 %v787_v29  ;;  %v1025_v29 = vld [vmem:[%s1488_s0 + $0xb0] sm:$0xf0] }
  0x46   :  { %879 = vmatmul.msk.bf16.gmra.mxu1 %vm175_vm0, %v807_v49 }
  0x4f   :  { %218 = vmatmul.bf16.gmra.mxu0 %v795_v39 }
  0x56   :  { %880 = vmatmul.msk.bf16.gmra.mxu1 %vm175_vm0, %v815_v55 }
  0x5f   :  { %v406_v63 = vpop.permute.xlu2 %405  ;;  %223 = vmatmul.bf16.gmra.mxu0 %v803_v47 }
  0x67   :  { %v408_v0 = vpop.permute.xlu2 %407 }
  0x68   :  { %v432_v1 = vsel %vm429_vm1, %v406_v63, %v408_v0  ;;  %v1021_v63 = vld [vmem:[%s1488_s0 + $0x80] sm:$0xf0] }
  0x6f   :  { %v414_v13 = vpop.permute.xlu2 %413  ;;  %228 = vmatmul.bf16.gmra.mxu0 %v811_v53 }
  0x76   :  { %v398_v57 = vpop.permute.xlu0 %397 }
  0x77   :  { %v402_v60 = vpop.permute.xlu1 %401  ;;  %v420_v23 = vpop.permute.xlu2 %419 }
  0x7e   :  { %v400_v58 = vpop.permute.xlu0 %399 }
  0x7f   :  { %1002 = vmatmul.msk.bf16.vlgmr.msra.gmra.mxu3 %vm175_vm0, %v400_v58  ;;  %v430_v59 = vsel %vm429_vm1, %v398_v57, %v400_v58  ;;  %v404_v61 = vpop.permute.xlu1 %403  ;;  %v426_v41 = vpop.permute.xlu2 %425 }
  0x80   :  { %532 = vmatmul.bf16.vlgmr.msra.gmra.mxu2 %v430_v59  ;;  %v431_v62 = vsel %vm429_vm1, %v402_v60, %v404_v61 }
  0x86   :  { %v410_v6 = vpop.permute.xlu0 %409 }
  0x87   :  { %v412_v5 = vpop.permute.xlu1 %411 }
  0x88   :  { %v433_v8 = vsel %vm429_vm1, %v410_v6, %v412_v5 }
  0x8e   :  { %v416_v14 = vpop.permute.xlu0 %415 }
  0x8f   :  { %1003 = vmatmul.msk.bf16.gmra.mxu3 %vm175_vm0, %v404_v61  ;;  %v434_v16 = vsel %vm429_vm1, %v414_v13, %v416_v14  ;;  %v418_v24 = vpop.permute.xlu1 %417  ;;  %v827_v13 = vor.u32 %v1023_v11, %v826_v10 }
  0x90   :  { %537 = vmatmul.bf16.gmra.mxu2 %v431_v62  ;;  %v435_v25 = vsel %vm429_vm1, %v418_v24, %v420_v23  ;;  %v818_v62 = vld [vmem:[%s1488_s0 + $0x78] sm:$0xf] }
  0x93   :  { %v258_v34 = vpop.f32.mrf.mxu1 }
  0x96   :  { %v422_v33 = vpop.permute.xlu0 %421 }
  0x97   :  { %v424_v32 = vpop.permute.xlu1 %423 }
  0x98   :  { %v436_v38 = vsel %vm429_vm1, %v422_v33, %v424_v32  ;;  %v836_v33 = vld [vmem:[%s1488_s0 + $0xb4] sm:$0xf0] }
  0x99   :  { %v839_v35 = vor.u32 %v1024_v30, %v836_v33 }
  0x9e   :  { %v428_v42 = vpop.permute.xlu0 %427 }
  0x9f   :  { %1004 = vmatmul.msk.bf16.gmra.mxu3 %vm175_vm0, %v408_v0  ;;  %v437_v43 = vsel %vm429_vm1, %v426_v41, %v428_v42  ;;  %v1020_v0 = vld [vmem:[%s1488_s0 + $0x7c] sm:$0xf]  ;;  %v260_v41 = vpop.f32.mrf.mxu1 }
  0xa0   :  { %542 = vmatmul.bf16.gmra.mxu2 %v432_v1  ;;  %v819_v1 = vor.u32 %v1021_v63, %v818_v62  ;;  %v823_v3 = vor.u32 %v1020_v0, %v820_v2 }
  0xa2   :  { %233 = vmatmul.bf16.gmra.mxu0 %v819_v1  ;;  %881 = vmatmul.msk.bf16.gmra.mxu1 %vm175_vm0, %v823_v3 }
  0xa7   :  { %v263_v48 = vpop.f32.mrf.mxu1 }
  0xac   :  { %v209_v31 = vpop.f32.mrf.mxu0 }
  0xad   :  { %v259_v10 = vadd.f32 %v258_v34, %v209_v31 }
  0xaf   :  { %1005 = vmatmul.msk.bf16.gmra.mxu3 %vm175_vm0, %v412_v5  ;;  %v265_v53 = vpop.f32.mrf.mxu1 }
  0xb0   :  { %547 = vmatmul.bf16.gmra.mxu2 %v433_v8 }
  0xb2   :  { %238 = vmatmul.bf16.gmra.mxu0 %v827_v13 }
  0xb4   :  { %v211_v39 = vpop.f32.mrf.mxu0 }
  0xbc   :  { %v214_v46 = vpop.f32.mrf.mxu0 }
  0xbf   :  { %1006 = vmatmul.msk.bf16.gmra.mxu3 %vm175_vm0, %v416_v14  ;;  %v828_v14 = vld [vmem:[%s1488_s0 + $0x9c] sm:$0xf0] }
  0xc0   :  { %552 = vmatmul.bf16.gmra.mxu2 %v434_v16  ;;  %v831_v15 = vor.u32 %v1022_v12, %v828_v14 }
  0xc2   :  { %882 = vmatmul.msk.bf16.gmra.mxu1 %vm175_vm0, %v831_v15 }
  0xc4   :  { %v216_v52 = vpop.f32.mrf.mxu0 }
  0xcf   :  { %1007 = vmatmul.msk.bf16.gmra.mxu3 %vm175_vm0, %v420_v23 }
  0xd0   :  { %557 = vmatmul.bf16.gmra.mxu2 %v435_v25 }
  0xd2   :  { %883 = vmatmul.msk.bf16.gmra.mxu1 %vm175_vm0, %v839_v35  ;;  %v266_v35 = vadd.f32 %v265_v53, %v216_v52 }
  0xdf   :  { %1008 = vmatmul.msk.bf16.gmra.mxu3 %vm175_vm0, %v424_v32  ;;  %v835_v32 = vor.u32 %v1025_v29, %v834_v28 }
  0xe0   :  { %562 = vmatmul.bf16.gmra.mxu2 %v436_v38 }
  0xe1   :  { %243 = vmatmul.bf16.gmra.mxu0 %v835_v32 }
  0xef   :  { %1009 = vmatmul.msk.bf16.gmra.mxu3 %vm175_vm0, %v428_v42 }
  0xf0   :  { %567 = vmatmul.bf16.gmra.mxu2 %v437_v43 }
 0x102   :  { %v582_v56 = vpop.f32.mrf.mxu3 }
 0x103   :  { %v533_v57 = vpop.f32.mrf.mxu2 }
 0x104   :  { %v583_v58 = vadd.f32 %v582_v56, %v533_v57  ;;  %v261_v57 = vadd.f32 %v260_v41, %v211_v39 }
 0x106   :  { %638 = vrot.lane.b32.xlu1 %v583_v58, %s1064_s17  ;;  %v1387_v58 = vld [vmem:[%s1490_s2] ss:$0 sm:$0xff] }
 0x10a   :  { %v584_v59 = vpop.f32.mrf.mxu3 }
 0x10b   :  { %v535_v60 = vpop.f32.mrf.mxu2 }
 0x10c   :  { %v585_v61 = vadd.f32 %v584_v59, %v535_v60  ;;  %v219_v59 = vpop.f32.mrf.mxu0 }
 0x10e   :  { %640 = vrot.lane.b32.xlu2 %v585_v61, %s1064_s17  ;;  %v268_v61 = vpop.f32.mrf.mxu1 }
 0x112   :  { %v587_v4 = vpop.f32.mrf.mxu3 }
 0x113   :  { %v538_v5 = vpop.f32.mrf.mxu2 }
 0x114   :  { %v588_v6 = vadd.f32 %v587_v4, %v538_v5  ;;  %v221_v5 = vpop.f32.mrf.mxu0 }
 0x116   :  { %642 = vrot.lane.b32.xlu0 %v588_v6, %s1064_s17 }
 0x11a   :  { %v589_v7 = vpop.f32.mrf.mxu3 }
 0x11b   :  { %v540_v8 = vpop.f32.mrf.mxu2 }
 0x11c   :  { %v590_v9 = vadd.f32 %v589_v7, %v540_v8  ;;  %v270_v7 = vpop.f32.mrf.mxu1 }
 0x11e   :  { %644 = vrot.lane.b32.xlu1 %v590_v9, %s1064_s17 }
 0x122   :  { %v592_v16 = vpop.f32.mrf.mxu3 }
 0x123   :  { %v543_v17 = vpop.f32.mrf.mxu2 }
 0x124   :  { %v593_v18 = vadd.f32 %v592_v16, %v543_v17  ;;  %v224_v16 = vpop.f32.mrf.mxu0 }
 0x126   :  { %646 = vrot.lane.b32.xlu2 %v593_v18, %s1064_s17 }
 0x12a   :  { %v594_v19 = vpop.f32.mrf.mxu3 }
 0x12b   :  { %v545_v20 = vpop.f32.mrf.mxu2 }
 0x12c   :  { %v595_v21 = vadd.f32 %v594_v19, %v545_v20  ;;  %v273_v19 = vpop.f32.mrf.mxu1  ;;  %v269_v20 = vadd.f32 %v268_v61, %v219_v59 }
 0x12d   :  { %v274_v59 = vadd.f32 %v273_v19, %v224_v16 }
 0x12e   :  { %648 = vrot.lane.b32.xlu0 %v595_v21, %s1064_s17 }
 0x132   :  { %v597_v22 = vpop.f32.mrf.mxu3 }
 0x133   :  { %v548_v23 = vpop.f32.mrf.mxu2 }
 0x134   :  { %v598_v24 = vadd.f32 %v597_v22, %v548_v23  ;;  %v275_v29 = vpop.f32.mrf.mxu1 }
 0x136   :  { %650 = vrot.lane.b32.xlu1 %v598_v24, %s1064_s17 }
 0x13a   :  { %v599_v25 = vpop.f32.mrf.mxu3 }
 0x13b   :  { %v550_v26 = vpop.f32.mrf.mxu2 }
 0x13c   :  { %v600_v27 = vadd.f32 %v599_v25, %v550_v26  ;;  %v264_v26 = vadd.f32 %v263_v48, %v214_v46 }
 0x13e   :  { %652 = vrot.lane.b32.xlu2 %v600_v27, %s1064_s17  ;;  %v226_v27 = vpop.f32.mrf.mxu0 }
 0x142   :  { %v602_v36 = vpop.f32.mrf.mxu3 }
 0x143   :  { %v553_v37 = vpop.f32.mrf.mxu2 }
 0x144   :  { %v603_v38 = vadd.f32 %v602_v36, %v553_v37 }
 0x146   :  { %654 = vrot.lane.b32.xlu0 %v603_v38, %s1064_s17  ;;  %v229_v36 = vpop.f32.mrf.mxu0  ;;  %v278_v38 = vpop.f32.mrf.mxu1 }
 0x14a   :  { %v604_v40 = vpop.f32.mrf.mxu3 }
 0x14b   :  { %v555_v42 = vpop.f32.mrf.mxu2 }
 0x14c   :  { %v605_v43 = vadd.f32 %v604_v40, %v555_v42  ;;  %v276_v42 = vadd.f32 %v275_v29, %v226_v27 }
 0x14e   :  { %656 = vrot.lane.b32.xlu1 %v605_v43, %s1064_s17  ;;  %v231_v46 = vpop.f32.mrf.mxu0  ;;  %v280_v48 = vpop.f32.mrf.mxu1 }
 0x152   :  { %v607_v44 = vpop.f32.mrf.mxu3 }
 0x153   :  { %v558_v45 = vpop.f32.mrf.mxu2 }
 0x154   :  { %v608_v47 = vadd.f32 %v607_v44, %v558_v45 }
 0x156   :  { %658 = vrot.lane.b32.xlu2 %v608_v47, %s1064_s17 }
 0x15a   :  { %v609_v49 = vpop.f32.mrf.mxu3 }
 0x15b   :  { %v560_v50 = vpop.f32.mrf.mxu2 }
 0x15c   :  { %v610_v51 = vadd.f32 %v609_v49, %v560_v50 }
 0x15e   :  { %660 = vrot.lane.b32.xlu0 %v610_v51, %s1064_s17  ;;  %v271_v51 = vadd.f32 %v270_v7, %v221_v5 }
 0x162   :  { %v612_v54 = vpop.f32.mrf.mxu3 }
 0x163   :  { %v563_v55 = vpop.f32.mrf.mxu2 }
 0x164   :  { %v613_v56 = vadd.f32 %v612_v54, %v563_v55  ;;  %v234_v55 = vpop.f32.mrf.mxu0 }
 0x166   :  { %662 = vrot.lane.b32.xlu1 %v613_v56, %s1064_s17 }
 0x168   :  { %v641_v60 = vpop.permute.xlu2 %640 }
 0x169   :  { %v688_v62 = vsel %vm686_vm2, %v261_v57, %v641_v60  ;;  %v283_v57 = vpop.f32.mrf.mxu1 }
 0x16a   :  { %v708_v63 = vadd.f32 %v1387_v58, %v688_v62  ;;  %v614_v0 = vpop.f32.mrf.mxu3 }
 0x16b   :  { %v565_v1 = vpop.f32.mrf.mxu2 }
 0x16c   :  { %v724_v2 = vmax.f32 %v708_v63, 0.0  ;;  %v615_v3 = vadd.f32 %v614_v0, %v565_v1  ;;  %v284_v1 = vadd.f32 %v283_v57, %v234_v55 }
 0x16e   :  { %v740_v4 = vpack.c.bf16 %v724_v2, %v724_v2  ;;  %664 = vrot.lane.b32.xlu2 %v615_v3, %s1064_s17  ;;  %v236_v2 = vpop.f32.mrf.mxu0 }
 0x170   :  { %757 = vst.msk [vmem:[%s1491_s3 + $0x4] sm:$0xf] %vm755_vm3, %v740_v4 }
 0x171   :  { %v285_v4 = vpop.f32.mrf.mxu1 }
 0x172   :  { %v617_v6 = vpop.f32.mrf.mxu3 }
 0x173   :  { %v568_v8 = vpop.f32.mrf.mxu2 }
 0x174   :  { %v618_v9 = vadd.f32 %v617_v6, %v568_v8 }
 0x176   :  { %666 = vrot.lane.b32.xlu0 %v618_v9, %s1064_s17  ;;  %v279_v9 = vadd.f32 %v278_v38, %v229_v36 }
 0x178   :  { %v639_v11 = vpop.permute.xlu1 %638 }
 0x179   :  { %v687_v12 = vsel %vm686_vm2, %v259_v10, %v639_v11  ;;  %v239_v11 = vpop.f32.mrf.mxu0 }
 0x17a   :  { %v707_v13 = vadd.f32 %v1387_v58, %v687_v12  ;;  %v619_v14 = vpop.f32.mrf.mxu3 }
 0x17b   :  { %v570_v15 = vpop.f32.mrf.mxu2 }
 0x17c   :  { %v723_v17 = vmax.f32 %v707_v13, 0.0  ;;  %v620_v18 = vadd.f32 %v619_v14, %v570_v15  ;;  %v288_v13 = vpop.f32.mrf.mxu1 }
 0x17e   :  { %v739_v21 = vpack.c.bf16 %v723_v17, %v723_v17  ;;  %668 = vrot.lane.b32.xlu1 %v620_v18, %s1064_s17  ;;  %v281_v18 = vadd.f32 %v280_v48, %v231_v46 }
 0x180   :  { %756 = vst.msk [vmem:[%s1491_s3] sm:$0xf] %vm755_vm3, %v739_v21  ;;  %v647_v22 = vpop.permute.xlu2 %646 }
 0x181   :  { %v691_v23 = vsel %vm686_vm2, %v269_v20, %v647_v22  ;;  %v241_v22 = vpop.f32.mrf.mxu0 }
 0x182   :  { %v711_v24 = vadd.f32 %v1387_v58, %v691_v23 }
 0x184   :  { %v727_v25 = vmax.f32 %v711_v24, 0.0  ;;  %v290_v23 = vpop.f32.mrf.mxu1 }
 0x186   :  { %v743_v28 = vpack.c.bf16 %v727_v25, %v727_v25  ;;  %v291_v25 = vadd.f32 %v290_v23, %v241_v22 }
 0x188   :  { %760 = vst.msk [vmem:[%s1491_s3 + $0x10] sm:$0xf] %vm755_vm3, %v743_v28  ;;  %v643_v30 = vpop.permute.xlu0 %642 }
 0x189   :  { %v689_v31 = vsel %vm686_vm2, %v264_v26, %v643_v30 }
 0x18a   :  { %v709_v32 = vadd.f32 %v1387_v58, %v689_v31 }
 0x18c   :  { %v725_v33 = vmax.f32 %v709_v32, 0.0  ;;  %v286_v32 = vadd.f32 %v285_v4, %v236_v2 }
 0x18e   :  { %v741_v34 = vpack.c.bf16 %v725_v33, %v725_v33 }
 0x190   :  { %758 = vst.msk [vmem:[%s1491_s3 + $0x8] sm:$0xf] %vm755_vm3, %v741_v34  ;;  %v645_v37 = vpop.permute.xlu1 %644 }
 0x191   :  { %v690_v39 = vsel %vm686_vm2, %v266_v35, %v645_v37  ;;  %v289_v37 = vadd.f32 %v288_v13, %v239_v11 }
 0x192   :  { %v710_v40 = vadd.f32 %v1387_v58, %v690_v39 }
 0x194   :  { %v726_v41 = vmax.f32 %v710_v40, 0.0 }
 0x196   :  { %v742_v43 = vpack.c.bf16 %v726_v41, %v726_v41 }
 0x198   :  { %759 = vst.msk [vmem:[%s1491_s3 + $0xc] sm:$0xf] %vm755_vm3, %v742_v43  ;;  %v653_v44 = vpop.permute.xlu2 %652 }
 0x199   :  { %v694_v45 = vsel %vm686_vm2, %v276_v42, %v653_v44  ;;  %v244_v44 = vpop.f32.mrf.mxu0 }
 0x19a   :  { %v714_v47 = vadd.f32 %v1387_v58, %v694_v45  ;;  %v293_v45 = vpop.f32.mrf.mxu1 }
 0x19b   :  { %v294_v46 = vadd.f32 %v293_v45, %v244_v44 }
 0x19c   :  { %v730_v49 = vmax.f32 %v714_v47, 0.0 }
 0x19e   :  { %v746_v50 = vpack.c.bf16 %v730_v49, %v730_v49 }
 0x1a0   :  { %763 = vst.msk [vmem:[%s1491_s3 + $0x1c] sm:$0xf] %vm755_vm3, %v746_v50  ;;  %v649_v52 = vpop.permute.xlu0 %648 }
 0x1a1   :  { %v692_v53 = vsel %vm686_vm2, %v271_v51, %v649_v52  ;;  %v246_v50 = vpop.f32.mrf.mxu0 }
 0x1a2   :  { %v712_v54 = vadd.f32 %v1387_v58, %v692_v53  ;;  %v295_v51 = vpop.f32.mrf.mxu1 }
 0x1a4   :  { %v728_v56 = vmax.f32 %v712_v54, 0.0  ;;  %v296_v54 = vadd.f32 %v295_v51, %v246_v50 }
 0x1a6   :  { %v744_v60 = vpack.c.bf16 %v728_v56, %v728_v56 }
 0x1a8   :  { %761 = vst.msk [vmem:[%s1491_s3 + $0x14] sm:$0xf] %vm755_vm3, %v744_v60  ;;  %v651_v61 = vpop.permute.xlu1 %650 }
 0x1a9   :  { %v693_v62 = vsel %vm686_vm2, %v274_v59, %v651_v61 }
 0x1aa   :  { %v713_v63 = vadd.f32 %v1387_v58, %v693_v62 }
 0x1ac   :  { %v729_v0 = vmax.f32 %v713_v63, 0.0 }
 0x1ae   :  { %v745_v3 = vpack.c.bf16 %v729_v0, %v729_v0 }
 0x1b0   :  { %762 = vst.msk [vmem:[%s1491_s3 + $0x18] sm:$0xf] %vm755_vm3, %v745_v3  ;;  %v659_v5 = vpop.permute.xlu2 %658 }
 0x1b1   :  { %v697_v6 = vsel %vm686_vm2, %v284_v1, %v659_v5 }
 0x1b2   :  { %v717_v7 = vadd.f32 %v1387_v58, %v697_v6 }
 0x1b4   :  { %v733_v8 = vmax.f32 %v717_v7, 0.0 }
 0x1b6   :  { %v749_v10 = vpack.c.bf16 %v733_v8, %v733_v8 }
 0x1b8   :  { %766 = vst.msk [vmem:[%s1491_s3 + $0x28] sm:$0xf] %vm755_vm3, %v749_v10  ;;  %v655_v12 = vpop.permute.xlu0 %654 }
 0x1b9   :  { %v695_v14 = vsel %vm686_vm2, %v279_v9, %v655_v12 }
 0x1ba   :  { %v715_v15 = vadd.f32 %v1387_v58, %v695_v14 }
 0x1bc   :  { %v731_v16 = vmax.f32 %v715_v15, 0.0 }
 0x1be   :  { %v747_v17 = vpack.c.bf16 %v731_v16, %v731_v16 }
 0x1c0   :  { %764 = vst.msk [vmem:[%s1491_s3 + $0x20] sm:$0xf] %vm755_vm3, %v747_v17  ;;  %v657_v19 = vpop.permute.xlu1 %656 }
 0x1c1   :  { %v696_v20 = vsel %vm686_vm2, %v281_v18, %v657_v19 }
 0x1c2   :  { %v716_v21 = vadd.f32 %v1387_v58, %v696_v20 }
 0x1c4   :  { %v732_v24 = vmax.f32 %v716_v21, 0.0 }
 0x1c6   :  { %v748_v26 = vpack.c.bf16 %v732_v24, %v732_v24 }
 0x1c8   :  { %765 = vst.msk [vmem:[%s1491_s3 + $0x24] sm:$0xf] %vm755_vm3, %v748_v26  ;;  %v665_v27 = vpop.permute.xlu2 %664 }
 0x1c9   :  { %v700_v28 = vsel %vm686_vm2, %v291_v25, %v665_v27 }
 0x1ca   :  { %v720_v29 = vadd.f32 %v1387_v58, %v700_v28 }
 0x1cc   :  { %v736_v30 = vmax.f32 %v720_v29, 0.0 }
 0x1ce   :  { %v752_v31 = vpack.c.bf16 %v736_v30, %v736_v30 }
 0x1d0   :  { %769 = vst.msk [vmem:[%s1491_s3 + $0x34] sm:$0xf] %vm755_vm3, %v752_v31  ;;  %v661_v33 = vpop.permute.xlu0 %660 }
 0x1d1   :  { %v698_v34 = vsel %vm686_vm2, %v286_v32, %v661_v33 }
 0x1d2   :  { %v718_v35 = vadd.f32 %v1387_v58, %v698_v34 }
 0x1d4   :  { %v734_v36 = vmax.f32 %v718_v35, 0.0 }
 0x1d6   :  { %v750_v38 = vpack.c.bf16 %v734_v36, %v734_v36 }
 0x1d8   :  { %767 = vst.msk [vmem:[%s1491_s3 + $0x2c] sm:$0xf] %vm755_vm3, %v750_v38  ;;  %v663_v39 = vpop.permute.xlu1 %662 }
 0x1d9   :  { %v699_v40 = vsel %vm686_vm2, %v289_v37, %v663_v39 }
 0x1da   :  { %v719_v41 = vadd.f32 %v1387_v58, %v699_v40 }
 0x1dc   :  { %v735_v42 = vmax.f32 %v719_v41, 0.0 }
 0x1de   :  { %v751_v43 = vpack.c.bf16 %v735_v42, %v735_v42 }
 0x1e0   :  { %768 = vst.msk [vmem:[%s1491_s3 + $0x30] sm:$0xf] %vm755_vm3, %v751_v43 }
 0x1e8   :  { %v667_v47 = vpop.permute.xlu0 %666 }
 0x1e9   :  { %v701_v48 = vsel %vm686_vm2, %v294_v46, %v667_v47 }
 0x1ea   :  { %v721_v49 = vadd.f32 %v1387_v58, %v701_v48 }
 0x1ec   :  { %v737_v52 = vmax.f32 %v721_v49, 0.0 }
 0x1ee   :  { %v753_v53 = vpack.c.bf16 %v737_v52, %v737_v52 }
 0x1f0   :  { %770 = vst.msk [vmem:[%s1491_s3 + $0x38] sm:$0xf] %vm755_vm3, %v753_v53  ;;  %v669_v55 = vpop.permute.xlu1 %668 }
 0x1f1   :  { %v702_v56 = vsel %vm686_vm2, %v296_v54, %v669_v55 }
 0x1f2   :  { %v722_v57 = vadd.f32 %v1387_v58, %v702_v56 }
 0x1f4   :  { %v738_v59 = vmax.f32 %v722_v57, 0.0 }
 0x1f6   :  { %v754_v60 = vpack.c.bf16 %v738_v59, %v738_v59 }
 0x1f8   :  { %771 = vst.msk [vmem:[%s1491_s3 + $0x3c] sm:$0xf] %vm755_vm3, %v754_v60 }

// kernel: _lambda_.17
= control target key start
LH: loop header
LB: loop body
LE: loop exit
PB: predicated region body
PF: predicated region fallthrough
CT: control target
= control target key end

     0   :  { %s462_s18 = smov 112   ;;  %vm79_vm0 = vcmask 130048   ;;  %vm315_vm1 = vcmask 261120   ;;  %vm368_vm2 = vcmask 519168   ;;  %s647_s0 = inlined_call_operand.vmem [shape: bf16[128,32], index: 0, kind: input, shape index: {}]   ;;  %s648_s1 = inlined_call_operand.vmem [shape: bf16[2,16,32], index: 1, kind: input, shape index: {}]   ;;  %s649_s2 = inlined_call_operand.vmem [shape: f32[1,64], index: 2, kind: input, shape index: {}]   ;;  %s650_s3 = inlined_call_operand.vmem [shape: bf16[128,64], index: 3, kind: output, shape index: {}]  }
   0x1   :  { %v451_v0 = vld [vmem:[%s647_s0 + $0x20] sm:$0xff]  ;;  %v452_v1 = vld [vmem:[%s647_s0 + $0x28] sm:$0xff]  ;;  %v453_v2 = vld [vmem:[%s647_s0 + $0x30] sm:$0xff] }
   0x2   :  { %164 = vrot.lane.b32.xlu0 %v451_v0, %s462_s18  ;;  %166 = vrot.lane.b32.xlu1 %v452_v1, %s462_s18  ;;  %v456_v3 = vld [vmem:[%s648_s1 + $0x8] sm:$0xff]  ;;  %v447_v4 = vld [vmem:[%s647_s0] sm:$0xff] }
   0x3   :  { %168 = vrot.lane.b32.xlu2 %v453_v2, %s462_s18  ;;  %458 = vmatpush.bf16.msra.mxu3 %v456_v3  ;;  %v448_v5 = vld [vmem:[%s647_s0 + $0x8] sm:$0xff]  ;;  %v449_v6 = vld [vmem:[%s647_s0 + $0x10] sm:$0xff]  ;;  %v450_v7 = vld [vmem:[%s647_s0 + $0x18] sm:$0xff] }
   0x4   :  { %209 = vmatpush.bf16.msra.mxu1 %v456_v3  ;;  %v454_v8 = vld [vmem:[%s647_s0 + $0x38] sm:$0xff]  ;;  %v455_v13 = vld [vmem:[%s648_s1] sm:$0xff]  ;;  %s463_s0 = smov 32  }
   0x5   :  { %457 = vmatpush.bf16.msra.mxu2 %v455_v13  ;;  %111 = vmatpush.bf16.msra.mxu0 %v455_v13  ;;  %v549_v38 = vld [vmem:[%s649_s2] ss:$0 sm:$0xff] }
   0x8   :  { %429 = vmatmul.msk.bf16.vlgmr.msra.gmra.mxu2 %vm79_vm0, %v451_v0  ;;  %425 = vmatmul.msk.bf16.vlgmr.msra.gmra.mxu0 %vm79_vm0, %v447_v4 }
   0xa   :  { %156 = vrot.lane.b32.xlu0 %v447_v4, %s462_s18  ;;  %158 = vrot.lane.b32.xlu1 %v448_v5, %s462_s18 }
   0xb   :  { %160 = vrot.lane.b32.xlu2 %v449_v6, %s462_s18 }
  0x12   :  { %162 = vrot.lane.b32.xlu1 %v450_v7, %s462_s18  ;;  %170 = vrot.lane.b32.xlu0 %v454_v8, %s462_s18 }
  0x18   :  { %430 = vmatmul.msk.bf16.gmra.mxu2 %vm79_vm0, %v452_v1  ;;  %426 = vmatmul.msk.bf16.gmra.mxu0 %vm79_vm0, %v448_v5 }
  0x28   :  { %431 = vmatmul.msk.bf16.gmra.mxu2 %vm79_vm0, %v453_v2  ;;  %427 = vmatmul.msk.bf16.gmra.mxu0 %vm79_vm0, %v449_v6 }
  0x38   :  { %428 = vmatmul.msk.bf16.gmra.mxu0 %vm79_vm0, %v450_v7  ;;  %432 = vmatmul.msk.bf16.gmra.mxu2 %vm79_vm0, %v454_v8 }
  0x5d   :  { %v169_v14 = vpop.permute.xlu2 %168 }
  0x65   :  { %v161_v15 = vpop.permute.xlu2 %160 }
  0x74   :  { %v165_v9 = vpop.permute.xlu0 %164  ;;  %v167_v11 = vpop.permute.xlu1 %166 }
  0x75   :  { %443 = vmatmul.msk.bf16.vlgmr.msra.gmra.mxu3 %vm79_vm0, %v165_v9 }
  0x7c   :  { %v157_v10 = vpop.permute.xlu0 %156  ;;  %v159_v12 = vpop.permute.xlu1 %158 }
  0x7d   :  { %439 = vmatmul.msk.bf16.vlgmr.msra.gmra.mxu1 %vm79_vm0, %v157_v10 }
  0x84   :  { %v171_v16 = vpop.permute.xlu0 %170  ;;  %v163_v17 = vpop.permute.xlu1 %162 }
  0x85   :  { %444 = vmatmul.msk.bf16.gmra.mxu3 %vm79_vm0, %v167_v11  ;;  %v113_v35 = vpop.f32.mrf.mxu0 }
  0x8b   :  { %v133_v34 = vpop.f32.mrf.mxu2 }
  0x8d   :  { %440 = vmatmul.msk.bf16.gmra.mxu1 %vm79_vm0, %v159_v12  ;;  %v115_v37 = vpop.f32.mrf.mxu0 }
  0x93   :  { %v135_v36 = vpop.f32.mrf.mxu2 }
  0x95   :  { %445 = vmatmul.msk.bf16.gmra.mxu3 %vm79_vm0, %v169_v14  ;;  %v118_v43 = vpop.f32.mrf.mxu0 }
  0x9b   :  { %v138_v44 = vpop.f32.mrf.mxu2 }
  0x9d   :  { %441 = vmatmul.msk.bf16.gmra.mxu1 %vm79_vm0, %v161_v15  ;;  %v120_v50 = vpop.f32.mrf.mxu0 }
  0xa3   :  { %v140_v49 = vpop.f32.mrf.mxu2 }
  0xa5   :  { %446 = vmatmul.msk.bf16.gmra.mxu3 %vm79_vm0, %v171_v16  ;;  %v123_v59 = vpop.f32.mrf.mxu0 }
  0xab   :  { %v143_v58 = vpop.f32.mrf.mxu2 }
  0xad   :  { %442 = vmatmul.msk.bf16.gmra.mxu1 %vm79_vm0, %v163_v17  ;;  %v125_v6 = vpop.f32.mrf.mxu0 }
  0xb3   :  { %v145_v3 = vpop.f32.mrf.mxu2 }
  0xb5   :  { %v128_v16 = vpop.f32.mrf.mxu0 }
  0xbb   :  { %v148_v15 = vpop.f32.mrf.mxu2 }
  0xf8   :  { %v231_v18 = vpop.f32.mrf.mxu3 }
  0xf9   :  { %283 = vrot.lane.b32.xlu1 %v231_v18, %s463_s0 }
  0xfa   :  { %v211_v19 = vpop.f32.mrf.mxu1 }
  0xfb   :  { %267 = vrot.lane.b32.xlu2 %v211_v19, %s463_s0 }
 0x100   :  { %v233_v20 = vpop.f32.mrf.mxu3 }
 0x102   :  { %v213_v21 = vpop.f32.mrf.mxu1 }
 0x103   :  { %285 = vrot.lane.b32.xlu2 %v233_v20, %s463_s0  ;;  %269 = vrot.lane.b32.xlu0 %v213_v21, %s463_s0 }
 0x108   :  { %v236_v22 = vpop.f32.mrf.mxu3 }
 0x10a   :  { %v216_v23 = vpop.f32.mrf.mxu1 }
 0x10b   :  { %287 = vrot.lane.b32.xlu0 %v236_v22, %s463_s0  ;;  %271 = vrot.lane.b32.xlu1 %v216_v23, %s463_s0 }
 0x110   :  { %v238_v24 = vpop.f32.mrf.mxu3 }
 0x112   :  { %v218_v25 = vpop.f32.mrf.mxu1 }
 0x113   :  { %289 = vrot.lane.b32.xlu1 %v238_v24, %s463_s0  ;;  %273 = vrot.lane.b32.xlu2 %v218_v25, %s463_s0  ;;  %v150_v25 = vpop.f32.mrf.mxu2 }
 0x118   :  { %v241_v26 = vpop.f32.mrf.mxu3 }
 0x11a   :  { %v221_v27 = vpop.f32.mrf.mxu1 }
 0x11b   :  { %291 = vrot.lane.b32.xlu2 %v241_v26, %s463_s0  ;;  %275 = vrot.lane.b32.xlu0 %v221_v27, %s463_s0 }
 0x120   :  { %v243_v28 = vpop.f32.mrf.mxu3 }
 0x122   :  { %v223_v29 = vpop.f32.mrf.mxu1 }
 0x123   :  { %277 = vrot.lane.b32.xlu1 %v223_v29, %s463_s0 }
 0x128   :  { %v246_v30 = vpop.f32.mrf.mxu3 }
 0x12a   :  { %v226_v31 = vpop.f32.mrf.mxu1 }
 0x12b   :  { %279 = vrot.lane.b32.xlu2 %v226_v31, %s463_s0  ;;  %295 = vrot.lane.b32.xlu1 %v246_v30, %s463_s0 }
 0x130   :  { %v248_v32 = vpop.f32.mrf.mxu3 }
 0x132   :  { %v228_v33 = vpop.f32.mrf.mxu1 }
 0x133   :  { %281 = vrot.lane.b32.xlu0 %v228_v33, %s463_s0  ;;  %297 = vrot.lane.b32.xlu2 %v248_v32, %s463_s0 }
 0x13b   :  { %293 = vrot.lane.b32.xlu0 %v243_v28, %s463_s0 }
 0x155   :  { %v268_v39 = vpop.permute.xlu2 %267 }
 0x156   :  { %v316_v40 = vsel %vm315_vm1, %v113_v35, %v268_v39 }
 0x157   :  { %v336_v41 = vadd.f32 %v549_v38, %v316_v40 }
 0x159   :  { %v352_v42 = vpack.c.bf16 %v336_v41, %v336_v41 }
 0x15b   :  { %369 = vst.msk [vmem:[%s650_s3] sm:$0xf] %vm368_vm2, %v352_v42 }
 0x15d   :  { %v286_v45 = vpop.permute.xlu2 %285 }
 0x15e   :  { %v325_v46 = vsel %vm315_vm1, %v135_v36, %v286_v45 }
 0x15f   :  { %v345_v47 = vadd.f32 %v549_v38, %v325_v46 }
 0x161   :  { %v361_v48 = vpack.c.bf16 %v345_v47, %v345_v47 }
 0x163   :  { %378 = vst.msk [vmem:[%s650_s3 + $0x24] sm:$0xf] %vm368_vm2, %v361_v48 }
 0x16b   :  { %v284_v51 = vpop.permute.xlu1 %283 }
 0x16c   :  { %v324_v52 = vsel %vm315_vm1, %v133_v34, %v284_v51 }
 0x16d   :  { %v344_v53 = vadd.f32 %v549_v38, %v324_v52  ;;  %v274_v54 = vpop.permute.xlu2 %273 }
 0x16e   :  { %v319_v55 = vsel %vm315_vm1, %v120_v50, %v274_v54 }
 0x16f   :  { %v360_v56 = vpack.c.bf16 %v344_v53, %v344_v53  ;;  %v339_v57 = vadd.f32 %v549_v38, %v319_v55 }
 0x171   :  { %377 = vst.msk [vmem:[%s650_s3 + $0x20] sm:$0xf] %vm368_vm2, %v360_v56  ;;  %v355_v60 = vpack.c.bf16 %v339_v57, %v339_v57 }
 0x173   :  { %372 = vst.msk [vmem:[%s650_s3 + $0xc] sm:$0xf] %vm368_vm2, %v355_v60 }
 0x175   :  { %v292_v61 = vpop.permute.xlu2 %291  ;;  %v270_v62 = vpop.permute.xlu0 %269 }
 0x176   :  { %v328_v63 = vsel %vm315_vm1, %v143_v58, %v292_v61  ;;  %v317_v0 = vsel %vm315_vm1, %v115_v37, %v270_v62 }
 0x177   :  { %v348_v1 = vadd.f32 %v549_v38, %v328_v63  ;;  %v337_v2 = vadd.f32 %v549_v38, %v317_v0 }
 0x179   :  { %v364_v4 = vpack.c.bf16 %v348_v1, %v348_v1  ;;  %v353_v5 = vpack.c.bf16 %v337_v2, %v337_v2 }
 0x17b   :  { %381 = vst.msk [vmem:[%s650_s3 + $0x30] sm:$0xf] %vm368_vm2, %v364_v4 }
 0x17c   :  { %370 = vst.msk [vmem:[%s650_s3 + $0x4] sm:$0xf] %vm368_vm2, %v353_v5 }
 0x17d   :  { %v272_v7 = vpop.permute.xlu1 %271  ;;  %v288_v8 = vpop.permute.xlu0 %287 }
 0x17e   :  { %v318_v9 = vsel %vm315_vm1, %v118_v43, %v272_v7  ;;  %v326_v10 = vsel %vm315_vm1, %v138_v44, %v288_v8  ;;  %v130_v43 = vpop.f32.mrf.mxu0 }
 0x17f   :  { %v338_v11 = vadd.f32 %v549_v38, %v318_v9  ;;  %v346_v12 = vadd.f32 %v549_v38, %v326_v10 }
 0x181   :  { %v354_v13 = vpack.c.bf16 %v338_v11, %v338_v11  ;;  %v362_v14 = vpack.c.bf16 %v346_v12, %v346_v12 }
 0x183   :  { %371 = vst.msk [vmem:[%s650_s3 + $0x8] sm:$0xf] %vm368_vm2, %v354_v13 }
 0x184   :  { %379 = vst.msk [vmem:[%s650_s3 + $0x28] sm:$0xf] %vm368_vm2, %v362_v14 }
 0x185   :  { %v290_v17 = vpop.permute.xlu1 %289  ;;  %v280_v18 = vpop.permute.xlu2 %279 }
 0x186   :  { %v327_v19 = vsel %vm315_vm1, %v140_v49, %v290_v17  ;;  %v322_v20 = vsel %vm315_vm1, %v128_v16, %v280_v18 }
 0x187   :  { %v347_v21 = vadd.f32 %v549_v38, %v327_v19  ;;  %v342_v22 = vadd.f32 %v549_v38, %v322_v20 }
 0x189   :  { %v363_v23 = vpack.c.bf16 %v347_v21, %v347_v21  ;;  %v358_v24 = vpack.c.bf16 %v342_v22, %v342_v22 }
 0x18b   :  { %380 = vst.msk [vmem:[%s650_s3 + $0x2c] sm:$0xf] %vm368_vm2, %v363_v23 }
 0x18c   :  { %375 = vst.msk [vmem:[%s650_s3 + $0x18] sm:$0xf] %vm368_vm2, %v358_v24 }
 0x18d   :  { %v276_v26 = vpop.permute.xlu0 %275  ;;  %v298_v27 = vpop.permute.xlu2 %297 }
 0x18e   :  { %v320_v28 = vsel %vm315_vm1, %v123_v59, %v276_v26  ;;  %v331_v29 = vsel %vm315_vm1, %v150_v25, %v298_v27 }
 0x18f   :  { %v340_v30 = vadd.f32 %v549_v38, %v320_v28  ;;  %v351_v31 = vadd.f32 %v549_v38, %v331_v29 }
 0x191   :  { %v356_v32 = vpack.c.bf16 %v340_v30, %v340_v30  ;;  %v367_v33 = vpack.c.bf16 %v351_v31, %v351_v31 }
 0x193   :  { %373 = vst.msk [vmem:[%s650_s3 + $0x10] sm:$0xf] %vm368_vm2, %v356_v32 }
 0x194   :  { %384 = vst.msk [vmem:[%s650_s3 + $0x3c] sm:$0xf] %vm368_vm2, %v367_v33 }
 0x195   :  { %v278_v34 = vpop.permute.xlu1 %277 }
 0x196   :  { %v321_v35 = vsel %vm315_vm1, %v125_v6, %v278_v34 }
 0x197   :  { %v341_v36 = vadd.f32 %v549_v38, %v321_v35 }
 0x199   :  { %v357_v37 = vpack.c.bf16 %v341_v36, %v341_v36 }
 0x19b   :  { %374 = vst.msk [vmem:[%s650_s3 + $0x14] sm:$0xf] %vm368_vm2, %v357_v37 }
 0x19d   :  { %v296_v39 = vpop.permute.xlu1 %295 }
 0x19e   :  { %v330_v40 = vsel %vm315_vm1, %v148_v15, %v296_v39 }
 0x19f   :  { %v350_v41 = vadd.f32 %v549_v38, %v330_v40 }
 0x1a1   :  { %v366_v42 = vpack.c.bf16 %v350_v41, %v350_v41 }
 0x1a3   :  { %383 = vst.msk [vmem:[%s650_s3 + $0x38] sm:$0xf] %vm368_vm2, %v366_v42 }
 0x1a5   :  { %v282_v44 = vpop.permute.xlu0 %281 }
 0x1a6   :  { %v323_v45 = vsel %vm315_vm1, %v130_v43, %v282_v44 }
 0x1a7   :  { %v343_v46 = vadd.f32 %v549_v38, %v323_v45 }
 0x1a9   :  { %v359_v47 = vpack.c.bf16 %v343_v46, %v343_v46 }
 0x1ab   :  { %376 = vst.msk [vmem:[%s650_s3 + $0x1c] sm:$0xf] %vm368_vm2, %v359_v47 }
 0x1ad   :  { %v294_v48 = vpop.permute.xlu0 %293 }
 0x1ae   :  { %v329_v49 = vsel %vm315_vm1, %v145_v3, %v294_v48 }
 0x1af   :  { %v349_v50 = vadd.f32 %v549_v38, %v329_v49 }
 0x1b1   :  { %v365_v51 = vpack.c.bf16 %v349_v50, %v349_v50 }
 0x1b3   :  { %382 = vst.msk [vmem:[%s650_s3 + $0x34] sm:$0xf] %vm368_vm2, %v365_v51 }

// kernel: _lambda_.18
= control target key start
LH: loop header
LB: loop body
LE: loop exit
PB: predicated region body
PF: predicated region fallthrough
CT: control target
= control target key end

     0   :  { %s1744_s27 = smov 96   ;;  %vm314_vm0 = vcmask 261120   ;;  %vm707_vm1 = vcmask 785408   ;;  %vm1199_vm2 = vcmask 519168   ;;  %s2476_s1 = inlined_call_operand.vmem [shape: bf16[2,288,32], index: 1, kind: input, shape index: {}]   ;;  %s2477_s0 = inlined_call_operand.vmem [shape: bf16[128,576], index: 0, kind: input, shape index: {}]   ;;  %s2478_s2 = inlined_call_operand.vmem [shape: f32[1,64], index: 2, kind: input, shape index: {}]   ;;  %s2479_s3 = inlined_call_operand.vmem [shape: bf16[128,64], index: 3, kind: input, shape index: {}]   ;;  %s2480_s4 = inlined_call_operand.vmem [shape: bf16[128,64], index: 4, kind: output, shape index: {}]  }
   0x1   :  { %v1639_v0 = vld [vmem:[%s2476_s1 + $0x38] sm:$0xff]  ;;  %v1442_v1 = vld [vmem:[%s2477_s0 + $0x10] sm:$0xf]  ;;  %v1652_v2 = vld [vmem:[%s2477_s0 + $0x20] sm:$0xf0] }
   0x2   :  { %v1443_v3 = vor.u32 %v1652_v2, %v1442_v1  ;;  %v1434_v4 = vld [vmem:[%s2477_s0 + $0x8] sm:$0xf]  ;;  %v1651_v5 = vld [vmem:[%s2477_s0 + $0x18] sm:$0xf0]  ;;  %1731 = vmatpush.bf16.msra.mxu1 %v1639_v0  ;;  %v1638_v7 = vld [vmem:[%s2476_s1 + $0x30] sm:$0xff]  ;;  %339 = vmatpush.bf16.msra.mxu0 %v1639_v0 }
   0x3   :  { %v1435_v6 = vor.u32 %v1651_v5, %v1434_v4  ;;  %v1446_v8 = vld [vmem:[%s2477_s0 + $0x30] sm:$0xf]  ;;  %v1654_v9 = vld [vmem:[%s2477_s0 + $0x40] sm:$0xf0]  ;;  %v1650_v10 = vld [vmem:[%s2477_s0 + $0xc] sm:$0xf] }
   0x4   :  { %663 = vrot.lane.b32.xlu1 %v1443_v3, %s1744_s27  ;;  %v1436_v11 = vld [vmem:[%s2477_s0 + $0x1c] sm:$0xf0]  ;;  %v1649_v12 = vld [vmem:[%s2476_s1 + $0x88] sm:$0xff]  ;;  %v1653_v14 = vld [vmem:[%s2477_s0 + $0x34] sm:$0xf]  ;;  %v1447_v16 = vor.u32 %v1654_v9, %v1446_v8 }
   0x5   :  { %659 = vrot.lane.b32.xlu0 %v1435_v6, %s1744_s27  ;;  %v1637_v13 = vld [vmem:[%s2476_s1 + $0x28] sm:$0xff]  ;;  %443 = vmatpush.bf16.msra.mxu2 %v1649_v12  ;;  %v1648_v18 = vld [vmem:[%s2476_s1 + $0x80] sm:$0xff]  ;;  %v1439_v19 = vor.u32 %v1650_v10, %v1436_v11  ;;  %v1610_v21 = vld [vmem:[%s2477_s0 + $0x18] sm:$0xf0] }
   0x6   :  { %1732 = vmatpush.bf16.msra.mxu1 %v1638_v7  ;;  %340 = vmatpush.bf16.msra.mxu0 %v1638_v7  ;;  %v1448_v15 = vld [vmem:[%s2477_s0 + $0x44] sm:$0xf0]  ;;  %v1636_v22 = vld [vmem:[%s2476_s1 + $0x20] sm:$0xff]  ;;  %v1454_v23 = vld [vmem:[%s2477_s0 + $0x38] sm:$0xf] }
   0x7   :  { %v1451_v17 = vor.u32 %v1653_v14, %v1448_v15  ;;  %1739 = vmatpush.bf16.msra.mxu3 %v1649_v12  ;;  %v1230_v20 = vld [vmem:[%s2477_s0 + $0x8] sm:$0xf]  ;;  %v1655_v24 = vld [vmem:[%s2477_s0 + $0x48] sm:$0xf0]  ;;  %v1656_v27 = vld [vmem:[%s2477_s0 + $0x5c] sm:$0xf] }
   0x8   :  { %v1689_v25 = vld [vmem:[%s2476_s1 + $0x108] sm:$0xff]  ;;  %v1231_v26 = vor.u32 %v1610_v21, %v1230_v20  ;;  %v1460_v28 = vld [vmem:[%s2477_s0 + $0x6c] sm:$0xf0]  ;;  %v1455_v29 = vor.u32 %v1655_v24, %v1454_v23  ;;  %v1458_v30 = vld [vmem:[%s2477_s0 + $0x58] sm:$0xf] }
   0x9   :  { %667 = vrot.lane.b32.xlu2 %v1451_v17, %s1744_s27  ;;  %444 = vmatpush.bf16.msra.mxu2 %v1648_v18  ;;  %v1657_v31 = vld [vmem:[%s2477_s0 + $0x68] sm:$0xf0]  ;;  %v1635_v32 = vld [vmem:[%s2476_s1 + $0x18] sm:$0xff]  ;;  %v1463_v33 = vor.u32 %v1656_v27, %v1460_v28  ;;  %v1634_v35 = vld [vmem:[%s2476_s1 + $0x10] sm:$0xff] }
   0xa   :  { %1733 = vmatpush.bf16.msra.mxu1 %v1637_v13  ;;  %341 = vmatpush.bf16.msra.mxu0 %v1637_v13  ;;  %v1459_v34 = vor.u32 %v1657_v31, %v1458_v30  ;;  %v1688_v36 = vld [vmem:[%s2476_s1 + $0x100] sm:$0xff]  ;;  %v1658_v38 = vld [vmem:[%s2477_s0 + $0x70] sm:$0xf0]  ;;  %v1472_v40 = vld [vmem:[%s2477_s0 + $0x94] sm:$0xf0] }
   0xb   :  { %1740 = vmatpush.bf16.msra.mxu3 %v1648_v18  ;;  %v1466_v37 = vld [vmem:[%s2477_s0 + $0x60] sm:$0xf]  ;;  %v1659_v39 = vld [vmem:[%s2477_s0 + $0x84] sm:$0xf]  ;;  %v1660_v43 = vld [vmem:[%s2477_s0 + $0x90] sm:$0xf0] }
   0xc   :  { %665 = vrot.lane.b32.xlu1 %v1447_v16, %s1744_s27  ;;  %1388 = vmatmul.msk.bf16.vlgmr.msra.gmra.mxu2 %vm314_vm0, %v1231_v26  ;;  %v1467_v41 = vor.u32 %v1658_v38, %v1466_v37  ;;  %v1470_v42 = vld [vmem:[%s2477_s0 + $0x80] sm:$0xf]  ;;  %v1633_v44 = vld [vmem:[%s2476_s1 + $0x8] sm:$0xff]  ;;  %v1475_v45 = vor.u32 %v1659_v39, %v1472_v40  ;;  %v1242_v46 = vld [vmem:[%s2477_s0 + $0x30] sm:$0xf] }
   0xd   :  { %661 = vrot.lane.b32.xlu0 %v1439_v19, %s1744_s27  ;;  %921 = vmatpush.bf16.msrb.mxu2 %v1689_v25  ;;  %v1613_v47 = vld [vmem:[%s2477_s0 + $0x40] sm:$0xf0]  ;;  %v1471_v48 = vor.u32 %v1660_v43, %v1470_v42  ;;  %v1270_v50 = vld [vmem:[%s2477_s0 + $0xa0] sm:$0xf]  ;;  %v1621_v51 = vld [vmem:[%s2477_s0 + $0xb0] sm:$0xf0] }
   0xe   :  { %1734 = vmatpush.bf16.msra.mxu1 %v1636_v22  ;;  %342 = vmatpush.bf16.msra.mxu0 %v1636_v22  ;;  %v1632_v49 = vld [vmem:[%s2476_s1] sm:$0xff]  ;;  %v1609_v53 = vld [vmem:[%s2477_s0 + $0x10] sm:$0xf0]  ;;  %v1243_v54 = vor.u32 %v1613_v47, %v1242_v46  ;;  %v1271_v55 = vor.u32 %v1621_v51, %v1270_v50  ;;  %v1647_v57 = vld [vmem:[%s2476_s1 + $0x78] sm:$0xff] }
   0xf   :  { %v1222_v52 = vld [vmem:[%s2477_s0] sm:$0xf]  ;;  %v1687_v58 = vld [vmem:[%s2476_s1 + $0xf8] sm:$0xff]  ;;  %v1646_v59 = vld [vmem:[%s2476_s1 + $0x70] sm:$0xff] }
  0x10   :  { %v1223_v56 = vor.u32 %v1609_v53, %v1222_v52  ;;  %v1290_v60 = vld [vmem:[%s2477_s0 + $0xd0] sm:$0xf]  ;;  %v1625_v61 = vld [vmem:[%s2477_s0 + $0xe0] sm:$0xf0]  ;;  %v1691_v63 = vld [vmem:[%s2476_s1 + $0x118] sm:$0xff] }
  0x11   :  { %669 = vrot.lane.b32.xlu2 %v1455_v29, %s1744_s27  ;;  %922 = vmatpush.bf16.msrb.mxu2 %v1688_v36  ;;  %v1291_v62 = vor.u32 %v1625_v61, %v1290_v60  ;;  %v1478_v0 = vld [vmem:[%s2477_s0 + $0x88] sm:$0xf]  ;;  %v1661_v1 = vld [vmem:[%s2477_s0 + $0x98] sm:$0xf0]  ;;  %v1662_v2 = vld [vmem:[%s2477_s0 + $0xac] sm:$0xf] }
  0x12   :  { %1735 = vmatpush.bf16.msra.mxu1 %v1635_v32  ;;  %343 = vmatpush.bf16.msra.mxu0 %v1635_v32  ;;  %v1484_v3 = vld [vmem:[%s2477_s0 + $0xbc] sm:$0xf0]  ;;  %v1479_v4 = vor.u32 %v1661_v1, %v1478_v0  ;;  %v1482_v6 = vld [vmem:[%s2477_s0 + $0xa8] sm:$0xf]  ;;  %v1663_v7 = vld [vmem:[%s2477_s0 + $0xb8] sm:$0xf0] }
  0x13   :  { %1393 = vmatmul.msk.bf16.vlgmr.msra.gmra.mxu3 %vm314_vm0, %v1291_v62  ;;  %v1487_v5 = vor.u32 %v1662_v2, %v1484_v3  ;;  %v1686_v8 = vld [vmem:[%s2476_s1 + $0xf0] sm:$0xff]  ;;  %v1645_v9 = vld [vmem:[%s2476_s1 + $0x68] sm:$0xff]  ;;  %v1483_v10 = vor.u32 %v1663_v7, %v1482_v6  ;;  %v1254_v12 = vld [vmem:[%s2477_s0 + $0x58] sm:$0xf] }
  0x14   :  { %673 = vrot.lane.b32.xlu1 %v1463_v33, %s1744_s27  ;;  %v1681_v11 = vld [vmem:[%s2476_s1 + $0xc8] sm:$0xff]  ;;  %v1624_v15 = vld [vmem:[%s2477_s0 + $0xd8] sm:$0xf0]  ;;  %v1644_v19 = vld [vmem:[%s2476_s1 + $0x60] sm:$0xff] }
  0x15   :  { %671 = vrot.lane.b32.xlu0 %v1459_v34, %s1744_s27  ;;  %923 = vmatpush.bf16.msrb.mxu2 %v1687_v58  ;;  %v1616_v13 = vld [vmem:[%s2477_s0 + $0x68] sm:$0xf0]  ;;  %v1282_v14 = vld [vmem:[%s2477_s0 + $0xc8] sm:$0xf]  ;;  %v1612_v17 = vld [vmem:[%s2477_s0 + $0x38] sm:$0xf0] }
  0x16   :  { %1736 = vmatpush.bf16.msra.mxu1 %v1634_v35  ;;  %344 = vmatpush.bf16.msra.mxu0 %v1634_v35  ;;  %v1234_v16 = vld [vmem:[%s2477_s0 + $0x28] sm:$0xf]  ;;  %v1255_v18 = vor.u32 %v1616_v13, %v1254_v12  ;;  %v1283_v20 = vor.u32 %v1624_v15, %v1282_v14  ;;  %v1643_v22 = vld [vmem:[%s2476_s1 + $0x58] sm:$0xff]  ;;  %v1680_v23 = vld [vmem:[%s2476_s1 + $0xc0] sm:$0xff] }
  0x17   :  { %872 = vmatpush.bf16.msrb.mxu3 %v1681_v11  ;;  %v1235_v21 = vor.u32 %v1612_v17, %v1234_v16  ;;  %v1642_v24 = vld [vmem:[%s2476_s1 + $0x50] sm:$0xff]  ;;  %v1302_v25 = vld [vmem:[%s2477_s0 + $0xf8] sm:$0xf]  ;;  %v1628_v26 = vld [vmem:[%s2477_s0 + $0x108] sm:$0xf0] }
  0x18   :  { %v1303_v27 = vor.u32 %v1628_v26, %v1302_v25  ;;  %v1685_v28 = vld [vmem:[%s2476_s1 + $0xe8] sm:$0xff]  ;;  %v1679_v29 = vld [vmem:[%s2476_s1 + $0xb8] sm:$0xff]  ;;  %v1490_v30 = vld [vmem:[%s2477_s0 + $0xb0] sm:$0xf] }
  0x19   :  { %675 = vrot.lane.b32.xlu2 %v1467_v41, %s1744_s27  ;;  %924 = vmatpush.bf16.msrb.mxu2 %v1686_v8  ;;  %v1664_v31 = vld [vmem:[%s2477_s0 + $0xc0] sm:$0xf0]  ;;  %v1665_v32 = vld [vmem:[%s2477_s0 + $0xd4] sm:$0xf]  ;;  %v1496_v34 = vld [vmem:[%s2477_s0 + $0xe4] sm:$0xf0] }
  0x1a   :  { %1737 = vmatpush.bf16.msra.mxu1 %v1633_v44  ;;  %345 = vmatpush.bf16.msra.mxu0 %v1633_v44  ;;  %v1491_v33 = vor.u32 %v1664_v31, %v1490_v30  ;;  %v1494_v35 = vld [vmem:[%s2477_s0 + $0xd0] sm:$0xf]  ;;  %v1666_v36 = vld [vmem:[%s2477_s0 + $0xe0] sm:$0xf0]  ;;  %v1641_v37 = vld [vmem:[%s2476_s1 + $0x48] sm:$0xff]  ;;  %v1499_v38 = vor.u32 %v1665_v32, %v1496_v34 }
  0x1b   :  { %873 = vmatpush.bf16.msrb.mxu3 %v1680_v23  ;;  %v1495_v39 = vor.u32 %v1666_v36, %v1494_v35  ;;  %v1678_v40 = vld [vmem:[%s2476_s1 + $0xb0] sm:$0xff]  ;;  %v1684_v41 = vld [vmem:[%s2476_s1 + $0xe0] sm:$0xff]  ;;  %v1502_v58 = vld [vmem:[%s2477_s0 + $0xd8] sm:$0xf] }
  0x1c   :  { %679 = vrot.lane.b32.xlu1 %v1475_v45, %s1744_s27  ;;  %1389 = vmatmul.msk.bf16.gmra.mxu2 %vm314_vm0, %v1243_v54  ;;  %v1266_v42 = vld [vmem:[%s2477_s0 + $0x80] sm:$0xf]  ;;  %v1619_v43 = vld [vmem:[%s2477_s0 + $0x90] sm:$0xf0]  ;;  %v1294_v44 = vld [vmem:[%s2477_s0 + $0xf0] sm:$0xf] }
  0x1d   :  { %677 = vrot.lane.b32.xlu0 %v1471_v48, %s1744_s27  ;;  %925 = vmatpush.bf16.msrb.mxu2 %v1685_v28  ;;  %v1627_v45 = vld [vmem:[%s2477_s0 + $0x100] sm:$0xf0]  ;;  %v1246_v46 = vld [vmem:[%s2477_s0 + $0x50] sm:$0xf]  ;;  %v1267_v48 = vor.u32 %v1619_v43, %v1266_v42  ;;  %v1314_v52 = vld [vmem:[%s2477_s0 + $0x120] sm:$0xf] }
  0x1e   :  { %1738 = vmatpush.bf16.msra.mxu1 %v1632_v49  ;;  %346 = vmatpush.bf16.msra.mxu0 %v1632_v49  ;;  %v1615_v47 = vld [vmem:[%s2477_s0 + $0x60] sm:$0xf0]  ;;  %v1295_v50 = vor.u32 %v1627_v45, %v1294_v44  ;;  %v1631_v53 = vld [vmem:[%s2477_s0 + $0x130] sm:$0xf0]  ;;  %v1668_v60 = vld [vmem:[%s2477_s0 + $0xfc] sm:$0xf] }
  0x1f   :  { %874 = vmatpush.bf16.msrb.mxu3 %v1679_v29  ;;  %v1640_v49 = vld [vmem:[%s2476_s1 + $0x40] sm:$0xff]  ;;  %v1247_v51 = vor.u32 %v1615_v47, %v1246_v46  ;;  %v1315_v54 = vor.u32 %v1631_v53, %v1314_v52  ;;  %v1508_v62 = vld [vmem:[%s2477_s0 + $0x10c] sm:$0xf0]  ;;  %v1669_v0 = vld [vmem:[%s2477_s0 + $0x108] sm:$0xf0] }
  0x20   :  { %v1511_v1 = vor.u32 %v1668_v60, %v1508_v62  ;;  %v1676_v3 = vld [vmem:[%s2476_s1 + $0xa0] sm:$0xff]  ;;  %v1306_v6 = vld [vmem:[%s2477_s0 + $0x118] sm:$0xf]  ;;  %v1630_v7 = vld [vmem:[%s2477_s0 + $0x128] sm:$0xf0] }
  0x21   :  { %367 = vmatmul.bf16.vlgmr.msra.gmra.mxu1 %v1271_v55  ;;  %347 = vmatmul.bf16.vlgmr.msra.gmra.mxu0 %v1223_v56  ;;  %v1677_v55 = vld [vmem:[%s2476_s1 + $0xa8] sm:$0xff]  ;;  %v1690_v56 = vld [vmem:[%s2476_s1 + $0x110] sm:$0xff]  ;;  %v1258_v8 = vld [vmem:[%s2477_s0 + $0x78] sm:$0xf]  ;;  %v1307_v11 = vor.u32 %v1630_v7, %v1306_v6 }
  0x22   :  { %388 = vmatpush.bf16.msrb.mxu1 %v1647_v57  ;;  %976 = vmatpush.bf16.msrb.mxu0 %v1691_v63  ;;  %v1683_v57 = vld [vmem:[%s2476_s1 + $0xd8] sm:$0xff]  ;;  %v1682_v14 = vld [vmem:[%s2476_s1 + $0xd0] sm:$0xff]  ;;  %v1514_v16 = vld [vmem:[%s2477_s0 + $0x100] sm:$0xf] }
  0x23   :  { %681 = vrot.lane.b32.xlu2 %v1479_v4, %s1744_s27  ;;  %1394 = vmatmul.msk.bf16.gmra.mxu3 %vm314_vm0, %v1303_v27  ;;  %v1506_v63 = vld [vmem:[%s2477_s0 + $0xf8] sm:$0xf]  ;;  %v1278_v4 = vld [vmem:[%s2477_s0 + $0xa8] sm:$0xf]  ;;  %v1674_v15 = vld [vmem:[%s2476_s1 + $0x90] sm:$0xff] }
  0x24   :  { %685 = vrot.lane.b32.xlu1 %v1487_v5, %s1744_s27  ;;  %926 = vmatpush.bf16.msrb.mxu2 %v1684_v41  ;;  %v1507_v2 = vor.u32 %v1669_v0, %v1506_v63  ;;  %v1622_v5 = vld [vmem:[%s2477_s0 + $0xb8] sm:$0xf0]  ;;  %v1670_v17 = vld [vmem:[%s2477_s0 + $0x110] sm:$0xf0]  ;;  %v1608_v25 = vld [vmem:[%s2477_s0 + $0x4] sm:$0xf] }
  0x25   :  { %683 = vrot.lane.b32.xlu0 %v1483_v10, %s1744_s27  ;;  %875 = vmatpush.bf16.msrb.mxu3 %v1678_v40  ;;  %v1279_v10 = vor.u32 %v1622_v5, %v1278_v4  ;;  %v1675_v13 = vld [vmem:[%s2476_s1 + $0x98] sm:$0xff]  ;;  %v1672_v23 = vld [vmem:[%s2477_s0 + $0x130] sm:$0xf0]  ;;  %v1526_v28 = vld [vmem:[%s2477_s0 + $0x128] sm:$0xf] }
  0x26   :  { %389 = vmatpush.bf16.msrb.mxu1 %v1646_v59  ;;  %v1667_v59 = vld [vmem:[%s2477_s0 + $0xe8] sm:$0xf0]  ;;  %977 = vmatpush.bf16.msrb.mxu0 %v1690_v56  ;;  %v1224_v26 = vld [vmem:[%s2477_s0 + $0x14] sm:$0xf0]  ;;  %v1673_v29 = vld [vmem:[%s2477_s0 + $0x138] sm:$0xf0] }
  0x27   :  { %v1503_v61 = vor.u32 %v1667_v59, %v1502_v58  ;;  %v1227_v27 = vor.u32 %v1608_v25, %v1224_v26  ;;  %v1527_v30 = vor.u32 %v1673_v29, %v1526_v28  ;;  %v1611_v31 = vld [vmem:[%s2477_s0 + $0x2c] sm:$0xf]  ;;  %v1236_v32 = vld [vmem:[%s2477_s0 + $0x3c] sm:$0xf0]  ;;  %v1617_v44 = vld [vmem:[%s2477_s0 + $0x7c] sm:$0xf] }
  0x28   :  { %927 = vmatpush.bf16.msrb.mxu2 %v1683_v57  ;;  %v1260_v45 = vld [vmem:[%s2477_s0 + $0x8c] sm:$0xf0]  ;;  %v1620_v53 = vld [vmem:[%s2477_s0 + $0xa4] sm:$0xf]  ;;  %v1623_v63 = vld [vmem:[%s2477_s0 + $0xcc] sm:$0xf] }
  0x29   :  { %876 = vmatpush.bf16.msrb.mxu3 %v1677_v55  ;;  %v1263_v47 = vor.u32 %v1617_v44, %v1260_v45  ;;  %v1284_v0 = vld [vmem:[%s2477_s0 + $0xdc] sm:$0xf0] }
  0x2a   :  { %390 = vmatpush.bf16.msrb.mxu1 %v1645_v9  ;;  %v1618_v9 = vld [vmem:[%s2477_s0 + $0x88] sm:$0xf0]  ;;  %v1287_v4 = vor.u32 %v1623_v63, %v1284_v0 }
  0x2b   :  { %687 = vrot.lane.b32.xlu2 %v1491_v33, %s1744_s27  ;;  %v1259_v12 = vor.u32 %v1618_v9, %v1258_v8  ;;  %v1239_v33 = vor.u32 %v1611_v31, %v1236_v32 }
  0x2c   :  { %1390 = vmatmul.msk.bf16.gmra.mxu2 %vm314_vm0, %v1255_v18  ;;  %691 = vrot.lane.b32.xlu1 %v1499_v38, %s1744_s27  ;;  %v1515_v18 = vor.u32 %v1670_v17, %v1514_v16  ;;  %v1248_v38 = vld [vmem:[%s2477_s0 + $0x64] sm:$0xf0] }
  0x2d   :  { %689 = vrot.lane.b32.xlu0 %v1495_v39, %s1744_s27  ;;  %877 = vmatpush.bf16.msrb.mxu3 %v1676_v3 }
  0x2e   :  { %391 = vmatpush.bf16.msrb.mxu1 %v1644_v19  ;;  %928 = vmatpush.bf16.msrb.mxu2 %v1682_v14  ;;  %v1671_v19 = vld [vmem:[%s2477_s0 + $0x124] sm:$0xf] }
  0x31   :  { %372 = vmatmul.bf16.gmra.mxu1 %v1283_v20  ;;  %352 = vmatmul.bf16.gmra.mxu0 %v1235_v21  ;;  %v1520_v20 = vld [vmem:[%s2477_s0 + $0x134] sm:$0xf0]  ;;  %v1518_v21 = vld [vmem:[%s2477_s0 + $0x120] sm:$0xf] }
  0x32   :  { %392 = vmatpush.bf16.msrb.mxu1 %v1643_v22  ;;  %878 = vmatpush.bf16.msrb.mxu3 %v1675_v13  ;;  %v1523_v22 = vor.u32 %v1671_v19, %v1520_v20 }
  0x33   :  { %1395 = vmatmul.msk.bf16.gmra.mxu3 %vm314_vm0, %v1315_v54  ;;  %693 = vrot.lane.b32.xlu2 %v1503_v61, %s1744_s27  ;;  %v1272_v54 = vld [vmem:[%s2477_s0 + $0xb4] sm:$0xf0] }
  0x34   :  { %697 = vrot.lane.b32.xlu1 %v1511_v1, %s1744_s27  ;;  %v1275_v57 = vor.u32 %v1620_v53, %v1272_v54 }
  0x35   :  { %695 = vrot.lane.b32.xlu0 %v1507_v2, %s1744_s27 }
  0x36   :  { %393 = vmatpush.bf16.msrb.mxu1 %v1642_v24  ;;  %879 = vmatpush.bf16.msrb.mxu3 %v1674_v15  ;;  %v1519_v24 = vor.u32 %v1672_v23, %v1518_v21  ;;  %v1629_v23 = vld [vmem:[%s2477_s0 + $0x11c] sm:$0xf] }
  0x3a   :  { %394 = vmatpush.bf16.msrb.mxu1 %v1641_v37  ;;  %v1614_v37 = vld [vmem:[%s2477_s0 + $0x54] sm:$0xf] }
  0x3b   :  { %699 = vrot.lane.b32.xlu2 %v1515_v18, %s1744_s27  ;;  %v1251_v39 = vor.u32 %v1614_v37, %v1248_v38 }
  0x3c   :  { %1391 = vmatmul.msk.bf16.gmra.mxu2 %vm314_vm0, %v1267_v48  ;;  %703 = vrot.lane.b32.xlu1 %v1523_v22, %s1744_s27 }
  0x3d   :  { %701 = vrot.lane.b32.xlu0 %v1519_v24, %s1744_s27  ;;  %v1308_v24 = vld [vmem:[%s2477_s0 + $0x12c] sm:$0xf0] }
  0x3e   :  { %395 = vmatpush.bf16.msrb.mxu1 %v1640_v49  ;;  %v1311_v28 = vor.u32 %v1629_v23, %v1308_v24 }
  0x41   :  { %377 = vmatmul.bf16.gmra.mxu1 %v1295_v50  ;;  %357 = vmatmul.bf16.gmra.mxu0 %v1247_v51 }
  0x43   :  { %705 = vrot.lane.b32.xlu2 %v1527_v30, %s1744_s27 }
  0x4c   :  { %1392 = vmatmul.msk.bf16.gmra.mxu2 %vm314_vm0, %v1279_v10 }
  0x51   :  { %382 = vmatmul.bf16.gmra.mxu1 %v1307_v11  ;;  %362 = vmatmul.bf16.gmra.mxu0 %v1259_v12  ;;  %v1626_v11 = vld [vmem:[%s2477_s0 + $0xf4] sm:$0xf]  ;;  %v1296_v12 = vld [vmem:[%s2477_s0 + $0x104] sm:$0xf0]  ;;  %s1745_s0 = smov 32  }
  0x52   :  { %v1299_v15 = vor.u32 %v1626_v11, %v1296_v12 }
  0x61   :  { %396 = vmatmul.bf16.vlgmr.msrb.gmra.mxu1 %v1227_v27 }
  0x63   :  { %v668_v36 = vpop.permute.xlu2 %667 }
  0x6b   :  { %v670_v43 = vpop.permute.xlu2 %669 }
  0x6c   :  { %v711_v49 = vsel %vm707_vm1, %v668_v36, %v670_v43 }
  0x71   :  { %401 = vmatmul.bf16.gmra.mxu1 %v1239_v33 }
  0x73   :  { %v676_v50 = vpop.permute.xlu2 %675 }
  0x76   :  { %v664_v34 = vpop.permute.xlu1 %663 }
  0x77   :  { %v660_v35 = vpop.permute.xlu0 %659  ;;  %1600 = vmatmul.msk.bf16.vlgmr.msrb.gmra.mxu0 %vm314_vm0, %v664_v34 }
  0x7d   :  { %v682_v59 = vpop.permute.xlu2 %681 }
  0x7e   :  { %v666_v46 = vpop.permute.xlu1 %665 }
  0x7f   :  { %v662_v40 = vpop.permute.xlu0 %661  ;;  %v710_v48 = vsel %vm707_vm1, %v666_v46, %v668_v36 }
  0x80   :  { %v708_v41 = vsel %vm707_vm1, %v660_v35, %v662_v40  ;;  %v709_v42 = vsel %vm707_vm1, %v662_v40, %v664_v34 }
  0x81   :  { %880 = vmatmul.bf16.vlgmr.msrb.gmra.mxu3 %v708_v41  ;;  %929 = vmatmul.bf16.vlgmr.msrb.gmra.mxu2 %v709_v42 }
  0x82   :  { %406 = vmatmul.bf16.gmra.mxu1 %v1251_v39 }
  0x85   :  { %v688_v6 = vpop.permute.xlu2 %687 }
  0x86   :  { %v674_v51 = vpop.permute.xlu1 %673 }
  0x87   :  { %1601 = vmatmul.msk.bf16.gmra.mxu0 %vm314_vm0, %v670_v43  ;;  %v672_v52 = vpop.permute.xlu0 %671  ;;  %v713_v56 = vsel %vm707_vm1, %v674_v51, %v676_v50 }
  0x88   :  { %v712_v55 = vsel %vm707_vm1, %v672_v52, %v674_v51 }
  0x8d   :  { %v694_v18 = vpop.permute.xlu2 %693 }
  0x8e   :  { %v680_v61 = vpop.permute.xlu1 %679 }
  0x8f   :  { %v2190_v58 = vpop.f32.mrf.mxu2  ;;  %v678_v62 = vpop.permute.xlu0 %677  ;;  %v715_v3 = vsel %vm707_vm1, %v680_v61, %v682_v59 }
  0x90   :  { %v714_v2 = vsel %vm707_vm1, %v678_v62, %v680_v61 }
  0x91   :  { %885 = vmatmul.bf16.gmra.mxu3 %v710_v48  ;;  %934 = vmatmul.bf16.gmra.mxu2 %v711_v49 }
  0x92   :  { %411 = vmatmul.bf16.gmra.mxu1 %v1263_v47 }
  0x95   :  { %v700_v31 = vpop.permute.xlu2 %699 }
  0x96   :  { %v686_v9 = vpop.permute.xlu1 %685  ;;  %v2225_v19 = vpop.f32.mrf.mxu3 }
  0x97   :  { %1602 = vmatmul.msk.bf16.gmra.mxu0 %vm314_vm0, %v676_v50  ;;  %v2201_v1 = vpop.f32.mrf.mxu2  ;;  %v684_v10 = vpop.permute.xlu0 %683  ;;  %v717_v14 = vsel %vm707_vm1, %v686_v9, %v688_v6 }
  0x98   :  { %v716_v13 = vsel %vm707_vm1, %v684_v10, %v686_v9 }
  0x9d   :  { %v706_v40 = vpop.permute.xlu2 %705 }
  0x9e   :  { %v2192_v60 = vpop.f32.mrf.mxu0  ;;  %v692_v21 = vpop.permute.xlu1 %691 }
  0x9f   :  { %v2207_v7 = vpop.f32.mrf.mxu2  ;;  %v690_v22 = vpop.permute.xlu0 %689  ;;  %v719_v27 = vsel %vm707_vm1, %v692_v21, %v694_v18 }
  0xa0   :  { %v718_v26 = vsel %vm707_vm1, %v690_v22, %v692_v21  ;;  %v2239_v29 = vpop.f32.mrf.mxu3  ;;  %v2263_v48 = vpop.f32.mrf.mxu1 }
  0xa1   :  { %890 = vmatmul.bf16.gmra.mxu3 %v712_v55  ;;  %939 = vmatmul.bf16.gmra.mxu2 %v713_v56 }
  0xa2   :  { %416 = vmatmul.bf16.gmra.mxu1 %v1275_v57 }
  0xa6   :  { %v2205_v5 = vpop.f32.mrf.mxu0  ;;  %v698_v33 = vpop.permute.xlu1 %697 }
  0xa7   :  { %1603 = vmatmul.msk.bf16.gmra.mxu0 %vm314_vm0, %v682_v59  ;;  %v2220_v16 = vpop.f32.mrf.mxu2  ;;  %v696_v34 = vpop.permute.xlu0 %695  ;;  %v721_v38 = vsel %vm707_vm1, %v698_v33, %v700_v31 }
  0xa8   :  { %v2246_v35 = vpop.f32.mrf.mxu3  ;;  %v720_v37 = vsel %vm707_vm1, %v696_v34, %v698_v33  ;;  %v2269_v52 = vpop.f32.mrf.mxu1 }
  0xae   :  { %v2210_v8 = vpop.f32.mrf.mxu0  ;;  %v704_v44 = vpop.permute.xlu1 %703 }
  0xaf   :  { %v2227_v20 = vpop.f32.mrf.mxu2  ;;  %v702_v45 = vpop.permute.xlu0 %701  ;;  %v723_v47 = vsel %vm707_vm1, %v704_v44, %v706_v40 }
  0xb0   :  { %v2254_v41 = vpop.f32.mrf.mxu3  ;;  %v722_v46 = vsel %vm707_vm1, %v702_v45, %v704_v44  ;;  %v2275_v56 = vpop.f32.mrf.mxu1 }
  0xb1   :  { %895 = vmatmul.bf16.gmra.mxu3 %v714_v2  ;;  %944 = vmatmul.bf16.gmra.mxu2 %v715_v3 }
  0xb2   :  { %421 = vmatmul.bf16.gmra.mxu1 %v1287_v4 }
  0xb6   :  { %v2222_v17 = vpop.f32.mrf.mxu0 }
  0xb7   :  { %1604 = vmatmul.msk.bf16.gmra.mxu0 %vm314_vm0, %v688_v6  ;;  %v2241_v30 = vpop.f32.mrf.mxu2 }
  0xb8   :  { %v2265_v49 = vpop.f32.mrf.mxu3  ;;  %v2278_v3 = vpop.f32.mrf.mxu1 }
  0xbe   :  { %v2235_v25 = vpop.f32.mrf.mxu0 }
  0xbf   :  { %v2248_v36 = vpop.f32.mrf.mxu2 }
  0xc0   :  { %v2271_v53 = vpop.f32.mrf.mxu3 }
  0xc1   :  { %900 = vmatmul.bf16.gmra.mxu3 %v716_v13  ;;  %949 = vmatmul.bf16.gmra.mxu2 %v717_v14  ;;  %v2281_v14 = vpop.f32.mrf.mxu1 }
  0xc2   :  { %426 = vmatmul.bf16.gmra.mxu1 %v1299_v15 }
  0xc6   :  { %v2243_v32 = vpop.f32.mrf.mxu0 }
  0xc7   :  { %1605 = vmatmul.msk.bf16.gmra.mxu0 %vm314_vm0, %v694_v18  ;;  %v2257_v42 = vpop.f32.mrf.mxu2 }
  0xce   :  { %v2252_v39 = vpop.f32.mrf.mxu0 }
  0xcf   :  { %v2267_v50 = vpop.f32.mrf.mxu2 }
  0xd1   :  { %905 = vmatmul.bf16.gmra.mxu3 %v718_v26  ;;  %954 = vmatmul.bf16.gmra.mxu2 %v719_v27  ;;  %v2284_v26 = vpop.f32.mrf.mxu1 }
  0xd2   :  { %431 = vmatmul.bf16.gmra.mxu1 %v1311_v28 }
  0xd6   :  { %v2259_v43 = vpop.f32.mrf.mxu0 }
  0xd7   :  { %1606 = vmatmul.msk.bf16.gmra.mxu0 %vm314_vm0, %v700_v31  ;;  %v2273_v54 = vpop.f32.mrf.mxu2 }
  0xe1   :  { %910 = vmatmul.bf16.gmra.mxu3 %v720_v37  ;;  %959 = vmatmul.bf16.gmra.mxu2 %v721_v38  ;;  %v2288_v37 = vpop.f32.mrf.mxu1 }
  0xe7   :  { %1607 = vmatmul.msk.bf16.gmra.mxu0 %vm314_vm0, %v706_v40 }
  0xf1   :  { %915 = vmatmul.bf16.gmra.mxu3 %v722_v46  ;;  %964 = vmatmul.bf16.gmra.mxu2 %v723_v47 }
  0xf4   :  { %v979_v51 = vpop.f32.mrf.mxu0 }
  0xfc   :  { %v981_v55 = vpop.f32.mrf.mxu0 }
 0x104   :  { %v881_v57 = vpop.f32.mrf.mxu3  ;;  %v930_v59 = vpop.f32.mrf.mxu2 }
 0x105   :  { %v931_v61 = vadd.f32 %v930_v59, %v881_v57  ;;  %v984_v62 = vpop.f32.mrf.mxu0 }
 0x107   :  { %v980_v63 = vadd.f32 %v979_v51, %v931_v61 }
 0x109   :  { %1035 = vrot.lane.b32.xlu0 %v980_v63, %s1745_s0 }
 0x10c   :  { %v883_v0 = vpop.f32.mrf.mxu3  ;;  %v932_v2 = vpop.f32.mrf.mxu2 }
 0x10d   :  { %v933_v4 = vadd.f32 %v932_v2, %v883_v0  ;;  %v986_v6 = vpop.f32.mrf.mxu0 }
 0x10f   :  { %v982_v9 = vadd.f32 %v981_v55, %v933_v4  ;;  %v2291_v55 = vpop.f32.mrf.mxu1 }
 0x111   :  { %1037 = vrot.lane.b32.xlu1 %v982_v9, %s1745_s0 }
 0x114   :  { %v886_v10 = vpop.f32.mrf.mxu3  ;;  %v935_v11 = vpop.f32.mrf.mxu2 }
 0x115   :  { %v936_v12 = vadd.f32 %v935_v11, %v886_v10  ;;  %v989_v13 = vpop.f32.mrf.mxu0 }
 0x117   :  { %v985_v15 = vadd.f32 %v984_v62, %v936_v12  ;;  %v397_v2 = vpop.f32.mrf.mxu1 }
 0x119   :  { %1039 = vrot.lane.b32.xlu2 %v985_v15, %s1745_s0 }
 0x11c   :  { %v888_v18 = vpop.f32.mrf.mxu3  ;;  %v937_v21 = vpop.f32.mrf.mxu2 }
 0x11d   :  { %v938_v22 = vadd.f32 %v937_v21, %v888_v18  ;;  %v991_v23 = vpop.f32.mrf.mxu0 }
 0x11f   :  { %v987_v24 = vadd.f32 %v986_v6, %v938_v22 }
 0x121   :  { %1041 = vrot.lane.b32.xlu0 %v987_v24, %s1745_s0 }
 0x124   :  { %v891_v27 = vpop.f32.mrf.mxu3  ;;  %v940_v28 = vpop.f32.mrf.mxu2 }
 0x125   :  { %v941_v31 = vadd.f32 %v940_v28, %v891_v27  ;;  %v994_v33 = vpop.f32.mrf.mxu0 }
 0x127   :  { %v990_v34 = vadd.f32 %v989_v13, %v941_v31  ;;  %v2295_v13 = vpop.f32.mrf.mxu1 }
 0x129   :  { %1043 = vrot.lane.b32.xlu1 %v990_v34, %s1745_s0 }
 0x12c   :  { %v893_v38 = vpop.f32.mrf.mxu3  ;;  %v942_v40 = vpop.f32.mrf.mxu2 }
 0x12d   :  { %v943_v44 = vadd.f32 %v942_v40, %v893_v38  ;;  %v996_v45 = vpop.f32.mrf.mxu0 }
 0x12f   :  { %v992_v46 = vadd.f32 %v991_v23, %v943_v44  ;;  %v402_v24 = vpop.f32.mrf.mxu1 }
 0x131   :  { %1045 = vrot.lane.b32.xlu2 %v992_v46, %s1745_s0 }
 0x134   :  { %v896_v47 = vpop.f32.mrf.mxu3  ;;  %v945_v51 = vpop.f32.mrf.mxu2 }
 0x135   :  { %v946_v57 = vadd.f32 %v945_v51, %v896_v47  ;;  %v999_v61 = vpop.f32.mrf.mxu0 }
 0x137   :  { %v995_v59 = vadd.f32 %v994_v33, %v946_v57  ;;  %v2300_v44 = vpop.f32.mrf.mxu1 }
 0x139   :  { %1047 = vrot.lane.b32.xlu0 %v995_v59, %s1745_s0 }
 0x13c   :  { %v898_v62 = vpop.f32.mrf.mxu3  ;;  %v947_v63 = vpop.f32.mrf.mxu2 }
 0x13d   :  { %v948_v0 = vadd.f32 %v947_v63, %v898_v62  ;;  %v1001_v6 = vpop.f32.mrf.mxu0 }
 0x13f   :  { %v997_v4 = vadd.f32 %v996_v45, %v948_v0 }
 0x141   :  { %1049 = vrot.lane.b32.xlu1 %v997_v4, %s1745_s0 }
 0x144   :  { %v901_v9 = vpop.f32.mrf.mxu3  ;;  %v950_v10 = vpop.f32.mrf.mxu2 }
 0x145   :  { %v951_v11 = vadd.f32 %v950_v10, %v901_v9  ;;  %v1004_v15 = vpop.f32.mrf.mxu0  ;;  %v403_v9 = vadd.f32 %v402_v24, %v2210_v8 }
 0x147   :  { %v1000_v12 = vadd.f32 %v999_v61, %v951_v11  ;;  %v2303_v61 = vpop.f32.mrf.mxu1  ;;  %v2310_v11 = vld [vmem:[%s2479_s3 + $0x8] sm:$0xff]  }
 0x149   :  { %1051 = vrot.lane.b32.xlu2 %v1000_v12, %s1745_s0 }
 0x14c   :  { %v903_v18 = vpop.f32.mrf.mxu3  ;;  %v952_v21 = vpop.f32.mrf.mxu2 }
 0x14d   :  { %v953_v22 = vadd.f32 %v952_v21, %v903_v18  ;;  %v1006_v31 = vpop.f32.mrf.mxu0  ;;  %v452_v18 = vadd.f32 %v2207_v7, %v403_v9 }
 0x14f   :  { %v1002_v23 = vadd.f32 %v1001_v6, %v953_v22  ;;  %v409_v12 = vpop.f32.mrf.mxu1  ;;  %v1698_v22 = vunpack.c.l.bf16 %v2310_v11 }
 0x151   :  { %1053 = vrot.lane.b32.xlu0 %v1002_v23, %s1745_s0 }
 0x154   :  { %v906_v27 = vpop.f32.mrf.mxu3  ;;  %v955_v28 = vpop.f32.mrf.mxu2 }
 0x155   :  { %v956_v33 = vadd.f32 %v955_v28, %v906_v27  ;;  %v1009_v46 = vpop.f32.mrf.mxu0 }
 0x157   :  { %v1005_v34 = vadd.f32 %v1004_v15, %v956_v33  ;;  %v2316_v15 = vld [vmem:[%s2478_s2] ss:$0 sm:$0xff]  ;;  %v398_v33 = vadd.f32 %v397_v2, %v2192_v60 }
 0x159   :  { %1055 = vrot.lane.b32.xlu1 %v1005_v34, %s1745_s0 }
 0x15c   :  { %v908_v38 = vpop.f32.mrf.mxu3  ;;  %v957_v40 = vpop.f32.mrf.mxu2 }
 0x15d   :  { %v958_v45 = vadd.f32 %v957_v40, %v908_v38  ;;  %v1011_v63 = vpop.f32.mrf.mxu0  ;;  %v1693_v40 = vld [vmem:[%s2479_s3] sm:$0xff]  }
 0x15f   :  { %v1007_v47 = vadd.f32 %v1006_v31, %v958_v45  ;;  %v447_v45 = vadd.f32 %v2190_v58, %v398_v33  ;;  %v400_v58 = vadd.f32 %v2295_v13, %v2205_v5  ;;  %v410_v13 = vadd.f32 %v409_v12, %v2243_v32 }
 0x160   :  { %v405_v12 = vadd.f32 %v2300_v44, %v2222_v17  ;;  %v408_v17 = vadd.f32 %v2303_v61, %v2235_v25  ;;  %v1727_v61 = vld [vmem:[%s2479_s3 + $0x20] sm:$0xff]  }
 0x161   :  { %1057 = vrot.lane.b32.xlu2 %v1007_v47, %s1745_s0 }
 0x164   :  { %v911_v51 = vpop.f32.mrf.mxu3  ;;  %v960_v57 = vpop.f32.mrf.mxu2 }
 0x165   :  { %v961_v59 = vadd.f32 %v960_v57, %v911_v51  ;;  %v1014_v21 = vpop.f32.mrf.mxu0  ;;  %v1694_v51 = vunpack.c.l.bf16 %v1693_v40 }
 0x167   :  { %v1010_v62 = vadd.f32 %v1009_v46, %v961_v59  ;;  %v2328_v46 = vpop.f32.mrf.mxu1 }
 0x169   :  { %1059 = vrot.lane.b32.xlu0 %v1010_v62, %s1745_s0 }
 0x16c   :  { %v913_v0 = vpop.f32.mrf.mxu3  ;;  %v962_v4 = vpop.f32.mrf.mxu2 }
 0x16d   :  { %v963_v6 = vadd.f32 %v962_v4, %v913_v0  ;;  %v1016_v0 = vpop.f32.mrf.mxu0 }
 0x16f   :  { %v1012_v10 = vadd.f32 %v1011_v63, %v963_v6 }
 0x171   :  { %1061 = vrot.lane.b32.xlu1 %v1012_v10, %s1745_s0  ;;  %v449_v10 = vadd.f32 %v2201_v1, %v400_v58  ;;  %v1725_v1 = vld [vmem:[%s2479_s3 + $0x10] sm:$0xff]  }
 0x172   :  { %v1703_v33 = vunpack.c.h.bf16 %v1725_v1 }
 0x173   :  { %v1040_v8 = vpop.permute.xlu2 %1039 }
 0x174   :  { %v1085_v23 = vsel %vm314_vm0, %v452_v18, %v1040_v8  ;;  %v916_v24 = vpop.f32.mrf.mxu3  ;;  %v965_v27 = vpop.f32.mrf.mxu2 }
 0x175   :  { %v1105_v28 = vadd.f32 %v2316_v15, %v1085_v23  ;;  %v966_v31 = vadd.f32 %v965_v27, %v916_v24  ;;  %v414_v23 = vpop.f32.mrf.mxu1 }
 0x177   :  { %v1153_v34 = vadd.f32 %v1698_v22, %v1105_v28  ;;  %v1015_v38 = vadd.f32 %v1014_v21, %v966_v31  ;;  %v1695_v21 = vunpack.c.h.bf16 %v1693_v40  ;;  %v459_v28 = vadd.f32 %v2241_v30, %v410_v13 }
 0x178   :  { %v454_v30 = vadd.f32 %v2220_v16, %v405_v12  ;;  %v457_v16 = vadd.f32 %v2227_v20, %v408_v17 }
 0x179   :  { %v1169_v7 = vmax.f32 %v1153_v34, 0.0  ;;  %1063 = vrot.lane.b32.xlu2 %v1015_v38, %s1745_s0 }
 0x17b   :  { %v1185_v47 = vpack.c.bf16 %v1169_v7, %v1169_v7  ;;  %v1036_v57 = vpop.permute.xlu0 %1035 }
 0x17c   :  { %v1083_v59 = vsel %vm314_vm0, %v447_v45, %v1036_v57  ;;  %v918_v60 = vpop.f32.mrf.mxu3  ;;  %v967_v2 = vpop.f32.mrf.mxu2 }
 0x17d   :  { %1202 = vst.msk [vmem:[%s2480_s4 + $0x8] sm:$0xf] %vm1199_vm2, %v1185_v47  ;;  %v1103_v62 = vadd.f32 %v2316_v15, %v1083_v59  ;;  %v968_v63 = vadd.f32 %v967_v2, %v918_v60  ;;  %v417_v40 = vpop.f32.mrf.mxu1 }
 0x17f   :  { %v1151_v4 = vadd.f32 %v1694_v51, %v1103_v62  ;;  %v1017_v6 = vadd.f32 %v1016_v0, %v968_v63  ;;  %v1699_v51 = vunpack.c.h.bf16 %v2310_v11  ;;  %v1702_v11 = vunpack.c.l.bf16 %v1725_v1 }
 0x181   :  { %v1167_v9 = vmax.f32 %v1151_v4, 0.0  ;;  %1065 = vrot.lane.b32.xlu0 %v1017_v6, %s1745_s0  ;;  %v418_v6 = vadd.f32 %v417_v40, %v2263_v48 }
 0x183   :  { %v1183_v18 = vpack.c.bf16 %v1167_v9, %v1167_v9  ;;  %v1038_v22 = vpop.permute.xlu1 %1037  ;;  %v467_v9 = vadd.f32 %v2267_v50, %v418_v6  ;;  %v1726_v50 = vld [vmem:[%s2479_s3 + $0x18] sm:$0xff]  }
 0x184   :  { %v1084_v8 = vsel %vm314_vm0, %v449_v10, %v1038_v22  ;;  %v1707_v40 = vunpack.c.h.bf16 %v1726_v50 }
 0x185   :  { %1200 = vst.msk [vmem:[%s2480_s4] sm:$0xf] %vm1199_vm2, %v1183_v18  ;;  %v1104_v5 = vadd.f32 %v2316_v15, %v1084_v8  ;;  %v419_v2 = vpop.f32.mrf.mxu1 }
 0x187   :  { %v1152_v24 = vadd.f32 %v1695_v21, %v1104_v5  ;;  %v1710_v21 = vunpack.c.l.bf16 %v1727_v61  ;;  %v413_v5 = vadd.f32 %v2328_v46, %v2252_v39  ;;  %v415_v46 = vadd.f32 %v414_v23, %v2259_v43 }
 0x189   :  { %v1168_v27 = vmax.f32 %v1152_v24, 0.0  ;;  %v462_v1 = vadd.f32 %v2248_v36, %v413_v5  ;;  %v464_v12 = vadd.f32 %v2257_v42, %v415_v46  ;;  %v1728_v42 = vld [vmem:[%s2479_s3 + $0x28] sm:$0xff]  }
 0x18b   :  { %v1184_v31 = vpack.c.bf16 %v1168_v27, %v1168_v27  ;;  %v1046_v34 = vpop.permute.xlu2 %1045 }
 0x18c   :  { %v1088_v38 = vsel %vm314_vm0, %v459_v28, %v1046_v34  ;;  %v1706_v28 = vunpack.c.l.bf16 %v1726_v50 }
 0x18d   :  { %1201 = vst.msk [vmem:[%s2480_s4 + $0x4] sm:$0xf] %vm1199_vm2, %v1184_v31  ;;  %v1108_v32 = vadd.f32 %v2316_v15, %v1088_v38  ;;  %v422_v10 = vpop.f32.mrf.mxu1 }
 0x18f   :  { %v1156_v7 = vadd.f32 %v1703_v33, %v1108_v32 }
 0x191   :  { %v1172_v45 = vmax.f32 %v1156_v7, 0.0 }
 0x193   :  { %v1188_v47 = vpack.c.bf16 %v1172_v45, %v1172_v45  ;;  %v1042_v57 = vpop.permute.xlu0 %1041 }
 0x194   :  { %v1086_v59 = vsel %vm314_vm0, %v454_v30, %v1042_v57 }
 0x195   :  { %1205 = vst.msk [vmem:[%s2480_s4 + $0x14] sm:$0xf] %vm1199_vm2, %v1188_v47  ;;  %v1106_v60 = vadd.f32 %v2316_v15, %v1086_v59  ;;  %v424_v34 = vpop.f32.mrf.mxu1 }
 0x196   :  { %v425_v47 = vadd.f32 %v424_v34, %v2278_v3 }
 0x197   :  { %v1154_v44 = vadd.f32 %v1699_v51, %v1106_v60  ;;  %v1715_v60 = vunpack.c.h.bf16 %v1728_v42 }
 0x198   :  { %v474_v57 = vadd.f32 %v2239_v29, %v425_v47 }
 0x199   :  { %v1170_v62 = vmax.f32 %v1154_v44, 0.0 }
 0x19b   :  { %v1186_v63 = vpack.c.bf16 %v1170_v62, %v1170_v62  ;;  %v1044_v58 = vpop.permute.xlu1 %1043  ;;  %v420_v62 = vadd.f32 %v419_v2, %v2269_v52 }
 0x19c   :  { %v1087_v0 = vsel %vm314_vm0, %v457_v16, %v1044_v58 }
 0x19d   :  { %1203 = vst.msk [vmem:[%s2480_s4 + $0xc] sm:$0xf] %vm1199_vm2, %v1186_v63  ;;  %v1107_v4 = vadd.f32 %v2316_v15, %v1087_v0  ;;  %v427_v51 = vpop.f32.mrf.mxu1  ;;  %v469_v58 = vadd.f32 %v2273_v54, %v420_v62  ;;  %v1711_v0 = vunpack.c.h.bf16 %v1727_v61 }
 0x19f   :  { %v1155_v25 = vadd.f32 %v1702_v11, %v1107_v4 }
 0x1a1   :  { %v1171_v20 = vmax.f32 %v1155_v25, 0.0 }
 0x1a3   :  { %v1187_v18 = vpack.c.bf16 %v1171_v20, %v1171_v20  ;;  %v1052_v22 = vpop.permute.xlu2 %1051  ;;  %v423_v20 = vadd.f32 %v422_v10, %v2275_v56 }
 0x1a4   :  { %v1091_v8 = vsel %vm314_vm0, %v467_v9, %v1052_v22 }
 0x1a5   :  { %1204 = vst.msk [vmem:[%s2480_s4 + $0x10] sm:$0xf] %vm1199_vm2, %v1187_v18  ;;  %v1111_v48 = vadd.f32 %v2316_v15, %v1091_v8  ;;  %v429_v63 = vpop.f32.mrf.mxu1  ;;  %v472_v9 = vadd.f32 %v2225_v19, %v423_v20  ;;  %v1730_v19 = vld [vmem:[%s2479_s3 + $0x38] sm:$0xff]  }
 0x1a6   :  { %v1722_v50 = vunpack.c.l.bf16 %v1730_v19 }
 0x1a7   :  { %v1159_v13 = vadd.f32 %v1710_v21, %v1111_v48  ;;  %v1714_v21 = vunpack.c.l.bf16 %v1728_v42 }
 0x1a9   :  { %v1175_v24 = vmax.f32 %v1159_v13, 0.0 }
 0x1ab   :  { %v1191_v27 = vpack.c.bf16 %v1175_v24, %v1175_v24  ;;  %v1048_v31 = vpop.permute.xlu0 %1047 }
 0x1ac   :  { %v1089_v33 = vsel %vm314_vm0, %v462_v1, %v1048_v31  ;;  %v1729_v31 = vld [vmem:[%s2479_s3 + $0x30] sm:$0xff]  }
 0x1ad   :  { %1208 = vst.msk [vmem:[%s2480_s4 + $0x20] sm:$0xf] %vm1199_vm2, %v1191_v27  ;;  %v1109_v39 = vadd.f32 %v2316_v15, %v1089_v33  ;;  %v432_v18 = vpop.f32.mrf.mxu1  ;;  %v428_v27 = vadd.f32 %v427_v51, %v2281_v14 }
 0x1ae   :  { %v433_v48 = vadd.f32 %v432_v18, %v2288_v37 }
 0x1af   :  { %v1157_v38 = vadd.f32 %v1706_v28, %v1109_v39  ;;  %v477_v33 = vadd.f32 %v2246_v35, %v428_v27  ;;  %v1718_v39 = vunpack.c.l.bf16 %v1729_v31  ;;  %v1719_v35 = vunpack.c.h.bf16 %v1729_v31 }
 0x1b0   :  { %v482_v5 = vadd.f32 %v2265_v49, %v433_v48 }
 0x1b1   :  { %v1173_v32 = vmax.f32 %v1157_v38, 0.0 }
 0x1b3   :  { %v1189_v36 = vpack.c.bf16 %v1173_v32, %v1173_v32  ;;  %v1050_v7 = vpop.permute.xlu1 %1049  ;;  %v430_v32 = vadd.f32 %v429_v63, %v2284_v26 }
 0x1b4   :  { %v1090_v45 = vsel %vm314_vm0, %v464_v12, %v1050_v7 }
 0x1b5   :  { %1206 = vst.msk [vmem:[%s2480_s4 + $0x18] sm:$0xf] %vm1199_vm2, %v1189_v36  ;;  %v1110_v30 = vadd.f32 %v2316_v15, %v1090_v45  ;;  %v434_v42 = vpop.f32.mrf.mxu1 }
 0x1b7   :  { %v1158_v43 = vadd.f32 %v1707_v40, %v1110_v30  ;;  %v479_v40 = vadd.f32 %v2254_v41, %v430_v32  ;;  %v435_v41 = vadd.f32 %v434_v42, %v2291_v55 }
 0x1b9   :  { %v1174_v23 = vmax.f32 %v1158_v43, 0.0 }
 0x1bb   :  { %v1190_v59 = vpack.c.bf16 %v1174_v23, %v1174_v23  ;;  %v1058_v17 = vpop.permute.xlu2 %1057  ;;  %v484_v23 = vadd.f32 %v2271_v53, %v435_v41 }
 0x1bc   :  { %v1094_v44 = vsel %vm314_vm0, %v474_v57, %v1058_v17  ;;  %v1723_v57 = vunpack.c.h.bf16 %v1730_v19 }
 0x1bd   :  { %1207 = vst.msk [vmem:[%s2480_s4 + $0x1c] sm:$0xf] %vm1199_vm2, %v1190_v59  ;;  %v1114_v3 = vadd.f32 %v2316_v15, %v1094_v44 }
 0x1bf   :  { %v1162_v16 = vadd.f32 %v1715_v60, %v1114_v3 }
 0x1c1   :  { %v1178_v11 = vmax.f32 %v1162_v16, 0.0 }
 0x1c3   :  { %v1194_v29 = vpack.c.bf16 %v1178_v11, %v1178_v11  ;;  %v1054_v4 = vpop.permute.xlu0 %1053 }
 0x1c4   :  { %v1092_v6 = vsel %vm314_vm0, %v469_v58, %v1054_v4 }
 0x1c5   :  { %1211 = vst.msk [vmem:[%s2480_s4 + $0x2c] sm:$0xf] %vm1199_vm2, %v1194_v29  ;;  %v1112_v25 = vadd.f32 %v2316_v15, %v1092_v6 }
 0x1c7   :  { %v1160_v52 = vadd.f32 %v1711_v0, %v1112_v25 }
 0x1c9   :  { %v1176_v2 = vmax.f32 %v1160_v52, 0.0 }
 0x1cb   :  { %v1192_v54 = vpack.c.bf16 %v1176_v2, %v1176_v2  ;;  %v1056_v61 = vpop.permute.xlu1 %1055 }
 0x1cc   :  { %v1093_v22 = vsel %vm314_vm0, %v472_v9, %v1056_v61 }
 0x1cd   :  { %1209 = vst.msk [vmem:[%s2480_s4 + $0x24] sm:$0xf] %vm1199_vm2, %v1192_v54  ;;  %v1113_v8 = vadd.f32 %v2316_v15, %v1093_v22 }
 0x1cf   :  { %v1161_v56 = vadd.f32 %v1714_v21, %v1113_v8 }
 0x1d1   :  { %v1177_v10 = vmax.f32 %v1161_v56, 0.0 }
 0x1d3   :  { %v1193_v13 = vpack.c.bf16 %v1177_v10, %v1177_v10  ;;  %v1064_v24 = vpop.permute.xlu2 %1063 }
 0x1d4   :  { %v1097_v1 = vsel %vm314_vm0, %v482_v5, %v1064_v24 }
 0x1d5   :  { %1210 = vst.msk [vmem:[%s2480_s4 + $0x28] sm:$0xf] %vm1199_vm2, %v1193_v13  ;;  %v1117_v37 = vadd.f32 %v2316_v15, %v1097_v1 }
 0x1d7   :  { %v1165_v28 = vadd.f32 %v1722_v50, %v1117_v37 }
 0x1d9   :  { %v1181_v49 = vmax.f32 %v1165_v28, 0.0 }
 0x1db   :  { %v1197_v34 = vpack.c.bf16 %v1181_v49, %v1181_v49  ;;  %v1060_v46 = vpop.permute.xlu0 %1059 }
 0x1dc   :  { %v1095_v38 = vsel %vm314_vm0, %v477_v33, %v1060_v46 }
 0x1dd   :  { %1214 = vst.msk [vmem:[%s2480_s4 + $0x38] sm:$0xf] %vm1199_vm2, %v1197_v34  ;;  %v1115_v14 = vadd.f32 %v2316_v15, %v1095_v38 }
 0x1df   :  { %v1163_v12 = vadd.f32 %v1718_v39, %v1115_v14 }
 0x1e1   :  { %v1179_v36 = vmax.f32 %v1163_v12, 0.0 }
 0x1e3   :  { %v1195_v7 = vpack.c.bf16 %v1179_v36, %v1179_v36  ;;  %v1062_v45 = vpop.permute.xlu1 %1061 }
 0x1e4   :  { %v1096_v30 = vsel %vm314_vm0, %v479_v40, %v1062_v45 }
 0x1e5   :  { %1212 = vst.msk [vmem:[%s2480_s4 + $0x30] sm:$0xf] %vm1199_vm2, %v1195_v7  ;;  %v1116_v47 = vadd.f32 %v2316_v15, %v1096_v30 }
 0x1e7   :  { %v1164_v51 = vadd.f32 %v1719_v35, %v1116_v47 }
 0x1e9   :  { %v1180_v43 = vmax.f32 %v1164_v51, 0.0 }
 0x1eb   :  { %v1196_v26 = vpack.c.bf16 %v1180_v43, %v1180_v43 }
 0x1ed   :  { %1213 = vst.msk [vmem:[%s2480_s4 + $0x34] sm:$0xf] %vm1199_vm2, %v1196_v26 }
 0x1f3   :  { %v1066_v59 = vpop.permute.xlu0 %1065 }
 0x1f4   :  { %v1098_v60 = vsel %vm314_vm0, %v484_v23, %v1066_v59 }
 0x1f5   :  { %v1118_v17 = vadd.f32 %v2316_v15, %v1098_v60 }
 0x1f7   :  { %v1166_v44 = vadd.f32 %v1723_v57, %v1118_v17 }
 0x1f9   :  { %v1182_v3 = vmax.f32 %v1166_v44, 0.0 }
 0x1fb   :  { %v1198_v62 = vpack.c.bf16 %v1182_v3, %v1182_v3 }
 0x1fd   :  { %1215 = vst.msk [vmem:[%s2480_s4 + $0x3c] sm:$0xf] %vm1199_vm2, %v1198_v62 }

// kernel: _lambda_.19
= control target key start
LH: loop header
LB: loop body
LE: loop exit
PB: predicated region body
PF: predicated region fallthrough
CT: control target
= control target key end

     0   :  { %s865_s22 = smov 96   ;;  %vm197_vm0 = vcmask 261120   ;;  %vm344_vm1 = vcmask 785408   ;;  %vm540_vm2 = vcmask 523264   ;;  %s1090_s0 = inlined_call_operand.vmem [shape: bf16[32,576], index: 0, kind: input, shape index: {}]   ;;  %s1091_s1 = inlined_call_operand.vmem [shape: bf16[2,288,64], index: 1, kind: input, shape index: {}]   ;;  %s1092_s2 = inlined_call_operand.vmem [shape: f32[1,128], index: 2, kind: input, shape index: {}]   ;;  %s1093_s3 = inlined_call_operand.vmem [shape: bf16[32,128], index: 3, kind: output, shape index: {}]  }
   0x1   :  { %v713_v0 = vld [vmem:[%s1090_s0 + $0x10] sm:$0xf]  ;;  %v827_v1 = vld [vmem:[%s1090_s0 + $0x20] sm:$0xf0]  ;;  %v705_v2 = vld [vmem:[%s1090_s0 + $0x8] sm:$0xf] }
   0x2   :  { %v714_v3 = vor.u32 %v827_v1, %v713_v0  ;;  %v826_v4 = vld [vmem:[%s1090_s0 + $0x18] sm:$0xf0]  ;;  %v828_v6 = vld [vmem:[%s1090_s0 + $0x34] sm:$0xf]  ;;  %v717_v7 = vld [vmem:[%s1090_s0 + $0x30] sm:$0xf] }
   0x3   :  { %v706_v5 = vor.u32 %v826_v4, %v705_v2  ;;  %v719_v8 = vld [vmem:[%s1090_s0 + $0x44] sm:$0xf0]  ;;  %v829_v9 = vld [vmem:[%s1090_s0 + $0x40] sm:$0xf0]  ;;  %v814_v11 = vld [vmem:[%s1091_s1 + $0x38] sm:$0xff] }
   0x4   :  { %336 = vrot.lane.b32.xlu1 %v714_v3, %s865_s22  ;;  %v722_v10 = vor.u32 %v828_v6, %v719_v8  ;;  %v822_v12 = vld [vmem:[%s1091_s1 + $0x78] sm:$0xff]  ;;  %v825_v13 = vld [vmem:[%s1090_s0 + $0xc] sm:$0xf]  ;;  %v707_v14 = vld [vmem:[%s1090_s0 + $0x1c] sm:$0xf0]  ;;  %204 = vmatpush.bf16.msra.mxu0 %v814_v11  ;;  %v718_v16 = vor.u32 %v829_v9, %v717_v7 }
   0x5   :  { %332 = vrot.lane.b32.xlu0 %v706_v5, %s865_s22  ;;  %v813_v15 = vld [vmem:[%s1091_s1 + $0x30] sm:$0xff]  ;;  %v725_v17 = vld [vmem:[%s1090_s0 + $0x38] sm:$0xf]  ;;  %v830_v18 = vld [vmem:[%s1090_s0 + $0x48] sm:$0xf0]  ;;  %223 = vmatpush.bf16.msra.mxu1 %v822_v12  ;;  %v710_v20 = vor.u32 %v825_v13, %v707_v14 }
   0x6   :  { %340 = vrot.lane.b32.xlu2 %v722_v10, %s865_s22  ;;  %v821_v19 = vld [vmem:[%s1091_s1 + $0x70] sm:$0xff]  ;;  %v824_v21 = vld [vmem:[%s1091_s1 + $0x88] sm:$0xff]  ;;  %v726_v22 = vor.u32 %v830_v18, %v725_v17  ;;  %v823_v25 = vld [vmem:[%s1091_s1 + $0x80] sm:$0xff] }
   0x7   :  { %v812_v23 = vld [vmem:[%s1091_s1 + $0x28] sm:$0xff]  ;;  %248 = vmatpush.bf16.msra.mxu2 %v824_v21  ;;  %v803_v27 = vld [vmem:[%s1090_s0 + $0x18] sm:$0xf0]  ;;  %v811_v30 = vld [vmem:[%s1091_s1 + $0x20] sm:$0xff] }
   0x8   :  { %205 = vmatpush.bf16.msra.mxu0 %v813_v15  ;;  %v820_v24 = vld [vmem:[%s1091_s1 + $0x68] sm:$0xff]  ;;  %v819_v32 = vld [vmem:[%s1091_s1 + $0x60] sm:$0xff]  ;;  %v810_v35 = vld [vmem:[%s1091_s1 + $0x18] sm:$0xff] }
   0x9   :  { %224 = vmatpush.bf16.msra.mxu1 %v821_v19  ;;  %v579_v26 = vld [vmem:[%s1090_s0 + $0x8] sm:$0xf]  ;;  %v845_v33 = vld [vmem:[%s1091_s1 + $0x100] sm:$0xff]  ;;  %v818_v36 = vld [vmem:[%s1091_s1 + $0x58] sm:$0xff] }
   0xa   :  { %v846_v28 = vld [vmem:[%s1091_s1 + $0x108] sm:$0xff]  ;;  %v580_v31 = vor.u32 %v803_v27, %v579_v26  ;;  %v837_v34 = vld [vmem:[%s1091_s1 + $0xc0] sm:$0xff]  ;;  %v844_v37 = vld [vmem:[%s1091_s1 + $0xf8] sm:$0xff] }
   0xb   :  { %v838_v29 = vld [vmem:[%s1091_s1 + $0xc8] sm:$0xff]  ;;  %249 = vmatpush.bf16.msra.mxu2 %v823_v25  ;;  %v809_v38 = vld [vmem:[%s1091_s1 + $0x10] sm:$0xff]  ;;  %v836_v39 = vld [vmem:[%s1091_s1 + $0xb8] sm:$0xff] }
   0xc   :  { %338 = vrot.lane.b32.xlu1 %v718_v16, %s865_s22  ;;  %206 = vmatpush.bf16.msra.mxu0 %v812_v23  ;;  %v817_v40 = vld [vmem:[%s1091_s1 + $0x50] sm:$0xff]  ;;  %v808_v43 = vld [vmem:[%s1091_s1 + $0x8] sm:$0xff]  ;;  %v806_v46 = vld [vmem:[%s1090_s0 + $0x40] sm:$0xf0] }
   0xd   :  { %334 = vrot.lane.b32.xlu0 %v710_v20, %s865_s22  ;;  %225 = vmatpush.bf16.msra.mxu1 %v820_v24  ;;  %v843_v41 = vld [vmem:[%s1091_s1 + $0xf0] sm:$0xff]  ;;  %v816_v44 = vld [vmem:[%s1091_s1 + $0x48] sm:$0xff]  ;;  %v807_v49 = vld [vmem:[%s1091_s1] sm:$0xff] }
   0xe   :  { %342 = vrot.lane.b32.xlu2 %v726_v22, %s865_s22  ;;  %467 = vmatpush.bf16.msra.mxu3 %v838_v29  ;;  %v835_v42 = vld [vmem:[%s1091_s1 + $0xb0] sm:$0xff]  ;;  %v842_v47 = vld [vmem:[%s1091_s1 + $0xe8] sm:$0xff]  ;;  %v571_v50 = vld [vmem:[%s1090_s0] sm:$0xf] }
   0xf   :  { %486 = vmatpush.bf16.msrb.mxu2 %v846_v28  ;;  %v591_v45 = vld [vmem:[%s1090_s0 + $0x30] sm:$0xf]  ;;  %v834_v48 = vld [vmem:[%s1091_s1 + $0xa8] sm:$0xff]  ;;  %v802_v51 = vld [vmem:[%s1090_s0 + $0x10] sm:$0xf0] }
  0x10   :  { %207 = vmatpush.bf16.msra.mxu0 %v811_v30  ;;  %665 = vmatmul.msk.bf16.vlgmr.msra.gmra.mxu2 %vm197_vm0, %v580_v31  ;;  %v815_v52 = vld [vmem:[%s1091_s1 + $0x40] sm:$0xff]  ;;  %v592_v53 = vor.u32 %v806_v46, %v591_v45  ;;  %v573_v55 = vld [vmem:[%s1090_s0 + $0x14] sm:$0xf0]  ;;  %v572_v59 = vor.u32 %v802_v51, %v571_v50  ;;  %v847_v61 = vld [vmem:[%s1091_s1 + $0x110] sm:$0xff] }
  0x11   :  { %226 = vmatpush.bf16.msra.mxu1 %v819_v32  ;;  %v801_v54 = vld [vmem:[%s1090_s0 + $0x4] sm:$0xf]  ;;  %v848_v56 = vld [vmem:[%s1091_s1 + $0x118] sm:$0xff]  ;;  %v583_v62 = vld [vmem:[%s1090_s0 + $0x28] sm:$0xf] }
  0x12   :  { %468 = vmatpush.bf16.msra.mxu3 %v837_v34  ;;  %v841_v57 = vld [vmem:[%s1091_s1 + $0xe0] sm:$0xff]  ;;  %v576_v60 = vor.u32 %v801_v54, %v573_v55  ;;  %v805_v63 = vld [vmem:[%s1090_s0 + $0x38] sm:$0xf0]  ;;  %v804_v0 = vld [vmem:[%s1090_s0 + $0x2c] sm:$0xf] }
  0x13   :  { %487 = vmatpush.bf16.msrb.mxu2 %v845_v33  ;;  %v833_v58 = vld [vmem:[%s1091_s1 + $0xa0] sm:$0xff]  ;;  %v584_v2 = vor.u32 %v805_v63, %v583_v62  ;;  %v840_v4 = vld [vmem:[%s1091_s1 + $0xd8] sm:$0xff]  ;;  %v839_v6 = vld [vmem:[%s1091_s1 + $0xd0] sm:$0xff] }
  0x14   :  { %208 = vmatpush.bf16.msra.mxu0 %v810_v35  ;;  %v585_v1 = vld [vmem:[%s1090_s0 + $0x3c] sm:$0xf0]  ;;  %v832_v5 = vld [vmem:[%s1091_s1 + $0x98] sm:$0xff]  ;;  %v831_v7 = vld [vmem:[%s1091_s1 + $0x90] sm:$0xff]  ;;  %s866_s1 = smov 64  }
  0x15   :  { %227 = vmatpush.bf16.msra.mxu1 %v818_v36  ;;  %v588_v3 = vor.u32 %v804_v0, %v585_v1 }
  0x16   :  { %469 = vmatpush.bf16.msra.mxu3 %v836_v39 }
  0x17   :  { %488 = vmatpush.bf16.msrb.mxu2 %v844_v37 }
  0x18   :  { %209 = vmatpush.bf16.msra.mxu0 %v809_v38 }
  0x19   :  { %228 = vmatpush.bf16.msra.mxu1 %v817_v40 }
  0x1a   :  { %470 = vmatpush.bf16.msra.mxu3 %v835_v42 }
  0x1b   :  { %489 = vmatpush.bf16.msrb.mxu2 %v843_v41 }
  0x1c   :  { %210 = vmatpush.bf16.msra.mxu0 %v808_v43 }
  0x1d   :  { %229 = vmatpush.bf16.msra.mxu1 %v816_v44 }
  0x1e   :  { %471 = vmatpush.bf16.msra.mxu3 %v834_v48 }
  0x1f   :  { %490 = vmatpush.bf16.msrb.mxu2 %v842_v47 }
  0x20   :  { %211 = vmatpush.bf16.msra.mxu0 %v807_v49  ;;  %666 = vmatmul.msk.bf16.gmra.mxu2 %vm197_vm0, %v592_v53 }
  0x21   :  { %230 = vmatpush.bf16.msra.mxu1 %v815_v52 }
  0x22   :  { %472 = vmatpush.bf16.msra.mxu3 %v833_v58 }
  0x23   :  { %491 = vmatpush.bf16.msrb.mxu2 %v841_v57  ;;  %212 = vmatmul.bf16.vlgmr.msra.gmra.mxu0 %v572_v59  ;;  %v864_v59 = vld [vmem:[%s1092_s2] ss:$0 sm:$0xff] }
  0x24   :  { %511 = vmatpush.bf16.msrb.mxu0 %v848_v56  ;;  %231 = vmatmul.bf16.vlgmr.msra.gmra.mxu1 %v576_v60 }
  0x25   :  { %860 = vmatpush.bf16.msrb.mxu1 %v848_v56 }
  0x26   :  { %473 = vmatpush.bf16.msra.mxu3 %v832_v5 }
  0x27   :  { %492 = vmatpush.bf16.msrb.mxu2 %v840_v4 }
  0x28   :  { %512 = vmatpush.bf16.msrb.mxu0 %v847_v61 }
  0x29   :  { %861 = vmatpush.bf16.msrb.mxu1 %v847_v61 }
  0x2a   :  { %474 = vmatpush.bf16.msra.mxu3 %v831_v7 }
  0x2b   :  { %493 = vmatpush.bf16.msrb.mxu2 %v839_v6 }
  0x33   :  { %217 = vmatmul.bf16.gmra.mxu0 %v584_v2 }
  0x34   :  { %236 = vmatmul.bf16.gmra.mxu1 %v588_v3 }
  0x60   :  { %v341_v8 = vpop.permute.xlu2 %340 }
  0x68   :  { %v343_v9 = vpop.permute.xlu2 %342 }
  0x69   :  { %800 = vmatmul.msk.bf16.vlgmr.msrb.gmra.mxu1 %vm197_vm0, %v343_v9  ;;  %v348_v17 = vsel %vm344_vm1, %v341_v8, %v343_v9 }
  0x76   :  { %v337_v10 = vpop.permute.xlu1 %336 }
  0x77   :  { %v333_v11 = vpop.permute.xlu0 %332  ;;  %799 = vmatmul.msk.bf16.vlgmr.msrb.gmra.mxu0 %vm197_vm0, %v337_v10 }
  0x7e   :  { %v339_v15 = vpop.permute.xlu1 %338 }
  0x7f   :  { %v335_v12 = vpop.permute.xlu0 %334  ;;  %v347_v16 = vsel %vm344_vm1, %v339_v15, %v341_v8 }
  0x80   :  { %v345_v13 = vsel %vm344_vm1, %v333_v11, %v335_v12  ;;  %v346_v14 = vsel %vm344_vm1, %v335_v12, %v337_v10 }
  0x81   :  { %475 = vmatmul.bf16.vlgmr.msra.gmra.mxu3 %v345_v13  ;;  %494 = vmatmul.bf16.vlgmr.msrb.gmra.mxu2 %v346_v14 }
  0x91   :  { %480 = vmatmul.bf16.gmra.mxu3 %v347_v16  ;;  %499 = vmatmul.bf16.gmra.mxu2 %v348_v17 }
  0x93   :  { %v251_v18 = vpop.f32.mrf.mxu2 }
  0x9b   :  { %v253_v25 = vpop.f32.mrf.mxu2 }
  0xa0   :  { %v213_v19 = vpop.f32.mrf.mxu0 }
  0xa1   :  { %v232_v20 = vpop.f32.mrf.mxu1 }
  0xa2   :  { %v233_v21 = vadd.f32 %v232_v20, %v213_v19 }
  0xa3   :  { %v256_v31 = vpop.f32.mrf.mxu2 }
  0xa4   :  { %v252_v22 = vadd.f32 %v251_v18, %v233_v21 }
  0xa8   :  { %v215_v23 = vpop.f32.mrf.mxu0 }
  0xa9   :  { %v234_v24 = vpop.f32.mrf.mxu1 }
  0xaa   :  { %v235_v26 = vadd.f32 %v234_v24, %v215_v23 }
  0xab   :  { %v258_v36 = vpop.f32.mrf.mxu2 }
  0xac   :  { %v254_v27 = vadd.f32 %v253_v25, %v235_v26 }
  0xb0   :  { %v218_v28 = vpop.f32.mrf.mxu0 }
  0xb1   :  { %v237_v29 = vpop.f32.mrf.mxu1 }
  0xb2   :  { %v238_v30 = vadd.f32 %v237_v29, %v218_v28 }
  0xb4   :  { %v257_v32 = vadd.f32 %v256_v31, %v238_v30 }
  0xb8   :  { %v220_v33 = vpop.f32.mrf.mxu0 }
  0xb9   :  { %v239_v34 = vpop.f32.mrf.mxu1 }
  0xba   :  { %v240_v35 = vadd.f32 %v239_v34, %v220_v33 }
  0xbc   :  { %v259_v5 = vadd.f32 %v258_v36, %v240_v35 }
  0xe6   :  { %v519_v47 = vpop.f32.mrf.mxu1 }
  0xee   :  { %v521_v55 = vpop.f32.mrf.mxu1 }
  0xf4   :  { %v514_v37 = vpop.f32.mrf.mxu0 }
  0xfc   :  { %v516_v45 = vpop.f32.mrf.mxu0 }
 0x104   :  { %v476_v38 = vpop.f32.mrf.mxu3  ;;  %v495_v39 = vpop.f32.mrf.mxu2 }
 0x105   :  { %v496_v40 = vadd.f32 %v495_v39, %v476_v38 }
 0x107   :  { %v515_v41 = vadd.f32 %v514_v37, %v496_v40 }
 0x109   :  { %528 = vrot.lane.b32.xlu0 %v515_v41, %s866_s1 }
 0x10c   :  { %v478_v42 = vpop.f32.mrf.mxu3  ;;  %v497_v43 = vpop.f32.mrf.mxu2 }
 0x10d   :  { %v498_v44 = vadd.f32 %v497_v43, %v478_v42 }
 0x10f   :  { %v517_v46 = vadd.f32 %v516_v45, %v498_v44 }
 0x111   :  { %530 = vrot.lane.b32.xlu1 %v517_v46, %s866_s1 }
 0x114   :  { %v481_v48 = vpop.f32.mrf.mxu3  ;;  %v500_v49 = vpop.f32.mrf.mxu2 }
 0x115   :  { %v501_v50 = vadd.f32 %v500_v49, %v481_v48 }
 0x117   :  { %v520_v51 = vadd.f32 %v519_v47, %v501_v50 }
 0x119   :  { %532 = vrot.lane.b32.xlu2 %v520_v51, %s866_s1 }
 0x11c   :  { %v483_v52 = vpop.f32.mrf.mxu3  ;;  %v502_v53 = vpop.f32.mrf.mxu2 }
 0x11d   :  { %v503_v54 = vadd.f32 %v502_v53, %v483_v52 }
 0x11f   :  { %v522_v56 = vadd.f32 %v521_v55, %v503_v54 }
 0x121   :  { %534 = vrot.lane.b32.xlu0 %v522_v56, %s866_s1 }
 0x173   :  { %v533_v3 = vpop.permute.xlu2 %532 }
 0x174   :  { %v543_v4 = vsel %vm540_vm2, %v257_v32, %v533_v3 }
 0x175   :  { %v551_v6 = vadd.f32 %v864_v59, %v543_v4 }
 0x177   :  { %v555_v10 = vmax.f32 %v551_v6, 0.0 }
 0x17b   :  { %v529_v57 = vpop.permute.xlu0 %528 }
 0x17c   :  { %v541_v58 = vsel %vm540_vm2, %v252_v22, %v529_v57 }
 0x17d   :  { %v549_v60 = vadd.f32 %v864_v59, %v541_v58 }
 0x17f   :  { %v553_v0 = vmax.f32 %v549_v60, 0.0 }
 0x183   :  { %v531_v61 = vpop.permute.xlu1 %530 }
 0x184   :  { %v542_v62 = vsel %vm540_vm2, %v254_v27, %v531_v61 }
 0x185   :  { %v550_v63 = vadd.f32 %v864_v59, %v542_v62 }
 0x187   :  { %v554_v1 = vmax.f32 %v550_v63, 0.0 }
 0x189   :  { %v852_v2 = vpack.c.bf16 %v554_v1, %v553_v0 }
 0x18b   :  { %853 = vst [vmem:[%s1093_s3] sm:$0xff] %v852_v2  }
 0x193   :  { %v535_v7 = vpop.permute.xlu0 %534 }
 0x194   :  { %v544_v8 = vsel %vm540_vm2, %v259_v5, %v535_v7 }
 0x195   :  { %v552_v9 = vadd.f32 %v864_v59, %v544_v8 }
 0x197   :  { %v556_v11 = vmax.f32 %v552_v9, 0.0 }
 0x199   :  { %v857_v12 = vpack.c.bf16 %v556_v11, %v555_v10 }
 0x19b   :  { %859 = vst [vmem:[%s1093_s3 + $0x8] sm:$0xff] %v857_v12  }

// kernel: _lambda_.20
= control target key start
LH: loop header
LB: loop body
LE: loop exit
PB: predicated region body
PF: predicated region fallthrough
CT: control target
= control target key end

     0   :  { %s214_s16 = smov 96   ;;  %vm45_vm0 = vcmask 261120   ;;  %vm133_vm1 = vcmask 523264   ;;  %s267_s0 = inlined_call_operand.vmem [shape: bf16[32,64], index: 0, kind: input, shape index: {}]   ;;  %s268_s1 = inlined_call_operand.vmem [shape: bf16[2,32,64], index: 1, kind: input, shape index: {}]   ;;  %s269_s2 = inlined_call_operand.vmem [shape: f32[1,128], index: 2, kind: input, shape index: {}]   ;;  %s270_s3 = inlined_call_operand.vmem [shape: bf16[32,128], index: 3, kind: output, shape index: {}]  }
   0x1   :  { %v191_v0 = vld [vmem:[%s267_s0 + $0x8] sm:$0xff]  ;;  %v195_v1 = vld [vmem:[%s268_s1 + $0x18] sm:$0xff]  ;;  %v194_v2 = vld [vmem:[%s268_s1 + $0x10] sm:$0xff] }
   0x2   :  { %78 = vrot.lane.b32.xlu0 %v191_v0, %s214_s16  ;;  %209 = vmatpush.bf16.msra.mxu3 %v195_v1  ;;  %v190_v3 = vld [vmem:[%s267_s0] sm:$0xff]  ;;  %v193_v4 = vld [vmem:[%s268_s1 + $0x8] sm:$0xff]  ;;  %s215_s0 = smov 64  }
   0x3   :  { %104 = vmatpush.bf16.msra.mxu1 %v195_v1  ;;  %207 = vmatpush.bf16.msra.mxu2 %v193_v4  ;;  %v192_v5 = vld [vmem:[%s268_s1] sm:$0xff] }
   0x4   :  { %58 = vmatpush.bf16.msra.mxu0 %v193_v4  ;;  %v213_v14 = vld [vmem:[%s269_s2] ss:$0 sm:$0xff] }
   0x6   :  { %210 = vmatpush.bf16.msra.mxu3 %v194_v2 }
   0x7   :  { %105 = vmatpush.bf16.msra.mxu1 %v194_v2  ;;  %208 = vmatpush.bf16.msra.mxu2 %v192_v5 }
   0x8   :  { %59 = vmatpush.bf16.msra.mxu0 %v192_v5 }
   0xa   :  { %76 = vrot.lane.b32.xlu0 %v190_v3, %s214_s16  ;;  %175 = vmatmul.msk.bf16.vlgmr.msra.gmra.mxu2 %vm45_vm0, %v191_v0 }
   0xb   :  { %174 = vmatmul.msk.bf16.vlgmr.msra.gmra.mxu0 %vm45_vm0, %v190_v3 }
  0x74   :  { %v79_v6 = vpop.permute.xlu0 %78 }
  0x75   :  { %189 = vmatmul.msk.bf16.vlgmr.msra.gmra.mxu3 %vm45_vm0, %v79_v6 }
  0x7c   :  { %v77_v7 = vpop.permute.xlu0 %76 }
  0x7d   :  { %188 = vmatmul.msk.bf16.vlgmr.msra.gmra.mxu1 %vm45_vm0, %v77_v7 }
  0x88   :  { %v61_v22 = vpop.f32.mrf.mxu0 }
  0x8d   :  { %v66_v12 = vpop.f32.mrf.mxu2 }
  0x90   :  { %v63_v25 = vpop.f32.mrf.mxu0 }
  0x95   :  { %v68_v15 = vpop.f32.mrf.mxu2 }
  0xf8   :  { %v112_v8 = vpop.f32.mrf.mxu3 }
  0xf9   :  { %125 = vrot.lane.b32.xlu2 %v112_v8, %s215_s0 }
  0xfa   :  { %v107_v9 = vpop.f32.mrf.mxu1 }
  0xfb   :  { %121 = vrot.lane.b32.xlu1 %v107_v9, %s215_s0 }
 0x100   :  { %v114_v10 = vpop.f32.mrf.mxu3 }
 0x101   :  { %127 = vrot.lane.b32.xlu2 %v114_v10, %s215_s0 }
 0x102   :  { %v109_v11 = vpop.f32.mrf.mxu1 }
 0x103   :  { %123 = vrot.lane.b32.xlu1 %v109_v11, %s215_s0 }
 0x153   :  { %v126_v13 = vpop.permute.xlu2 %125 }
 0x154   :  { %v136_v16 = vsel %vm133_vm1, %v66_v12, %v126_v13 }
 0x155   :  { %v144_v19 = vadd.f32 %v213_v14, %v136_v16 }
 0x15b   :  { %v128_v17 = vpop.permute.xlu2 %127 }
 0x15c   :  { %v137_v18 = vsel %vm133_vm1, %v68_v15, %v128_v17 }
 0x15d   :  { %v145_v20 = vadd.f32 %v213_v14, %v137_v18 }
 0x15f   :  { %v204_v21 = vpack.c.bf16 %v145_v20, %v144_v19 }
 0x161   :  { %206 = vst [vmem:[%s270_s3 + $0x8] sm:$0xff] %v204_v21  }
 0x16d   :  { %v122_v23 = vpop.permute.xlu1 %121 }
 0x16e   :  { %v134_v24 = vsel %vm133_vm1, %v61_v22, %v122_v23 }
 0x16f   :  { %v142_v28 = vadd.f32 %v213_v14, %v134_v24 }
 0x175   :  { %v124_v26 = vpop.permute.xlu1 %123 }
 0x176   :  { %v135_v27 = vsel %vm133_vm1, %v63_v25, %v124_v26 }
 0x177   :  { %v143_v29 = vadd.f32 %v213_v14, %v135_v27 }
 0x179   :  { %v199_v30 = vpack.c.bf16 %v143_v29, %v142_v28 }
 0x17b   :  { %200 = vst [vmem:[%s270_s3] sm:$0xff] %v199_v30  }

// kernel: _lambda_.21
= control target key start
LH: loop header
LB: loop body
LE: loop exit
PB: predicated region body
PF: predicated region fallthrough
CT: control target
= control target key end

     0   :  { %s1577_s23 = smov 64   ;;  %vm368_vm0 = vcmask 523264   ;;  %s1994_s0 = inlined_call_operand.vmem [shape: bf16[32,1152], index: 0, kind: input, shape index: {}]   ;;  %s1995_s1 = inlined_call_operand.vmem [shape: bf16[2,576,64], index: 1, kind: input, shape index: {}]   ;;  %s1996_s2 = inlined_call_operand.vmem [shape: f32[1,128], index: 2, kind: input, shape index: {}]   ;;  %s1997_s3 = inlined_call_operand.vmem [shape: bf16[32,128], index: 3, kind: input, shape index: {}]   ;;  %s1998_s4 = inlined_call_operand.vmem [shape: bf16[32,128], index: 4, kind: output, shape index: {}]  }
   0x1   :  { %v1498_v0 = vld [vmem:[%s1994_s0 + $0x1c] sm:$0xf]  ;;  %v1277_v1 = vld [vmem:[%s1994_s0 + $0x3c] sm:$0xf0]  ;;  %v1497_v2 = vld [vmem:[%s1994_s0 + $0x14] sm:$0xf] }
   0x2   :  { %v1280_v3 = vor.u32 %v1498_v0, %v1277_v1  ;;  %v1269_v4 = vld [vmem:[%s1994_s0 + $0x34] sm:$0xf0]  ;;  %v1267_v6 = vld [vmem:[%s1994_s0 + $0x10] sm:$0xf]  ;;  %v1499_v7 = vld [vmem:[%s1994_s0 + $0x30] sm:$0xf0] }
   0x3   :  { %v1272_v5 = vor.u32 %v1497_v2, %v1269_v4  ;;  %v1275_v8 = vld [vmem:[%s1994_s0 + $0x18] sm:$0xf]  ;;  %v1500_v10 = vld [vmem:[%s1994_s0 + $0x38] sm:$0xf0]  ;;  %v1289_v12 = vld [vmem:[%s1994_s0 + $0x7c] sm:$0xf0]  ;;  %v1268_v15 = vor.u32 %v1499_v7, %v1267_v6 }
   0x4   :  { %603 = vrot.lane.b32.xlu1 %v1280_v3, %s1577_s23  ;;  %v1468_v9 = vld [vmem:[%s1995_s1 + $0x38] sm:$0xff]  ;;  %v1467_v14 = vld [vmem:[%s1995_s1 + $0x30] sm:$0xff]  ;;  %v1276_v16 = vor.u32 %v1500_v10, %v1275_v8  ;;  %v1295_v17 = vld [vmem:[%s1994_s0 + $0x60] sm:$0xf] }
   0x5   :  { %599 = vrot.lane.b32.xlu0 %v1272_v5, %s1577_s23  ;;  %v1502_v11 = vld [vmem:[%s1994_s0 + $0x5c] sm:$0xf]  ;;  %375 = vmatpush.bf16.msra.mxu0 %v1468_v9  ;;  %v1505_v19 = vld [vmem:[%s1994_s0 + $0x80] sm:$0xf0]  ;;  %v1466_v22 = vld [vmem:[%s1995_s1 + $0x28] sm:$0xff] }
   0x6   :  { %v1292_v13 = vor.u32 %v1502_v11, %v1289_v12  ;;  %v1484_v18 = vld [vmem:[%s1995_s1 + $0xb8] sm:$0xff]  ;;  %v1483_v23 = vld [vmem:[%s1995_s1 + $0xb0] sm:$0xff]  ;;  %v1296_v27 = vor.u32 %v1505_v19, %v1295_v17  ;;  %v1503_v29 = vld [vmem:[%s1994_s0 + $0x64] sm:$0xf] }
   0x7   :  { %v1492_v20 = vld [vmem:[%s1995_s1 + $0xf8] sm:$0xff]  ;;  %413 = vmatpush.bf16.msra.mxu2 %v1484_v18  ;;  %v1491_v24 = vld [vmem:[%s1995_s1 + $0xf0] sm:$0xff]  ;;  %v1297_v30 = vld [vmem:[%s1994_s0 + $0x84] sm:$0xf0] }
   0x8   :  { %609 = vrot.lane.b32.xlu2 %v1292_v13, %s1577_s23  ;;  %v1476_v21 = vld [vmem:[%s1995_s1 + $0x78] sm:$0xff]  ;;  %432 = vmatpush.bf16.msra.mxu3 %v1492_v20  ;;  %v1475_v28 = vld [vmem:[%s1995_s1 + $0x70] sm:$0xff]  ;;  %v1465_v31 = vld [vmem:[%s1995_s1 + $0x20] sm:$0xff]  ;;  %v1300_v35 = vor.u32 %v1503_v29, %v1297_v30 }
   0x9   :  { %376 = vmatpush.bf16.msra.mxu0 %v1467_v14  ;;  %v1287_v25 = vld [vmem:[%s1994_s0 + $0x58] sm:$0xf]  ;;  %v1504_v26 = vld [vmem:[%s1994_s0 + $0x78] sm:$0xf0]  ;;  %394 = vmatpush.bf16.msra.mxu1 %v1476_v21  ;;  %v1482_v32 = vld [vmem:[%s1995_s1 + $0xa8] sm:$0xff] }
   0xa   :  { %v1288_v33 = vor.u32 %v1504_v26, %v1287_v25  ;;  %v1490_v34 = vld [vmem:[%s1995_s1 + $0xe8] sm:$0xff]  ;;  %v1464_v39 = vld [vmem:[%s1995_s1 + $0x18] sm:$0xff]  ;;  %v1481_v40 = vld [vmem:[%s1995_s1 + $0xa0] sm:$0xff] }
   0xb   :  { %414 = vmatpush.bf16.msra.mxu2 %v1483_v23  ;;  %v1474_v36 = vld [vmem:[%s1995_s1 + $0x68] sm:$0xff]  ;;  %v1489_v41 = vld [vmem:[%s1995_s1 + $0xe0] sm:$0xff]  ;;  %v1463_v46 = vld [vmem:[%s1995_s1 + $0x10] sm:$0xff] }
   0xc   :  { %597 = vrot.lane.b32.xlu1 %v1268_v15, %s1577_s23  ;;  %433 = vmatpush.bf16.msra.mxu3 %v1491_v24  ;;  %v1303_v37 = vld [vmem:[%s1994_s0 + $0x68] sm:$0xf]  ;;  %v1506_v38 = vld [vmem:[%s1994_s0 + $0x88] sm:$0xf0]  ;;  %v1473_v43 = vld [vmem:[%s1995_s1 + $0x60] sm:$0xff] }
   0xd   :  { %601 = vrot.lane.b32.xlu0 %v1276_v16, %s1577_s23  ;;  %377 = vmatpush.bf16.msra.mxu0 %v1466_v22  ;;  %v1304_v42 = vor.u32 %v1506_v38, %v1303_v37  ;;  %v1283_v44 = vld [vmem:[%s1994_s0 + $0x20] sm:$0xf]  ;;  %v1501_v45 = vld [vmem:[%s1994_s0 + $0x40] sm:$0xf0]  ;;  %v1480_v47 = vld [vmem:[%s1995_s1 + $0x98] sm:$0xff] }
   0xe   :  { %395 = vmatpush.bf16.msra.mxu1 %v1475_v28  ;;  %v1488_v48 = vld [vmem:[%s1995_s1 + $0xd8] sm:$0xff]  ;;  %v1284_v49 = vor.u32 %v1501_v45, %v1283_v44  ;;  %v1462_v51 = vld [vmem:[%s1995_s1 + $0x8] sm:$0xff]  ;;  %v1479_v52 = vld [vmem:[%s1995_s1 + $0x90] sm:$0xff] }
   0xf   :  { %415 = vmatpush.bf16.msra.mxu2 %v1482_v32  ;;  %v1472_v50 = vld [vmem:[%s1995_s1 + $0x58] sm:$0xff]  ;;  %v1487_v53 = vld [vmem:[%s1995_s1 + $0xd0] sm:$0xff]  ;;  %v1461_v55 = vld [vmem:[%s1995_s1] sm:$0xff] }
  0x10   :  { %611 = vrot.lane.b32.xlu2 %v1296_v27, %s1577_s23  ;;  %434 = vmatpush.bf16.msra.mxu3 %v1490_v34  ;;  %v1471_v54 = vld [vmem:[%s1995_s1 + $0x50] sm:$0xff]  ;;  %v1009_v56 = vld [vmem:[%s1994_s0] sm:$0xf]  ;;  %v1453_v57 = vld [vmem:[%s1994_s0 + $0x20] sm:$0xf0] }
  0x11   :  { %378 = vmatpush.bf16.msra.mxu0 %v1465_v31  ;;  %v1478_v58 = vld [vmem:[%s1995_s1 + $0x88] sm:$0xff]  ;;  %v1496_v60 = vld [vmem:[%s1995_s1 + $0x118] sm:$0xff]  ;;  %v1010_v62 = vor.u32 %v1453_v57, %v1009_v56  ;;  %v1477_v63 = vld [vmem:[%s1995_s1 + $0x80] sm:$0xff] }
  0x12   :  { %396 = vmatpush.bf16.msra.mxu1 %v1474_v36  ;;  %v1486_v59 = vld [vmem:[%s1995_s1 + $0xc8] sm:$0xff]  ;;  %v1485_v0 = vld [vmem:[%s1995_s1 + $0xc0] sm:$0xff]  ;;  %v1495_v1 = vld [vmem:[%s1995_s1 + $0x110] sm:$0xff] }
  0x13   :  { %416 = vmatpush.bf16.msra.mxu2 %v1481_v40  ;;  %v1470_v61 = vld [vmem:[%s1995_s1 + $0x48] sm:$0xff]  ;;  %v1469_v4 = vld [vmem:[%s1995_s1 + $0x40] sm:$0xff]  ;;  %v1019_v6 = vld [vmem:[%s1994_s0 + $0x2c] sm:$0xf0] }
  0x14   :  { %607 = vrot.lane.b32.xlu1 %v1288_v33, %s1577_s23  ;;  %435 = vmatpush.bf16.msra.mxu3 %v1489_v41  ;;  %v1017_v2 = vld [vmem:[%s1994_s0 + $0x8] sm:$0xf]  ;;  %v1454_v3 = vld [vmem:[%s1994_s0 + $0x28] sm:$0xf0]  ;;  %v1451_v7 = vld [vmem:[%s1994_s0 + $0x4] sm:$0xf] }
  0x15   :  { %613 = vrot.lane.b32.xlu0 %v1300_v35, %s1577_s23  ;;  %379 = vmatpush.bf16.msra.mxu0 %v1464_v39  ;;  %v1452_v5 = vld [vmem:[%s1994_s0 + $0xc] sm:$0xf]  ;;  %v1011_v8 = vld [vmem:[%s1994_s0 + $0x24] sm:$0xf0]  ;;  %v1522_v9 = vld [vmem:[%s1995_s1 + $0x198] sm:$0xff]  ;;  %v1018_v10 = vor.u32 %v1454_v3, %v1017_v2 }
  0x16   :  { %397 = vmatpush.bf16.msra.mxu1 %v1473_v43  ;;  %v1514_v11 = vld [vmem:[%s1995_s1 + $0x158] sm:$0xff]  ;;  %v1022_v12 = vor.u32 %v1452_v5, %v1019_v6  ;;  %v1494_v13 = vld [vmem:[%s1995_s1 + $0x108] sm:$0xff]  ;;  %v1014_v14 = vor.u32 %v1451_v7, %v1011_v8  ;;  %v1521_v16 = vld [vmem:[%s1995_s1 + $0x190] sm:$0xff] }
  0x17   :  { %417 = vmatpush.bf16.msra.mxu2 %v1480_v47  ;;  %v1530_v15 = vld [vmem:[%s1995_s1 + $0x1d8] sm:$0xff]  ;;  %v1513_v17 = vld [vmem:[%s1995_s1 + $0x150] sm:$0xff]  ;;  %v1493_v18 = vld [vmem:[%s1995_s1 + $0x100] sm:$0xff] }
  0x18   :  { %615 = vrot.lane.b32.xlu2 %v1304_v42, %s1577_s23  ;;  %436 = vmatpush.bf16.msra.mxu3 %v1488_v48  ;;  %v1529_v19 = vld [vmem:[%s1995_s1 + $0x1d0] sm:$0xff]  ;;  %v1520_v20 = vld [vmem:[%s1995_s1 + $0x188] sm:$0xff]  ;;  %v1832_v22 = vld [vmem:[%s1995_s1 + $0x218] sm:$0xff] }
  0x19   :  { %380 = vmatpush.bf16.msra.mxu0 %v1463_v46  ;;  %v1512_v21 = vld [vmem:[%s1995_s1 + $0x148] sm:$0xff]  ;;  %v1519_v26 = vld [vmem:[%s1995_s1 + $0x180] sm:$0xff]  ;;  %v1037_v29 = vld [vmem:[%s1994_s0 + $0x50] sm:$0xf] }
  0x1a   :  { %398 = vmatpush.bf16.msra.mxu1 %v1472_v50  ;;  %v1029_v23 = vld [vmem:[%s1994_s0 + $0x48] sm:$0xf]  ;;  %v1458_v24 = vld [vmem:[%s1994_s0 + $0x68] sm:$0xf0]  ;;  %v1511_v28 = vld [vmem:[%s1995_s1 + $0x140] sm:$0xff] }
  0x1b   :  { %418 = vmatpush.bf16.msra.mxu2 %v1479_v52  ;;  %v1528_v25 = vld [vmem:[%s1995_s1 + $0x1c8] sm:$0xff]  ;;  %v1030_v27 = vor.u32 %v1458_v24, %v1029_v23  ;;  %v1459_v30 = vld [vmem:[%s1994_s0 + $0x70] sm:$0xf0]  ;;  %v1039_v32 = vld [vmem:[%s1994_s0 + $0x74] sm:$0xf0] }
  0x1c   :  { %437 = vmatpush.bf16.msra.mxu3 %v1487_v53  ;;  %v1457_v31 = vld [vmem:[%s1994_s0 + $0x54] sm:$0xf]  ;;  %v1456_v33 = vld [vmem:[%s1994_s0 + $0x4c] sm:$0xf]  ;;  %v1031_v34 = vld [vmem:[%s1994_s0 + $0x6c] sm:$0xf0]  ;;  %v1038_v37 = vor.u32 %v1459_v30, %v1037_v29 }
  0x1d   :  { %605 = vrot.lane.b32.xlu0 %v1284_v49, %s1577_s23  ;;  %381 = vmatpush.bf16.msra.mxu0 %v1462_v51  ;;  %v1527_v35 = vld [vmem:[%s1995_s1 + $0x1c0] sm:$0xff]  ;;  %v1518_v36 = vld [vmem:[%s1995_s1 + $0x178] sm:$0xff]  ;;  %v1042_v39 = vor.u32 %v1457_v31, %v1039_v32  ;;  %v1537_v40 = vld [vmem:[%s1995_s1 + $0x210] sm:$0xff]  ;;  %v1034_v41 = vor.u32 %v1456_v33, %v1031_v34 }
  0x1e   :  { %399 = vmatpush.bf16.msra.mxu1 %v1471_v54  ;;  %v1510_v38 = vld [vmem:[%s1995_s1 + $0x138] sm:$0xff]  ;;  %v1517_v43 = vld [vmem:[%s1995_s1 + $0x170] sm:$0xff]  ;;  %v1516_v52 = vld [vmem:[%s1995_s1 + $0x168] sm:$0xff] }
  0x1f   :  { %419 = vmatpush.bf16.msra.mxu2 %v1478_v58  ;;  %v1526_v42 = vld [vmem:[%s1995_s1 + $0x1b8] sm:$0xff]  ;;  %v1509_v44 = vld [vmem:[%s1995_s1 + $0x130] sm:$0xff]  ;;  %v1508_v53 = vld [vmem:[%s1995_s1 + $0x128] sm:$0xff] }
  0x20   :  { %438 = vmatpush.bf16.msra.mxu3 %v1486_v59  ;;  %v1525_v45 = vld [vmem:[%s1995_s1 + $0x1b0] sm:$0xff]  ;;  %v1045_v49 = vld [vmem:[%s1994_s0 + $0x58] sm:$0xf]  ;;  %v1460_v50 = vld [vmem:[%s1994_s0 + $0x78] sm:$0xf0] }
  0x21   :  { %382 = vmatpush.bf16.msra.mxu0 %v1461_v55  ;;  %v1025_v46 = vld [vmem:[%s1994_s0 + $0x10] sm:$0xf]  ;;  %v1455_v47 = vld [vmem:[%s1994_s0 + $0x30] sm:$0xf0]  ;;  %v1046_v51 = vor.u32 %v1460_v50, %v1045_v49  ;;  %v1524_v54 = vld [vmem:[%s1995_s1 + $0x1a8] sm:$0xff] }
  0x22   :  { %400 = vmatpush.bf16.msra.mxu1 %v1470_v61  ;;  %v1026_v48 = vor.u32 %v1455_v47, %v1025_v46  ;;  %v1536_v55 = vld [vmem:[%s1995_s1 + $0x208] sm:$0xff]  ;;  %v1515_v56 = vld [vmem:[%s1995_s1 + $0x160] sm:$0xff]  ;;  %v1542_v61 = vld [vmem:[%s1995_s1 + $0x238] sm:$0xff] }
  0x23   :  { %420 = vmatpush.bf16.msra.mxu2 %v1477_v63  ;;  %v1507_v57 = vld [vmem:[%s1995_s1 + $0x120] sm:$0xff]  ;;  %v1532_v63 = vld [vmem:[%s1995_s1 + $0x1e8] sm:$0xff] }
  0x24   :  { %383 = vmatmul.bf16.vlgmr.msra.gmra.mxu0 %v1010_v62  ;;  %439 = vmatpush.bf16.msra.mxu3 %v1485_v0  ;;  %v1523_v58 = vld [vmem:[%s1995_s1 + $0x1a0] sm:$0xff]  ;;  %v1533_v62 = vld [vmem:[%s1995_s1 + $0x1f0] sm:$0xff]  ;;  %v1540_v2 = vld [vmem:[%s1995_s1 + $0x228] sm:$0xff] }
  0x25   :  { %455 = vmatpush.bf16.msrb.mxu0 %v1496_v60  ;;  %v1535_v59 = vld [vmem:[%s1995_s1 + $0x200] sm:$0xff]  ;;  %v1534_v60 = vld [vmem:[%s1995_s1 + $0x1f8] sm:$0xff]  ;;  %v1541_v0 = vld [vmem:[%s1995_s1 + $0x230] sm:$0xff] }
  0x26   :  { %401 = vmatpush.bf16.msra.mxu1 %v1469_v4  ;;  %421 = vmatmul.bf16.vlgmr.msra.gmra.mxu2 %v1018_v10  ;;  %v1539_v3 = vld [vmem:[%s1995_s1 + $0x220] sm:$0xff] }
  0x27   :  { %875 = vmatpush.bf16.msrb.mxu2 %v1522_v9  ;;  %440 = vmatmul.bf16.vlgmr.msra.gmra.mxu3 %v1022_v12 }
  0x28   :  { %894 = vmatpush.bf16.msrb.mxu3 %v1530_v15 }
  0x29   :  { %456 = vmatpush.bf16.msrb.mxu0 %v1495_v1  ;;  %402 = vmatmul.bf16.vlgmr.msra.gmra.mxu1 %v1014_v14  ;;  %v1531_v1 = vld [vmem:[%s1995_s1 + $0x1e0] sm:$0xff] }
  0x2a   :  { %856 = vmatpush.bf16.msrb.mxu1 %v1514_v11 }
  0x2b   :  { %876 = vmatpush.bf16.msrb.mxu2 %v1521_v16 }
  0x2c   :  { %895 = vmatpush.bf16.msrb.mxu3 %v1529_v19 }
  0x2d   :  { %457 = vmatpush.bf16.msrb.mxu0 %v1494_v13 }
  0x2e   :  { %857 = vmatpush.bf16.msrb.mxu1 %v1513_v17 }
  0x2f   :  { %877 = vmatpush.bf16.msrb.mxu2 %v1520_v20 }
  0x30   :  { %896 = vmatpush.bf16.msrb.mxu3 %v1528_v25 }
  0x31   :  { %458 = vmatpush.bf16.msrb.mxu0 %v1493_v18 }
  0x32   :  { %858 = vmatpush.bf16.msrb.mxu1 %v1512_v21 }
  0x33   :  { %878 = vmatpush.bf16.msrb.mxu2 %v1519_v26 }
  0x34   :  { %388 = vmatmul.bf16.gmra.mxu0 %v1030_v27  ;;  %897 = vmatpush.bf16.msrb.mxu3 %v1527_v35 }
  0x35   :  { %913 = vmatpush.bf16.msra.mxu0 %v1832_v22 }
  0x36   :  { %859 = vmatpush.bf16.msrb.mxu1 %v1511_v28  ;;  %426 = vmatmul.bf16.gmra.mxu2 %v1038_v37 }
  0x37   :  { %879 = vmatpush.bf16.msrb.mxu2 %v1518_v36  ;;  %445 = vmatmul.bf16.gmra.mxu3 %v1042_v39 }
  0x38   :  { %898 = vmatpush.bf16.msrb.mxu3 %v1526_v42 }
  0x39   :  { %914 = vmatpush.bf16.msra.mxu0 %v1537_v40  ;;  %407 = vmatmul.bf16.gmra.mxu1 %v1034_v41 }
  0x3a   :  { %860 = vmatpush.bf16.msrb.mxu1 %v1510_v38 }
  0x3b   :  { %880 = vmatpush.bf16.msrb.mxu2 %v1517_v43 }
  0x3c   :  { %899 = vmatpush.bf16.msrb.mxu3 %v1525_v45 }
  0x3d   :  { %915 = vmatpush.bf16.msra.mxu0 %v1536_v55 }
  0x3e   :  { %861 = vmatpush.bf16.msrb.mxu1 %v1509_v44 }
  0x3f   :  { %881 = vmatpush.bf16.msrb.mxu2 %v1516_v52 }
  0x40   :  { %900 = vmatpush.bf16.msrb.mxu3 %v1524_v54 }
  0x41   :  { %916 = vmatpush.bf16.msra.mxu0 %v1535_v59 }
  0x42   :  { %862 = vmatpush.bf16.msrb.mxu1 %v1508_v53 }
  0x43   :  { %882 = vmatpush.bf16.msrb.mxu2 %v1515_v56 }
  0x44   :  { %1191 = vmatmul.msk.bf16.vlgmr.msrb.gmra.mxu0 %vm368_vm0, %v1026_v48  ;;  %901 = vmatpush.bf16.msrb.mxu3 %v1523_v58 }
  0x45   :  { %917 = vmatpush.bf16.msra.mxu0 %v1534_v60 }
  0x46   :  { %863 = vmatpush.bf16.msrb.mxu1 %v1507_v57 }
  0x47   :  { %1563 = vmatpush.bf16.msra.mxu2 %v1832_v22 }
  0x48   :  { %1571 = vmatpush.bf16.msra.mxu3 %v1542_v61 }
  0x49   :  { %918 = vmatpush.bf16.msra.mxu0 %v1533_v62 }
  0x4a   :  { %936 = vmatpush.bf16.msra.mxu1 %v1542_v61 }
  0x4b   :  { %1564 = vmatpush.bf16.msra.mxu2 %v1537_v40 }
  0x4c   :  { %1572 = vmatpush.bf16.msra.mxu3 %v1541_v0 }
  0x4d   :  { %919 = vmatpush.bf16.msra.mxu0 %v1532_v63 }
  0x4e   :  { %937 = vmatpush.bf16.msra.mxu1 %v1541_v0 }
  0x4f   :  { %1565 = vmatpush.bf16.msra.mxu2 %v1536_v55 }
  0x50   :  { %1573 = vmatpush.bf16.msra.mxu3 %v1540_v2 }
  0x51   :  { %920 = vmatpush.bf16.msra.mxu0 %v1531_v1 }
  0x52   :  { %938 = vmatpush.bf16.msra.mxu1 %v1540_v2 }
  0x53   :  { %1566 = vmatpush.bf16.msra.mxu2 %v1535_v59 }
  0x54   :  { %1192 = vmatmul.msk.bf16.gmra.mxu0 %vm368_vm0, %v1046_v51  ;;  %1574 = vmatpush.bf16.msra.mxu3 %v1539_v3 }
  0x56   :  { %939 = vmatpush.bf16.msra.mxu1 %v1539_v3 }
  0x57   :  { %1567 = vmatpush.bf16.msra.mxu2 %v1534_v60 }
  0x5b   :  { %1568 = vmatpush.bf16.msra.mxu2 %v1533_v62 }
  0x5f   :  { %1569 = vmatpush.bf16.msra.mxu2 %v1532_v63 }
  0x62   :  { %v610_v11 = vpop.permute.xlu2 %609 }
  0x63   :  { %1570 = vmatpush.bf16.msra.mxu2 %v1531_v1 }
  0x6a   :  { %v612_v14 = vpop.permute.xlu2 %611 }
  0x6b   :  { %v623_v19 = vsel %vm368_vm0, %v610_v11, %v612_v14 }
  0x72   :  { %v616_v20 = vpop.permute.xlu2 %615 }
  0x76   :  { %v604_v4 = vpop.permute.xlu1 %603 }
  0x77   :  { %v600_v5 = vpop.permute.xlu0 %599 }
  0x7e   :  { %v598_v6 = vpop.permute.xlu1 %597 }
  0x7f   :  { %v602_v7 = vpop.permute.xlu0 %601  ;;  %v618_v8 = vsel %vm368_vm0, %v598_v6, %v600_v5 }
  0x80   :  { %864 = vmatmul.bf16.vlgmr.msrb.gmra.mxu1 %v618_v8  ;;  %v619_v9 = vsel %vm368_vm0, %v600_v5, %v602_v7  ;;  %v620_v10 = vsel %vm368_vm0, %v602_v7, %v604_v4 }
  0x81   :  { %883 = vmatmul.bf16.vlgmr.msrb.gmra.mxu2 %v619_v9  ;;  %902 = vmatmul.bf16.vlgmr.msrb.gmra.mxu3 %v620_v10 }
  0x86   :  { %v608_v13 = vpop.permute.xlu1 %607 }
  0x87   :  { %v614_v12 = vpop.permute.xlu0 %613  ;;  %v622_v17 = vsel %vm368_vm0, %v608_v13, %v610_v11 }
  0x88   :  { %v624_v15 = vsel %vm368_vm0, %v612_v14, %v614_v12  ;;  %v625_v21 = vsel %vm368_vm0, %v614_v12, %v616_v20 }
  0x8f   :  { %v606_v16 = vpop.permute.xlu0 %605 }
  0x90   :  { %v621_v18 = vsel %vm368_vm0, %v604_v4, %v606_v16  ;;  %869 = vmatmul.bf16.gmra.mxu1 %v622_v17 }
  0x91   :  { %888 = vmatmul.bf16.gmra.mxu2 %v623_v19  ;;  %907 = vmatmul.bf16.gmra.mxu3 %v624_v15 }
  0x92   :  { %921 = vmatmul.bf16.vlgmr.msra.gmra.mxu0 %v621_v18 }
  0xa0   :  { %1449 = vmatmul.msk.bf16.vlgmr.msra.gmra.mxu1 %vm368_vm0, %v606_v16 }
  0xa1   :  { %926 = vmatmul.bf16.vlgmr.msra.gmra.mxu2 %v625_v21  ;;  %1450 = vmatmul.msk.bf16.vlgmr.msra.gmra.mxu3 %vm368_vm0, %v616_v20  ;;  %v384_v22 = vpop.f32.mrf.mxu0 }
  0xa6   :  { %v403_v23 = vpop.f32.mrf.mxu1 }
  0xa7   :  { %v404_v24 = vadd.f32 %v403_v23, %v384_v22 }
  0xa9   :  { %v386_v25 = vpop.f32.mrf.mxu0  ;;  %v422_v26 = vpop.f32.mrf.mxu2 }
  0xaa   :  { %v423_v27 = vadd.f32 %v422_v26, %v404_v24  ;;  %v441_v28 = vpop.f32.mrf.mxu3 }
  0xac   :  { %v442_v29 = vadd.f32 %v441_v28, %v423_v27 }
  0xae   :  { %v405_v30 = vpop.f32.mrf.mxu1 }
  0xaf   :  { %v406_v31 = vadd.f32 %v405_v30, %v386_v25 }
  0xb1   :  { %v389_v32 = vpop.f32.mrf.mxu0  ;;  %v424_v33 = vpop.f32.mrf.mxu2 }
  0xb2   :  { %v425_v34 = vadd.f32 %v424_v33, %v406_v31  ;;  %v443_v35 = vpop.f32.mrf.mxu3  ;;  %v1576_v31 = vld [vmem:[%s1996_s2] ss:$0 sm:$0xff] }
  0xb4   :  { %v444_v36 = vadd.f32 %v443_v35, %v425_v34 }
  0xb6   :  { %v408_v37 = vpop.f32.mrf.mxu1 }
  0xb7   :  { %v409_v38 = vadd.f32 %v408_v37, %v389_v32  ;;  %v1544_v32 = vld [vmem:[%s1997_s3] sm:$0xff]  }
  0xb8   :  { %v1546_v34 = vunpack.c.h.bf16 %v1544_v32 }
  0xb9   :  { %v391_v39 = vpop.f32.mrf.mxu0  ;;  %v427_v40 = vpop.f32.mrf.mxu2 }
  0xba   :  { %v428_v41 = vadd.f32 %v427_v40, %v409_v38  ;;  %v446_v42 = vpop.f32.mrf.mxu3 }
  0xbc   :  { %v447_v43 = vadd.f32 %v446_v42, %v428_v41 }
  0xbe   :  { %v410_v44 = vpop.f32.mrf.mxu1 }
  0xbf   :  { %v411_v45 = vadd.f32 %v410_v44, %v391_v39 }
  0xc1   :  { %v460_v46 = vpop.f32.mrf.mxu0  ;;  %v429_v48 = vpop.f32.mrf.mxu2 }
  0xc2   :  { %v461_v47 = vadd.f32 %v460_v46, %v442_v29  ;;  %v430_v49 = vadd.f32 %v429_v48, %v411_v45  ;;  %v448_v50 = vpop.f32.mrf.mxu3  ;;  %v1561_v46 = vld [vmem:[%s1997_s3 + $0x8] sm:$0xff]  }
  0xc4   :  { %v449_v51 = vadd.f32 %v448_v50, %v430_v49  ;;  %v1549_v49 = vunpack.c.l.bf16 %v1561_v46  ;;  %v1550_v50 = vunpack.c.h.bf16 %v1561_v46 }
  0xc9   :  { %v462_v52 = vpop.f32.mrf.mxu0 }
  0xca   :  { %v463_v53 = vadd.f32 %v462_v52, %v444_v36  ;;  %v1545_v36 = vunpack.c.l.bf16 %v1544_v32 }
  0xd1   :  { %v465_v54 = vpop.f32.mrf.mxu0 }
  0xd2   :  { %v1965_v55 = vadd.f32 %v465_v54, %v447_v43 }
  0xd9   :  { %v467_v56 = vpop.f32.mrf.mxu0 }
  0xda   :  { %v1967_v57 = vadd.f32 %v467_v56, %v449_v51 }
  0xfd   :  { %v865_v58 = vpop.f32.mrf.mxu1 }
 0x104   :  { %v884_v59 = vpop.f32.mrf.mxu2  ;;  %v903_v60 = vpop.f32.mrf.mxu3 }
 0x105   :  { %v867_v61 = vpop.f32.mrf.mxu1  ;;  %v885_v4 = vadd.f32 %v884_v59, %v865_v58 }
 0x107   :  { %v904_v6 = vadd.f32 %v903_v60, %v885_v4 }
 0x10c   :  { %v886_v62 = vpop.f32.mrf.mxu2  ;;  %v905_v63 = vpop.f32.mrf.mxu3 }
 0x10d   :  { %v870_v0 = vpop.f32.mrf.mxu1  ;;  %v887_v11 = vadd.f32 %v886_v62, %v867_v61 }
 0x10f   :  { %v922_v5 = vpop.f32.mrf.mxu0  ;;  %v906_v15 = vadd.f32 %v905_v63, %v887_v11 }
 0x110   :  { %v923_v7 = vadd.f32 %v922_v5, %v904_v6 }
 0x114   :  { %v889_v1 = vpop.f32.mrf.mxu2  ;;  %v908_v2 = vpop.f32.mrf.mxu3 }
 0x115   :  { %v872_v3 = vpop.f32.mrf.mxu1  ;;  %v890_v13 = vadd.f32 %v889_v1, %v870_v0 }
 0x117   :  { %v924_v14 = vpop.f32.mrf.mxu0  ;;  %v909_v16 = vadd.f32 %v908_v2, %v890_v13 }
 0x118   :  { %v925_v17 = vadd.f32 %v924_v14, %v906_v15 }
 0x11c   :  { %v891_v8 = vpop.f32.mrf.mxu2  ;;  %v910_v9 = vpop.f32.mrf.mxu3 }
 0x11d   :  { %v941_v10 = vpop.f32.mrf.mxu1  ;;  %v892_v23 = vadd.f32 %v891_v8, %v872_v3 }
 0x11e   :  { %v942_v12 = vadd.f32 %v941_v10, %v923_v7 }
 0x11f   :  { %v911_v25 = vadd.f32 %v910_v9, %v892_v23 }
 0x120   :  { %955 = vrot.lane.b32.xlu1 %v942_v12, %s1577_s23 }
 0x124   :  { %v927_v18 = vpop.f32.mrf.mxu2  ;;  %v946_v19 = vpop.f32.mrf.mxu3 }
 0x125   :  { %v928_v20 = vadd.f32 %v927_v18, %v909_v16  ;;  %v943_v21 = vpop.f32.mrf.mxu1 }
 0x126   :  { %v944_v22 = vadd.f32 %v943_v21, %v925_v17 }
 0x127   :  { %v947_v24 = vadd.f32 %v946_v19, %v928_v20 }
 0x128   :  { %957 = vrot.lane.b32.xlu2 %v944_v22, %s1577_s23 }
 0x129   :  { %959 = vrot.lane.b32.xlu0 %v947_v24, %s1577_s23 }
 0x12c   :  { %v929_v26 = vpop.f32.mrf.mxu2  ;;  %v948_v28 = vpop.f32.mrf.mxu3 }
 0x12d   :  { %v930_v27 = vadd.f32 %v929_v26, %v911_v25 }
 0x12f   :  { %v949_v29 = vadd.f32 %v948_v28, %v930_v27 }
 0x131   :  { %961 = vrot.lane.b32.xlu1 %v949_v29, %s1577_s23 }
 0x182   :  { %v958_v30 = vpop.permute.xlu2 %957 }
 0x183   :  { %v968_v33 = vsel %vm368_vm0, %v463_v53, %v958_v30 }
 0x184   :  { %v976_v35 = vadd.f32 %v1576_v31, %v968_v33 }
 0x186   :  { %v988_v39 = vadd.f32 %v1546_v34, %v976_v35 }
 0x188   :  { %v992_v42 = vmax.f32 %v988_v39, 0.0 }
 0x192   :  { %v956_v37 = vpop.permute.xlu1 %955 }
 0x193   :  { %v967_v38 = vsel %vm368_vm0, %v461_v47, %v956_v37 }
 0x194   :  { %v975_v40 = vadd.f32 %v1576_v31, %v967_v38 }
 0x196   :  { %v987_v41 = vadd.f32 %v1545_v36, %v975_v40 }
 0x198   :  { %v991_v43 = vmax.f32 %v987_v41, 0.0 }
 0x19a   :  { %v1554_v44 = vpack.c.bf16 %v992_v42, %v991_v43 }
 0x19b   :  { %v960_v45 = vpop.permute.xlu0 %959 }
 0x19c   :  { %1555 = vst [vmem:[%s1998_s4] sm:$0xff] %v1554_v44   ;;  %v969_v48 = vsel %vm368_vm0, %v1965_v55, %v960_v45 }
 0x19d   :  { %v977_v47 = vadd.f32 %v1576_v31, %v969_v48 }
 0x19f   :  { %v989_v53 = vadd.f32 %v1549_v49, %v977_v47 }
 0x1a1   :  { %v993_v58 = vmax.f32 %v989_v53, 0.0 }
 0x1a3   :  { %v962_v51 = vpop.permute.xlu1 %961 }
 0x1a4   :  { %v970_v52 = vsel %vm368_vm0, %v1967_v57, %v962_v51 }
 0x1a5   :  { %v978_v54 = vadd.f32 %v1576_v31, %v970_v52 }
 0x1a7   :  { %v990_v56 = vadd.f32 %v1550_v50, %v978_v54 }
 0x1a9   :  { %v994_v59 = vmax.f32 %v990_v56, 0.0 }
 0x1ab   :  { %v1559_v60 = vpack.c.bf16 %v994_v59, %v993_v58 }
 0x1ad   :  { %1562 = vst [vmem:[%s1998_s4 + $0x8] sm:$0xff] %v1559_v60  }

// kernel: _lambda_.22
= control target key start
LH: loop header
LB: loop body
LE: loop exit
PB: predicated region body
PF: predicated region fallthrough
CT: control target
= control target key end

     0   :  { %s1235_s5 = smov 64   ;;  %vm323_vm0 = vcmask 523264   ;;  %s1502_s0 = inlined_call_operand.vmem [shape: bf16[8,1152], index: 0, kind: input, shape index: {}]   ;;  %s1503_s1 = inlined_call_operand.vmem [shape: bf16[2,576,128], index: 1, kind: input, shape index: {}]   ;;  %s1504_s2 = inlined_call_operand.vmem [shape: f32[1,256], index: 2, kind: input, shape index: {}]   ;;  %s1505_s3 = inlined_call_operand.vmem [shape: bf16[8,256], index: 3, kind: output, shape index: {}]  }
   0x1   :  { %v393_v0 = vld [vmem:[%s1502_s0 + $0x18] sm:$0xff]  ;;  %v392_v1 = vld [vmem:[%s1502_s0 + $0x10] sm:$0xff]  ;;  %v394_v2 = vld [vmem:[%s1502_s0 + $0x20] sm:$0xf] }
   0x2   :  { %v473_v3 = vunpack.c.l.b16 %v393_v0  ;;  %v471_v4 = vunpack.c.l.b16 %v392_v1  ;;  %v1169_v5 = vld [vmem:[%s1503_s1 + $0x38] sm:$0xff]  ;;  %v475_v6 = vunpack.c.l.b16 %v394_v2  ;;  %v1168_v11 = vld [vmem:[%s1503_s1 + $0x30] sm:$0xff]  ;;  %v474_v16 = vunpack.c.h.b16 %v393_v0  ;;  %v1167_v19 = vld [vmem:[%s1503_s1 + $0x28] sm:$0xff] }
   0x3   :  { %v1177_v7 = vld [vmem:[%s1503_s1 + $0x78] sm:$0xff]  ;;  %327 = vmatpush.bf16.msra.mxu0 %v1169_v5  ;;  %v1176_v14 = vld [vmem:[%s1503_s1 + $0x70] sm:$0xff]  ;;  %v472_v17 = vunpack.c.h.b16 %v392_v1  ;;  %v1175_v20 = vld [vmem:[%s1503_s1 + $0x68] sm:$0xff] }
   0x4   :  { %v1185_v8 = vld [vmem:[%s1503_s1 + $0xb8] sm:$0xff]  ;;  %v478_v9 = vpack.c.b16 %v473_v3, %v473_v3  ;;  %v476_v10 = vpack.c.b16 %v471_v4, %v471_v4  ;;  %v480_v13 = vpack.c.b16 %v475_v6, %v475_v6  ;;  %340 = vmatpush.bf16.msra.mxu1 %v1177_v7  ;;  %v1184_v15 = vld [vmem:[%s1503_s1 + $0xb0] sm:$0xff]  ;;  %v1183_v21 = vld [vmem:[%s1503_s1 + $0xa8] sm:$0xff]  ;;  %v479_v22 = vpack.c.b16 %v474_v16, %v474_v16 }
   0x5   :  { %v1193_v12 = vld [vmem:[%s1503_s1 + $0xf8] sm:$0xff]  ;;  %353 = vmatpush.bf16.msra.mxu2 %v1185_v8  ;;  %v1192_v18 = vld [vmem:[%s1503_s1 + $0xf0] sm:$0xff]  ;;  %v477_v23 = vpack.c.b16 %v472_v17, %v472_v17  ;;  %v1191_v24 = vld [vmem:[%s1503_s1 + $0xe8] sm:$0xff] }
   0x6   :  { %485 = vrot.lane.b32.xlu1 %v478_v9, %s1235_s5  ;;  %481 = vrot.lane.b32.xlu0 %v476_v10, %s1235_s5  ;;  %v1166_v25 = vld [vmem:[%s1503_s1 + $0x20] sm:$0xff]  ;;  %v1165_v29 = vld [vmem:[%s1503_s1 + $0x18] sm:$0xff] }
   0x7   :  { %489 = vrot.lane.b32.xlu2 %v480_v13, %s1235_s5  ;;  %366 = vmatpush.bf16.msra.mxu3 %v1193_v12  ;;  %v1174_v26 = vld [vmem:[%s1503_s1 + $0x60] sm:$0xff]  ;;  %v1173_v30 = vld [vmem:[%s1503_s1 + $0x58] sm:$0xff]  ;;  %v1164_v33 = vld [vmem:[%s1503_s1 + $0x10] sm:$0xff] }
   0x8   :  { %328 = vmatpush.bf16.msra.mxu0 %v1168_v11  ;;  %341 = vmatpush.bf16.msra.mxu1 %v1176_v14  ;;  %v1182_v27 = vld [vmem:[%s1503_s1 + $0xa0] sm:$0xff]  ;;  %v1181_v31 = vld [vmem:[%s1503_s1 + $0x98] sm:$0xff]  ;;  %v1172_v34 = vld [vmem:[%s1503_s1 + $0x50] sm:$0xff] }
   0x9   :  { %354 = vmatpush.bf16.msra.mxu2 %v1184_v15  ;;  %v1190_v28 = vld [vmem:[%s1503_s1 + $0xe0] sm:$0xff]  ;;  %v1189_v32 = vld [vmem:[%s1503_s1 + $0xd8] sm:$0xff]  ;;  %v1180_v35 = vld [vmem:[%s1503_s1 + $0x90] sm:$0xff] }
   0xa   :  { %v1188_v36 = vld [vmem:[%s1503_s1 + $0xd0] sm:$0xff]  ;;  %v1163_v37 = vld [vmem:[%s1503_s1 + $0x8] sm:$0xff]  ;;  %v15_v38 = vld [vmem:[%s1502_s0] sm:$0xff] }
   0xb   :  { %367 = vmatpush.bf16.msra.mxu3 %v1192_v18  ;;  %v1171_v39 = vld [vmem:[%s1503_s1 + $0x48] sm:$0xff]  ;;  %v93_v42 = vunpack.c.l.b16 %v15_v38  ;;  %v1162_v44 = vld [vmem:[%s1503_s1] sm:$0xff]  ;;  %v1197_v45 = vld [vmem:[%s1503_s1 + $0x118] sm:$0xff]  ;;  %v94_v47 = vunpack.c.h.b16 %v15_v38 }
   0xc   :  { %329 = vmatpush.bf16.msra.mxu0 %v1167_v19  ;;  %342 = vmatpush.bf16.msra.mxu1 %v1175_v20  ;;  %v1179_v40 = vld [vmem:[%s1503_s1 + $0x88] sm:$0xff]  ;;  %v1170_v46 = vld [vmem:[%s1503_s1 + $0x40] sm:$0xff]  ;;  %v1205_v49 = vld [vmem:[%s1503_s1 + $0x158] sm:$0xff] }
   0xd   :  { %355 = vmatpush.bf16.msra.mxu2 %v1183_v21  ;;  %v1187_v41 = vld [vmem:[%s1503_s1 + $0xc8] sm:$0xff]  ;;  %v1178_v48 = vld [vmem:[%s1503_s1 + $0x80] sm:$0xff]  ;;  %v98_v51 = vpack.c.b16 %v93_v42, %v93_v42  ;;  %v1213_v54 = vld [vmem:[%s1503_s1 + $0x198] sm:$0xff]  ;;  %v99_v57 = vpack.c.b16 %v94_v47, %v94_v47 }
   0xe   :  { %487 = vrot.lane.b32.xlu1 %v479_v22, %s1235_s5  ;;  %483 = vrot.lane.b32.xlu0 %v477_v23, %s1235_s5  ;;  %v16_v43 = vld [vmem:[%s1502_s0 + $0x8] sm:$0xff]  ;;  %v1186_v52 = vld [vmem:[%s1503_s1 + $0xc0] sm:$0xff] }
   0xf   :  { %368 = vmatpush.bf16.msra.mxu3 %v1191_v24  ;;  %v95_v50 = vunpack.c.l.b16 %v16_v43  ;;  %v96_v53 = vunpack.c.h.b16 %v16_v43  ;;  %v1221_v55 = vld [vmem:[%s1503_s1 + $0x1d8] sm:$0xff]  ;;  %v1196_v56 = vld [vmem:[%s1503_s1 + $0x110] sm:$0xff]  ;;  %v1195_v63 = vld [vmem:[%s1503_s1 + $0x108] sm:$0xff] }
  0x10   :  { %330 = vmatpush.bf16.msra.mxu0 %v1166_v25  ;;  %343 = vmatpush.bf16.msra.mxu1 %v1174_v26  ;;  %v1204_v58 = vld [vmem:[%s1503_s1 + $0x150] sm:$0xff]  ;;  %v1203_v0 = vld [vmem:[%s1503_s1 + $0x148] sm:$0xff]  ;;  %v1194_v4 = vld [vmem:[%s1503_s1 + $0x100] sm:$0xff] }
  0x11   :  { %356 = vmatpush.bf16.msra.mxu2 %v1182_v27  ;;  %v100_v59 = vpack.c.b16 %v95_v50, %v95_v50  ;;  %v101_v60 = vpack.c.b16 %v96_v53, %v96_v53  ;;  %v1212_v61 = vld [vmem:[%s1503_s1 + $0x190] sm:$0xff]  ;;  %v1211_v1 = vld [vmem:[%s1503_s1 + $0x188] sm:$0xff]  ;;  %v1229_v5 = vld [vmem:[%s1503_s1 + $0x218] sm:$0xff] }
  0x12   :  { %v1220_v62 = vld [vmem:[%s1503_s1 + $0x1d0] sm:$0xff]  ;;  %v1219_v2 = vld [vmem:[%s1503_s1 + $0x1c8] sm:$0xff]  ;;  %v1202_v6 = vld [vmem:[%s1503_s1 + $0x140] sm:$0xff] }
  0x13   :  { %369 = vmatpush.bf16.msra.mxu3 %v1190_v28  ;;  %v17_v3 = vld [vmem:[%s1502_s0 + $0x10] sm:$0xf]  ;;  %v1210_v8 = vld [vmem:[%s1503_s1 + $0x180] sm:$0xff]  ;;  %v1201_v11 = vld [vmem:[%s1503_s1 + $0x138] sm:$0xff] }
  0x14   :  { %331 = vmatpush.bf16.msra.mxu0 %v1165_v29  ;;  %344 = vmatpush.bf16.msra.mxu1 %v1173_v30  ;;  %v97_v7 = vunpack.c.l.b16 %v17_v3  ;;  %v1218_v9 = vld [vmem:[%s1503_s1 + $0x1c0] sm:$0xff]  ;;  %v1228_v10 = vld [vmem:[%s1503_s1 + $0x210] sm:$0xff]  ;;  %v1209_v13 = vld [vmem:[%s1503_s1 + $0x178] sm:$0xff] }
  0x15   :  { %357 = vmatpush.bf16.msra.mxu2 %v1181_v31  ;;  %v1217_v14 = vld [vmem:[%s1503_s1 + $0x1b8] sm:$0xff]  ;;  %v1227_v15 = vld [vmem:[%s1503_s1 + $0x208] sm:$0xff]  ;;  %v1200_v16 = vld [vmem:[%s1503_s1 + $0x130] sm:$0xff] }
  0x16   :  { %v102_v12 = vpack.c.b16 %v97_v7, %v97_v7  ;;  %v1208_v17 = vld [vmem:[%s1503_s1 + $0x170] sm:$0xff]  ;;  %v1226_v19 = vld [vmem:[%s1503_s1 + $0x200] sm:$0xff]  ;;  %v1225_v20 = vld [vmem:[%s1503_s1 + $0x1f8] sm:$0xff] }
  0x17   :  { %370 = vmatpush.bf16.msra.mxu3 %v1189_v32  ;;  %v1216_v18 = vld [vmem:[%s1503_s1 + $0x1b0] sm:$0xff]  ;;  %v1199_v22 = vld [vmem:[%s1503_s1 + $0x128] sm:$0xff]  ;;  %v1198_v26 = vld [vmem:[%s1503_s1 + $0x120] sm:$0xff] }
  0x18   :  { %332 = vmatpush.bf16.msra.mxu0 %v1164_v33  ;;  %345 = vmatpush.bf16.msra.mxu1 %v1172_v34  ;;  %v1224_v21 = vld [vmem:[%s1503_s1 + $0x1f0] sm:$0xff]  ;;  %v1207_v23 = vld [vmem:[%s1503_s1 + $0x168] sm:$0xff]  ;;  %v1206_v27 = vld [vmem:[%s1503_s1 + $0x160] sm:$0xff] }
  0x19   :  { %358 = vmatpush.bf16.msra.mxu2 %v1180_v35  ;;  %v1215_v24 = vld [vmem:[%s1503_s1 + $0x1a8] sm:$0xff]  ;;  %v1214_v28 = vld [vmem:[%s1503_s1 + $0x1a0] sm:$0xff]  ;;  %v1233_v30 = vld [vmem:[%s1503_s1 + $0x238] sm:$0xff] }
  0x1a   :  { %v1223_v25 = vld [vmem:[%s1503_s1 + $0x1e8] sm:$0xff]  ;;  %v1222_v29 = vld [vmem:[%s1503_s1 + $0x1e0] sm:$0xff]  ;;  %v1232_v31 = vld [vmem:[%s1503_s1 + $0x230] sm:$0xff] }
  0x1b   :  { %371 = vmatpush.bf16.msra.mxu3 %v1188_v36  ;;  %v1231_v32 = vld [vmem:[%s1503_s1 + $0x228] sm:$0xff]  ;;  %v1230_v33 = vld [vmem:[%s1503_s1 + $0x220] sm:$0xff] }
  0x1c   :  { %333 = vmatpush.bf16.msra.mxu0 %v1163_v37  ;;  %346 = vmatpush.bf16.msra.mxu1 %v1171_v39 }
  0x1d   :  { %359 = vmatpush.bf16.msra.mxu2 %v1179_v40 }
  0x1f   :  { %372 = vmatpush.bf16.msra.mxu3 %v1187_v41 }
  0x20   :  { %334 = vmatpush.bf16.msra.mxu0 %v1162_v44  ;;  %347 = vmatpush.bf16.msra.mxu1 %v1170_v46 }
  0x21   :  { %360 = vmatpush.bf16.msra.mxu2 %v1178_v48 }
  0x23   :  { %335 = vmatmul.bf16.vlgmr.msra.gmra.mxu0 %v98_v51  ;;  %373 = vmatpush.bf16.msra.mxu3 %v1186_v52 }
  0x24   :  { %383 = vmatpush.bf16.msrb.mxu0 %v1197_v45  ;;  %719 = vmatpush.bf16.msrb.mxu1 %v1205_v49 }
  0x25   :  { %732 = vmatpush.bf16.msrb.mxu2 %v1213_v54  ;;  %348 = vmatmul.bf16.vlgmr.msra.gmra.mxu1 %v99_v57 }
  0x26   :  { %361 = vmatmul.bf16.vlgmr.msra.gmra.mxu2 %v100_v59  ;;  %374 = vmatmul.bf16.vlgmr.msra.gmra.mxu3 %v101_v60 }
  0x27   :  { %745 = vmatpush.bf16.msrb.mxu3 %v1221_v55 }
  0x28   :  { %384 = vmatpush.bf16.msrb.mxu0 %v1196_v56  ;;  %720 = vmatpush.bf16.msrb.mxu1 %v1204_v58 }
  0x29   :  { %733 = vmatpush.bf16.msrb.mxu2 %v1212_v61 }
  0x2b   :  { %746 = vmatpush.bf16.msrb.mxu3 %v1220_v62 }
  0x2c   :  { %385 = vmatpush.bf16.msrb.mxu0 %v1195_v63  ;;  %721 = vmatpush.bf16.msrb.mxu1 %v1203_v0  ;;  %v784_v0 = vld [vmem:[%s1504_s2] sm:$0x3] }
  0x2d   :  { %734 = vmatpush.bf16.msrb.mxu2 %v1211_v1 }
  0x2f   :  { %747 = vmatpush.bf16.msrb.mxu3 %v1219_v2  ;;  %v786_v2 = vperm.slane %v784_v0, 0 }
  0x30   :  { %386 = vmatpush.bf16.msrb.mxu0 %v1194_v4  ;;  %722 = vmatpush.bf16.msrb.mxu1 %v1202_v6  ;;  %v787_v6 = vperm.slane %v784_v0, 1 }
  0x31   :  { %735 = vmatpush.bf16.msrb.mxu2 %v1210_v8 }
  0x33   :  { %748 = vmatpush.bf16.msrb.mxu3 %v1218_v9  ;;  %944 = vmatmul.msk.bf16.vlgmr.msrb.gmra.mxu0 %vm323_vm0, %v102_v12 }
  0x34   :  { %758 = vmatpush.bf16.msra.mxu0 %v1229_v5  ;;  %723 = vmatpush.bf16.msrb.mxu1 %v1201_v11 }
  0x35   :  { %736 = vmatpush.bf16.msrb.mxu2 %v1209_v13 }
  0x37   :  { %749 = vmatpush.bf16.msrb.mxu3 %v1217_v14 }
  0x38   :  { %759 = vmatpush.bf16.msra.mxu0 %v1228_v10  ;;  %724 = vmatpush.bf16.msrb.mxu1 %v1200_v16 }
  0x39   :  { %737 = vmatpush.bf16.msrb.mxu2 %v1208_v17 }
  0x3b   :  { %750 = vmatpush.bf16.msrb.mxu3 %v1216_v18 }
  0x3c   :  { %760 = vmatpush.bf16.msra.mxu0 %v1227_v15  ;;  %725 = vmatpush.bf16.msrb.mxu1 %v1199_v22 }
  0x3d   :  { %738 = vmatpush.bf16.msrb.mxu2 %v1207_v23 }
  0x3f   :  { %751 = vmatpush.bf16.msrb.mxu3 %v1215_v24 }
  0x40   :  { %761 = vmatpush.bf16.msra.mxu0 %v1226_v19  ;;  %726 = vmatpush.bf16.msrb.mxu1 %v1198_v26 }
  0x41   :  { %739 = vmatpush.bf16.msrb.mxu2 %v1206_v27 }
  0x43   :  { %752 = vmatpush.bf16.msrb.mxu3 %v1214_v28 }
  0x44   :  { %762 = vmatpush.bf16.msra.mxu0 %v1225_v20  ;;  %775 = vmatpush.bf16.msra.mxu1 %v1233_v30 }
  0x48   :  { %763 = vmatpush.bf16.msra.mxu0 %v1224_v21  ;;  %776 = vmatpush.bf16.msra.mxu1 %v1232_v31 }
  0x4c   :  { %764 = vmatpush.bf16.msra.mxu0 %v1223_v25  ;;  %777 = vmatpush.bf16.msra.mxu1 %v1231_v32 }
  0x50   :  { %765 = vmatpush.bf16.msra.mxu0 %v1222_v29  ;;  %778 = vmatpush.bf16.msra.mxu1 %v1230_v33 }
  0x61   :  { %v490_v36 = vpop.permute.xlu2 %489 }
  0x78   :  { %v486_v34 = vpop.permute.xlu1 %485  ;;  %v482_v35 = vpop.permute.xlu0 %481 }
  0x80   :  { %v488_v37 = vpop.permute.xlu1 %487  ;;  %v484_v38 = vpop.permute.xlu0 %483 }
  0x81   :  { %v495_v39 = vsel %vm323_vm0, %v488_v37, %v490_v36  ;;  %v492_v40 = vsel %vm323_vm0, %v482_v35, %v484_v38  ;;  %v493_v41 = vsel %vm323_vm0, %v484_v38, %v486_v34  ;;  %v494_v42 = vsel %vm323_vm0, %v486_v34, %v488_v37 }
  0x82   :  { %727 = vmatmul.bf16.vlgmr.msrb.gmra.mxu1 %v492_v40  ;;  %740 = vmatmul.bf16.vlgmr.msrb.gmra.mxu2 %v493_v41 }
  0x83   :  { %753 = vmatmul.bf16.vlgmr.msrb.gmra.mxu3 %v494_v42  ;;  %766 = vmatmul.bf16.vlgmr.msra.gmra.mxu0 %v495_v39 }
  0x92   :  { %1161 = vmatmul.msk.bf16.vlgmr.msra.gmra.mxu1 %vm323_vm0, %v490_v36 }
  0xa0   :  { %v336_v43 = vpop.f32.mrf.mxu0 }
  0xa2   :  { %v349_v44 = vpop.f32.mrf.mxu1 }
  0xa3   :  { %v350_v45 = vadd.f32 %v349_v44, %v336_v43 }
  0xa8   :  { %v338_v46 = vpop.f32.mrf.mxu0 }
  0xa9   :  { %v362_v47 = vpop.f32.mrf.mxu2  ;;  %v375_v50 = vpop.f32.mrf.mxu3 }
  0xaa   :  { %v351_v48 = vpop.f32.mrf.mxu1  ;;  %v363_v49 = vadd.f32 %v362_v47, %v350_v45 }
  0xac   :  { %v376_v51 = vadd.f32 %v375_v50, %v363_v49 }
  0xb0   :  { %v388_v52 = vpop.f32.mrf.mxu0 }
  0xb1   :  { %v389_v53 = vadd.f32 %v388_v52, %v376_v51  ;;  %v364_v54 = vpop.f32.mrf.mxu2  ;;  %v377_v55 = vpop.f32.mrf.mxu3 }
  0xb3   :  { %v790_v8 = vadd.f32 %v786_v2, %v389_v53 }
  0xb5   :  { %v792_v11 = vmax.f32 %v790_v8, 0.0 }
  0xb8   :  { %v390_v56 = vpop.f32.mrf.mxu0 }
  0xff   :  { %v728_v57 = vpop.f32.mrf.mxu1 }
 0x100   :  { %v767_v58 = vpop.f32.mrf.mxu0 }
 0x105   :  { %v741_v59 = vpop.f32.mrf.mxu2 }
 0x106   :  { %v742_v60 = vadd.f32 %v741_v59, %v728_v57  ;;  %v754_v61 = vpop.f32.mrf.mxu3 }
 0x107   :  { %v730_v62 = vpop.f32.mrf.mxu1 }
 0x108   :  { %v769_v63 = vpop.f32.mrf.mxu0  ;;  %v755_v1 = vadd.f32 %v754_v61, %v742_v60 }
 0x10a   :  { %v768_v5 = vadd.f32 %v767_v58, %v755_v1 }
 0x10d   :  { %v743_v3 = vpop.f32.mrf.mxu2 }
 0x10e   :  { %v756_v4 = vpop.f32.mrf.mxu3 }
 0x10f   :  { %v780_v7 = vpop.f32.mrf.mxu1 }
 0x110   :  { %v781_v9 = vadd.f32 %v780_v7, %v768_v5 }
 0x112   :  { %v791_v10 = vadd.f32 %v787_v6, %v781_v9 }
 0x114   :  { %v793_v12 = vmax.f32 %v791_v10, 0.0 }
 0x116   :  { %v794_v13 = vpack.c.bf16 %v793_v12, %v792_v11 }
 0x117   :  { %v782_v14 = vpop.f32.mrf.mxu1 }
 0x118   :  { %795 = vst [vmem:[%s1505_s3] sm:$0xff] %v794_v13 }

// kernel: _lambda_.23
= control target key start
LH: loop header
LB: loop body
LE: loop exit
PB: predicated region body
PF: predicated region fallthrough
CT: control target
= control target key end

     0   :  { %vm48_vm0 = vcmask 523264   ;;  %s238_s0 = inlined_call_operand.vmem [shape: bf16[8,128], index: 0, kind: input, shape index: {}]   ;;  %s239_s1 = inlined_call_operand.vmem [shape: bf16[2,64,128], index: 1, kind: input, shape index: {}]   ;;  %s240_s2 = inlined_call_operand.vmem [shape: f32[1,256], index: 2, kind: input, shape index: {}]   ;;  %s241_s3 = inlined_call_operand.vmem [shape: bf16[8,256], index: 3, kind: output, shape index: {}]  }
   0x1   :  { %v15_v0 = vld [vmem:[%s238_s0] sm:$0xf]  ;;  %v178_v1 = vld [vmem:[%s239_s1 + $0x18] sm:$0xff]  ;;  %v177_v4 = vld [vmem:[%s239_s1 + $0x10] sm:$0xff]  ;;  %s184_s0 = smov 64  }
   0x2   :  { %v75_v2 = vunpack.c.l.b16 %v15_v0  ;;  %v182_v3 = vld [vmem:[%s239_s1 + $0x38] sm:$0xff]  ;;  %56 = vmatpush.bf16.msra.mxu0 %v178_v1  ;;  %v181_v6 = vld [vmem:[%s239_s1 + $0x30] sm:$0xff]  ;;  %v176_v7 = vld [vmem:[%s239_s1 + $0x8] sm:$0xff] }
   0x3   :  { %110 = vmatpush.bf16.msra.mxu1 %v182_v3  ;;  %v180_v8 = vld [vmem:[%s239_s1 + $0x28] sm:$0xff]  ;;  %v175_v9 = vld [vmem:[%s239_s1] sm:$0xff] }
   0x4   :  { %v76_v5 = vpack.c.b16 %v75_v2, %v75_v2  ;;  %v179_v10 = vld [vmem:[%s239_s1 + $0x20] sm:$0xff] }
   0x5   :  { %v119_v14 = vld [vmem:[%s240_s2] sm:$0x3] }
   0x6   :  { %77 = vrot.lane.b32.xlu0 %v76_v5, %s184_s0  ;;  %57 = vmatpush.bf16.msra.mxu0 %v177_v4  ;;  %v121_v15 = vperm.slane %v119_v14, 0  ;;  %v122_v16 = vperm.slane %v119_v14, 1 }
   0x7   :  { %111 = vmatpush.bf16.msra.mxu1 %v181_v6 }
   0xa   :  { %58 = vmatpush.bf16.msra.mxu0 %v176_v7 }
   0xb   :  { %112 = vmatpush.bf16.msra.mxu1 %v180_v8 }
   0xe   :  { %59 = vmatpush.bf16.msra.mxu0 %v175_v9 }
   0xf   :  { %113 = vmatpush.bf16.msra.mxu1 %v179_v10 }
  0x11   :  { %149 = vmatmul.msk.bf16.vlgmr.msra.gmra.mxu0 %vm48_vm0, %v15_v0 }
  0x78   :  { %v78_v11 = vpop.permute.xlu0 %77 }
  0x79   :  { %174 = vmatmul.msk.bf16.vlgmr.msra.gmra.mxu1 %vm48_vm0, %v78_v11 }
  0x8e   :  { %v61_v12 = vpop.f32.mrf.mxu0 }
  0x8f   :  { %v125_v17 = vadd.f32 %v121_v15, %v61_v12 }
  0x96   :  { %v63_v13 = vpop.f32.mrf.mxu0 }
  0xf6   :  { %v115_v18 = vpop.f32.mrf.mxu1 }
  0xf7   :  { %v126_v19 = vadd.f32 %v122_v16, %v115_v18 }
  0xf9   :  { %v127_v20 = vpack.c.bf16 %v126_v19, %v125_v17 }
  0xfb   :  { %128 = vst [vmem:[%s241_s3] sm:$0xff] %v127_v20 }
  0xfe   :  { %v117_v21 = vpop.f32.mrf.mxu1 }

// kernel: _lambda_.24
= control target key start
LH: loop header
LB: loop body
LE: loop exit
PB: predicated region body
PF: predicated region fallthrough
CT: control target
= control target key end

     0   :  { %s2863_s1 = inlined_call_operand.vmem [shape: bf16[2,1152,128], index: 1, kind: input, shape index: {}]   ;;  %s2864_s0 = inlined_call_operand.vmem [shape: bf16[8,2304], index: 0, kind: input, shape index: {}]   ;;  %s2865_s2 = inlined_call_operand.vmem [shape: f32[1,256], index: 2, kind: input, shape index: {}]   ;;  %s2866_s3 = inlined_call_operand.vmem [shape: bf16[8,256], index: 3, kind: input, shape index: {}]   ;;  %s2867_s4 = inlined_call_operand.vmem [shape: bf16[8,256], index: 4, kind: output, shape index: {}]  }
   0x1   :  { %v2226_v0 = vld [vmem:[%s2863_s1 + $0x38] sm:$0xff]  ;;  %v2225_v4 = vld [vmem:[%s2863_s1 + $0x30] sm:$0xff]  ;;  %v2224_v8 = vld [vmem:[%s2863_s1 + $0x28] sm:$0xff] }
   0x2   :  { %v2234_v1 = vld [vmem:[%s2863_s1 + $0x78] sm:$0xff]  ;;  %630 = vmatpush.bf16.msra.mxu0 %v2226_v0  ;;  %v2233_v5 = vld [vmem:[%s2863_s1 + $0x70] sm:$0xff]  ;;  %v2232_v9 = vld [vmem:[%s2863_s1 + $0x68] sm:$0xff] }
   0x3   :  { %v2242_v2 = vld [vmem:[%s2863_s1 + $0xb8] sm:$0xff]  ;;  %643 = vmatpush.bf16.msra.mxu1 %v2234_v1  ;;  %v2241_v6 = vld [vmem:[%s2863_s1 + $0xb0] sm:$0xff]  ;;  %v2240_v10 = vld [vmem:[%s2863_s1 + $0xa8] sm:$0xff] }
   0x4   :  { %v2250_v3 = vld [vmem:[%s2863_s1 + $0xf8] sm:$0xff]  ;;  %656 = vmatpush.bf16.msra.mxu2 %v2242_v2  ;;  %v2249_v7 = vld [vmem:[%s2863_s1 + $0xf0] sm:$0xff]  ;;  %v2248_v11 = vld [vmem:[%s2863_s1 + $0xe8] sm:$0xff] }
   0x5   :  { %669 = vmatpush.bf16.msra.mxu3 %v2250_v3  ;;  %v2223_v12 = vld [vmem:[%s2863_s1 + $0x20] sm:$0xff]  ;;  %v2222_v16 = vld [vmem:[%s2863_s1 + $0x18] sm:$0xff]  ;;  %v2221_v20 = vld [vmem:[%s2863_s1 + $0x10] sm:$0xff] }
   0x6   :  { %631 = vmatpush.bf16.msra.mxu0 %v2225_v4  ;;  %v2231_v13 = vld [vmem:[%s2863_s1 + $0x60] sm:$0xff]  ;;  %v2230_v17 = vld [vmem:[%s2863_s1 + $0x58] sm:$0xff]  ;;  %v2229_v21 = vld [vmem:[%s2863_s1 + $0x50] sm:$0xff] }
   0x7   :  { %644 = vmatpush.bf16.msra.mxu1 %v2233_v5  ;;  %v2239_v14 = vld [vmem:[%s2863_s1 + $0xa0] sm:$0xff]  ;;  %v2238_v18 = vld [vmem:[%s2863_s1 + $0x98] sm:$0xff]  ;;  %v2237_v22 = vld [vmem:[%s2863_s1 + $0x90] sm:$0xff] }
   0x8   :  { %657 = vmatpush.bf16.msra.mxu2 %v2241_v6  ;;  %v2247_v15 = vld [vmem:[%s2863_s1 + $0xe0] sm:$0xff]  ;;  %v2246_v19 = vld [vmem:[%s2863_s1 + $0xd8] sm:$0xff]  ;;  %v2245_v23 = vld [vmem:[%s2863_s1 + $0xd0] sm:$0xff] }
   0x9   :  { %670 = vmatpush.bf16.msra.mxu3 %v2249_v7  ;;  %v2220_v24 = vld [vmem:[%s2863_s1 + $0x8] sm:$0xff]  ;;  %v17_v26 = vld [vmem:[%s2864_s0] sm:$0xff]  ;;  %v2258_v35 = vld [vmem:[%s2863_s1 + $0x138] sm:$0xff] }
   0xa   :  { %632 = vmatpush.bf16.msra.mxu0 %v2224_v8  ;;  %v2228_v25 = vld [vmem:[%s2863_s1 + $0x48] sm:$0xff]  ;;  %v171_v30 = vunpack.c.l.b16 %v17_v26  ;;  %v2219_v31 = vld [vmem:[%s2863_s1] sm:$0xff]  ;;  %v172_v36 = vunpack.c.h.b16 %v17_v26  ;;  %v2266_v37 = vld [vmem:[%s2863_s1 + $0x178] sm:$0xff] }
   0xb   :  { %645 = vmatpush.bf16.msra.mxu1 %v2232_v9  ;;  %v2236_v27 = vld [vmem:[%s2863_s1 + $0x88] sm:$0xff]  ;;  %v2227_v32 = vld [vmem:[%s2863_s1 + $0x40] sm:$0xff]  ;;  %v2274_v38 = vld [vmem:[%s2863_s1 + $0x1b8] sm:$0xff] }
   0xc   :  { %658 = vmatpush.bf16.msra.mxu2 %v2240_v10  ;;  %v2244_v28 = vld [vmem:[%s2863_s1 + $0xc8] sm:$0xff]  ;;  %v2235_v34 = vld [vmem:[%s2863_s1 + $0x80] sm:$0xff]  ;;  %v180_v40 = vpack.c.b16 %v171_v30, %v171_v30  ;;  %v2282_v42 = vld [vmem:[%s2863_s1 + $0x1f8] sm:$0xff]  ;;  %v181_v45 = vpack.c.b16 %v172_v36, %v172_v36 }
   0xd   :  { %671 = vmatpush.bf16.msra.mxu3 %v2248_v11  ;;  %v18_v29 = vld [vmem:[%s2864_s0 + $0x8] sm:$0xff]  ;;  %v2243_v39 = vld [vmem:[%s2863_s1 + $0xc0] sm:$0xff]  ;;  %v2257_v44 = vld [vmem:[%s2863_s1 + $0x130] sm:$0xff] }
   0xe   :  { %633 = vmatpush.bf16.msra.mxu0 %v2223_v12  ;;  %v173_v33 = vunpack.c.l.b16 %v18_v29  ;;  %v174_v41 = vunpack.c.h.b16 %v18_v29  ;;  %v2265_v46 = vld [vmem:[%s2863_s1 + $0x170] sm:$0xff]  ;;  %v2256_v50 = vld [vmem:[%s2863_s1 + $0x128] sm:$0xff]  ;;  %v2255_v54 = vld [vmem:[%s2863_s1 + $0x120] sm:$0xff] }
   0xf   :  { %646 = vmatpush.bf16.msra.mxu1 %v2231_v13  ;;  %v2273_v47 = vld [vmem:[%s2863_s1 + $0x1b0] sm:$0xff]  ;;  %v2264_v51 = vld [vmem:[%s2863_s1 + $0x168] sm:$0xff]  ;;  %v2263_v55 = vld [vmem:[%s2863_s1 + $0x160] sm:$0xff] }
  0x10   :  { %659 = vmatpush.bf16.msra.mxu2 %v2239_v14  ;;  %v182_v43 = vpack.c.b16 %v173_v33, %v173_v33  ;;  %v183_v48 = vpack.c.b16 %v174_v41, %v174_v41  ;;  %v2281_v49 = vld [vmem:[%s2863_s1 + $0x1f0] sm:$0xff]  ;;  %v2272_v52 = vld [vmem:[%s2863_s1 + $0x1a8] sm:$0xff]  ;;  %v2271_v56 = vld [vmem:[%s2863_s1 + $0x1a0] sm:$0xff] }
  0x11   :  { %672 = vmatpush.bf16.msra.mxu3 %v2247_v15  ;;  %v2280_v53 = vld [vmem:[%s2863_s1 + $0x1e8] sm:$0xff]  ;;  %v2279_v57 = vld [vmem:[%s2863_s1 + $0x1e0] sm:$0xff]  ;;  %v2254_v58 = vld [vmem:[%s2863_s1 + $0x118] sm:$0xff] }
  0x12   :  { %634 = vmatpush.bf16.msra.mxu0 %v2222_v16  ;;  %v2262_v59 = vld [vmem:[%s2863_s1 + $0x158] sm:$0xff]  ;;  %v2253_v62 = vld [vmem:[%s2863_s1 + $0x110] sm:$0xff]  ;;  %v2252_v2 = vld [vmem:[%s2863_s1 + $0x108] sm:$0xff] }
  0x13   :  { %647 = vmatpush.bf16.msra.mxu1 %v2230_v17  ;;  %v2270_v60 = vld [vmem:[%s2863_s1 + $0x198] sm:$0xff]  ;;  %v2261_v63 = vld [vmem:[%s2863_s1 + $0x150] sm:$0xff]  ;;  %v2260_v3 = vld [vmem:[%s2863_s1 + $0x148] sm:$0xff] }
  0x14   :  { %660 = vmatpush.bf16.msra.mxu2 %v2238_v18  ;;  %v2278_v61 = vld [vmem:[%s2863_s1 + $0x1d8] sm:$0xff]  ;;  %v2269_v0 = vld [vmem:[%s2863_s1 + $0x190] sm:$0xff]  ;;  %v2268_v4 = vld [vmem:[%s2863_s1 + $0x188] sm:$0xff] }
  0x15   :  { %673 = vmatpush.bf16.msra.mxu3 %v2246_v19  ;;  %v2277_v1 = vld [vmem:[%s2863_s1 + $0x1d0] sm:$0xff]  ;;  %v20_v5 = vld [vmem:[%s2864_s0 + $0x18] sm:$0xff]  ;;  %v2276_v7 = vld [vmem:[%s2863_s1 + $0x1c8] sm:$0xff] }
  0x16   :  { %635 = vmatpush.bf16.msra.mxu0 %v2221_v20  ;;  %v19_v6 = vld [vmem:[%s2864_s0 + $0x10] sm:$0xff]  ;;  %v2251_v8 = vld [vmem:[%s2863_s1 + $0x100] sm:$0xff]  ;;  %v177_v9 = vunpack.c.l.b16 %v20_v5  ;;  %v2290_v14 = vld [vmem:[%s2863_s1 + $0x238] sm:$0xff]  ;;  %v178_v18 = vunpack.c.h.b16 %v20_v5 }
  0x17   :  { %648 = vmatpush.bf16.msra.mxu1 %v2229_v21  ;;  %v2259_v10 = vld [vmem:[%s2863_s1 + $0x140] sm:$0xff]  ;;  %v175_v12 = vunpack.c.l.b16 %v19_v6  ;;  %v176_v13 = vunpack.c.h.b16 %v19_v6  ;;  %v2298_v15 = vld [vmem:[%s2863_s1 + $0x278] sm:$0xff]  ;;  %v2296_v29 = vld [vmem:[%s2863_s1 + $0x268] sm:$0xff] }
  0x18   :  { %661 = vmatpush.bf16.msra.mxu2 %v2237_v22  ;;  %v2267_v11 = vld [vmem:[%s2863_s1 + $0x180] sm:$0xff]  ;;  %v2306_v16 = vld [vmem:[%s2863_s1 + $0x2b8] sm:$0xff]  ;;  %v186_v20 = vpack.c.b16 %v177_v9, %v177_v9  ;;  %v187_v26 = vpack.c.b16 %v178_v18, %v178_v18  ;;  %v2304_v30 = vld [vmem:[%s2863_s1 + $0x2a8] sm:$0xff] }
  0x19   :  { %674 = vmatpush.bf16.msra.mxu3 %v2245_v23  ;;  %v2275_v17 = vld [vmem:[%s2863_s1 + $0x1c0] sm:$0xff]  ;;  %v2314_v19 = vld [vmem:[%s2863_s1 + $0x2f8] sm:$0xff]  ;;  %v184_v21 = vpack.c.b16 %v175_v12, %v175_v12  ;;  %v185_v22 = vpack.c.b16 %v176_v13, %v176_v13  ;;  %v2289_v23 = vld [vmem:[%s2863_s1 + $0x230] sm:$0xff] }
  0x1a   :  { %636 = vmatpush.bf16.msra.mxu0 %v2220_v24  ;;  %v2297_v24 = vld [vmem:[%s2863_s1 + $0x270] sm:$0xff]  ;;  %v2295_v33 = vld [vmem:[%s2863_s1 + $0x260] sm:$0xff]  ;;  %v2286_v36 = vld [vmem:[%s2863_s1 + $0x218] sm:$0xff] }
  0x1b   :  { %649 = vmatpush.bf16.msra.mxu1 %v2228_v25  ;;  %v2305_v25 = vld [vmem:[%s2863_s1 + $0x2b0] sm:$0xff]  ;;  %v2336_v9 = vld [vmem:[%s2863_s1 + $0x3a8] sm:$0xff]  ;;  %v2327_v12 = vld [vmem:[%s2863_s1 + $0x360] sm:$0xff] }
  0x1c   :  { %662 = vmatpush.bf16.msra.mxu2 %v2236_v27  ;;  %v2313_v27 = vld [vmem:[%s2863_s1 + $0x2f0] sm:$0xff]  ;;  %v2335_v13 = vld [vmem:[%s2863_s1 + $0x3a0] sm:$0xff]  ;;  %v2342_v18 = vld [vmem:[%s2863_s1 + $0x3d8] sm:$0xff] }
  0x1d   :  { %675 = vmatpush.bf16.msra.mxu3 %v2244_v28  ;;  %v2288_v28 = vld [vmem:[%s2863_s1 + $0x228] sm:$0xff]  ;;  %v2293_v41 = vld [vmem:[%s2863_s1 + $0x250] sm:$0xff] }
  0x1e   :  { %637 = vmatpush.bf16.msra.mxu0 %v2219_v31  ;;  %v2312_v31 = vld [vmem:[%s2863_s1 + $0x2e8] sm:$0xff]  ;;  %v2345_v6 = vld [vmem:[%s2863_s1 + $0x3f0] sm:$0xff] }
  0x1f   :  { %650 = vmatpush.bf16.msra.mxu1 %v2227_v32  ;;  %v2287_v32 = vld [vmem:[%s2863_s1 + $0x220] sm:$0xff] }
  0x20   :  { %663 = vmatpush.bf16.msra.mxu2 %v2235_v34  ;;  %v2303_v34 = vld [vmem:[%s2863_s1 + $0x2a0] sm:$0xff] }
  0x21   :  { %676 = vmatpush.bf16.msra.mxu3 %v2243_v39  ;;  %638 = vmatmul.bf16.vlgmr.msra.gmra.mxu0 %v180_v40  ;;  %v2310_v39 = vld [vmem:[%s2863_s1 + $0x2d8] sm:$0xff]  ;;  %v2285_v40 = vld [vmem:[%s2863_s1 + $0x210] sm:$0xff] }
  0x22   :  { %682 = vmatpush.bf16.msrb.mxu0 %v2258_v35  ;;  %651 = vmatmul.bf16.vlgmr.msra.gmra.mxu1 %v181_v45  ;;  %v2311_v35 = vld [vmem:[%s2863_s1 + $0x2e0] sm:$0xff]  ;;  %v2292_v45 = vld [vmem:[%s2863_s1 + $0x248] sm:$0xff] }
  0x23   :  { %695 = vmatpush.bf16.msrb.mxu1 %v2266_v37  ;;  %664 = vmatmul.bf16.vlgmr.msra.gmra.mxu2 %v182_v43  ;;  %v2294_v37 = vld [vmem:[%s2863_s1 + $0x258] sm:$0xff]  ;;  %v2309_v43 = vld [vmem:[%s2863_s1 + $0x2d0] sm:$0xff] }
  0x24   :  { %708 = vmatpush.bf16.msrb.mxu2 %v2274_v38  ;;  %677 = vmatmul.bf16.vlgmr.msra.gmra.mxu3 %v183_v48  ;;  %v2302_v38 = vld [vmem:[%s2863_s1 + $0x298] sm:$0xff]  ;;  %v747_v48 = vld [vmem:[%s2864_s0 + $0x24] sm:$0xff] }
  0x25   :  { %721 = vmatpush.bf16.msrb.mxu3 %v2282_v42  ;;  %v2301_v42 = vld [vmem:[%s2863_s1 + $0x290] sm:$0xff] }
  0x26   :  { %683 = vmatpush.bf16.msrb.mxu0 %v2257_v44  ;;  %v2284_v44 = vld [vmem:[%s2863_s1 + $0x208] sm:$0xff] }
  0x27   :  { %696 = vmatpush.bf16.msrb.mxu1 %v2265_v46  ;;  %v21_v46 = vld [vmem:[%s2864_s0 + $0x20] sm:$0xf] }
  0x28   :  { %709 = vmatpush.bf16.msrb.mxu2 %v2273_v47  ;;  %v2300_v47 = vld [vmem:[%s2863_s1 + $0x288] sm:$0xff] }
  0x29   :  { %722 = vmatpush.bf16.msrb.mxu3 %v2281_v49  ;;  %v2308_v49 = vld [vmem:[%s2863_s1 + $0x2c8] sm:$0xff] }
  0x2a   :  { %684 = vmatpush.bf16.msrb.mxu0 %v2256_v50  ;;  %v179_v50 = vunpack.c.l.b16 %v21_v46  ;;  %v2360_v46 = vld [vmem:[%s2863_s1 + $0x468] sm:$0xff] }
  0x2b   :  { %697 = vmatpush.bf16.msrb.mxu1 %v2264_v51  ;;  %v2283_v51 = vld [vmem:[%s2863_s1 + $0x200] sm:$0xff] }
  0x2c   :  { %710 = vmatpush.bf16.msrb.mxu2 %v2272_v52  ;;  %v2291_v52 = vld [vmem:[%s2863_s1 + $0x240] sm:$0xff] }
  0x2d   :  { %723 = vmatpush.bf16.msrb.mxu3 %v2280_v53  ;;  %v903_v53 = vunpack.c.h.b16 %v747_v48 }
  0x2e   :  { %685 = vmatpush.bf16.msrb.mxu0 %v2255_v54  ;;  %v2691_v54 = vld [vmem:[%s2864_s0 + $0x2c] sm:$0xff] }
  0x2f   :  { %698 = vmatpush.bf16.msrb.mxu1 %v2263_v55  ;;  %v2299_v55 = vld [vmem:[%s2863_s1 + $0x280] sm:$0xff] }
  0x30   :  { %711 = vmatpush.bf16.msrb.mxu2 %v2271_v56  ;;  %v2322_v56 = vld [vmem:[%s2863_s1 + $0x338] sm:$0xff] }
  0x31   :  { %724 = vmatpush.bf16.msrb.mxu3 %v2279_v57  ;;  %v902_v57 = vunpack.c.l.b16 %v747_v48  ;;  %v2359_v48 = vld [vmem:[%s2863_s1 + $0x460] sm:$0xff] }
  0x32   :  { %686 = vmatpush.bf16.msrb.mxu0 %v2254_v58  ;;  %v2330_v58 = vld [vmem:[%s2863_s1 + $0x378] sm:$0xff] }
  0x33   :  { %699 = vmatpush.bf16.msrb.mxu1 %v2262_v59  ;;  %v2338_v59 = vld [vmem:[%s2863_s1 + $0x3b8] sm:$0xff] }
  0x34   :  { %712 = vmatpush.bf16.msrb.mxu2 %v2270_v60  ;;  %v188_v60 = vpack.c.b16 %v179_v50, %v179_v50  ;;  %v2358_v50 = vld [vmem:[%s2863_s1 + $0x458] sm:$0xff] }
  0x35   :  { %725 = vmatpush.bf16.msrb.mxu3 %v2278_v61  ;;  %v2307_v61 = vld [vmem:[%s2863_s1 + $0x2c0] sm:$0xff] }
  0x36   :  { %687 = vmatpush.bf16.msrb.mxu0 %v2253_v62  ;;  %v904_v62 = vunpack.c.l.b16 %v2691_v54 }
  0x37   :  { %700 = vmatpush.bf16.msrb.mxu1 %v2261_v63  ;;  %v2346_v63 = vld [vmem:[%s2863_s1 + $0x3f8] sm:$0xff] }
  0x38   :  { %713 = vmatpush.bf16.msrb.mxu2 %v2269_v0  ;;  %v912_v0 = vpack.c.b16 %v903_v53, %v903_v53  ;;  %v913_v5 = vpack.c.b16 %v904_v62, %v904_v62  ;;  %v2348_v53 = vld [vmem:[%s2863_s1 + $0x408] sm:$0xff] }
  0x39   :  { %726 = vmatpush.bf16.msrb.mxu3 %v2277_v1  ;;  %v2321_v1 = vld [vmem:[%s2863_s1 + $0x330] sm:$0xff] }
  0x3a   :  { %688 = vmatpush.bf16.msrb.mxu0 %v2252_v2  ;;  %v911_v2 = vpack.c.b16 %v902_v57, %v902_v57 }
  0x3b   :  { %701 = vmatpush.bf16.msrb.mxu1 %v2260_v3  ;;  %v2329_v3 = vld [vmem:[%s2863_s1 + $0x370] sm:$0xff] }
  0x3c   :  { %714 = vmatpush.bf16.msrb.mxu2 %v2268_v4  ;;  %v2337_v4 = vld [vmem:[%s2863_s1 + $0x3b0] sm:$0xff] }
  0x3d   :  { %727 = vmatpush.bf16.msrb.mxu3 %v2276_v7  ;;  %v2320_v7 = vld [vmem:[%s2863_s1 + $0x328] sm:$0xff] }
  0x3e   :  { %689 = vmatpush.bf16.msrb.mxu0 %v2251_v8  ;;  %v2328_v8 = vld [vmem:[%s2863_s1 + $0x368] sm:$0xff] }
  0x3f   :  { %702 = vmatpush.bf16.msrb.mxu1 %v2259_v10  ;;  %v2344_v10 = vld [vmem:[%s2863_s1 + $0x3e8] sm:$0xff] }
  0x40   :  { %715 = vmatpush.bf16.msrb.mxu2 %v2267_v11  ;;  %v2319_v11 = vld [vmem:[%s2863_s1 + $0x320] sm:$0xff] }
  0x41   :  { %728 = vmatpush.bf16.msrb.mxu3 %v2275_v17  ;;  %690 = vmatmul.bf16.vlgmr.msrb.gmra.mxu0 %v184_v21  ;;  %v2334_v17 = vld [vmem:[%s2863_s1 + $0x398] sm:$0xff]  ;;  %v2333_v21 = vld [vmem:[%s2863_s1 + $0x390] sm:$0xff] }
  0x42   :  { %734 = vmatpush.bf16.msra.mxu0 %v2290_v14  ;;  %703 = vmatmul.bf16.vlgmr.msrb.gmra.mxu1 %v185_v22  ;;  %v2343_v14 = vld [vmem:[%s2863_s1 + $0x3e0] sm:$0xff]  ;;  %v2341_v22 = vld [vmem:[%s2863_s1 + $0x3d0] sm:$0xff] }
  0x43   :  { %1361 = vmatpush.bf16.msra.mxu1 %v2298_v15  ;;  %716 = vmatmul.bf16.vlgmr.msrb.gmra.mxu2 %v186_v20  ;;  %v2318_v15 = vld [vmem:[%s2863_s1 + $0x318] sm:$0xff]  ;;  %v2325_v20 = vld [vmem:[%s2863_s1 + $0x350] sm:$0xff] }
  0x44   :  { %1374 = vmatpush.bf16.msra.mxu2 %v2306_v16  ;;  %729 = vmatmul.bf16.vlgmr.msrb.gmra.mxu3 %v187_v26  ;;  %v2326_v16 = vld [vmem:[%s2863_s1 + $0x358] sm:$0xff] }
  0x45   :  { %1387 = vmatpush.bf16.msra.mxu3 %v2314_v19  ;;  %v2317_v19 = vld [vmem:[%s2863_s1 + $0x310] sm:$0xff] }
  0x46   :  { %735 = vmatpush.bf16.msra.mxu0 %v2289_v23  ;;  %v2316_v23 = vld [vmem:[%s2863_s1 + $0x308] sm:$0xff]  ;;  %v749_v26 = vld [vmem:[%s2864_s0 + $0x34] sm:$0xff] }
  0x47   :  { %1362 = vmatpush.bf16.msra.mxu1 %v2297_v24  ;;  %v2324_v24 = vld [vmem:[%s2863_s1 + $0x348] sm:$0xff] }
  0x48   :  { %1375 = vmatpush.bf16.msra.mxu2 %v2305_v25  ;;  %v2332_v25 = vld [vmem:[%s2863_s1 + $0x388] sm:$0xff] }
  0x49   :  { %1388 = vmatpush.bf16.msra.mxu3 %v2313_v27  ;;  %v2340_v27 = vld [vmem:[%s2863_s1 + $0x3c8] sm:$0xff] }
  0x4a   :  { %736 = vmatpush.bf16.msra.mxu0 %v2288_v28  ;;  %v905_v28 = vunpack.c.h.b16 %v2691_v54  ;;  %v2356_v54 = vld [vmem:[%s2863_s1 + $0x448] sm:$0xff] }
  0x4b   :  { %1363 = vmatpush.bf16.msra.mxu1 %v2296_v29  ;;  %v2315_v29 = vld [vmem:[%s2863_s1 + $0x300] sm:$0xff] }
  0x4c   :  { %1376 = vmatpush.bf16.msra.mxu2 %v2304_v30  ;;  %v907_v30 = vunpack.c.h.b16 %v749_v26 }
  0x4d   :  { %1389 = vmatpush.bf16.msra.mxu3 %v2312_v31  ;;  %v750_v31 = vld [vmem:[%s2864_s0 + $0x3c] sm:$0xff] }
  0x4e   :  { %737 = vmatpush.bf16.msra.mxu0 %v2287_v32  ;;  %v906_v32 = vunpack.c.l.b16 %v749_v26 }
  0x4f   :  { %1364 = vmatpush.bf16.msra.mxu1 %v2295_v33  ;;  %v2323_v33 = vld [vmem:[%s2863_s1 + $0x340] sm:$0xff] }
  0x50   :  { %1377 = vmatpush.bf16.msra.mxu2 %v2303_v34  ;;  %v2331_v34 = vld [vmem:[%s2863_s1 + $0x380] sm:$0xff] }
  0x51   :  { %1390 = vmatpush.bf16.msra.mxu3 %v2311_v35  ;;  %v2354_v35 = vld [vmem:[%s2863_s1 + $0x438] sm:$0xff] }
  0x52   :  { %738 = vmatpush.bf16.msra.mxu0 %v2286_v36  ;;  %v2362_v36 = vld [vmem:[%s2863_s1 + $0x478] sm:$0xff] }
  0x53   :  { %1365 = vmatpush.bf16.msra.mxu1 %v2294_v37  ;;  %v2339_v37 = vld [vmem:[%s2863_s1 + $0x3c0] sm:$0xff] }
  0x54   :  { %1378 = vmatpush.bf16.msra.mxu2 %v2302_v38  ;;  %v914_v38 = vpack.c.b16 %v905_v28, %v905_v28 }
  0x55   :  { %1391 = vmatpush.bf16.msra.mxu3 %v2310_v39  ;;  %v908_v39 = vunpack.c.l.b16 %v750_v31 }
  0x56   :  { %739 = vmatpush.bf16.msra.mxu0 %v2285_v40  ;;  %v916_v40 = vpack.c.b16 %v907_v30, %v907_v30 }
  0x57   :  { %1366 = vmatpush.bf16.msra.mxu1 %v2293_v41  ;;  %v915_v41 = vpack.c.b16 %v906_v32, %v906_v32 }
  0x58   :  { %1379 = vmatpush.bf16.msra.mxu2 %v2301_v42  ;;  %v2353_v42 = vld [vmem:[%s2863_s1 + $0x430] sm:$0xff] }
  0x59   :  { %1392 = vmatpush.bf16.msra.mxu3 %v2309_v43  ;;  %v2361_v43 = vld [vmem:[%s2863_s1 + $0x470] sm:$0xff] }
  0x5a   :  { %740 = vmatpush.bf16.msra.mxu0 %v2284_v44  ;;  %v917_v44 = vpack.c.b16 %v908_v39, %v908_v39 }
  0x5b   :  { %1367 = vmatpush.bf16.msra.mxu1 %v2292_v45  ;;  %v2352_v45 = vld [vmem:[%s2863_s1 + $0x428] sm:$0xff] }
  0x5c   :  { %1380 = vmatpush.bf16.msra.mxu2 %v2300_v47  ;;  %v2351_v47 = vld [vmem:[%s2863_s1 + $0x420] sm:$0xff] }
  0x5d   :  { %1393 = vmatpush.bf16.msra.mxu3 %v2308_v49  ;;  %v2350_v49 = vld [vmem:[%s2863_s1 + $0x418] sm:$0xff] }
  0x5e   :  { %741 = vmatpush.bf16.msra.mxu0 %v2283_v51  ;;  %v2349_v51 = vld [vmem:[%s2863_s1 + $0x410] sm:$0xff] }
  0x5f   :  { %1368 = vmatpush.bf16.msra.mxu1 %v2291_v52  ;;  %v2357_v52 = vld [vmem:[%s2863_s1 + $0x450] sm:$0xff] }
  0x60   :  { %1381 = vmatpush.bf16.msra.mxu2 %v2299_v55  ;;  %v751_v55 = vld [vmem:[%s2864_s0 + $0x44] sm:$0xf] }
  0x61   :  { %742 = vmatmul.bf16.vlgmr.msra.gmra.mxu0 %v188_v60  ;;  %1394 = vmatpush.bf16.msra.mxu3 %v2307_v61  ;;  %v910_v57 = vunpack.c.l.b16 %v751_v55 }
  0x62   :  { %1400 = vmatpush.bf16.msrb.mxu0 %v2322_v56  ;;  %1369 = vmatmul.bf16.vlgmr.msra.gmra.mxu1 %v911_v2  ;;  %v909_v56 = vunpack.c.h.b16 %v750_v31 }
  0x63   :  { %1413 = vmatpush.bf16.msrb.mxu1 %v2330_v58  ;;  %1382 = vmatmul.bf16.vlgmr.msra.gmra.mxu2 %v912_v0  ;;  %v2347_v58 = vld [vmem:[%s2863_s1 + $0x400] sm:$0xff]  ;;  %v919_v61 = vpack.c.b16 %v910_v57, %v910_v57 }
  0x64   :  { %1426 = vmatpush.bf16.msrb.mxu2 %v2338_v59  ;;  %1395 = vmatmul.bf16.vlgmr.msra.gmra.mxu3 %v913_v5  ;;  %v2355_v59 = vld [vmem:[%s2863_s1 + $0x440] sm:$0xff]  ;;  %v918_v60 = vpack.c.b16 %v909_v56, %v909_v56 }
  0x65   :  { %1439 = vmatpush.bf16.msrb.mxu3 %v2346_v63 }
  0x66   :  { %1401 = vmatpush.bf16.msrb.mxu0 %v2321_v1 }
  0x67   :  { %1414 = vmatpush.bf16.msrb.mxu1 %v2329_v3 }
  0x68   :  { %1427 = vmatpush.bf16.msrb.mxu2 %v2337_v4 }
  0x69   :  { %1440 = vmatpush.bf16.msrb.mxu3 %v2345_v6 }
  0x6a   :  { %1402 = vmatpush.bf16.msrb.mxu0 %v2320_v7 }
  0x6b   :  { %1415 = vmatpush.bf16.msrb.mxu1 %v2328_v8 }
  0x6c   :  { %1428 = vmatpush.bf16.msrb.mxu2 %v2336_v9 }
  0x6d   :  { %1441 = vmatpush.bf16.msrb.mxu3 %v2344_v10 }
  0x6e   :  { %1403 = vmatpush.bf16.msrb.mxu0 %v2319_v11 }
  0x6f   :  { %1416 = vmatpush.bf16.msrb.mxu1 %v2327_v12 }
  0x70   :  { %1429 = vmatpush.bf16.msrb.mxu2 %v2335_v13 }
  0x71   :  { %1442 = vmatpush.bf16.msrb.mxu3 %v2343_v14 }
  0x72   :  { %1404 = vmatpush.bf16.msrb.mxu0 %v2318_v15 }
  0x73   :  { %1417 = vmatpush.bf16.msrb.mxu1 %v2326_v16 }
  0x74   :  { %1430 = vmatpush.bf16.msrb.mxu2 %v2334_v17 }
  0x75   :  { %1443 = vmatpush.bf16.msrb.mxu3 %v2342_v18 }
  0x76   :  { %1405 = vmatpush.bf16.msrb.mxu0 %v2317_v19 }
  0x77   :  { %1418 = vmatpush.bf16.msrb.mxu1 %v2325_v20 }
  0x78   :  { %1431 = vmatpush.bf16.msrb.mxu2 %v2333_v21 }
  0x79   :  { %1444 = vmatpush.bf16.msrb.mxu3 %v2341_v22 }
  0x7a   :  { %1406 = vmatpush.bf16.msrb.mxu0 %v2316_v23 }
  0x7b   :  { %1419 = vmatpush.bf16.msrb.mxu1 %v2324_v24 }
  0x7c   :  { %1432 = vmatpush.bf16.msrb.mxu2 %v2332_v25 }
  0x7d   :  { %1445 = vmatpush.bf16.msrb.mxu3 %v2340_v27 }
  0x7e   :  { %1407 = vmatpush.bf16.msrb.mxu0 %v2315_v29 }
  0x7f   :  { %1420 = vmatpush.bf16.msrb.mxu1 %v2323_v33 }
  0x80   :  { %1433 = vmatpush.bf16.msrb.mxu2 %v2331_v34 }
  0x81   :  { %1446 = vmatpush.bf16.msrb.mxu3 %v2339_v37  ;;  %1408 = vmatmul.bf16.vlgmr.msrb.gmra.mxu0 %v914_v38 }
  0x82   :  { %1452 = vmatpush.bf16.msra.mxu0 %v2354_v35  ;;  %1421 = vmatmul.bf16.vlgmr.msrb.gmra.mxu1 %v915_v41  ;;  %v1478_v41 = vld [vmem:[%s2865_s2] sm:$0x3] }
  0x83   :  { %1465 = vmatpush.bf16.msra.mxu1 %v2362_v36  ;;  %1434 = vmatmul.bf16.vlgmr.msrb.gmra.mxu2 %v916_v40 }
  0x84   :  { %1447 = vmatmul.bf16.vlgmr.msrb.gmra.mxu3 %v917_v44  ;;  %v1480_v44 = vperm.slane %v1478_v41, 0 }
  0x86   :  { %1453 = vmatpush.bf16.msra.mxu0 %v2353_v42 }
  0x87   :  { %1466 = vmatpush.bf16.msra.mxu1 %v2361_v43 }
  0x8a   :  { %1454 = vmatpush.bf16.msra.mxu0 %v2352_v45  ;;  %v1486_v45 = vld [vmem:[%s2866_s3] sm:$0xff] }
  0x8b   :  { %1467 = vmatpush.bf16.msra.mxu1 %v2360_v46 }
  0x8e   :  { %1455 = vmatpush.bf16.msra.mxu0 %v2351_v47 }
  0x8f   :  { %1468 = vmatpush.bf16.msra.mxu1 %v2359_v48 }
  0x92   :  { %1456 = vmatpush.bf16.msra.mxu0 %v2350_v49 }
  0x93   :  { %1469 = vmatpush.bf16.msra.mxu1 %v2358_v50  ;;  %v1487_v50 = vunpack.c.l.bf16 %v1486_v45 }
  0x96   :  { %1457 = vmatpush.bf16.msra.mxu0 %v2349_v51 }
  0x97   :  { %1470 = vmatpush.bf16.msra.mxu1 %v2357_v52  ;;  %v1481_v52 = vperm.slane %v1478_v41, 1 }
  0x9a   :  { %1458 = vmatpush.bf16.msra.mxu0 %v2348_v53 }
  0x9b   :  { %1471 = vmatpush.bf16.msra.mxu1 %v2356_v54  ;;  %v1488_v54 = vunpack.c.h.bf16 %v1486_v45 }
  0x9e   :  { %1459 = vmatpush.bf16.msra.mxu0 %v2347_v58  ;;  %v639_v62 = vpop.f32.mrf.mxu0 }
  0x9f   :  { %1472 = vmatpush.bf16.msra.mxu1 %v2355_v59  ;;  %v652_v63 = vpop.f32.mrf.mxu1 }
  0xa0   :  { %v653_v0 = vadd.f32 %v652_v63, %v639_v62 }
  0xa1   :  { %1460 = vmatmul.bf16.vlgmr.msra.gmra.mxu0 %v918_v60 }
  0xa2   :  { %1473 = vmatmul.bf16.vlgmr.msra.gmra.mxu1 %v919_v61 }
  0xa6   :  { %v665_v1 = vpop.f32.mrf.mxu2  ;;  %v641_v3 = vpop.f32.mrf.mxu0 }
  0xa7   :  { %v666_v2 = vadd.f32 %v665_v1, %v653_v0  ;;  %v678_v4 = vpop.f32.mrf.mxu3  ;;  %v654_v5 = vpop.f32.mrf.mxu1 }
  0xa9   :  { %v679_v6 = vadd.f32 %v678_v4, %v666_v2 }
  0xae   :  { %v667_v7 = vpop.f32.mrf.mxu2 }
  0xaf   :  { %v680_v8 = vpop.f32.mrf.mxu3 }
  0xbe   :  { %v691_v9 = vpop.f32.mrf.mxu0 }
  0xbf   :  { %v704_v10 = vpop.f32.mrf.mxu1  ;;  %v692_v11 = vadd.f32 %v691_v9, %v679_v6 }
  0xc1   :  { %v705_v12 = vadd.f32 %v704_v10, %v692_v11 }
  0xc6   :  { %v717_v13 = vpop.f32.mrf.mxu2  ;;  %v693_v16 = vpop.f32.mrf.mxu0 }
  0xc7   :  { %v718_v14 = vadd.f32 %v717_v13, %v705_v12  ;;  %v730_v15 = vpop.f32.mrf.mxu3  ;;  %v706_v18 = vpop.f32.mrf.mxu1 }
  0xc9   :  { %v731_v17 = vadd.f32 %v730_v15, %v718_v14 }
  0xce   :  { %v719_v19 = vpop.f32.mrf.mxu2 }
  0xcf   :  { %v732_v20 = vpop.f32.mrf.mxu3 }
  0xde   :  { %v743_v21 = vpop.f32.mrf.mxu0 }
  0xdf   :  { %v1370_v22 = vpop.f32.mrf.mxu1  ;;  %v744_v43 = vadd.f32 %v743_v21, %v731_v17 }
  0xe1   :  { %v1484_v49 = vadd.f32 %v1480_v44, %v744_v43 }
  0xe3   :  { %v1489_v55 = vadd.f32 %v1487_v50, %v1484_v49 }
  0xe5   :  { %v1491_v60 = vmax.f32 %v1489_v55, 0.0 }
  0xe6   :  { %v1383_v23 = vpop.f32.mrf.mxu2  ;;  %v745_v24 = vpop.f32.mrf.mxu0 }
  0xe7   :  { %v1396_v25 = vpop.f32.mrf.mxu3  ;;  %v1372_v26 = vpop.f32.mrf.mxu1  ;;  %v1384_v33 = vadd.f32 %v1383_v23, %v1370_v22 }
  0xe9   :  { %v1397_v36 = vadd.f32 %v1396_v25, %v1384_v33 }
  0xee   :  { %v1385_v27 = vpop.f32.mrf.mxu2 }
  0xef   :  { %v1398_v28 = vpop.f32.mrf.mxu3 }
  0xfe   :  { %v1409_v29 = vpop.f32.mrf.mxu0 }
  0xff   :  { %v1422_v30 = vpop.f32.mrf.mxu1  ;;  %v1410_v38 = vadd.f32 %v1409_v29, %v1397_v36 }
 0x101   :  { %v1423_v40 = vadd.f32 %v1422_v30, %v1410_v38 }
 0x106   :  { %v1435_v31 = vpop.f32.mrf.mxu2  ;;  %v1411_v32 = vpop.f32.mrf.mxu0 }
 0x107   :  { %v1424_v34 = vpop.f32.mrf.mxu1  ;;  %v1448_v35 = vpop.f32.mrf.mxu3  ;;  %v1436_v42 = vadd.f32 %v1435_v31, %v1423_v40 }
 0x109   :  { %v1449_v46 = vadd.f32 %v1448_v35, %v1436_v42 }
 0x10e   :  { %v1437_v37 = vpop.f32.mrf.mxu2 }
 0x10f   :  { %v1450_v39 = vpop.f32.mrf.mxu3 }
 0x11e   :  { %v1461_v47 = vpop.f32.mrf.mxu0 }
 0x11f   :  { %v1474_v48 = vpop.f32.mrf.mxu1  ;;  %v1462_v51 = vadd.f32 %v1461_v47, %v1449_v46 }
 0x121   :  { %v1475_v53 = vadd.f32 %v1474_v48, %v1462_v51 }
 0x123   :  { %v1485_v56 = vadd.f32 %v1481_v52, %v1475_v53 }
 0x125   :  { %v1490_v57 = vadd.f32 %v1488_v54, %v1485_v56 }
 0x126   :  { %v1463_v58 = vpop.f32.mrf.mxu0 }
 0x127   :  { %v1476_v59 = vpop.f32.mrf.mxu1  ;;  %v1492_v61 = vmax.f32 %v1490_v57, 0.0 }
 0x129   :  { %v1493_v62 = vpack.c.bf16 %v1492_v61, %v1491_v60 }
 0x12b   :  { %1494 = vst [vmem:[%s2867_s4] sm:$0xff] %v1493_v62 }

// kernel: _lambda_.25
= control target key start
LH: loop header
LB: loop body
LE: loop exit
PB: predicated region body
PF: predicated region fallthrough
CT: control target
= control target key end

     0   :  { %v407_v1 = vmov 4.0   ;;  %s487_s0 = inlined_call_operand.vmem [shape: bf16[2,4,256], index: 0, kind: input, shape index: {}]   ;;  %s488_s1 = inlined_call_operand.vmem [shape: bf16[2,128,10], index: 1, kind: input, shape index: {}]   ;;  %s489_s2 = inlined_call_operand.vmem [shape: f32[1,20], index: 2, kind: input, shape index: {}]   ;;  %s490_s3 = inlined_call_operand.hbm [shape: f32[2,20], index: 3, kind: output, shape index: {}]  }
   0x1   :  { %v370_v0 = vld [vmem:[%s488_s1 + $0x78] sm:$0xff]  ;;  %379 = vrcp.f32 %v407_v1  ;;  %v369_v2 = vld [vmem:[%s488_s1 + $0x70] sm:$0xff]  ;;  %v372_v3 = vld [vmem:[%s487_s0] sm:$0xff]  }
   0x2   :  { %233 = vmatpush.bf16.msra.mxu1 %v370_v0  ;;  %v373_v4 = vunpack.c.l.bf16 %v372_v3  ;;  %v374_v5 = vunpack.c.h.bf16 %v372_v3 }
   0x3   :  { %8 = vsyncpa [#allocation3], 0  ;;  %v368_v6 = vld [vmem:[%s488_s1 + $0x68] sm:$0xff]  ;;  %v362_v7 = vld [vmem:[%s488_s1 + $0x38] sm:$0xff]  ;;  %vm32_vm0 = vcmask 1043456   ;;  %vm96_vm2 = vcmask 1041409  }
   0x4   :  { %21 = vst [vmem:[#allocation1] ss:$2 sm:$0xff] %v373_v4  ;;  %148 = vmatpush.bf16.msra.mxu0 %v362_v7  ;;  %v361_v10 = vld [vmem:[%s488_s1 + $0x30] sm:$0xff]  ;;  %v367_v11 = vld [vmem:[%s488_s1 + $0x60] sm:$0xff]  ;;  %v360_v13 = vld [vmem:[%s488_s1 + $0x28] sm:$0xff]  ;;  %s408_s18 = smov 10  }
   0x5   :  { %25 = vst [vmem:[#allocation1 + $0x10] ss:$2 sm:$0xff] %v374_v5  ;;  %v366_v18 = vld [vmem:[%s488_s1 + $0x58] sm:$0xff]  ;;  %v359_v28 = vld [vmem:[%s488_s1 + $0x20] sm:$0xff]  ;;  %v365_v33 = vld [vmem:[%s488_s1 + $0x50] sm:$0xff]  ;;  %vm250_vm3 = vcmask 80896  }
   0x6   :  { %234 = vmatpush.bf16.msra.mxu1 %v369_v2  ;;  %v358_v39 = vld [vmem:[%s488_s1 + $0x18] sm:$0xff]  ;;  %v364_v44 = vld [vmem:[%s488_s1 + $0x48] sm:$0xff]  ;;  %v357_v50 = vld [vmem:[%s488_s1 + $0x10] sm:$0xff]  ;;  %s409_s20 = smov [#allocation2]   ;;  %s266_s0 = sshll.u32 %s490_s3, 4  ;;  %vm257_vm4 = vcmask 156672   ;;  %s267_s0 = int_to_ptr.hbm [resolvable:$true] %s266_s0 }
   0x7   :  { %v380_v8 = vpop.eup %379  ;;  %v363_v55 = vld [vmem:[%s488_s1 + $0x40] sm:$0xff]  ;;  %v356_v60 = vld [vmem:[%s488_s1 + $0x8] sm:$0xff]  ;;  %s264_s21 = sshll.u32 %s409_s20, 4  ;;  %s265_s21 = int_to_ptr.vmem [resolvable:$true] %s264_s21 }
   0x8   :  { %v62_v9 = vmul.f32 4.0, %v380_v8  ;;  %149 = vmatpush.bf16.msra.mxu0 %v361_v10  ;;  %vm66_vm1 = vweird.f32 %v380_v8  ;;  %v355_v3 = vld [vmem:[%s488_s1] sm:$0xff] }
   0xa   :  { %235 = vmatpush.bf16.msra.mxu1 %v368_v6  ;;  %v63_v12 = vsub.f32 1.0, %v62_v9 }
   0xb   :  { %v22_v14 = vld.sshfl [vmem:[#allocation1] sm:$0xff pattern:$0x75316420]  ;;  %v23_v15 = vld.sshfl [vmem:[#allocation1 + $0x8] sm:$0xff pattern:$0x75316420] }
   0xc   :  { %v26_v16 = vld.sshfl [vmem:[#allocation1 + $0x10] sm:$0xff pattern:$0x75316420]  ;;  %v27_v17 = vld.sshfl [vmem:[#allocation1 + $0x18] sm:$0xff pattern:$0x75316420]  ;;  %v64_v27 = vmul.f32 %v380_v8, %v63_v12  ;;  %150 = vmatpush.bf16.msra.mxu0 %v360_v13 }
   0xd   :  { %v33_v19 = vsel %vm32_vm0, %v22_v14, 0.0  ;;  %v40_v20 = vsel %vm32_vm0, %v23_v15, 0.0  ;;  %v47_v21 = vsel %vm32_vm0, %v26_v16, 0.0  ;;  %v54_v22 = vsel %vm32_vm0, %v27_v17, 0.0  ;;  %v378_v16 = vld [vmem:[%s489_s2] ss:$0 sm:$0xff] }
   0xe   :  { %236 = vmatpush.bf16.msra.mxu1 %v367_v11  ;;  %v34_v23 = vrot.slane %v33_v19, 4  ;;  %v41_v24 = vrot.slane %v40_v20, 4  ;;  %v48_v25 = vrot.slane %v47_v21, 4  ;;  %v55_v26 = vrot.slane %v54_v22, 4 }
   0xf   :  { %v65_v38 = vadd.f32 %v380_v8, %v64_v27 }
  0x10   :  { %v35_v29 = vadd.f32 %v34_v23, %v33_v19  ;;  %v42_v30 = vadd.f32 %v41_v24, %v40_v20  ;;  %v49_v31 = vadd.f32 %v48_v25, %v47_v21  ;;  %v56_v32 = vadd.f32 %v55_v26, %v54_v22  ;;  %151 = vmatpush.bf16.msra.mxu0 %v359_v28 }
  0x11   :  { %v67_v49 = vsel %vm66_vm1, %v380_v8, %v65_v38 }
  0x12   :  { %237 = vmatpush.bf16.msra.mxu1 %v366_v18  ;;  %v36_v34 = vrot.slane %v35_v29, 2  ;;  %v43_v35 = vrot.slane %v42_v30, 2  ;;  %v50_v36 = vrot.slane %v49_v31, 2  ;;  %v57_v37 = vrot.slane %v56_v32, 2 }
  0x14   :  { %v37_v40 = vadd.f32 %v36_v34, %v35_v29  ;;  %v44_v41 = vadd.f32 %v43_v35, %v42_v30  ;;  %v51_v42 = vadd.f32 %v50_v36, %v49_v31  ;;  %v58_v43 = vadd.f32 %v57_v37, %v56_v32  ;;  %152 = vmatpush.bf16.msra.mxu0 %v358_v39 }
  0x16   :  { %238 = vmatpush.bf16.msra.mxu1 %v365_v33  ;;  %v38_v45 = vrot.slane %v37_v40, 1  ;;  %v45_v46 = vrot.slane %v44_v41, 1  ;;  %v52_v47 = vrot.slane %v51_v42, 1  ;;  %v59_v48 = vrot.slane %v58_v43, 1 }
  0x18   :  { %v39_v51 = vadd.f32 %v38_v45, %v37_v40  ;;  %v46_v52 = vadd.f32 %v45_v46, %v44_v41  ;;  %v53_v53 = vadd.f32 %v52_v47, %v51_v42  ;;  %v60_v54 = vadd.f32 %v59_v48, %v58_v43  ;;  %153 = vmatpush.bf16.msra.mxu0 %v357_v50 }
  0x1a   :  { %239 = vmatpush.bf16.msra.mxu1 %v364_v44  ;;  %v68_v56 = vmul.f32 %v67_v49, %v39_v51  ;;  %v69_v57 = vmul.f32 %v67_v49, %v46_v52  ;;  %v70_v58 = vmul.f32 %v67_v49, %v53_v53  ;;  %v71_v59 = vmul.f32 %v67_v49, %v60_v54 }
  0x1c   :  { %v72_v61 = vpack.c.bf16 %v69_v57, %v68_v56  ;;  %v73_v62 = vpack.c.bf16 %v71_v59, %v70_v58  ;;  %154 = vmatpush.bf16.msra.mxu0 %v356_v60 }
  0x1e   :  { %240 = vmatpush.bf16.msra.mxu1 %v363_v55  ;;  %v178_v63 = vperm.slane %v72_v61, 4  ;;  %v179_v0 = vperm.slane %v73_v62, 4  ;;  %v92_v1 = vperm.slane %v72_v61, 0  ;;  %v93_v2 = vperm.slane %v73_v62, 0 }
  0x20   :  { %v180_v4 = vunpack.c.l.b16 %v178_v63  ;;  %v181_v5 = vunpack.c.l.b16 %v179_v0  ;;  %v94_v6 = vunpack.c.l.b16 %v92_v1  ;;  %v95_v7 = vunpack.c.l.b16 %v93_v2  ;;  %155 = vmatpush.bf16.msra.mxu0 %v355_v3 }
  0x22   :  { %v182_v8 = vsel %vm96_vm2, %v181_v5, %v180_v4  ;;  %v97_v9 = vsel %vm96_vm2, %v95_v7, %v94_v6 }
  0x23   :  { %v183_v10 = vpack.c.b16 %v182_v8, %v182_v8  ;;  %v98_v11 = vpack.c.b16 %v97_v9, %v97_v9 }
  0x25   :  { %241 = vmatmul.bf16.vlgmr.msra.gmra.mxu1 %v183_v10  ;;  %156 = vmatmul.bf16.vlgmr.msra.gmra.mxu0 %v98_v11 }
  0xa2   :  { %v242_v12 = vpop.f32.mrf.mxu1  ;;  %v157_v13 = vpop.f32.mrf.mxu0 }
  0xa3   :  { %247 = vrot.lane.b32.xlu0 %v242_v12, %s408_s18 }
  0xaa   :  { %v244_v14 = vpop.f32.mrf.mxu1  ;;  %v159_v15 = vpop.f32.mrf.mxu0 }
 0x115   :  { %v248_v17 = vpop.permute.xlu0 %247 }
 0x116   :  { %v251_v18 = vsel %vm250_vm3, %v157_v13, %v248_v17 }
 0x117   :  { %v256_v19 = vadd.f32 %v378_v16, %v251_v18 }
 0x119   :  { %258 = vst.msk [vmem:[#allocation2] sm:$0x3] %vm257_vm4, %v256_v19 }
 0x11a   :  { %269 = dma.vmem_to_hbm [thread:$0]  %s265_s21, 32, %s267_s0, [#allocation3]  }
 0x11b   :  { %405 = dma.done.wait [#allocation3], 32  }
 0x11c   :  { %406 = vsyncadd [#allocation3], 4294967264 }
 0x11d   :  { %274 = vsyncpa [#allocation3], 1 }

</bundles_post_ra>
